<compile_context>
chip_gen: v6e
topology: v6e:2x2x1
jax: 0.10.0
libtpu: 0.0.40
codegen_flags: <defaults>
</compile_context>

<pallas_src>
import math

import jax
import jax.numpy as jnp
from jax.experimental import pallas as pl
from jax.experimental.pallas import tpu as pltpu

# ----------------------- model config (scaled-down ViT-tiny) -----------------------
IMG = 32          # small spatial size (224 in the real model)
PATCH = 16
IN_CH = 3
EMBED = 192       # vit_tiny embed dim
HEADS = 3
HEAD_DIM = EMBED // HEADS
DEPTH = 2         # scaled down from 12 blocks
MLP = 4 * EMBED
NUM_CLASSES = 512
LN_EPS = 1e-6
SCALE = HEAD_DIM ** -0.5

HP = IMG // PATCH
P = HP * HP                      # patches per image
N_TOK = P + 1                    # + cls token
NP = ((N_TOK + 7) // 8) * 8      # sequence rows padded to a sublane multiple (8)
PATCH_K = IN_CH * PATCH * PATCH  # im2col row width (768)

HPAD = 128                       # per-head q/k/v lane-padded width (HEAD_DIM=64 -> 128)
QKV_COLS = HEADS * 3 * HPAD      # 1152, per-head [q|k|v] slabs, each 128-lane aligned
PROJ_ROWS = HEADS * HPAD         # 384


# --------------------------------- math helpers ------------------------------------

def _layernorm(x, g, b):
    mu = jnp.mean(x, axis=-1, keepdims=True)
    xc = x - mu
    var = jnp.mean(xc * xc, axis=-1, keepdims=True)
    return xc * jax.lax.rsqrt(var + LN_EPS) * g + b


def _gelu(x):
    # TODO(synk): timm uses exact (erf) GELU; tanh approximation used here.
    c = math.sqrt(2.0 / math.pi)
    return 0.5 * x * (1.0 + jnp.tanh(c * (x + 0.044715 * x * x * x)))


def _inv_spec(shape):
    """Full-array block that is invariant across the grid."""
    shape = tuple(shape)
    return pl.BlockSpec(shape, lambda g, _n=len(shape): (0,) * _n)


# --------------------------------- fused ViT kernel --------------------------------

def _make_kernel(b_tile):
    rows = b_tile * NP

    def kernel(p_ref, pemb_ref, add_ref,
               ln1g_ref, ln1b_ref, qkvw_ref, qkvb_ref, projw_ref, projb_ref,
               ln2g_ref, ln2b_ref, fc1w_ref, fc1b_ref, fc2w_ref, fc2b_ref,
               ng_ref, nb_ref, hw_ref, hb_ref, o_ref, x_scr):
        f32 = jnp.float32

        # ---- patch embedding: all B_TILE*P patches through one MXU matmul ----
        tok = jnp.dot(p_ref[0], pemb_ref[...], preferred_element_type=f32)  # (B_TILE*P, D)
        add_cls = add_ref[0:1, :]          # cls_token + pos[0]
        add_pat = add_ref[1:N_TOK, :]      # pos[1:] + patch_b

        # residual stream lives in a VMEM scratch; rows >= N_TOK per element are padding
        # (zeroed so downstream math stays finite; attention masks them as keys).
        x_scr[...] = jnp.zeros((rows, EMBED), f32)
        for b in range(b_tile):
            r0 = b * NP
            x_scr[r0:r0 + 1, :] = add_cls
            x_scr[r0 + 1:r0 + 1 + P, :] = tok[b * P:(b + 1) * P, :] + add_pat

        # additive key-padding mask, hoisted out of the depth/head loops
        col = jax.lax.broadcasted_iota(jnp.int32, (1, NP), 1)
        mask_bias = jnp.where(col < N_TOK, 0.0, -1e30).astype(f32)          # (1, NP)

        for li in range(DEPTH):                      # static unroll (DEPTH=2)
            # ---- attention: LN1 -> qkv (all rows) -> per-element softmax(QK^T)V -> proj ----
            x = x_scr[...]
            h = _layernorm(x, ln1g_ref[li], ln1b_ref[li])
            qkv = (jnp.dot(h, qkvw_ref[li], preferred_element_type=f32)
                   + qkvb_ref[li])                                           # (rows, 1152)
            pw_l = projw_ref[li]                                             # (384, EMBED)

            for b in range(b_tile):
                r0 = b * NP
                acc = jnp.zeros((NP, EMBED), f32)
                for hi in range(HEADS):              # static unroll (HEADS=3)
                    c0 = hi * 3 * HPAD               # 128-lane aligned head slab
                    q = qkv[r0:r0 + NP, c0:c0 + HPAD] * SCALE
                    k = qkv[r0:r0 + NP, c0 + HPAD:c0 + 2 * HPAD]
                    v = qkv[r0:r0 + NP, c0 + 2 * HPAD:c0 + 3 * HPAD]
                    # q @ k^T without materializing a transpose
                    s = jax.lax.dot_general(q, k, (((1,), (1,)), ((), ())),
                                            preferred_element_type=f32) + mask_bias
                    m = jnp.max(s, axis=-1, keepdims=True)
                    e = jnp.exp(s - m)
                    pr = e * pl.reciprocal(jnp.sum(e, axis=-1, keepdims=True), approx=True)
                    oh = jnp.dot(pr, v, preferred_element_type=f32)          # (NP, 128)
                    # fold each head straight through the matching (zero-padded) proj rows:
                    # no (B,H,N,d) transpose / concat is ever materialized.
                    acc = acc + jnp.dot(oh, pw_l[hi * HPAD:(hi + 1) * HPAD, :],
                                        preferred_element_type=f32)
                x_scr[r0:r0 + NP, :] = x[r0:r0 + NP, :] + acc + projb_ref[li]

            # ---- MLP: LN2 -> fc1 -> GELU -> fc2 -> residual (all rows at once) ----
            x = x_scr[...]
            h = _layernorm(x, ln2g_ref[li], ln2b_ref[li])
            h = _gelu(jnp.dot(h, fc1w_ref[li], preferred_element_type=f32) + fc1b_ref[li])
            x_scr[...] = (x + jnp.dot(h, fc2w_ref[li], preferred_element_type=f32)
                          + fc2b_ref[li])

        # ---- final LN on CLS rows + head matmul + sigmoid (lane-dense 512 output) ----
        if b_tile == 1:
            cls = x_scr[0:1, :]
        else:
            cls = x_scr[pl.ds(0, b_tile, stride=NP), :]   # rows 0, NP, 2*NP, ...
        cls = _layernorm(cls, ng_ref[...], nb_ref[...])
        y = jnp.dot(cls, hw_ref[...], preferred_element_type=f32) + hb_ref[...]
        o_ref[0] = (1.0 / (1.0 + jnp.exp(-y))).astype(o_ref.dtype)

    return kernel


def _pick_b_tile(batch):
    # as many batch elements (rows) per grid step as possible while keeping >=2 parallel
    # grid steps for v7x megacore; for tiny batches this degrades to one element per step.
    for cand in (8, 4, 2):
        if batch % cand == 0 and batch // cand >= 2:
            return cand
    return 1


@jax.jit
def feat_extractor_vit(x, kp):
    """x: (B, C, H, W) NCHW float32 -> (B, NUM_CLASSES) sigmoid features."""
    B, C, H, W = x.shape
    assert C == IN_CH and H == IMG and W == IMG

    b_tile = _pick_b_tile(B)
    grid_n = B // b_tile
    rows = b_tile * NP

    # im2col patch extraction (plain-JAX glue); no zero-row HBM concat for the CLS token.
    patches = (x.reshape(B, C, HP, PATCH, HP, PATCH)
                 .transpose(0, 2, 4, 1, 3, 5)                 # (B, Hp, Wp, C, ph, pw)
                 .reshape(grid_n, b_tile * P, PATCH_K))

    out = pl.pallas_call(
        _make_kernel(b_tile),
        out_shape=jax.ShapeDtypeStruct((grid_n, b_tile, NUM_CLASSES), jnp.float32),
        grid=(grid_n,),
        in_specs=[
            pl.BlockSpec((1, b_tile * P, PATCH_K), lambda g: (g, 0, 0)),
            _inv_spec(kp["patch_w"].shape),
            _inv_spec(kp["add_tab"].shape),
            _inv_spec(kp["ln1_g"].shape), _inv_spec(kp["ln1_b"].shape),
            _inv_spec(kp["qkv_w"].shape), _inv_spec(kp["qkv_b"].shape),
            _inv_spec(kp["proj_w"].shape), _inv_spec(kp["proj_b"].shape),
            _inv_spec(kp["ln2_g"].shape), _inv_spec(kp["ln2_b"].shape),
            _inv_spec(kp["fc1_w"].shape), _inv_spec(kp["fc1_b"].shape),
            _inv_spec(kp["fc2_w"].shape), _inv_spec(kp["fc2_b"].shape),
            _inv_spec(kp["norm_g"].shape), _inv_spec(kp["norm_b"].shape),
            _inv_spec(kp["head_w"].shape), _inv_spec(kp["head_b"].shape),
        ],
        out_specs=pl.BlockSpec((1, b_tile, NUM_CLASSES), lambda g: (g, 0, 0)),
        scratch_shapes=[pltpu.VMEM((rows, EMBED), jnp.float32)],
        compiler_params=pltpu.CompilerParams(
            dimension_semantics=("parallel",),
            vmem_limit_bytes=32 * 1024 * 1024),
    )(patches, kp["patch_w"], kp["add_tab"],
      kp["ln1_g"], kp["ln1_b"], kp["qkv_w"], kp["qkv_b"],
      kp["proj_w"], kp["proj_b"], kp["ln2_g"], kp["ln2_b"],
      kp["fc1_w"], kp["fc1_b"], kp["fc2_w"], kp["fc2_b"],
      kp["norm_g"], kp["norm_b"], kp["head_w"], kp["head_b"])

    return out.reshape(B, NUM_CLASSES)


# ------------------------------- parameters & packing -------------------------------

def init_params(key):
    """Canonical (timm-layout) synthetic weights."""
    def nrm(k, shape, std=0.02):
        return std * jax.random.normal(k, shape, dtype=jnp.float32)

    ks = iter(jax.random.split(key, 16))
    zeros = lambda *s: jnp.zeros(s, jnp.float32)
    ones = lambda *s: jnp.ones(s, jnp.float32)
    return {
        "patch_w": nrm(next(ks), (PATCH_K, EMBED)),
        "patch_b": zeros(EMBED),
        "cls_token": nrm(next(ks), (1, EMBED)),
        "pos_embed": nrm(next(ks), (N_TOK, EMBED)),
        "ln1_g": ones(DEPTH, EMBED), "ln1_b": zeros(DEPTH, EMBED),
        "qkv_w": nrm(next(ks), (DEPTH, EMBED, 3 * EMBED)),
        "qkv_b": nrm(next(ks), (DEPTH, 3 * EMBED), std=0.01),
        "proj_w": nrm(next(ks), (DEPTH, EMBED, EMBED)),
        "proj_b": nrm(next(ks), (DEPTH, EMBED), std=0.01),
        "ln2_g": ones(DEPTH, EMBED), "ln2_b": zeros(DEPTH, EMBED),
        "fc1_w": nrm(next(ks), (DEPTH, EMBED, MLP)),
        "fc1_b": nrm(next(ks), (DEPTH, MLP), std=0.01),
        "fc2_w": nrm(next(ks), (DEPTH, MLP, EMBED)),
        "fc2_b": nrm(next(ks), (DEPTH, EMBED), std=0.01),
        "norm_g": ones(EMBED), "norm_b": zeros(EMBED),
        "head_w": nrm(next(ks), (EMBED, NUM_CLASSES)),
        "head_b": zeros(NUM_CLASSES),
    }


def pack_params(p):
    """Repack canonical weights into the kernel's 128-lane-aligned per-head layout."""
    def pack_qkv_layer(w, b):
        wcols, bcols = [], []
        for hi in range(HEADS):
            for part in range(3):                        # q, k, v for this head
                c0 = part * EMBED + hi * HEAD_DIM
                wcols.append(jnp.pad(w[:, c0:c0 + HEAD_DIM],
                                     ((0, 0), (0, HPAD - HEAD_DIM))))
                bcols.append(jnp.pad(b[c0:c0 + HEAD_DIM], (0, HPAD - HEAD_DIM)))
        return jnp.concatenate(wcols, axis=1), jnp.concatenate(bcols, axis=0)

    def pack_proj_layer(w):
        rows = [jnp.pad(w[hi * HEAD_DIM:(hi + 1) * HEAD_DIM, :],
                        ((0, HPAD - HEAD_DIM), (0, 0))) for hi in range(HEADS)]
        return jnp.concatenate(rows, axis=0)

    qkv = [pack_qkv_layer(p["qkv_w"][l], p["qkv_b"][l]) for l in range(DEPTH)]
    return {
        "patch_w": p["patch_w"],
        # row 0 -> cls_token + pos[0]; rows 1..P -> pos[1:] + patch_b
        "add_tab": jnp.concatenate(
            [p["cls_token"] + p["pos_embed"][0:1],
             p["pos_embed"][1:] + p["patch_b"][None, :]], axis=0),
        "ln1_g": p["ln1_g"], "ln1_b": p["ln1_b"],
        "qkv_w": jnp.stack([w for w, _ in qkv]),          # (DEPTH, EMBED, 1152)
        "qkv_b": jnp.stack([b for _, b in qkv]),          # (DEPTH, 1152)
        "proj_w": jnp.stack([pack_proj_layer(p["proj_w"][l]) for l in range(DEPTH)]),
        "proj_b": p["proj_b"],
        "ln2_g": p["ln2_g"], "ln2_b": p["ln2_b"],
        "fc1_w": p["fc1_w"], "fc1_b": p["fc1_b"],
        "fc2_w": p["fc2_w"], "fc2_b": p["fc2_b"],
        "norm_g": p["norm_g"].reshape(1, EMBED),
        "norm_b": p["norm_b"].reshape(1, EMBED),
        "head_w": p["head_w"],
        "head_b": p["head_b"].reshape(1, NUM_CLASSES),
    }


# ------------------------------- pure-JAX reference ---------------------------------

def reference_forward(x, p):
    B = x.shape[0]
    patches = (x.reshape(B, IN_CH, HP, PATCH, HP, PATCH)
                 .transpose(0, 2, 4, 1, 3, 5)
                 .reshape(B, P, PATCH_K))
    tok = patches @ p["patch_w"] + p["patch_b"]
    cls = jnp.broadcast_to(p["cls_token"][None], (B, 1, EMBED))
    z = jnp.concatenate([cls, tok], axis=1) + p["pos_embed"][None]
    for l in range(DEPTH):
        h = _layernorm(z, p["ln1_g"][l], p["ln1_b"][l])
        qkv = (h @ p["qkv_w"][l] + p["qkv_b"][l]).reshape(B, N_TOK, 3, HEADS, HEAD_DIM)
        q = qkv[:, :, 0].transpose(0, 2, 1, 3) * SCALE
        k = qkv[:, :, 1].transpose(0, 2, 1, 3)
        v = qkv[:, :, 2].transpose(0, 2, 1, 3)
        a = jax.nn.softmax(q @ k.transpose(0, 1, 3, 2), axis=-1)
        o = (a @ v).transpose(0, 2, 1, 3).reshape(B, N_TOK, EMBED)
        z = z + o @ p["proj_w"][l] + p["proj_b"][l]
        h = _layernorm(z, p["ln2_g"][l], p["ln2_b"][l])
        z = z + _gelu(h @ p["fc1_w"][l] + p["fc1_b"][l]) @ p["fc2_w"][l] + p["fc2_b"][l]
    c = _layernorm(z[:, 0], p["norm_g"], p["norm_b"])
    return jax.nn.sigmoid(c @ p["head_w"] + p["head_b"])


# ------------------------------------- main ------------------------------------------

if __name__ == "__main__":
    key = jax.random.PRNGKey(0)
    pkey, xkey = jax.random.split(key)
    params = init_params(pkey)
    kparams = pack_params(params)

    x = jax.random.normal(xkey, (2, IN_CH, IMG, IMG), dtype=jnp.float32)

    feat = feat_extractor_vit(x, kparams)
    feat = jax.block_until_ready(feat)

    assert feat.shape == (2, NUM_CLASSES), feat.shape
    assert bool(jnp.all(jnp.isfinite(feat)))
    assert bool(jnp.all((feat >= 0.0) & (feat <= 1.0)))   # sigmoid range

    ref = jax.block_until_ready(reference_forward(x, params))
    err = float(jnp.max(jnp.abs(feat - ref)))
    # loose tolerance: approx reciprocal in softmax + MXU accumulation order differences
    assert err < 2e-2, f"max abs diff vs reference = {err}"

    print("KERNEL_OK")
</pallas_src>

<mosaic_0001>
module attributes {stable_mosaic.version = 11 : i64} {
  func.func @kernel(%arg0: i32, %arg1: memref<1x4x768xf32, #tpu.memory_space<vmem>>, %arg2: memref<768x192xf32, #tpu.memory_space<vmem>>, %arg3: memref<5x192xf32, #tpu.memory_space<vmem>>, %arg4: memref<2x192xf32, #tpu.memory_space<vmem>>, %arg5: memref<2x192xf32, #tpu.memory_space<vmem>>, %arg6: memref<2x192x1152xf32, #tpu.memory_space<vmem>>, %arg7: memref<2x1152xf32, #tpu.memory_space<vmem>>, %arg8: memref<2x384x192xf32, #tpu.memory_space<vmem>>, %arg9: memref<2x192xf32, #tpu.memory_space<vmem>>, %arg10: memref<2x192xf32, #tpu.memory_space<vmem>>, %arg11: memref<2x192xf32, #tpu.memory_space<vmem>>, %arg12: memref<2x192x768xf32, #tpu.memory_space<vmem>>, %arg13: memref<2x768xf32, #tpu.memory_space<vmem>>, %arg14: memref<2x768x192xf32, #tpu.memory_space<vmem>>, %arg15: memref<2x192xf32, #tpu.memory_space<vmem>>, %arg16: memref<1x192xf32, #tpu.memory_space<vmem>>, %arg17: memref<1x192xf32, #tpu.memory_space<vmem>>, %arg18: memref<192x512xf32, #tpu.memory_space<vmem>>, %arg19: memref<1x512xf32, #tpu.memory_space<vmem>>, %arg20: memref<1x1x512xf32, #tpu.memory_space<vmem>>, %arg21: memref<8x192xf32, #tpu.memory_space<vmem>>) attributes {dimension_semantics = [#tpu.dimension_semantics<parallel>], iteration_bounds = array<i64: 2>, scalar_prefetch = 0 : i64, scratch_operands = 1 : i64, tpu.core_type = #tpu.core_type<tc>, window_params = [{transform_indices = @transform_0, window_bounds = array<i64: 1, 4, 768>}, {pipeline_mode = #tpu.pipeline_mode<synchronous>, transform_indices = @transform_1, window_bounds = array<i64: 768, 192>}, {pipeline_mode = #tpu.pipeline_mode<synchronous>, transform_indices = @transform_2, window_bounds = array<i64: 5, 192>}, {pipeline_mode = #tpu.pipeline_mode<synchronous>, transform_indices = @transform_3, window_bounds = array<i64: 2, 192>}, {pipeline_mode = #tpu.pipeline_mode<synchronous>, transform_indices = @transform_4, window_bounds = array<i64: 2, 192>}, {pipeline_mode = #tpu.pipeline_mode<synchronous>, transform_indices = @transform_5, window_bounds = array<i64: 2, 192, 1152>}, {pipeline_mode = #tpu.pipeline_mode<synchronous>, transform_indices = @transform_6, window_bounds = array<i64: 2, 1152>}, {pipeline_mode = #tpu.pipeline_mode<synchronous>, transform_indices = @transform_7, window_bounds = array<i64: 2, 384, 192>}, {pipeline_mode = #tpu.pipeline_mode<synchronous>, transform_indices = @transform_8, window_bounds = array<i64: 2, 192>}, {pipeline_mode = #tpu.pipeline_mode<synchronous>, transform_indices = @transform_9, window_bounds = array<i64: 2, 192>}, {pipeline_mode = #tpu.pipeline_mode<synchronous>, transform_indices = @transform_10, window_bounds = array<i64: 2, 192>}, {pipeline_mode = #tpu.pipeline_mode<synchronous>, transform_indices = @transform_11, window_bounds = array<i64: 2, 192, 768>}, {pipeline_mode = #tpu.pipeline_mode<synchronous>, transform_indices = @transform_12, window_bounds = array<i64: 2, 768>}, {pipeline_mode = #tpu.pipeline_mode<synchronous>, transform_indices = @transform_13, window_bounds = array<i64: 2, 768, 192>}, {pipeline_mode = #tpu.pipeline_mode<synchronous>, transform_indices = @transform_14, window_bounds = array<i64: 2, 192>}, {pipeline_mode = #tpu.pipeline_mode<synchronous>, transform_indices = @transform_15, window_bounds = array<i64: 1, 192>}, {pipeline_mode = #tpu.pipeline_mode<synchronous>, transform_indices = @transform_16, window_bounds = array<i64: 1, 192>}, {pipeline_mode = #tpu.pipeline_mode<synchronous>, transform_indices = @transform_17, window_bounds = array<i64: 192, 512>}, {pipeline_mode = #tpu.pipeline_mode<synchronous>, transform_indices = @transform_18, window_bounds = array<i64: 1, 512>}, {transform_indices = @transform_19, window_bounds = array<i64: 1, 1, 512>}]} {
    %c0 = arith.constant 0 : index
    %c0_0 = arith.constant 0 : index
    %c0_1 = arith.constant 0 : index
    %0 = vector.load %arg1[%c0, %c0_0, %c0_1] : memref<1x4x768xf32, #tpu.memory_space<vmem>>, vector<1x4x768xf32>
    %1 = vector.shape_cast %0 : vector<1x4x768xf32> to vector<4x768xf32>
    %c0_2 = arith.constant 0 : index
    %c0_3 = arith.constant 0 : index
    %2 = vector.load %arg2[%c0_2, %c0_3] : memref<768x192xf32, #tpu.memory_space<vmem>>, vector<768x192xf32>
    %cst = arith.constant dense<0.000000e+00> : vector<4x192xf32>
    %3 = tpu.matmul %1, %2, %cst {dimension_numbers = #tpu.dot_dimension_numbers<[1], [0], [0], [1], [0, 0, 1, 1], [], []>} : vector<4x768xf32>, vector<768x192xf32>, vector<4x192xf32> -> vector<4x192xf32>
    %c0_4 = arith.constant 0 : index
    %c0_5 = arith.constant 0 : index
    %4 = vector.load %arg3[%c0_4, %c0_5] : memref<5x192xf32, #tpu.memory_space<vmem>>, vector<1x192xf32>
    %c1 = arith.constant 1 : index
    %c0_6 = arith.constant 0 : index
    %5 = vector.load %arg3[%c1, %c0_6] : memref<5x192xf32, #tpu.memory_space<vmem>>, vector<4x192xf32>
    %cst_7 = arith.constant 0.000000e+00 : f32
    %6 = vector.broadcast %cst_7 : f32 to vector<8x192xf32>
    %c0_8 = arith.constant 0 : index
    %c0_9 = arith.constant 0 : index
    %7 = vector.load %arg21[%c0_8, %c0_9] : memref<8x192xf32, #tpu.memory_space<vmem>>, vector<8x192xf32>
    tpu.vector_store %arg21[%c0_8, %c0_9], %6 {strides = array<i32>} : memref<8x192xf32, #tpu.memory_space<vmem>>, vector<8x192xf32>,
    %c0_10 = arith.constant 0 : index
    %c0_11 = arith.constant 0 : index
    %8 = vector.load %arg21[%c0_10, %c0_11] : memref<8x192xf32, #tpu.memory_space<vmem>>, vector<1x192xf32>
    tpu.vector_store %arg21[%c0_10, %c0_11], %4 {strides = array<i32>} : memref<8x192xf32, #tpu.memory_space<vmem>>, vector<1x192xf32>,
    %9 = arith.addf %3, %5 : vector<4x192xf32>
    %c1_12 = arith.constant 1 : index
    %c0_13 = arith.constant 0 : index
    %10 = vector.load %arg21[%c1_12, %c0_13] : memref<8x192xf32, #tpu.memory_space<vmem>>, vector<4x192xf32>
    tpu.vector_store %arg21[%c1_12, %c0_13], %9 {strides = array<i32>} : memref<8x192xf32, #tpu.memory_space<vmem>>, vector<4x192xf32>,
    %11 = tpu.iota {dimensions = array<i32: 1>} : vector<1x8xi32>
    %c5_i32 = arith.constant 5 : i32
    %12 = vector.broadcast %c5_i32 : i32 to vector<1x8xi32>
    %13 = arith.cmpi slt, %11, %12 : vector<1x8xi32>
    %cst_14 = arith.constant 0.000000e+00 : f32
    %cst_15 = arith.constant -1.000000e+30 : f32
    %14 = vector.broadcast %cst_14 : f32 to vector<1x8xf32>
    %15 = vector.broadcast %cst_15 : f32 to vector<1x8xf32>
    %16 = arith.select %13, %14, %15 : vector<1x8xi1>, vector<1x8xf32>
    %c0_16 = arith.constant 0 : index
    %c0_17 = arith.constant 0 : index
    %17 = vector.load %arg21[%c0_16, %c0_17] : memref<8x192xf32, #tpu.memory_space<vmem>>, vector<8x192xf32>
    %c0_18 = arith.constant 0 : index
    %c0_19 = arith.constant 0 : index
    %18 = vector.load %arg4[%c0_18, %c0_19] : memref<2x192xf32, #tpu.memory_space<vmem>>, vector<1x192xf32>
    %19 = vector.shape_cast %18 : vector<1x192xf32> to vector<192xf32>
    %c0_20 = arith.constant 0 : index
    %c0_21 = arith.constant 0 : index
    %20 = vector.load %arg5[%c0_20, %c0_21] : memref<2x192xf32, #tpu.memory_space<vmem>>, vector<1x192xf32>
    %21 = vector.shape_cast %20 : vector<1x192xf32> to vector<192xf32>
    %cst_22 = arith.constant dense<0.000000e+00> : vector<8xf32>
    %22 = vector.multi_reduction <add>, %17, %cst_22 [1] : vector<8x192xf32> to vector<8xf32>
    %23 = vector.shape_cast %22 : vector<8xf32> to vector<8x1xf32>
    %cst_23 = arith.constant 1.920000e+02 : f32
    %24 = vector.broadcast %cst_23 : f32 to vector<8x1xf32>
    %25 = arith.divf %23, %24 : vector<8x1xf32>
    %26 = vector.broadcast %25 : vector<8x1xf32> to vector<8x192xf32>
    %27 = arith.subf %17, %26 : vector<8x192xf32>
    %28 = arith.mulf %27, %27 : vector<8x192xf32>
    %cst_24 = arith.constant dense<0.000000e+00> : vector<8xf32>
    %29 = vector.multi_reduction <add>, %28, %cst_24 [1] : vector<8x192xf32> to vector<8xf32>
    %30 = vector.shape_cast %29 : vector<8xf32> to vector<8x1xf32>
    %cst_25 = arith.constant 1.920000e+02 : f32
    %31 = vector.broadcast %cst_25 : f32 to vector<8x1xf32>
    %32 = arith.divf %30, %31 : vector<8x1xf32>
    %cst_26 = arith.constant 9.99999997E-7 : f32
    %33 = vector.broadcast %cst_26 : f32 to vector<8x1xf32>
    %34 = arith.addf %32, %33 : vector<8x1xf32>
    %35 = math.rsqrt %34 : vector<8x1xf32>
    %36 = vector.broadcast %35 : vector<8x1xf32> to vector<8x192xf32>
    %37 = arith.mulf %27, %36 : vector<8x192xf32>
    %38 = vector.shape_cast %19 : vector<192xf32> to vector<1x192xf32>
    %39 = vector.broadcast %38 : vector<1x192xf32> to vector<8x192xf32>
    %40 = arith.mulf %37, %39 : vector<8x192xf32>
    %41 = vector.shape_cast %21 : vector<192xf32> to vector<1x192xf32>
    %42 = vector.broadcast %41 : vector<1x192xf32> to vector<8x192xf32>
    %43 = arith.addf %40, %42 : vector<8x192xf32>
    %c0_27 = arith.constant 0 : index
    %c0_28 = arith.constant 0 : index
    %c0_29 = arith.constant 0 : index
    %44 = vector.load %arg6[%c0_27, %c0_28, %c0_29] : memref<2x192x1152xf32, #tpu.memory_space<vmem>>, vector<1x192x1152xf32>
    %45 = vector.shape_cast %44 : vector<1x192x1152xf32> to vector<192x1152xf32>
    %cst_30 = arith.constant dense<0.000000e+00> : vector<8x1152xf32>
    %46 = tpu.matmul %43, %45, %cst_30 {dimension_numbers = #tpu.dot_dimension_numbers<[1], [0], [0], [1], [0, 0, 1, 1], [], []>} : vector<8x192xf32>, vector<192x1152xf32>, vector<8x1152xf32> -> vector<8x1152xf32>
    %c0_31 = arith.constant 0 : index
    %c0_32 = arith.constant 0 : index
    %47 = vector.load %arg7[%c0_31, %c0_32] : memref<2x1152xf32, #tpu.memory_space<vmem>>, vector<1x1152xf32>
    %48 = vector.shape_cast %47 : vector<1x1152xf32> to vector<1152xf32>
    %49 = vector.shape_cast %48 : vector<1152xf32> to vector<1x1152xf32>
    %50 = vector.broadcast %49 : vector<1x1152xf32> to vector<8x1152xf32>
    %51 = arith.addf %46, %50 : vector<8x1152xf32>
    %c0_33 = arith.constant 0 : index
    %c0_34 = arith.constant 0 : index
    %c0_35 = arith.constant 0 : index
    %52 = vector.load %arg8[%c0_33, %c0_34, %c0_35] : memref<2x384x192xf32, #tpu.memory_space<vmem>>, vector<1x384x192xf32>
    %53 = vector.shape_cast %52 : vector<1x384x192xf32> to vector<384x192xf32>
    %cst_36 = arith.constant 0.000000e+00 : f32
    %54 = vector.broadcast %cst_36 : f32 to vector<8x192xf32>
    %55 = vector.extract_strided_slice %51 {offsets = [0, 0], sizes = [8, 128], strides = [1, 1]} : vector<8x1152xf32> to vector<8x128xf32>
    %cst_37 = arith.constant 1.250000e-01 : f32
    %56 = vector.broadcast %cst_37 : f32 to vector<8x128xf32>
    %57 = arith.mulf %55, %56 : vector<8x128xf32>
    %58 = vector.extract_strided_slice %51 {offsets = [0, 128], sizes = [8, 128], strides = [1, 1]} : vector<8x1152xf32> to vector<8x128xf32>
    %59 = vector.extract_strided_slice %51 {offsets = [0, 256], sizes = [8, 128], strides = [1, 1]} : vector<8x1152xf32> to vector<8x128xf32>
    %cst_38 = arith.constant dense<0.000000e+00> : vector<8x8xf32>
    %60 = tpu.matmul %57, %58, %cst_38 {dimension_numbers = #tpu.dot_dimension_numbers<[1], [1], [0], [0], [0, 0, 1, 0], [], []>} : vector<8x128xf32>, vector<8x128xf32>, vector<8x8xf32> -> vector<8x8xf32>
    %61 = vector.broadcast %16 : vector<1x8xf32> to vector<8x8xf32>
    %62 = arith.addf %60, %61 : vector<8x8xf32>
    %cst_39 = arith.constant dense<0xFF800000> : vector<8xf32>
    %63 = vector.multi_reduction <maximumf>, %62, %cst_39 [1] : vector<8x8xf32> to vector<8xf32>
    %64 = vector.shape_cast %63 : vector<8xf32> to vector<8x1xf32>
    %65 = vector.broadcast %64 : vector<8x1xf32> to vector<8x8xf32>
    %66 = arith.subf %62, %65 : vector<8x8xf32>
    %67 = math.exp %66 : vector<8x8xf32>
    %cst_40 = arith.constant dense<0.000000e+00> : vector<8xf32>
    %68 = vector.multi_reduction <add>, %67, %cst_40 [1] : vector<8x8xf32> to vector<8xf32>
    %69 = vector.shape_cast %68 : vector<8xf32> to vector<8x1xf32>
    %70 = tpu.reciprocal %69 {approx = true} : vector<8x1xf32> -> vector<8x1xf32>
    %71 = vector.broadcast %70 : vector<8x1xf32> to vector<8x8xf32>
    %72 = arith.mulf %67, %71 : vector<8x8xf32>
    %cst_41 = arith.constant dense<0.000000e+00> : vector<8x128xf32>
    %73 = tpu.matmul %72, %59, %cst_41 {dimension_numbers = #tpu.dot_dimension_numbers<[1], [0], [0], [1], [0, 0, 1, 1], [], []>} : vector<8x8xf32>, vector<8x128xf32>, vector<8x128xf32> -> vector<8x128xf32>
    %74 = vector.extract_strided_slice %53 {offsets = [0, 0], sizes = [128, 192], strides = [1, 1]} : vector<384x192xf32> to vector<128x192xf32>
    %cst_42 = arith.constant dense<0.000000e+00> : vector<8x192xf32>
    %75 = tpu.matmul %73, %74, %cst_42 {dimension_numbers = #tpu.dot_dimension_numbers<[1], [0], [0], [1], [0, 0, 1, 1], [], []>} : vector<8x128xf32>, vector<128x192xf32>, vector<8x192xf32> -> vector<8x192xf32>
    %76 = arith.addf %54, %75 : vector<8x192xf32>
    %77 = vector.extract_strided_slice %51 {offsets = [0, 384], sizes = [8, 128], strides = [1, 1]} : vector<8x1152xf32> to vector<8x128xf32>
    %cst_43 = arith.constant 1.250000e-01 : f32
    %78 = vector.broadcast %cst_43 : f32 to vector<8x128xf32>
    %79 = arith.mulf %77, %78 : vector<8x128xf32>
    %80 = vector.extract_strided_slice %51 {offsets = [0, 512], sizes = [8, 128], strides = [1, 1]} : vector<8x1152xf32> to vector<8x128xf32>
    %81 = vector.extract_strided_slice %51 {offsets = [0, 640], sizes = [8, 128], strides = [1, 1]} : vector<8x1152xf32> to vector<8x128xf32>
    %cst_44 = arith.constant dense<0.000000e+00> : vector<8x8xf32>
    %82 = tpu.matmul %79, %80, %cst_44 {dimension_numbers = #tpu.dot_dimension_numbers<[1], [1], [0], [0], [0, 0, 1, 0], [], []>} : vector<8x128xf32>, vector<8x128xf32>, vector<8x8xf32> -> vector<8x8xf32>
    %83 = vector.broadcast %16 : vector<1x8xf32> to vector<8x8xf32>
    %84 = arith.addf %82, %83 : vector<8x8xf32>
    %cst_45 = arith.constant dense<0xFF800000> : vector<8xf32>
    %85 = vector.multi_reduction <maximumf>, %84, %cst_45 [1] : vector<8x8xf32> to vector<8xf32>
    %86 = vector.shape_cast %85 : vector<8xf32> to vector<8x1xf32>
    %87 = vector.broadcast %86 : vector<8x1xf32> to vector<8x8xf32>
    %88 = arith.subf %84, %87 : vector<8x8xf32>
    %89 = math.exp %88 : vector<8x8xf32>
    %cst_46 = arith.constant dense<0.000000e+00> : vector<8xf32>
    %90 = vector.multi_reduction <add>, %89, %cst_46 [1] : vector<8x8xf32> to vector<8xf32>
    %91 = vector.shape_cast %90 : vector<8xf32> to vector<8x1xf32>
    %92 = tpu.reciprocal %91 {approx = true} : vector<8x1xf32> -> vector<8x1xf32>
    %93 = vector.broadcast %92 : vector<8x1xf32> to vector<8x8xf32>
    %94 = arith.mulf %89, %93 : vector<8x8xf32>
    %cst_47 = arith.constant dense<0.000000e+00> : vector<8x128xf32>
    %95 = tpu.matmul %94, %81, %cst_47 {dimension_numbers = #tpu.dot_dimension_numbers<[1], [0], [0], [1], [0, 0, 1, 1], [], []>} : vector<8x8xf32>, vector<8x128xf32>, vector<8x128xf32> -> vector<8x128xf32>
    %96 = vector.extract_strided_slice %53 {offsets = [128, 0], sizes = [128, 192], strides = [1, 1]} : vector<384x192xf32> to vector<128x192xf32>
    %cst_48 = arith.constant dense<0.000000e+00> : vector<8x192xf32>
    %97 = tpu.matmul %95, %96, %cst_48 {dimension_numbers = #tpu.dot_dimension_numbers<[1], [0], [0], [1], [0, 0, 1, 1], [], []>} : vector<8x128xf32>, vector<128x192xf32>, vector<8x192xf32> -> vector<8x192xf32>
    %98 = arith.addf %76, %97 : vector<8x192xf32>
    %99 = vector.extract_strided_slice %51 {offsets = [0, 768], sizes = [8, 128], strides = [1, 1]} : vector<8x1152xf32> to vector<8x128xf32>
    %cst_49 = arith.constant 1.250000e-01 : f32
    %100 = vector.broadcast %cst_49 : f32 to vector<8x128xf32>
    %101 = arith.mulf %99, %100 : vector<8x128xf32>
    %102 = vector.extract_strided_slice %51 {offsets = [0, 896], sizes = [8, 128], strides = [1, 1]} : vector<8x1152xf32> to vector<8x128xf32>
    %103 = vector.extract_strided_slice %51 {offsets = [0, 1024], sizes = [8, 128], strides = [1, 1]} : vector<8x1152xf32> to vector<8x128xf32>
    %cst_50 = arith.constant dense<0.000000e+00> : vector<8x8xf32>
    %104 = tpu.matmul %101, %102, %cst_50 {dimension_numbers = #tpu.dot_dimension_numbers<[1], [1], [0], [0], [0, 0, 1, 0], [], []>} : vector<8x128xf32>, vector<8x128xf32>, vector<8x8xf32> -> vector<8x8xf32>
    %105 = vector.broadcast %16 : vector<1x8xf32> to vector<8x8xf32>
    %106 = arith.addf %104, %105 : vector<8x8xf32>
    %cst_51 = arith.constant dense<0xFF800000> : vector<8xf32>
    %107 = vector.multi_reduction <maximumf>, %106, %cst_51 [1] : vector<8x8xf32> to vector<8xf32>
    %108 = vector.shape_cast %107 : vector<8xf32> to vector<8x1xf32>
    %109 = vector.broadcast %108 : vector<8x1xf32> to vector<8x8xf32>
    %110 = arith.subf %106, %109 : vector<8x8xf32>
    %111 = math.exp %110 : vector<8x8xf32>
    %cst_52 = arith.constant dense<0.000000e+00> : vector<8xf32>
    %112 = vector.multi_reduction <add>, %111, %cst_52 [1] : vector<8x8xf32> to vector<8xf32>
    %113 = vector.shape_cast %112 : vector<8xf32> to vector<8x1xf32>
    %114 = tpu.reciprocal %113 {approx = true} : vector<8x1xf32> -> vector<8x1xf32>
    %115 = vector.broadcast %114 : vector<8x1xf32> to vector<8x8xf32>
    %116 = arith.mulf %111, %115 : vector<8x8xf32>
    %cst_53 = arith.constant dense<0.000000e+00> : vector<8x128xf32>
    %117 = tpu.matmul %116, %103, %cst_53 {dimension_numbers = #tpu.dot_dimension_numbers<[1], [0], [0], [1], [0, 0, 1, 1], [], []>} : vector<8x8xf32>, vector<8x128xf32>, vector<8x128xf32> -> vector<8x128xf32>
    %118 = vector.extract_strided_slice %53 {offsets = [256, 0], sizes = [128, 192], strides = [1, 1]} : vector<384x192xf32> to vector<128x192xf32>
    %cst_54 = arith.constant dense<0.000000e+00> : vector<8x192xf32>
    %119 = tpu.matmul %117, %118, %cst_54 {dimension_numbers = #tpu.dot_dimension_numbers<[1], [0], [0], [1], [0, 0, 1, 1], [], []>} : vector<8x128xf32>, vector<128x192xf32>, vector<8x192xf32> -> vector<8x192xf32>
    %120 = arith.addf %98, %119 : vector<8x192xf32>
    %121 = arith.addf %17, %120 : vector<8x192xf32>
    %c0_55 = arith.constant 0 : index
    %c0_56 = arith.constant 0 : index
    %122 = vector.load %arg9[%c0_55, %c0_56] : memref<2x192xf32, #tpu.memory_space<vmem>>, vector<1x192xf32>
    %123 = vector.shape_cast %122 : vector<1x192xf32> to vector<192xf32>
    %124 = vector.shape_cast %123 : vector<192xf32> to vector<1x192xf32>
    %125 = vector.broadcast %124 : vector<1x192xf32> to vector<8x192xf32>
    %126 = arith.addf %121, %125 : vector<8x192xf32>
    %c0_57 = arith.constant 0 : index
    %c0_58 = arith.constant 0 : index
    %127 = vector.load %arg21[%c0_57, %c0_58] : memref<8x192xf32, #tpu.memory_space<vmem>>, vector<8x192xf32>
    tpu.vector_store %arg21[%c0_57, %c0_58], %126 {strides = array<i32>} : memref<8x192xf32, #tpu.memory_space<vmem>>, vector<8x192xf32>,
    %c0_59 = arith.constant 0 : index
    %c0_60 = arith.constant 0 : index
    %128 = vector.load %arg21[%c0_59, %c0_60] : memref<8x192xf32, #tpu.memory_space<vmem>>, vector<8x192xf32>
    %c0_61 = arith.constant 0 : index
    %c0_62 = arith.constant 0 : index
    %129 = vector.load %arg10[%c0_61, %c0_62] : memref<2x192xf32, #tpu.memory_space<vmem>>, vector<1x192xf32>
    %130 = vector.shape_cast %129 : vector<1x192xf32> to vector<192xf32>
    %c0_63 = arith.constant 0 : index
    %c0_64 = arith.constant 0 : index
    %131 = vector.load %arg11[%c0_63, %c0_64] : memref<2x192xf32, #tpu.memory_space<vmem>>, vector<1x192xf32>
    %132 = vector.shape_cast %131 : vector<1x192xf32> to vector<192xf32>
    %cst_65 = arith.constant dense<0.000000e+00> : vector<8xf32>
    %133 = vector.multi_reduction <add>, %128, %cst_65 [1] : vector<8x192xf32> to vector<8xf32>
    %134 = vector.shape_cast %133 : vector<8xf32> to vector<8x1xf32>
    %cst_66 = arith.constant 1.920000e+02 : f32
    %135 = vector.broadcast %cst_66 : f32 to vector<8x1xf32>
    %136 = arith.divf %134, %135 : vector<8x1xf32>
    %137 = vector.broadcast %136 : vector<8x1xf32> to vector<8x192xf32>
    %138 = arith.subf %128, %137 : vector<8x192xf32>
    %139 = arith.mulf %138, %138 : vector<8x192xf32>
    %cst_67 = arith.constant dense<0.000000e+00> : vector<8xf32>
    %140 = vector.multi_reduction <add>, %139, %cst_67 [1] : vector<8x192xf32> to vector<8xf32>
    %141 = vector.shape_cast %140 : vector<8xf32> to vector<8x1xf32>
    %cst_68 = arith.constant 1.920000e+02 : f32
    %142 = vector.broadcast %cst_68 : f32 to vector<8x1xf32>
    %143 = arith.divf %141, %142 : vector<8x1xf32>
    %cst_69 = arith.constant 9.99999997E-7 : f32
    %144 = vector.broadcast %cst_69 : f32 to vector<8x1xf32>
    %145 = arith.addf %143, %144 : vector<8x1xf32>
    %146 = math.rsqrt %145 : vector<8x1xf32>
    %147 = vector.broadcast %146 : vector<8x1xf32> to vector<8x192xf32>
    %148 = arith.mulf %138, %147 : vector<8x192xf32>
    %149 = vector.shape_cast %130 : vector<192xf32> to vector<1x192xf32>
    %150 = vector.broadcast %149 : vector<1x192xf32> to vector<8x192xf32>
    %151 = arith.mulf %148, %150 : vector<8x192xf32>
    %152 = vector.shape_cast %132 : vector<192xf32> to vector<1x192xf32>
    %153 = vector.broadcast %152 : vector<1x192xf32> to vector<8x192xf32>
    %154 = arith.addf %151, %153 : vector<8x192xf32>
    %c0_70 = arith.constant 0 : index
    %c0_71 = arith.constant 0 : index
    %c0_72 = arith.constant 0 : index
    %155 = vector.load %arg12[%c0_70, %c0_71, %c0_72] : memref<2x192x768xf32, #tpu.memory_space<vmem>>, vector<1x192x768xf32>
    %156 = vector.shape_cast %155 : vector<1x192x768xf32> to vector<192x768xf32>
    %cst_73 = arith.constant dense<0.000000e+00> : vector<8x768xf32>
    %157 = tpu.matmul %154, %156, %cst_73 {dimension_numbers = #tpu.dot_dimension_numbers<[1], [0], [0], [1], [0, 0, 1, 1], [], []>} : vector<8x192xf32>, vector<192x768xf32>, vector<8x768xf32> -> vector<8x768xf32>
    %c0_74 = arith.constant 0 : index
    %c0_75 = arith.constant 0 : index
    %158 = vector.load %arg13[%c0_74, %c0_75] : memref<2x768xf32, #tpu.memory_space<vmem>>, vector<1x768xf32>
    %159 = vector.shape_cast %158 : vector<1x768xf32> to vector<768xf32>
    %160 = vector.shape_cast %159 : vector<768xf32> to vector<1x768xf32>
    %161 = vector.broadcast %160 : vector<1x768xf32> to vector<8x768xf32>
    %162 = arith.addf %157, %161 : vector<8x768xf32>
    %cst_76 = arith.constant 5.000000e-01 : f32
    %163 = vector.broadcast %cst_76 : f32 to vector<8x768xf32>
    %164 = arith.mulf %163, %162 : vector<8x768xf32>
    %cst_77 = arith.constant 4.471500e-02 : f32
    %165 = vector.broadcast %cst_77 : f32 to vector<8x768xf32>
    %166 = arith.mulf %165, %162 : vector<8x768xf32>
    %167 = arith.mulf %166, %162 : vector<8x768xf32>
    %168 = arith.mulf %167, %162 : vector<8x768xf32>
    %169 = arith.addf %162, %168 : vector<8x768xf32>
    %cst_78 = arith.constant 0.797884583 : f32
    %170 = vector.broadcast %cst_78 : f32 to vector<8x768xf32>
    %171 = arith.mulf %170, %169 : vector<8x768xf32>
    %172 = math.tanh %171 : vector<8x768xf32>
    %cst_79 = arith.constant 1.000000e+00 : f32
    %173 = vector.broadcast %cst_79 : f32 to vector<8x768xf32>
    %174 = arith.addf %173, %172 : vector<8x768xf32>
    %175 = arith.mulf %164, %174 : vector<8x768xf32>
    %c0_80 = arith.constant 0 : index
    %c0_81 = arith.constant 0 : index
    %c0_82 = arith.constant 0 : index
    %176 = vector.load %arg14[%c0_80, %c0_81, %c0_82] : memref<2x768x192xf32, #tpu.memory_space<vmem>>, vector<1x768x192xf32>
    %177 = vector.shape_cast %176 : vector<1x768x192xf32> to vector<768x192xf32>
    %cst_83 = arith.constant dense<0.000000e+00> : vector<8x192xf32>
    %178 = tpu.matmul %175, %177, %cst_83 {dimension_numbers = #tpu.dot_dimension_numbers<[1], [0], [0], [1], [0, 0, 1, 1], [], []>} : vector<8x768xf32>, vector<768x192xf32>, vector<8x192xf32> -> vector<8x192xf32>
    %179 = arith.addf %128, %178 : vector<8x192xf32>
    %c0_84 = arith.constant 0 : index
    %c0_85 = arith.constant 0 : index
    %180 = vector.load %arg15[%c0_84, %c0_85] : memref<2x192xf32, #tpu.memory_space<vmem>>, vector<1x192xf32>
    %181 = vector.shape_cast %180 : vector<1x192xf32> to vector<192xf32>
    %182 = vector.shape_cast %181 : vector<192xf32> to vector<1x192xf32>
    %183 = vector.broadcast %182 : vector<1x192xf32> to vector<8x192xf32>
    %184 = arith.addf %179, %183 : vector<8x192xf32>
    %c0_86 = arith.constant 0 : index
    %c0_87 = arith.constant 0 : index
    %185 = vector.load %arg21[%c0_86, %c0_87] : memref<8x192xf32, #tpu.memory_space<vmem>>, vector<8x192xf32>
    tpu.vector_store %arg21[%c0_86, %c0_87], %184 {strides = array<i32>} : memref<8x192xf32, #tpu.memory_space<vmem>>, vector<8x192xf32>,
    %c0_88 = arith.constant 0 : index
    %c0_89 = arith.constant 0 : index
    %186 = vector.load %arg21[%c0_88, %c0_89] : memref<8x192xf32, #tpu.memory_space<vmem>>, vector<8x192xf32>
    %c1_90 = arith.constant 1 : index
    %c0_91 = arith.constant 0 : index
    %187 = vector.load %arg4[%c1_90, %c0_91] : memref<2x192xf32, #tpu.memory_space<vmem>>, vector<1x192xf32>
    %188 = vector.shape_cast %187 : vector<1x192xf32> to vector<192xf32>
    %c1_92 = arith.constant 1 : index
    %c0_93 = arith.constant 0 : index
    %189 = vector.load %arg5[%c1_92, %c0_93] : memref<2x192xf32, #tpu.memory_space<vmem>>, vector<1x192xf32>
    %190 = vector.shape_cast %189 : vector<1x192xf32> to vector<192xf32>
    %cst_94 = arith.constant dense<0.000000e+00> : vector<8xf32>
    %191 = vector.multi_reduction <add>, %186, %cst_94 [1] : vector<8x192xf32> to vector<8xf32>
    %192 = vector.shape_cast %191 : vector<8xf32> to vector<8x1xf32>
    %cst_95 = arith.constant 1.920000e+02 : f32
    %193 = vector.broadcast %cst_95 : f32 to vector<8x1xf32>
    %194 = arith.divf %192, %193 : vector<8x1xf32>
    %195 = vector.broadcast %194 : vector<8x1xf32> to vector<8x192xf32>
    %196 = arith.subf %186, %195 : vector<8x192xf32>
    %197 = arith.mulf %196, %196 : vector<8x192xf32>
    %cst_96 = arith.constant dense<0.000000e+00> : vector<8xf32>
    %198 = vector.multi_reduction <add>, %197, %cst_96 [1] : vector<8x192xf32> to vector<8xf32>
    %199 = vector.shape_cast %198 : vector<8xf32> to vector<8x1xf32>
    %cst_97 = arith.constant 1.920000e+02 : f32
    %200 = vector.broadcast %cst_97 : f32 to vector<8x1xf32>
    %201 = arith.divf %199, %200 : vector<8x1xf32>
    %cst_98 = arith.constant 9.99999997E-7 : f32
    %202 = vector.broadcast %cst_98 : f32 to vector<8x1xf32>
    %203 = arith.addf %201, %202 : vector<8x1xf32>
    %204 = math.rsqrt %203 : vector<8x1xf32>
    %205 = vector.broadcast %204 : vector<8x1xf32> to vector<8x192xf32>
    %206 = arith.mulf %196, %205 : vector<8x192xf32>
    %207 = vector.shape_cast %188 : vector<192xf32> to vector<1x192xf32>
    %208 = vector.broadcast %207 : vector<1x192xf32> to vector<8x192xf32>
    %209 = arith.mulf %206, %208 : vector<8x192xf32>
    %210 = vector.shape_cast %190 : vector<192xf32> to vector<1x192xf32>
    %211 = vector.broadcast %210 : vector<1x192xf32> to vector<8x192xf32>
    %212 = arith.addf %209, %211 : vector<8x192xf32>
    %c1_99 = arith.constant 1 : index
    %c0_100 = arith.constant 0 : index
    %c0_101 = arith.constant 0 : index
    %213 = vector.load %arg6[%c1_99, %c0_100, %c0_101] : memref<2x192x1152xf32, #tpu.memory_space<vmem>>, vector<1x192x1152xf32>
    %214 = vector.shape_cast %213 : vector<1x192x1152xf32> to vector<192x1152xf32>
    %cst_102 = arith.constant dense<0.000000e+00> : vector<8x1152xf32>
    %215 = tpu.matmul %212, %214, %cst_102 {dimension_numbers = #tpu.dot_dimension_numbers<[1], [0], [0], [1], [0, 0, 1, 1], [], []>} : vector<8x192xf32>, vector<192x1152xf32>, vector<8x1152xf32> -> vector<8x1152xf32>
    %c1_103 = arith.constant 1 : index
    %c0_104 = arith.constant 0 : index
    %216 = vector.load %arg7[%c1_103, %c0_104] : memref<2x1152xf32, #tpu.memory_space<vmem>>, vector<1x1152xf32>
    %217 = vector.shape_cast %216 : vector<1x1152xf32> to vector<1152xf32>
    %218 = vector.shape_cast %217 : vector<1152xf32> to vector<1x1152xf32>
    %219 = vector.broadcast %218 : vector<1x1152xf32> to vector<8x1152xf32>
    %220 = arith.addf %215, %219 : vector<8x1152xf32>
    %c1_105 = arith.constant 1 : index
    %c0_106 = arith.constant 0 : index
    %c0_107 = arith.constant 0 : index
    %221 = vector.load %arg8[%c1_105, %c0_106, %c0_107] : memref<2x384x192xf32, #tpu.memory_space<vmem>>, vector<1x384x192xf32>
    %222 = vector.shape_cast %221 : vector<1x384x192xf32> to vector<384x192xf32>
    %cst_108 = arith.constant 0.000000e+00 : f32
    %223 = vector.broadcast %cst_108 : f32 to vector<8x192xf32>
    %224 = vector.extract_strided_slice %220 {offsets = [0, 0], sizes = [8, 128], strides = [1, 1]} : vector<8x1152xf32> to vector<8x128xf32>
    %cst_109 = arith.constant 1.250000e-01 : f32
    %225 = vector.broadcast %cst_109 : f32 to vector<8x128xf32>
    %226 = arith.mulf %224, %225 : vector<8x128xf32>
    %227 = vector.extract_strided_slice %220 {offsets = [0, 128], sizes = [8, 128], strides = [1, 1]} : vector<8x1152xf32> to vector<8x128xf32>
    %228 = vector.extract_strided_slice %220 {offsets = [0, 256], sizes = [8, 128], strides = [1, 1]} : vector<8x1152xf32> to vector<8x128xf32>
    %cst_110 = arith.constant dense<0.000000e+00> : vector<8x8xf32>
    %229 = tpu.matmul %226, %227, %cst_110 {dimension_numbers = #tpu.dot_dimension_numbers<[1], [1], [0], [0], [0, 0, 1, 0], [], []>} : vector<8x128xf32>, vector<8x128xf32>, vector<8x8xf32> -> vector<8x8xf32>
    %230 = vector.broadcast %16 : vector<1x8xf32> to vector<8x8xf32>
    %231 = arith.addf %229, %230 : vector<8x8xf32>
    %cst_111 = arith.constant dense<0xFF800000> : vector<8xf32>
    %232 = vector.multi_reduction <maximumf>, %231, %cst_111 [1] : vector<8x8xf32> to vector<8xf32>
    %233 = vector.shape_cast %232 : vector<8xf32> to vector<8x1xf32>
    %234 = vector.broadcast %233 : vector<8x1xf32> to vector<8x8xf32>
    %235 = arith.subf %231, %234 : vector<8x8xf32>
    %236 = math.exp %235 : vector<8x8xf32>
    %cst_112 = arith.constant dense<0.000000e+00> : vector<8xf32>
    %237 = vector.multi_reduction <add>, %236, %cst_112 [1] : vector<8x8xf32> to vector<8xf32>
    %238 = vector.shape_cast %237 : vector<8xf32> to vector<8x1xf32>
    %239 = tpu.reciprocal %238 {approx = true} : vector<8x1xf32> -> vector<8x1xf32>
    %240 = vector.broadcast %239 : vector<8x1xf32> to vector<8x8xf32>
    %241 = arith.mulf %236, %240 : vector<8x8xf32>
    %cst_113 = arith.constant dense<0.000000e+00> : vector<8x128xf32>
    %242 = tpu.matmul %241, %228, %cst_113 {dimension_numbers = #tpu.dot_dimension_numbers<[1], [0], [0], [1], [0, 0, 1, 1], [], []>} : vector<8x8xf32>, vector<8x128xf32>, vector<8x128xf32> -> vector<8x128xf32>
    %243 = vector.extract_strided_slice %222 {offsets = [0, 0], sizes = [128, 192], strides = [1, 1]} : vector<384x192xf32> to vector<128x192xf32>
    %cst_114 = arith.constant dense<0.000000e+00> : vector<8x192xf32>
    %244 = tpu.matmul %242, %243, %cst_114 {dimension_numbers = #tpu.dot_dimension_numbers<[1], [0], [0], [1], [0, 0, 1, 1], [], []>} : vector<8x128xf32>, vector<128x192xf32>, vector<8x192xf32> -> vector<8x192xf32>
    %245 = arith.addf %223, %244 : vector<8x192xf32>
    %246 = vector.extract_strided_slice %220 {offsets = [0, 384], sizes = [8, 128], strides = [1, 1]} : vector<8x1152xf32> to vector<8x128xf32>
    %cst_115 = arith.constant 1.250000e-01 : f32
    %247 = vector.broadcast %cst_115 : f32 to vector<8x128xf32>
    %248 = arith.mulf %246, %247 : vector<8x128xf32>
    %249 = vector.extract_strided_slice %220 {offsets = [0, 512], sizes = [8, 128], strides = [1, 1]} : vector<8x1152xf32> to vector<8x128xf32>
    %250 = vector.extract_strided_slice %220 {offsets = [0, 640], sizes = [8, 128], strides = [1, 1]} : vector<8x1152xf32> to vector<8x128xf32>
    %cst_116 = arith.constant dense<0.000000e+00> : vector<8x8xf32>
    %251 = tpu.matmul %248, %249, %cst_116 {dimension_numbers = #tpu.dot_dimension_numbers<[1], [1], [0], [0], [0, 0, 1, 0], [], []>} : vector<8x128xf32>, vector<8x128xf32>, vector<8x8xf32> -> vector<8x8xf32>
    %252 = vector.broadcast %16 : vector<1x8xf32> to vector<8x8xf32>
    %253 = arith.addf %251, %252 : vector<8x8xf32>
    %cst_117 = arith.constant dense<0xFF800000> : vector<8xf32>
    %254 = vector.multi_reduction <maximumf>, %253, %cst_117 [1] : vector<8x8xf32> to vector<8xf32>
    %255 = vector.shape_cast %254 : vector<8xf32> to vector<8x1xf32>
    %256 = vector.broadcast %255 : vector<8x1xf32> to vector<8x8xf32>
    %257 = arith.subf %253, %256 : vector<8x8xf32>
    %258 = math.exp %257 : vector<8x8xf32>
    %cst_118 = arith.constant dense<0.000000e+00> : vector<8xf32>
    %259 = vector.multi_reduction <add>, %258, %cst_118 [1] : vector<8x8xf32> to vector<8xf32>
    %260 = vector.shape_cast %259 : vector<8xf32> to vector<8x1xf32>
    %261 = tpu.reciprocal %260 {approx = true} : vector<8x1xf32> -> vector<8x1xf32>
    %262 = vector.broadcast %261 : vector<8x1xf32> to vector<8x8xf32>
    %263 = arith.mulf %258, %262 : vector<8x8xf32>
    %cst_119 = arith.constant dense<0.000000e+00> : vector<8x128xf32>
    %264 = tpu.matmul %263, %250, %cst_119 {dimension_numbers = #tpu.dot_dimension_numbers<[1], [0], [0], [1], [0, 0, 1, 1], [], []>} : vector<8x8xf32>, vector<8x128xf32>, vector<8x128xf32> -> vector<8x128xf32>
    %265 = vector.extract_strided_slice %222 {offsets = [128, 0], sizes = [128, 192], strides = [1, 1]} : vector<384x192xf32> to vector<128x192xf32>
    %cst_120 = arith.constant dense<0.000000e+00> : vector<8x192xf32>
    %266 = tpu.matmul %264, %265, %cst_120 {dimension_numbers = #tpu.dot_dimension_numbers<[1], [0], [0], [1], [0, 0, 1, 1], [], []>} : vector<8x128xf32>, vector<128x192xf32>, vector<8x192xf32> -> vector<8x192xf32>
    %267 = arith.addf %245, %266 : vector<8x192xf32>
    %268 = vector.extract_strided_slice %220 {offsets = [0, 768], sizes = [8, 128], strides = [1, 1]} : vector<8x1152xf32> to vector<8x128xf32>
    %cst_121 = arith.constant 1.250000e-01 : f32
    %269 = vector.broadcast %cst_121 : f32 to vector<8x128xf32>
    %270 = arith.mulf %268, %269 : vector<8x128xf32>
    %271 = vector.extract_strided_slice %220 {offsets = [0, 896], sizes = [8, 128], strides = [1, 1]} : vector<8x1152xf32> to vector<8x128xf32>
    %272 = vector.extract_strided_slice %220 {offsets = [0, 1024], sizes = [8, 128], strides = [1, 1]} : vector<8x1152xf32> to vector<8x128xf32>
    %cst_122 = arith.constant dense<0.000000e+00> : vector<8x8xf32>
    %273 = tpu.matmul %270, %271, %cst_122 {dimension_numbers = #tpu.dot_dimension_numbers<[1], [1], [0], [0], [0, 0, 1, 0], [], []>} : vector<8x128xf32>, vector<8x128xf32>, vector<8x8xf32> -> vector<8x8xf32>
    %274 = vector.broadcast %16 : vector<1x8xf32> to vector<8x8xf32>
    %275 = arith.addf %273, %274 : vector<8x8xf32>
    %cst_123 = arith.constant dense<0xFF800000> : vector<8xf32>
    %276 = vector.multi_reduction <maximumf>, %275, %cst_123 [1] : vector<8x8xf32> to vector<8xf32>
    %277 = vector.shape_cast %276 : vector<8xf32> to vector<8x1xf32>
    %278 = vector.broadcast %277 : vector<8x1xf32> to vector<8x8xf32>
    %279 = arith.subf %275, %278 : vector<8x8xf32>
    %280 = math.exp %279 : vector<8x8xf32>
    %cst_124 = arith.constant dense<0.000000e+00> : vector<8xf32>
    %281 = vector.multi_reduction <add>, %280, %cst_124 [1] : vector<8x8xf32> to vector<8xf32>
    %282 = vector.shape_cast %281 : vector<8xf32> to vector<8x1xf32>
    %283 = tpu.reciprocal %282 {approx = true} : vector<8x1xf32> -> vector<8x1xf32>
    %284 = vector.broadcast %283 : vector<8x1xf32> to vector<8x8xf32>
    %285 = arith.mulf %280, %284 : vector<8x8xf32>
    %cst_125 = arith.constant dense<0.000000e+00> : vector<8x128xf32>
    %286 = tpu.matmul %285, %272, %cst_125 {dimension_numbers = #tpu.dot_dimension_numbers<[1], [0], [0], [1], [0, 0, 1, 1], [], []>} : vector<8x8xf32>, vector<8x128xf32>, vector<8x128xf32> -> vector<8x128xf32>
    %287 = vector.extract_strided_slice %222 {offsets = [256, 0], sizes = [128, 192], strides = [1, 1]} : vector<384x192xf32> to vector<128x192xf32>
    %cst_126 = arith.constant dense<0.000000e+00> : vector<8x192xf32>
    %288 = tpu.matmul %286, %287, %cst_126 {dimension_numbers = #tpu.dot_dimension_numbers<[1], [0], [0], [1], [0, 0, 1, 1], [], []>} : vector<8x128xf32>, vector<128x192xf32>, vector<8x192xf32> -> vector<8x192xf32>
    %289 = arith.addf %267, %288 : vector<8x192xf32>
    %290 = arith.addf %186, %289 : vector<8x192xf32>
    %c1_127 = arith.constant 1 : index
    %c0_128 = arith.constant 0 : index
    %291 = vector.load %arg9[%c1_127, %c0_128] : memref<2x192xf32, #tpu.memory_space<vmem>>, vector<1x192xf32>
    %292 = vector.shape_cast %291 : vector<1x192xf32> to vector<192xf32>
    %293 = vector.shape_cast %292 : vector<192xf32> to vector<1x192xf32>
    %294 = vector.broadcast %293 : vector<1x192xf32> to vector<8x192xf32>
    %295 = arith.addf %290, %294 : vector<8x192xf32>
    %c0_129 = arith.constant 0 : index
    %c0_130 = arith.constant 0 : index
    %296 = vector.load %arg21[%c0_129, %c0_130] : memref<8x192xf32, #tpu.memory_space<vmem>>, vector<8x192xf32>
    tpu.vector_store %arg21[%c0_129, %c0_130], %295 {strides = array<i32>} : memref<8x192xf32, #tpu.memory_space<vmem>>, vector<8x192xf32>,
    %c0_131 = arith.constant 0 : index
    %c0_132 = arith.constant 0 : index
    %297 = vector.load %arg21[%c0_131, %c0_132] : memref<8x192xf32, #tpu.memory_space<vmem>>, vector<8x192xf32>
    %c1_133 = arith.constant 1 : index
    %c0_134 = arith.constant 0 : index
    %298 = vector.load %arg10[%c1_133, %c0_134] : memref<2x192xf32, #tpu.memory_space<vmem>>, vector<1x192xf32>
    %299 = vector.shape_cast %298 : vector<1x192xf32> to vector<192xf32>
    %c1_135 = arith.constant 1 : index
    %c0_136 = arith.constant 0 : index
    %300 = vector.load %arg11[%c1_135, %c0_136] : memref<2x192xf32, #tpu.memory_space<vmem>>, vector<1x192xf32>
    %301 = vector.shape_cast %300 : vector<1x192xf32> to vector<192xf32>
    %cst_137 = arith.constant dense<0.000000e+00> : vector<8xf32>
    %302 = vector.multi_reduction <add>, %297, %cst_137 [1] : vector<8x192xf32> to vector<8xf32>
    %303 = vector.shape_cast %302 : vector<8xf32> to vector<8x1xf32>
    %cst_138 = arith.constant 1.920000e+02 : f32
    %304 = vector.broadcast %cst_138 : f32 to vector<8x1xf32>
    %305 = arith.divf %303, %304 : vector<8x1xf32>
    %306 = vector.broadcast %305 : vector<8x1xf32> to vector<8x192xf32>
    %307 = arith.subf %297, %306 : vector<8x192xf32>
    %308 = arith.mulf %307, %307 : vector<8x192xf32>
    %cst_139 = arith.constant dense<0.000000e+00> : vector<8xf32>
    %309 = vector.multi_reduction <add>, %308, %cst_139 [1] : vector<8x192xf32> to vector<8xf32>
    %310 = vector.shape_cast %309 : vector<8xf32> to vector<8x1xf32>
    %cst_140 = arith.constant 1.920000e+02 : f32
    %311 = vector.broadcast %cst_140 : f32 to vector<8x1xf32>
    %312 = arith.divf %310, %311 : vector<8x1xf32>
    %cst_141 = arith.constant 9.99999997E-7 : f32
    %313 = vector.broadcast %cst_141 : f32 to vector<8x1xf32>
    %314 = arith.addf %312, %313 : vector<8x1xf32>
    %315 = math.rsqrt %314 : vector<8x1xf32>
    %316 = vector.broadcast %315 : vector<8x1xf32> to vector<8x192xf32>
    %317 = arith.mulf %307, %316 : vector<8x192xf32>
    %318 = vector.shape_cast %299 : vector<192xf32> to vector<1x192xf32>
    %319 = vector.broadcast %318 : vector<1x192xf32> to vector<8x192xf32>
    %320 = arith.mulf %317, %319 : vector<8x192xf32>
    %321 = vector.shape_cast %301 : vector<192xf32> to vector<1x192xf32>
    %322 = vector.broadcast %321 : vector<1x192xf32> to vector<8x192xf32>
    %323 = arith.addf %320, %322 : vector<8x192xf32>
    %c1_142 = arith.constant 1 : index
    %c0_143 = arith.constant 0 : index
    %c0_144 = arith.constant 0 : index
    %324 = vector.load %arg12[%c1_142, %c0_143, %c0_144] : memref<2x192x768xf32, #tpu.memory_space<vmem>>, vector<1x192x768xf32>
    %325 = vector.shape_cast %324 : vector<1x192x768xf32> to vector<192x768xf32>
    %cst_145 = arith.constant dense<0.000000e+00> : vector<8x768xf32>
    %326 = tpu.matmul %323, %325, %cst_145 {dimension_numbers = #tpu.dot_dimension_numbers<[1], [0], [0], [1], [0, 0, 1, 1], [], []>} : vector<8x192xf32>, vector<192x768xf32>, vector<8x768xf32> -> vector<8x768xf32>
    %c1_146 = arith.constant 1 : index
    %c0_147 = arith.constant 0 : index
    %327 = vector.load %arg13[%c1_146, %c0_147] : memref<2x768xf32, #tpu.memory_space<vmem>>, vector<1x768xf32>
    %328 = vector.shape_cast %327 : vector<1x768xf32> to vector<768xf32>
    %329 = vector.shape_cast %328 : vector<768xf32> to vector<1x768xf32>
    %330 = vector.broadcast %329 : vector<1x768xf32> to vector<8x768xf32>
    %331 = arith.addf %326, %330 : vector<8x768xf32>
    %cst_148 = arith.constant 5.000000e-01 : f32
    %332 = vector.broadcast %cst_148 : f32 to vector<8x768xf32>
    %333 = arith.mulf %332, %331 : vector<8x768xf32>
    %cst_149 = arith.constant 4.471500e-02 : f32
    %334 = vector.broadcast %cst_149 : f32 to vector<8x768xf32>
    %335 = arith.mulf %334, %331 : vector<8x768xf32>
    %336 = arith.mulf %335, %331 : vector<8x768xf32>
    %337 = arith.mulf %336, %331 : vector<8x768xf32>
    %338 = arith.addf %331, %337 : vector<8x768xf32>
    %cst_150 = arith.constant 0.797884583 : f32
    %339 = vector.broadcast %cst_150 : f32 to vector<8x768xf32>
    %340 = arith.mulf %339, %338 : vector<8x768xf32>
    %341 = math.tanh %340 : vector<8x768xf32>
    %cst_151 = arith.constant 1.000000e+00 : f32
    %342 = vector.broadcast %cst_151 : f32 to vector<8x768xf32>
    %343 = arith.addf %342, %341 : vector<8x768xf32>
    %344 = arith.mulf %333, %343 : vector<8x768xf32>
    %c1_152 = arith.constant 1 : index
    %c0_153 = arith.constant 0 : index
    %c0_154 = arith.constant 0 : index
    %345 = vector.load %arg14[%c1_152, %c0_153, %c0_154] : memref<2x768x192xf32, #tpu.memory_space<vmem>>, vector<1x768x192xf32>
    %346 = vector.shape_cast %345 : vector<1x768x192xf32> to vector<768x192xf32>
    %cst_155 = arith.constant dense<0.000000e+00> : vector<8x192xf32>
    %347 = tpu.matmul %344, %346, %cst_155 {dimension_numbers = #tpu.dot_dimension_numbers<[1], [0], [0], [1], [0, 0, 1, 1], [], []>} : vector<8x768xf32>, vector<768x192xf32>, vector<8x192xf32> -> vector<8x192xf32>
    %348 = arith.addf %297, %347 : vector<8x192xf32>
    %c1_156 = arith.constant 1 : index
    %c0_157 = arith.constant 0 : index
    %349 = vector.load %arg15[%c1_156, %c0_157] : memref<2x192xf32, #tpu.memory_space<vmem>>, vector<1x192xf32>
    %350 = vector.shape_cast %349 : vector<1x192xf32> to vector<192xf32>
    %351 = vector.shape_cast %350 : vector<192xf32> to vector<1x192xf32>
    %352 = vector.broadcast %351 : vector<1x192xf32> to vector<8x192xf32>
    %353 = arith.addf %348, %352 : vector<8x192xf32>
    %c0_158 = arith.constant 0 : index
    %c0_159 = arith.constant 0 : index
    %354 = vector.load %arg21[%c0_158, %c0_159] : memref<8x192xf32, #tpu.memory_space<vmem>>, vector<8x192xf32>
    tpu.vector_store %arg21[%c0_158, %c0_159], %353 {strides = array<i32>} : memref<8x192xf32, #tpu.memory_space<vmem>>, vector<8x192xf32>,
    %c0_160 = arith.constant 0 : index
    %c0_161 = arith.constant 0 : index
    %355 = vector.load %arg21[%c0_160, %c0_161] : memref<8x192xf32, #tpu.memory_space<vmem>>, vector<1x192xf32>
    %c0_162 = arith.constant 0 : index
    %c0_163 = arith.constant 0 : index
    %356 = vector.load %arg16[%c0_162, %c0_163] : memref<1x192xf32, #tpu.memory_space<vmem>>, vector<1x192xf32>
    %c0_164 = arith.constant 0 : index
    %c0_165 = arith.constant 0 : index
    %357 = vector.load %arg17[%c0_164, %c0_165] : memref<1x192xf32, #tpu.memory_space<vmem>>, vector<1x192xf32>
    %cst_166 = arith.constant dense<0.000000e+00> : vector<1xf32>
    %358 = vector.multi_reduction <add>, %355, %cst_166 [1] : vector<1x192xf32> to vector<1xf32>
    %359 = vector.shape_cast %358 : vector<1xf32> to vector<1x1xf32>
    %cst_167 = arith.constant 1.920000e+02 : f32
    %360 = vector.broadcast %cst_167 : f32 to vector<1x1xf32>
    %361 = arith.divf %359, %360 : vector<1x1xf32>
    %362 = vector.broadcast %361 : vector<1x1xf32> to vector<1x192xf32>
    %363 = arith.subf %355, %362 : vector<1x192xf32>
    %364 = arith.mulf %363, %363 : vector<1x192xf32>
    %cst_168 = arith.constant dense<0.000000e+00> : vector<1xf32>
    %365 = vector.multi_reduction <add>, %364, %cst_168 [1] : vector<1x192xf32> to vector<1xf32>
    %366 = vector.shape_cast %365 : vector<1xf32> to vector<1x1xf32>
    %cst_169 = arith.constant 1.920000e+02 : f32
    %367 = vector.broadcast %cst_169 : f32 to vector<1x1xf32>
    %368 = arith.divf %366, %367 : vector<1x1xf32>
    %cst_170 = arith.constant 9.99999997E-7 : f32
    %369 = vector.broadcast %cst_170 : f32 to vector<1x1xf32>
    %370 = arith.addf %368, %369 : vector<1x1xf32>
    %371 = math.rsqrt %370 : vector<1x1xf32>
    %372 = vector.broadcast %371 : vector<1x1xf32> to vector<1x192xf32>
    %373 = arith.mulf %363, %372 : vector<1x192xf32>
    %374 = arith.mulf %373, %356 : vector<1x192xf32>
    %375 = arith.addf %374, %357 : vector<1x192xf32>
    %c0_171 = arith.constant 0 : index
    %c0_172 = arith.constant 0 : index
    %376 = vector.load %arg18[%c0_171, %c0_172] : memref<192x512xf32, #tpu.memory_space<vmem>>, vector<192x512xf32>
    %cst_173 = arith.constant dense<0.000000e+00> : vector<1x512xf32>
    %377 = tpu.matmul %375, %376, %cst_173 {dimension_numbers = #tpu.dot_dimension_numbers<[1], [0], [0], [1], [0, 0, 1, 1], [], []>} : vector<1x192xf32>, vector<192x512xf32>, vector<1x512xf32> -> vector<1x512xf32>
    %c0_174 = arith.constant 0 : index
    %c0_175 = arith.constant 0 : index
    %378 = vector.load %arg19[%c0_174, %c0_175] : memref<1x512xf32, #tpu.memory_space<vmem>>, vector<1x512xf32>
    %379 = arith.addf %377, %378 : vector<1x512xf32>
    %cst_176 = arith.constant 0.000000e+00 : f32
    %380 = vector.broadcast %cst_176 : f32 to vector<1x512xf32>
    %381 = arith.subf %380, %379 : vector<1x512xf32>
    %382 = math.exp %381 : vector<1x512xf32>
    %cst_177 = arith.constant 1.000000e+00 : f32
    %383 = vector.broadcast %cst_177 : f32 to vector<1x512xf32>
    %384 = arith.addf %383, %382 : vector<1x512xf32>
    %cst_178 = arith.constant 1.000000e+00 : f32
    %385 = vector.broadcast %cst_178 : f32 to vector<1x512xf32>
    %386 = arith.divf %385, %384 : vector<1x512xf32>
    %c0_179 = arith.constant 0 : index
    %c0_180 = arith.constant 0 : index
    %c0_181 = arith.constant 0 : index
    %387 = vector.load %arg20[%c0_179, %c0_180, %c0_181] : memref<1x1x512xf32, #tpu.memory_space<vmem>>, vector<1x1x512xf32>
    %388 = vector.shape_cast %387 : vector<1x1x512xf32> to vector<1x512xf32>
    %389 = vector.shape_cast %386 : vector<1x512xf32> to vector<1x1x512xf32>
    tpu.vector_store %arg20[%c0_179, %c0_180, %c0_181], %389 {strides = array<i32>} : memref<1x1x512xf32, #tpu.memory_space<vmem>>, vector<1x1x512xf32>,
    return
  }
  func.func @transform_0(%arg0: i32) -> (i32, i32, i32) {
    %c0_i32 = arith.constant 0 : i32
    %c0_i32_0 = arith.constant 0 : i32
    %c0_i32_1 = arith.constant 0 : i32
    return %arg0, %c0_i32, %c0_i32_0 : i32, i32, i32
  }
  func.func @transform_1(%arg0: i32) -> (i32, i32) {
    %c0_i32 = arith.constant 0 : i32
    %c0_i32_0 = arith.constant 0 : i32
    %c0_i32_1 = arith.constant 0 : i32
    return %c0_i32, %c0_i32_0 : i32, i32
  }
  func.func @transform_2(%arg0: i32) -> (i32, i32) {
    %c0_i32 = arith.constant 0 : i32
    %c0_i32_0 = arith.constant 0 : i32
    %c0_i32_1 = arith.constant 0 : i32
    return %c0_i32, %c0_i32_0 : i32, i32
  }
  func.func @transform_3(%arg0: i32) -> (i32, i32) {
    %c0_i32 = arith.constant 0 : i32
    %c0_i32_0 = arith.constant 0 : i32
    %c0_i32_1 = arith.constant 0 : i32
    return %c0_i32, %c0_i32_0 : i32, i32
  }
  func.func @transform_4(%arg0: i32) -> (i32, i32) {
    %c0_i32 = arith.constant 0 : i32
    %c0_i32_0 = arith.constant 0 : i32
    %c0_i32_1 = arith.constant 0 : i32
    return %c0_i32, %c0_i32_0 : i32, i32
  }
  func.func @transform_5(%arg0: i32) -> (i32, i32, i32) {
    %c0_i32 = arith.constant 0 : i32
    %c0_i32_0 = arith.constant 0 : i32
    %c0_i32_1 = arith.constant 0 : i32
    %c0_i32_2 = arith.constant 0 : i32
    return %c0_i32, %c0_i32_0, %c0_i32_1 : i32, i32, i32
  }
  func.func @transform_6(%arg0: i32) -> (i32, i32) {
    %c0_i32 = arith.constant 0 : i32
    %c0_i32_0 = arith.constant 0 : i32
    %c0_i32_1 = arith.constant 0 : i32
    return %c0_i32, %c0_i32_0 : i32, i32
  }
  func.func @transform_7(%arg0: i32) -> (i32, i32, i32) {
    %c0_i32 = arith.constant 0 : i32
    %c0_i32_0 = arith.constant 0 : i32
    %c0_i32_1 = arith.constant 0 : i32
    %c0_i32_2 = arith.constant 0 : i32
    return %c0_i32, %c0_i32_0, %c0_i32_1 : i32, i32, i32
  }
  func.func @transform_8(%arg0: i32) -> (i32, i32) {
    %c0_i32 = arith.constant 0 : i32
    %c0_i32_0 = arith.constant 0 : i32
    %c0_i32_1 = arith.constant 0 : i32
    return %c0_i32, %c0_i32_0 : i32, i32
  }
  func.func @transform_9(%arg0: i32) -> (i32, i32) {
    %c0_i32 = arith.constant 0 : i32
    %c0_i32_0 = arith.constant 0 : i32
    %c0_i32_1 = arith.constant 0 : i32
    return %c0_i32, %c0_i32_0 : i32, i32
  }
  func.func @transform_10(%arg0: i32) -> (i32, i32) {
    %c0_i32 = arith.constant 0 : i32
    %c0_i32_0 = arith.constant 0 : i32
    %c0_i32_1 = arith.constant 0 : i32
    return %c0_i32, %c0_i32_0 : i32, i32
  }
  func.func @transform_11(%arg0: i32) -> (i32, i32, i32) {
    %c0_i32 = arith.constant 0 : i32
    %c0_i32_0 = arith.constant 0 : i32
    %c0_i32_1 = arith.constant 0 : i32
    %c0_i32_2 = arith.constant 0 : i32
    return %c0_i32, %c0_i32_0, %c0_i32_1 : i32, i32, i32
  }
  func.func @transform_12(%arg0: i32) -> (i32, i32) {
    %c0_i32 = arith.constant 0 : i32
    %c0_i32_0 = arith.constant 0 : i32
    %c0_i32_1 = arith.constant 0 : i32
    return %c0_i32, %c0_i32_0 : i32, i32
  }
  func.func @transform_13(%arg0: i32) -> (i32, i32, i32) {
    %c0_i32 = arith.constant 0 : i32
    %c0_i32_0 = arith.constant 0 : i32
    %c0_i32_1 = arith.constant 0 : i32
    %c0_i32_2 = arith.constant 0 : i32
    return %c0_i32, %c0_i32_0, %c0_i32_1 : i32, i32, i32
  }
  func.func @transform_14(%arg0: i32) -> (i32, i32) {
    %c0_i32 = arith.constant 0 : i32
    %c0_i32_0 = arith.constant 0 : i32
    %c0_i32_1 = arith.constant 0 : i32
    return %c0_i32, %c0_i32_0 : i32, i32
  }
  func.func @transform_15(%arg0: i32) -> (i32, i32) {
    %c0_i32 = arith.constant 0 : i32
    %c0_i32_0 = arith.constant 0 : i32
    %c0_i32_1 = arith.constant 0 : i32
    return %c0_i32, %c0_i32_0 : i32, i32
  }
  func.func @transform_16(%arg0: i32) -> (i32, i32) {
    %c0_i32 = arith.constant 0 : i32
    %c0_i32_0 = arith.constant 0 : i32
    %c0_i32_1 = arith.constant 0 : i32
    return %c0_i32, %c0_i32_0 : i32, i32
  }
  func.func @transform_17(%arg0: i32) -> (i32, i32) {
    %c0_i32 = arith.constant 0 : i32
    %c0_i32_0 = arith.constant 0 : i32
    %c0_i32_1 = arith.constant 0 : i32
    return %c0_i32, %c0_i32_0 : i32, i32
  }
  func.func @transform_18(%arg0: i32) -> (i32, i32) {
    %c0_i32 = arith.constant 0 : i32
    %c0_i32_0 = arith.constant 0 : i32
    %c0_i32_1 = arith.constant 0 : i32
    return %c0_i32, %c0_i32_0 : i32, i32
  }
  func.func @transform_19(%arg0: i32) -> (i32, i32, i32) {
    %c0_i32 = arith.constant 0 : i32
    %c0_i32_0 = arith.constant 0 : i32
    %c0_i32_1 = arith.constant 0 : i32
    return %arg0, %c0_i32, %c0_i32_0 : i32, i32, i32
  }
}

</mosaic_0001>

<bundles_post_ra>
// kernel: feat_extractor_vit.1
= control target key start
LH: loop header
LB: loop body
LE: loop exit
PB: predicated region body
PF: predicated region fallthrough
CT: control target
= control target key end

     0   :  { %s12583_s0 = inlined_call_operand.vmem [shape: f32[2,4,768], index: 0, kind: input, shape index: {}]   ;;  %s12584_s1 = inlined_call_operand.vmem [shape: f32[768,192], index: 1, kind: input, shape index: {}]   ;;  %s12585_s2 = inlined_call_operand.vmem [shape: f32[5,192], index: 2, kind: input, shape index: {}]   ;;  %s12586_s3 = inlined_call_operand.vmem [shape: f32[2,192], index: 3, kind: input, shape index: {}]   ;;  %s12587_s4 = inlined_call_operand.vmem [shape: f32[2,192], index: 4, kind: input, shape index: {}]   ;;  %s12588_s5 = inlined_call_operand.vmem [shape: f32[2,192,1152], index: 5, kind: input, shape index: {}]   ;;  %s12589_s6 = inlined_call_operand.vmem [shape: f32[2,1152], index: 6, kind: input, shape index: {}]   ;;  %s12590_s7 = inlined_call_operand.vmem [shape: f32[2,384,192], index: 7, kind: input, shape index: {}]   ;;  %s12591_s8 = inlined_call_operand.vmem [shape: f32[2,192], index: 8, kind: input, shape index: {}]   ;;  %s12592_s9 = inlined_call_operand.vmem [shape: f32[2,192], index: 9, kind: input, shape index: {}]   ;;  %s12593_s10 = inlined_call_operand.vmem [shape: f32[2,192], index: 10, kind: input, shape index: {}]   ;;  %s12594_s11 = inlined_call_operand.vmem [shape: f32[2,192,768], index: 11, kind: input, shape index: {}]   ;;  %s12595_s12 = inlined_call_operand.vmem [shape: f32[2,768], index: 12, kind: input, shape index: {}]   ;;  %s12596_s13 = inlined_call_operand.vmem [shape: f32[2,768,192], index: 13, kind: input, shape index: {}]   ;;  %s12597_s14 = inlined_call_operand.vmem [shape: f32[2,192], index: 14, kind: input, shape index: {}]   ;;  %s12598_s15 = inlined_call_operand.vmem [shape: f32[1,192], index: 15, kind: input, shape index: {}]   ;;  %s12599_s16 = inlined_call_operand.vmem [shape: f32[1,192], index: 16, kind: input, shape index: {}]   ;;  %s12600_s17 = inlined_call_operand.vmem [shape: f32[192,512], index: 17, kind: input, shape index: {}]   ;;  %s12601_s18 = inlined_call_operand.vmem [shape: f32[1,512], index: 18, kind: input, shape index: {}]   ;;  %s12602_s19 = inlined_call_operand.vmem [shape: f32[2,1,512], index: 19, kind: output, shape index: {}]  }
   0x1   :  { %12607 = sst [smem:[#allocation4_spill]] %s12583_s0  ;;  %s7248_s0 = smov 0  }
   0x2   :  { %12608 = sst [smem:[#allocation5_spill]] %s12584_s1 }
   0x3   :  { %12609 = sst [smem:[#allocation6_spill]] %s12585_s2 }
   0x4   :  { %12610 = sst [smem:[#allocation7_spill]] %s12586_s3 }
   0x5 LB: > { %12611 = sst [smem:[#allocation3_spill]] %s7142_s0  ;;  %s6266_s30 = sadd.s32 4294967295, %s7142_s0   ;;  %s7142_s0 = sphi %s7248_s0, %s29_s0  }
   0x6   : > { %p6270_p0 = scmp.ge.s32.totalorder %s7142_s0, 1  ;;  %p537_p1 = scmp.lt.s32.totalorder %s7142_s0, 3 }
   0x8   : > { %p538_p2 = pnand %p6270_p0, %p537_p1 }
   0x9   : > { %s12612_s1 = sld [smem:[#allocation5_spill]] (!%p538_p2)  ;;  %p7519_p3 = scmp.lt.s32.totalorder (!%p538_p2), %s6266_s30, 1 }
   0xa   : > { %541 = sbr.rel (%p538_p2) target bundleno = 6646 (0x19f6), region = 96  ;;  %s12614_s20 = sld [smem:[#allocation4_spill]] (!%p538_p2) }
   0xb   : > { %s12615_s29 = sld [smem:[#allocation6_spill]] (!%p538_p2) }
   0xf   : > { %v635_v0 = vld [vmem:[%s12612_s1 + $0xf8] sm:$0xff]  ;;  %v634_v1 = vld [vmem:[%s12612_s1 + $0xf0] sm:$0xff]  ;;  %v633_v2 = vld [vmem:[%s12612_s1 + $0xe8] sm:$0xff]  ;;  %s12620_s30 = smov (!%p7519_p3, %s6266_s30), 1  ;;  %vm800_vm0 = vcmask 523264   ;;  %vm1043_vm2 = vcmask 520193  }
  0x10   : > { %823 = vmatprep.subr.mxu0 %v635_v0  ;;  %v699_v3 = vld [vmem:[%s12612_s1 + $0x2f8] sm:$0xff]  ;;  %v632_v4 = vld [vmem:[%s12612_s1 + $0xe0] sm:$0xff]  ;;  %v698_v5 = vld [vmem:[%s12612_s1 + $0x2f0] sm:$0xff]  ;;  %s7041_s23 = smul.u32 24, %s12620_s30  ;;  %vm7145_vm3 = vmmov 0   ;;  %vm1888_vm5 = vcmask 64512  }
  0x11   : > { %824 = vmatpush1.msra.mxu0 %v634_v1  ;;  %894 = vmatprep.subr.mxu1 %v699_v3  ;;  %v631_v6 = vld [vmem:[%s12612_s1 + $0xd8] sm:$0xff]  ;;  %v697_v7 = vld [vmem:[%s12612_s1 + $0x2e8] sm:$0xff]  ;;  %v630_v8 = vld [vmem:[%s12612_s1 + $0xd0] sm:$0xff]  ;;  %vm5841_vm6 = vcmask 1040384   ;;  %vm5843_vm7 = vcmask 516096   ;;  %s6272_s28 = sshll.u32 %s12620_s30, 2 }
  0x12   : > { %825 = vmatprep.subr.mxu0 %v633_v2  ;;  %895 = vmatpush1.msra.mxu1 %v698_v5  ;;  %v696_v9 = vld [vmem:[%s12612_s1 + $0x2e0] sm:$0xff]  ;;  %v695_v10 = vld [vmem:[%s12612_s1 + $0x2d8] sm:$0xff]  ;;  %v629_v11 = vld [vmem:[%s12612_s1 + $0xc8] sm:$0xff]  ;;  %s7605_s0 = scalar_lea.vmem %s12614_s20, %s7041_s23  ;;  %s600_s22 = scalar_lea.vmem %s12602_s19, %s6272_s28 }
  0x13   : > { %826 = vmatpush1.msra.mxu0 %v632_v4  ;;  %896 = vmatprep.subr.mxu1 %v697_v7  ;;  %v694_v12 = vld [vmem:[%s12612_s1 + $0x2d0] sm:$0xff]  ;;  %v628_v13 = vld [vmem:[%s12612_s1 + $0xc0] sm:$0xff]  ;;  %v693_v14 = vld [vmem:[%s12612_s1 + $0x2c8] sm:$0xff] }
  0x14   : > { %827 = vmatprep.subr.mxu0 %v631_v6  ;;  %897 = vmatpush1.msra.mxu1 %v696_v9  ;;  %v627_v15 = vld [vmem:[%s12612_s1 + $0xb8] sm:$0xff]  ;;  %v692_v16 = vld [vmem:[%s12612_s1 + $0x2c0] sm:$0xff]  ;;  %v626_v17 = vld [vmem:[%s12612_s1 + $0xb0] sm:$0xff] }
  0x15   : > { %828 = vmatpush1.msra.mxu0 %v630_v8  ;;  %898 = vmatprep.subr.mxu1 %v695_v10  ;;  %v691_v18 = vld [vmem:[%s12612_s1 + $0x2b8] sm:$0xff]  ;;  %v625_v19 = vld [vmem:[%s12612_s1 + $0xa8] sm:$0xff]  ;;  %v690_v20 = vld [vmem:[%s12612_s1 + $0x2b0] sm:$0xff] }
  0x16   : > { %829 = vmatprep.subr.mxu0 %v629_v11  ;;  %899 = vmatpush1.msra.mxu1 %v694_v12  ;;  %v624_v21 = vld [vmem:[%s12612_s1 + $0xa0] sm:$0xff]  ;;  %v689_v22 = vld [vmem:[%s12612_s1 + $0x2a8] sm:$0xff]  ;;  %v623_v23 = vld [vmem:[%s12612_s1 + $0x98] sm:$0xff] }
  0x17   : > { %830 = vmatpush1.msra.mxu0 %v628_v13  ;;  %900 = vmatprep.subr.mxu1 %v693_v14  ;;  %v688_v24 = vld [vmem:[%s12612_s1 + $0x2a0] sm:$0xff]  ;;  %v622_v25 = vld [vmem:[%s12612_s1 + $0x90] sm:$0xff]  ;;  %v687_v26 = vld [vmem:[%s12612_s1 + $0x298] sm:$0xff] }
  0x18   : > { %831 = vmatprep.subr.mxu0 %v627_v15  ;;  %901 = vmatpush1.msra.mxu1 %v692_v16  ;;  %v621_v27 = vld [vmem:[%s12612_s1 + $0x88] sm:$0xff]  ;;  %v686_v28 = vld [vmem:[%s12612_s1 + $0x290] sm:$0xff]  ;;  %v620_v29 = vld [vmem:[%s12612_s1 + $0x80] sm:$0xff] }
  0x19   : > { %832 = vmatpush1.msra.mxu0 %v626_v17  ;;  %902 = vmatprep.subr.mxu1 %v691_v18  ;;  %v685_v30 = vld [vmem:[%s12612_s1 + $0x288] sm:$0xff]  ;;  %v619_v31 = vld [vmem:[%s12612_s1 + $0x78] sm:$0xff]  ;;  %v684_v32 = vld [vmem:[%s12612_s1 + $0x280] sm:$0xff] }
  0x1a   : > { %833 = vmatprep.subr.mxu0 %v625_v19  ;;  %903 = vmatpush1.msra.mxu1 %v690_v20  ;;  %v618_v33 = vld [vmem:[%s12612_s1 + $0x70] sm:$0xff]  ;;  %v683_v34 = vld [vmem:[%s12612_s1 + $0x278] sm:$0xff]  ;;  %v617_v35 = vld [vmem:[%s12612_s1 + $0x68] sm:$0xff] }
  0x1b   : > { %834 = vmatpush1.msra.mxu0 %v624_v21  ;;  %904 = vmatprep.subr.mxu1 %v689_v22  ;;  %v682_v36 = vld [vmem:[%s12612_s1 + $0x270] sm:$0xff]  ;;  %v616_v37 = vld [vmem:[%s12612_s1 + $0x60] sm:$0xff]  ;;  %v681_v38 = vld [vmem:[%s12612_s1 + $0x268] sm:$0xff] }
  0x1c   : > { %835 = vmatprep.subr.mxu0 %v623_v23  ;;  %905 = vmatpush1.msra.mxu1 %v688_v24  ;;  %v615_v39 = vld [vmem:[%s12612_s1 + $0x58] sm:$0xff]  ;;  %v680_v40 = vld [vmem:[%s12612_s1 + $0x260] sm:$0xff]  ;;  %v614_v41 = vld [vmem:[%s12612_s1 + $0x50] sm:$0xff] }
  0x1d   : > { %836 = vmatpush1.msra.mxu0 %v622_v25  ;;  %906 = vmatprep.subr.mxu1 %v687_v26  ;;  %v679_v42 = vld [vmem:[%s12612_s1 + $0x258] sm:$0xff]  ;;  %v613_v43 = vld [vmem:[%s12612_s1 + $0x48] sm:$0xff]  ;;  %v678_v44 = vld [vmem:[%s12612_s1 + $0x250] sm:$0xff] }
  0x1e   : > { %837 = vmatprep.subr.mxu0 %v621_v27  ;;  %907 = vmatpush1.msra.mxu1 %v686_v28  ;;  %v612_v45 = vld [vmem:[%s12612_s1 + $0x40] sm:$0xff]  ;;  %v677_v46 = vld [vmem:[%s12612_s1 + $0x248] sm:$0xff]  ;;  %v611_v47 = vld [vmem:[%s12612_s1 + $0x38] sm:$0xff] }
  0x1f   : > { %838 = vmatpush1.msra.mxu0 %v620_v29  ;;  %908 = vmatprep.subr.mxu1 %v685_v30  ;;  %v676_v48 = vld [vmem:[%s12612_s1 + $0x240] sm:$0xff]  ;;  %v610_v49 = vld [vmem:[%s12612_s1 + $0x30] sm:$0xff]  ;;  %v675_v50 = vld [vmem:[%s12612_s1 + $0x238] sm:$0xff] }
  0x20   : > { %839 = vmatprep.subr.mxu0 %v619_v31  ;;  %909 = vmatpush1.msra.mxu1 %v684_v32  ;;  %v609_v51 = vld [vmem:[%s12612_s1 + $0x28] sm:$0xff]  ;;  %v674_v52 = vld [vmem:[%s12612_s1 + $0x230] sm:$0xff]  ;;  %v608_v53 = vld [vmem:[%s12612_s1 + $0x20] sm:$0xff] }
  0x21   : > { %840 = vmatpush1.msra.mxu0 %v618_v33  ;;  %910 = vmatprep.subr.mxu1 %v683_v34  ;;  %v673_v54 = vld [vmem:[%s12612_s1 + $0x228] sm:$0xff]  ;;  %v607_v55 = vld [vmem:[%s12612_s1 + $0x18] sm:$0xff]  ;;  %v672_v56 = vld [vmem:[%s12612_s1 + $0x220] sm:$0xff] }
  0x22   : > { %841 = vmatprep.subr.mxu0 %v617_v35  ;;  %911 = vmatpush1.msra.mxu1 %v682_v36  ;;  %v606_v57 = vld [vmem:[%s12612_s1 + $0x10] sm:$0xff]  ;;  %v671_v58 = vld [vmem:[%s12612_s1 + $0x218] sm:$0xff]  ;;  %v605_v59 = vld [vmem:[%s12612_s1 + $0x8] sm:$0xff] }
  0x23   : > { %842 = vmatpush1.msra.mxu0 %v616_v37  ;;  %912 = vmatprep.subr.mxu1 %v681_v38  ;;  %v670_v60 = vld [vmem:[%s12612_s1 + $0x210] sm:$0xff]  ;;  %v604_v61 = vld [vmem:[%s12612_s1] sm:$0xff]  ;;  %v669_v62 = vld [vmem:[%s12612_s1 + $0x208] sm:$0xff] }
  0x24   : > { %843 = vmatprep.subr.mxu0 %v615_v39  ;;  %913 = vmatpush1.msra.mxu1 %v680_v40  ;;  %v667_v63 = vld [vmem:[%s12612_s1 + $0x1f8] sm:$0xff]  ;;  %v668_v0 = vld [vmem:[%s12612_s1 + $0x200] sm:$0xff]  ;;  %v666_v1 = vld [vmem:[%s12612_s1 + $0x1f0] sm:$0xff] }
  0x25   : > { %844 = vmatpush1.msra.mxu0 %v614_v41  ;;  %914 = vmatprep.subr.mxu1 %v679_v42  ;;  %v731_v2 = vld [vmem:[%s12612_s1 + $0x3f8] sm:$0xff]  ;;  %v665_v3 = vld [vmem:[%s12612_s1 + $0x1e8] sm:$0xff]  ;;  %v730_v4 = vld [vmem:[%s12612_s1 + $0x3f0] sm:$0xff] }
  0x26   : > { %845 = vmatprep.subr.mxu0 %v613_v43  ;;  %915 = vmatpush1.msra.mxu1 %v678_v44  ;;  %v664_v5 = vld [vmem:[%s12612_s1 + $0x1e0] sm:$0xff]  ;;  %v729_v6 = vld [vmem:[%s12612_s1 + $0x3e8] sm:$0xff]  ;;  %v663_v7 = vld [vmem:[%s12612_s1 + $0x1d8] sm:$0xff] }
  0x27   : > { %846 = vmatpush1.msra.mxu0 %v612_v45  ;;  %916 = vmatprep.subr.mxu1 %v677_v46  ;;  %v728_v8 = vld [vmem:[%s12612_s1 + $0x3e0] sm:$0xff]  ;;  %v662_v9 = vld [vmem:[%s12612_s1 + $0x1d0] sm:$0xff]  ;;  %v727_v10 = vld [vmem:[%s12612_s1 + $0x3d8] sm:$0xff] }
  0x28   : > { %847 = vmatprep.subr.mxu0 %v611_v47  ;;  %917 = vmatpush1.msra.mxu1 %v676_v48  ;;  %v661_v11 = vld [vmem:[%s12612_s1 + $0x1c8] sm:$0xff]  ;;  %v726_v12 = vld [vmem:[%s12612_s1 + $0x3d0] sm:$0xff]  ;;  %v660_v13 = vld [vmem:[%s12612_s1 + $0x1c0] sm:$0xff] }
  0x29   : > { %848 = vmatpush1.msra.mxu0 %v610_v49  ;;  %918 = vmatprep.subr.mxu1 %v675_v50  ;;  %v725_v14 = vld [vmem:[%s12612_s1 + $0x3c8] sm:$0xff]  ;;  %v659_v15 = vld [vmem:[%s12612_s1 + $0x1b8] sm:$0xff]  ;;  %v724_v16 = vld [vmem:[%s12612_s1 + $0x3c0] sm:$0xff] }
  0x2a   : > { %849 = vmatprep.subr.mxu0 %v609_v51  ;;  %919 = vmatpush1.msra.mxu1 %v674_v52  ;;  %v658_v17 = vld [vmem:[%s12612_s1 + $0x1b0] sm:$0xff]  ;;  %v723_v18 = vld [vmem:[%s12612_s1 + $0x3b8] sm:$0xff]  ;;  %v657_v19 = vld [vmem:[%s12612_s1 + $0x1a8] sm:$0xff] }
  0x2b   : > { %850 = vmatpush1.msra.mxu0 %v608_v53  ;;  %920 = vmatprep.subr.mxu1 %v673_v54  ;;  %v722_v20 = vld [vmem:[%s12612_s1 + $0x3b0] sm:$0xff]  ;;  %v656_v21 = vld [vmem:[%s12612_s1 + $0x1a0] sm:$0xff]  ;;  %v721_v22 = vld [vmem:[%s12612_s1 + $0x3a8] sm:$0xff] }
  0x2c   : > { %851 = vmatprep.subr.mxu0 %v607_v55  ;;  %921 = vmatpush1.msra.mxu1 %v672_v56  ;;  %v655_v23 = vld [vmem:[%s12612_s1 + $0x198] sm:$0xff]  ;;  %v720_v24 = vld [vmem:[%s12612_s1 + $0x3a0] sm:$0xff]  ;;  %v654_v25 = vld [vmem:[%s12612_s1 + $0x190] sm:$0xff] }
  0x2d   : > { %852 = vmatpush1.msra.mxu0 %v606_v57  ;;  %922 = vmatprep.subr.mxu1 %v671_v58  ;;  %v719_v26 = vld [vmem:[%s12612_s1 + $0x398] sm:$0xff]  ;;  %v653_v27 = vld [vmem:[%s12612_s1 + $0x188] sm:$0xff]  ;;  %v718_v28 = vld [vmem:[%s12612_s1 + $0x390] sm:$0xff] }
  0x2e   : > { %853 = vmatprep.subr.mxu0 %v605_v59  ;;  %923 = vmatpush1.msra.mxu1 %v670_v60  ;;  %v652_v29 = vld [vmem:[%s12612_s1 + $0x180] sm:$0xff]  ;;  %v717_v30 = vld [vmem:[%s12612_s1 + $0x388] sm:$0xff]  ;;  %v651_v31 = vld [vmem:[%s12612_s1 + $0x178] sm:$0xff] }
  0x2f   : > { %854 = vmatpush1.msra.mxu0 %v604_v61  ;;  %924 = vmatprep.subr.mxu1 %v669_v62  ;;  %v716_v32 = vld [vmem:[%s12612_s1 + $0x380] sm:$0xff]  ;;  %v650_v33 = vld [vmem:[%s12612_s1 + $0x170] sm:$0xff]  ;;  %v715_v34 = vld [vmem:[%s12612_s1 + $0x378] sm:$0xff] }
  0x30   : > { %855 = vmatprep.subr.mxu0 %v667_v63  ;;  %925 = vmatpush1.msra.mxu1 %v668_v0  ;;  %v649_v35 = vld [vmem:[%s12612_s1 + $0x168] sm:$0xff]  ;;  %v714_v36 = vld [vmem:[%s12612_s1 + $0x370] sm:$0xff]  ;;  %v648_v37 = vld [vmem:[%s12612_s1 + $0x160] sm:$0xff] }
  0x31   : > { %856 = vmatpush2.msra.mxu0 %v666_v1  ;;  %926 = vmatprep.subr.mxu1 %v731_v2  ;;  %v713_v38 = vld [vmem:[%s12612_s1 + $0x368] sm:$0xff]  ;;  %v647_v39 = vld [vmem:[%s12612_s1 + $0x158] sm:$0xff]  ;;  %v712_v40 = vld [vmem:[%s12612_s1 + $0x360] sm:$0xff] }
  0x32   : > { %857 = vmatprep.subr.mxu0 %v665_v3  ;;  %927 = vmatpush2.msra.mxu1 %v730_v4  ;;  %v646_v41 = vld [vmem:[%s12612_s1 + $0x150] sm:$0xff]  ;;  %v711_v42 = vld [vmem:[%s12612_s1 + $0x358] sm:$0xff]  ;;  %v645_v43 = vld [vmem:[%s12612_s1 + $0x148] sm:$0xff] }
  0x33   : > { %858 = vmatpush2.msra.mxu0 %v664_v5  ;;  %928 = vmatprep.subr.mxu1 %v729_v6  ;;  %v710_v44 = vld [vmem:[%s12612_s1 + $0x350] sm:$0xff]  ;;  %v644_v45 = vld [vmem:[%s12612_s1 + $0x140] sm:$0xff]  ;;  %v709_v46 = vld [vmem:[%s12612_s1 + $0x348] sm:$0xff] }
  0x34   : > { %859 = vmatprep.subr.mxu0 %v663_v7  ;;  %929 = vmatpush2.msra.mxu1 %v728_v8  ;;  %v643_v47 = vld [vmem:[%s12612_s1 + $0x138] sm:$0xff]  ;;  %v708_v48 = vld [vmem:[%s12612_s1 + $0x340] sm:$0xff]  ;;  %v642_v49 = vld [vmem:[%s12612_s1 + $0x130] sm:$0xff] }
  0x35   : > { %860 = vmatpush2.msra.mxu0 %v662_v9  ;;  %930 = vmatprep.subr.mxu1 %v727_v10  ;;  %v707_v50 = vld [vmem:[%s12612_s1 + $0x338] sm:$0xff]  ;;  %v641_v51 = vld [vmem:[%s12612_s1 + $0x128] sm:$0xff]  ;;  %v706_v52 = vld [vmem:[%s12612_s1 + $0x330] sm:$0xff] }
  0x36   : > { %861 = vmatprep.subr.mxu0 %v661_v11  ;;  %931 = vmatpush2.msra.mxu1 %v726_v12  ;;  %v601_v53 = vld [vmem:[%s7605_s0] sm:$0xff]  ;;  %v705_v55 = vld [vmem:[%s12612_s1 + $0x328] sm:$0xff]  ;;  %v639_v56 = vld [vmem:[%s12612_s1 + $0x118] sm:$0xff] }
  0x37   : > { %862 = vmatpush2.msra.mxu0 %v660_v13  ;;  %932 = vmatprep.subr.mxu1 %v725_v14  ;;  %v640_v54 = vld [vmem:[%s12612_s1 + $0x120] sm:$0xff]  ;;  %v638_v58 = vld [vmem:[%s12612_s1 + $0x110] sm:$0xff]  ;;  %v703_v59 = vld [vmem:[%s12612_s1 + $0x318] sm:$0xff]  ;;  %v811_v60 = vcombine.high %v601_v53, %v601_v53 }
  0x38   : > { %863 = vmatprep.subr.mxu0 %v659_v15  ;;  %933 = vmatpush2.msra.mxu1 %v724_v16  ;;  %v704_v57 = vld [vmem:[%s12612_s1 + $0x320] sm:$0xff]  ;;  %v637_v61 = vld [vmem:[%s12612_s1 + $0x108] sm:$0xff]  ;;  %v702_v0 = vld [vmem:[%s12612_s1 + $0x310] sm:$0xff] }
  0x39   : > { %864 = vmatpush2.msra.mxu0 %v658_v17  ;;  %934 = vmatprep.subr.mxu1 %v723_v18  ;;  %v602_v62 = vld [vmem:[%s7605_s0 + $0x8] sm:$0xff]  ;;  %v636_v63 = vld [vmem:[%s12612_s1 + $0x100] sm:$0xff]  ;;  %v763_v2 = vld [vmem:[%s12612_s1 + $0x4f8] sm:$0xff] }
  0x3a   : > { %865 = vmatprep.subr.mxu0 %v657_v19  ;;  %935 = vmatpush2.msra.mxu1 %v722_v20  ;;  %v701_v1 = vld [vmem:[%s12612_s1 + $0x308] sm:$0xff]  ;;  %v700_v3 = vld [vmem:[%s12612_s1 + $0x300] sm:$0xff]  ;;  %v812_v4 = vcombine.high %v602_v62, %v602_v62  ;;  %v762_v5 = vld [vmem:[%s12612_s1 + $0x4f0] sm:$0xff] }
  0x3b   : > { %866 = vmatpush2.msra.mxu0 %v656_v21  ;;  %936 = vmatprep.subr.mxu1 %v721_v22  ;;  %v7667_v6 = vld [vmem:[%s7605_s0 + $0x10] sm:$0xff]  ;;  %v761_v7 = vld [vmem:[%s12612_s1 + $0x4e8] sm:$0xff]  ;;  %v760_v9 = vld [vmem:[%s12612_s1 + $0x4e0] sm:$0xff]  ;;  %s12616_s0 = sld [smem:[#allocation7_spill]] }
  0x3c   : > { %867 = vmatprep.subr.mxu0 %v655_v23  ;;  %937 = vmatpush2.msra.mxu1 %v720_v24  ;;  %v813_v8 = vcombine.high %v7667_v6, %v7667_v6  ;;  %v759_v10 = vld [vmem:[%s12612_s1 + $0x4d8] sm:$0xff]  ;;  %v758_v11 = vld [vmem:[%s12612_s1 + $0x4d0] sm:$0xff]  ;;  %v757_v12 = vld [vmem:[%s12612_s1 + $0x4c8] sm:$0xff] }
  0x3d   : > { %868 = vmatpush2.msra.mxu0 %v654_v25  ;;  %938 = vmatprep.subr.mxu1 %v719_v26  ;;  %v756_v13 = vld [vmem:[%s12612_s1 + $0x4c0] sm:$0xff]  ;;  %v755_v14 = vld [vmem:[%s12612_s1 + $0x4b8] sm:$0xff]  ;;  %v754_v15 = vld [vmem:[%s12612_s1 + $0x4b0] sm:$0xff] }
  0x3e   : > { %869 = vmatprep.subr.mxu0 %v653_v27  ;;  %939 = vmatpush2.msra.mxu1 %v718_v28  ;;  %v753_v16 = vld [vmem:[%s12612_s1 + $0x4a8] sm:$0xff]  ;;  %v752_v17 = vld [vmem:[%s12612_s1 + $0x4a0] sm:$0xff]  ;;  %v751_v18 = vld [vmem:[%s12612_s1 + $0x498] sm:$0xff] }
  0x3f   : > { %870 = vmatpush2.msra.mxu0 %v652_v29  ;;  %940 = vmatprep.subr.mxu1 %v717_v30  ;;  %v750_v19 = vld [vmem:[%s12612_s1 + $0x490] sm:$0xff]  ;;  %v749_v20 = vld [vmem:[%s12612_s1 + $0x488] sm:$0xff]  ;;  %v748_v21 = vld [vmem:[%s12612_s1 + $0x480] sm:$0xff] }
  0x40   : > { %871 = vmatprep.subr.mxu0 %v651_v31  ;;  %941 = vmatpush2.msra.mxu1 %v716_v32  ;;  %v747_v22 = vld [vmem:[%s12612_s1 + $0x478] sm:$0xff]  ;;  %v746_v23 = vld [vmem:[%s12612_s1 + $0x470] sm:$0xff]  ;;  %v745_v24 = vld [vmem:[%s12612_s1 + $0x468] sm:$0xff] }
  0x41   : > { %872 = vmatpush2.msra.mxu0 %v650_v33  ;;  %942 = vmatprep.subr.mxu1 %v715_v34  ;;  %v744_v25 = vld [vmem:[%s12612_s1 + $0x460] sm:$0xff]  ;;  %v743_v26 = vld [vmem:[%s12612_s1 + $0x458] sm:$0xff]  ;;  %v742_v27 = vld [vmem:[%s12612_s1 + $0x450] sm:$0xff]  ;;  %s12617_s23 = smov %s12616_s0 }
  0x42   : > { %873 = vmatprep.subr.mxu0 %v649_v35  ;;  %943 = vmatpush2.msra.mxu1 %v714_v36  ;;  %v741_v28 = vld [vmem:[%s12612_s1 + $0x448] sm:$0xff]  ;;  %v740_v29 = vld [vmem:[%s12612_s1 + $0x440] sm:$0xff]  ;;  %v739_v30 = vld [vmem:[%s12612_s1 + $0x438] sm:$0xff] }
  0x43   : > { %874 = vmatpush2.msra.mxu0 %v648_v37  ;;  %944 = vmatprep.subr.mxu1 %v713_v38  ;;  %v738_v31 = vld [vmem:[%s12612_s1 + $0x430] sm:$0xff]  ;;  %v737_v32 = vld [vmem:[%s12612_s1 + $0x428] sm:$0xff]  ;;  %v736_v33 = vld [vmem:[%s12612_s1 + $0x420] sm:$0xff] }
  0x44   : > { %875 = vmatprep.subr.mxu0 %v647_v39  ;;  %945 = vmatpush2.msra.mxu1 %v712_v40  ;;  %v735_v34 = vld [vmem:[%s12612_s1 + $0x418] sm:$0xff]  ;;  %v734_v35 = vld [vmem:[%s12612_s1 + $0x410] sm:$0xff]  ;;  %v733_v36 = vld [vmem:[%s12612_s1 + $0x408] sm:$0xff] }
  0x45   : > { %876 = vmatpush2.msra.mxu0 %v646_v41  ;;  %946 = vmatprep.subr.mxu1 %v711_v42  ;;  %v732_v37 = vld [vmem:[%s12612_s1 + $0x400] sm:$0xff]  ;;  %v795_v38 = vld [vmem:[%s12612_s1 + $0x5f8] sm:$0xff]  ;;  %v794_v39 = vld [vmem:[%s12612_s1 + $0x5f0] sm:$0xff] }
  0x46   : > { %877 = vmatprep.subr.mxu0 %v645_v43  ;;  %947 = vmatpush2.msra.mxu1 %v710_v44  ;;  %v793_v40 = vld [vmem:[%s12612_s1 + $0x5e8] sm:$0xff]  ;;  %v792_v41 = vld [vmem:[%s12612_s1 + $0x5e0] sm:$0xff]  ;;  %v791_v42 = vld [vmem:[%s12612_s1 + $0x5d8] sm:$0xff] }
  0x47   : > { %878 = vmatpush2.msra.mxu0 %v644_v45  ;;  %948 = vmatprep.subr.mxu1 %v709_v46  ;;  %v790_v43 = vld [vmem:[%s12612_s1 + $0x5d0] sm:$0xff]  ;;  %v789_v44 = vld [vmem:[%s12612_s1 + $0x5c8] sm:$0xff]  ;;  %v788_v45 = vld [vmem:[%s12612_s1 + $0x5c0] sm:$0xff] }
  0x48   : > { %879 = vmatprep.subr.mxu0 %v643_v47  ;;  %949 = vmatpush2.msra.mxu1 %v708_v48  ;;  %v787_v46 = vld [vmem:[%s12612_s1 + $0x5b8] sm:$0xff]  ;;  %v786_v47 = vld [vmem:[%s12612_s1 + $0x5b0] sm:$0xff]  ;;  %v785_v48 = vld [vmem:[%s12612_s1 + $0x5a8] sm:$0xff] }
  0x49   : > { %880 = vmatpush2.msra.mxu0 %v642_v49  ;;  %950 = vmatprep.subr.mxu1 %v707_v50  ;;  %v784_v49 = vld [vmem:[%s12612_s1 + $0x5a0] sm:$0xff]  ;;  %v783_v50 = vld [vmem:[%s12612_s1 + $0x598] sm:$0xff] }
  0x4a   : > { %881 = vmatprep.subr.mxu0 %v641_v51  ;;  %951 = vmatpush2.msra.mxu1 %v706_v52  ;;  %v782_v51 = vld [vmem:[%s12612_s1 + $0x590] sm:$0xff]  ;;  %v781_v52 = vld [vmem:[%s12612_s1 + $0x588] sm:$0xff] }
  0x4b   : > { %882 = vmatpush2.msra.mxu0 %v640_v54  ;;  %952 = vmatprep.subr.mxu1 %v705_v55  ;;  %v779_v54 = vld [vmem:[%s12612_s1 + $0x578] sm:$0xff]  ;;  %v778_v55 = vld [vmem:[%s12612_s1 + $0x570] sm:$0xff] }
  0x4c   : > { %883 = vmatprep.subr.mxu0 %v639_v56  ;;  %953 = vmatpush2.msra.mxu1 %v704_v57  ;;  %v777_v56 = vld [vmem:[%s12612_s1 + $0x568] sm:$0xff]  ;;  %v776_v57 = vld [vmem:[%s12612_s1 + $0x560] sm:$0xff] }
  0x4d   : > { %884 = vmatpush2.msra.mxu0 %v638_v58  ;;  %954 = vmatprep.subr.mxu1 %v703_v59  ;;  %v775_v58 = vld [vmem:[%s12612_s1 + $0x558] sm:$0xff]  ;;  %v774_v59 = vld [vmem:[%s12612_s1 + $0x550] sm:$0xff] }
  0x4e   : > { %885 = vmatprep.subr.mxu0 %v637_v61  ;;  %887 = vmatprep.mubr.f32.mxu0 %v811_v60  ;;  %v773_v60 = vld [vmem:[%s12612_s1 + $0x548] sm:$0xff]  ;;  %v772_v61 = vld [vmem:[%s12612_s1 + $0x540] sm:$0xff] }
  0x4f   : > { %886 = vmatpush2.msra.mxu0 %v636_v63  ;;  %955 = vmatpush2.msra.mxu1 %v702_v0  ;;  %v770_v63 = vld [vmem:[%s12612_s1 + $0x530] sm:$0xff]  ;;  %v769_v0 = vld [vmem:[%s12612_s1 + $0x528] sm:$0xff] }
  0x50   : > { %888 = vmatmul.mubr.f32.vlgmr.msra.gmra.mxu0 %v601_v53  ;;  %956 = vmatprep.subr.mxu1 %v701_v1  ;;  %v780_v53 = vld [vmem:[%s12612_s1 + $0x580] sm:$0xff] }
  0x51   : > { %965 = vmatprep.subr.mxu0 %v763_v2  ;;  %957 = vmatpush2.msra.mxu1 %v700_v3  ;;  %v768_v1 = vld [vmem:[%s12612_s1 + $0x520] sm:$0xff]  ;;  %v767_v2 = vld [vmem:[%s12612_s1 + $0x518] sm:$0xff]  ;;  %v766_v3 = vld [vmem:[%s12612_s1 + $0x510] sm:$0xff] }
  0x52   : > { %958 = vmatprep.mubr.f32.mxu1 %v812_v4  ;;  %966 = vmatpush1.msra.mxu0 %v762_v5  ;;  %v765_v4 = vld [vmem:[%s12612_s1 + $0x508] sm:$0xff]  ;;  %v764_v5 = vld [vmem:[%s12612_s1 + $0x500] sm:$0xff] }
  0x53   : > { %959 = vmatmul.mubr.f32.vlgmr.msra.gmra.mxu1 %v602_v62  ;;  %967 = vmatprep.subr.mxu0 %v761_v7  ;;  %v771_v62 = vld [vmem:[%s12612_s1 + $0x538] sm:$0xff]  ;;  %v7144_v7 = vmov 0.0  }
  0x54   : > { %968 = vmatpush1.msra.mxu0 %v760_v9  ;;  %1029 = vmatprep.mubr.f32.mxu0 %v813_v8  ;;  %799 = vst [vmem:[#allocation2] sm:$0xff] %v7144_v7  ;;  %v802_v8 = vlaneseq  ;;  %v796_v9 = vld [vmem:[%s12615_s29] ss:$8 sm:$0x3]  ;;  %801 = vst.msk [vmem:[#allocation2 + $0x8] sm:$0xff] %vm800_vm0, %v7144_v7 }
  0x55   : > { %969 = vmatprep.subr.mxu0 %v759_v10  ;;  %v797_v10 = vld [vmem:[%s12615_s29] sm:$0x1e] }
  0x56   : > { %970 = vmatpush1.msra.mxu0 %v758_v11  ;;  %vm804_vm1 = vcmp.lt.s32.totalorder %v802_v8, 192  ;;  %v798_v11 = vld [vmem:[%s12615_s29 + $0x8] sm:$0x1e]  ;;  %vm6210_vm8 = vcmp.lt.s32.totalorder %v802_v8, 512 }
  0x57   : > { %971 = vmatprep.subr.mxu0 %v757_v12  ;;  %806 = vst.msk [vmem:[#allocation2] ss:$8 sm:$0x3] %vm804_vm1, %v796_v9  ;;  %v819_v12 = vrot.slane %v797_v10, 1  ;;  %v1156_v9 = vld [vmem:[%s12588_s5 + $0x1d0] sm:$0xff] }
  0x58   : > { %972 = vmatpush1.msra.mxu0 %v756_v13  ;;  %v820_v13 = vrot.slane %v798_v11, 1  ;;  %v1144_v10 = vld [vmem:[%s12588_s5 + $0x170] sm:$0xff]  ;;  %v1143_v11 = vld [vmem:[%s12588_s5 + $0x168] sm:$0xff] }
  0x59   : > { %973 = vmatprep.subr.mxu0 %v755_v14 }
  0x5a   : > { %974 = vmatpush1.msra.mxu0 %v754_v15 }
  0x5b   : > { %975 = vmatprep.subr.mxu0 %v753_v16 }
  0x5c   : > { %976 = vmatpush1.msra.mxu0 %v752_v17 }
  0x5d   : > { %977 = vmatprep.subr.mxu0 %v751_v18 }
  0x5e   : > { %978 = vmatpush1.msra.mxu0 %v750_v19 }
  0x5f   : > { %979 = vmatprep.subr.mxu0 %v749_v20 }
  0x60   : > { %980 = vmatpush1.msra.mxu0 %v748_v21 }
  0x61   : > { %981 = vmatprep.subr.mxu0 %v747_v22 }
  0x62   : > { %982 = vmatpush1.msra.mxu0 %v746_v23 }
  0x63   : > { %983 = vmatprep.subr.mxu0 %v745_v24 }
  0x64   : > { %984 = vmatpush1.msra.mxu0 %v744_v25 }
  0x65   : > { %985 = vmatprep.subr.mxu0 %v743_v26 }
  0x66   : > { %986 = vmatpush1.msra.mxu0 %v742_v27 }
  0x67   : > { %987 = vmatprep.subr.mxu0 %v741_v28 }
  0x68   : > { %988 = vmatpush1.msra.mxu0 %v740_v29 }
  0x69   : > { %989 = vmatprep.subr.mxu0 %v739_v30 }
  0x6a   : > { %990 = vmatpush1.msra.mxu0 %v738_v31  ;;  %v1234_v31 = vld [vmem:[%s12588_s5 + $0x440] sm:$0xff] }
  0x6b   : > { %991 = vmatprep.subr.mxu0 %v737_v32  ;;  %v1238_v32 = vld [vmem:[%s12588_s5 + $0x460] sm:$0xff]  ;;  %1367 = vmatprep.subr.mxu1 %v1234_v31  ;;  %v1116_v31 = vld [vmem:[%s12588_s5 + $0x90] sm:$0xff] }
  0x6c   : > { %992 = vmatpush1.msra.mxu0 %v736_v33  ;;  %v1233_v33 = vld [vmem:[%s12588_s5 + $0x438] sm:$0xff] }
  0x6d   : > { %993 = vmatprep.subr.mxu0 %v735_v34  ;;  %v1237_v34 = vld [vmem:[%s12588_s5 + $0x458] sm:$0xff]  ;;  %1368 = vmatpush1.msra.mxu1 %v1233_v33  ;;  %v1108_v33 = vld [vmem:[%s12588_s5 + $0x50] sm:$0xff] }
  0x6e   : > { %994 = vmatpush1.msra.mxu0 %v734_v35  ;;  %v1225_v35 = vld [vmem:[%s12588_s5 + $0x3f8] sm:$0xff] }
  0x6f   : > { %995 = vmatprep.subr.mxu0 %v733_v36  ;;  %v1229_v36 = vld [vmem:[%s12588_s5 + $0x418] sm:$0xff]  ;;  %1369 = vmatprep.subr.mxu1 %v1225_v35  ;;  %v1107_v35 = vld [vmem:[%s12588_s5 + $0x48] sm:$0xff] }
  0x70   : > { %996 = vmatpush1.msra.mxu0 %v732_v37  ;;  %v1224_v37 = vld [vmem:[%s12588_s5 + $0x3f0] sm:$0xff] }
  0x71   : > { %997 = vmatprep.subr.mxu0 %v795_v38  ;;  %v1228_v38 = vld [vmem:[%s12588_s5 + $0x410] sm:$0xff]  ;;  %1370 = vmatpush1.msra.mxu1 %v1224_v37  ;;  %v1099_v37 = vld [vmem:[%s12588_s5 + $0x8] sm:$0xff] }
  0x72   : > { %998 = vmatpush2.msra.mxu0 %v794_v39  ;;  %v1216_v39 = vld [vmem:[%s12588_s5 + $0x3b0] sm:$0xff] }
  0x73   : > { %999 = vmatprep.subr.mxu0 %v793_v40  ;;  %v1220_v40 = vld [vmem:[%s12588_s5 + $0x3d0] sm:$0xff]  ;;  %1371 = vmatprep.subr.mxu1 %v1216_v39  ;;  %v1098_v39 = vld [vmem:[%s12588_s5] sm:$0xff] }
  0x74   : > { %1000 = vmatpush2.msra.mxu0 %v792_v41  ;;  %v1215_v41 = vld [vmem:[%s12588_s5 + $0x3a8] sm:$0xff] }
  0x75   : > { %1001 = vmatprep.subr.mxu0 %v791_v42  ;;  %v1219_v42 = vld [vmem:[%s12588_s5 + $0x3c8] sm:$0xff]  ;;  %1372 = vmatpush1.msra.mxu1 %v1215_v41  ;;  %v1306_v41 = vld [vmem:[%s12588_s5 + $0x680] sm:$0xff] }
  0x76   : > { %1002 = vmatpush2.msra.mxu0 %v790_v43  ;;  %v1207_v43 = vld [vmem:[%s12588_s5 + $0x368] sm:$0xff] }
  0x77   : > { %1003 = vmatprep.subr.mxu0 %v789_v44  ;;  %v1211_v44 = vld [vmem:[%s12588_s5 + $0x388] sm:$0xff]  ;;  %1373 = vmatprep.subr.mxu1 %v1207_v43  ;;  %v1305_v43 = vld [vmem:[%s12588_s5 + $0x678] sm:$0xff] }
  0x78   : > { %1004 = vmatpush2.msra.mxu0 %v788_v45  ;;  %v1206_v45 = vld [vmem:[%s12588_s5 + $0x360] sm:$0xff] }
  0x79   : > { %1005 = vmatprep.subr.mxu0 %v787_v46  ;;  %v1210_v46 = vld [vmem:[%s12588_s5 + $0x380] sm:$0xff]  ;;  %1374 = vmatpush1.msra.mxu1 %v1206_v45  ;;  %v1297_v45 = vld [vmem:[%s12588_s5 + $0x638] sm:$0xff] }
  0x7a   : > { %1006 = vmatpush2.msra.mxu0 %v786_v47  ;;  %v1198_v47 = vld [vmem:[%s12588_s5 + $0x320] sm:$0xff] }
  0x7b   : > { %1007 = vmatprep.subr.mxu0 %v785_v48  ;;  %v1202_v48 = vld [vmem:[%s12588_s5 + $0x340] sm:$0xff]  ;;  %1375 = vmatprep.subr.mxu1 %v1198_v47  ;;  %v1296_v47 = vld [vmem:[%s12588_s5 + $0x630] sm:$0xff] }
  0x7c   : > { %1008 = vmatpush2.msra.mxu0 %v784_v49  ;;  %v1197_v49 = vld [vmem:[%s12588_s5 + $0x318] sm:$0xff] }
  0x7d   : > { %1009 = vmatprep.subr.mxu0 %v783_v50  ;;  %v1201_v50 = vld [vmem:[%s12588_s5 + $0x338] sm:$0xff]  ;;  %1376 = vmatpush1.msra.mxu1 %v1197_v49  ;;  %v1288_v49 = vld [vmem:[%s12588_s5 + $0x5f0] sm:$0xff] }
  0x7e   : > { %1010 = vmatpush2.msra.mxu0 %v782_v51  ;;  %v1189_v51 = vld [vmem:[%s12588_s5 + $0x2d8] sm:$0xff] }
  0x7f   : > { %1011 = vmatprep.subr.mxu0 %v781_v52  ;;  %v1193_v52 = vld [vmem:[%s12588_s5 + $0x2f8] sm:$0xff]  ;;  %1377 = vmatprep.subr.mxu1 %v1189_v51  ;;  %v1287_v51 = vld [vmem:[%s12588_s5 + $0x5e8] sm:$0xff] }
  0x80   : > { %1012 = vmatpush2.msra.mxu0 %v780_v53  ;;  %v1188_v53 = vld [vmem:[%s12588_s5 + $0x2d0] sm:$0xff] }
  0x81   : > { %1013 = vmatprep.subr.mxu0 %v779_v54  ;;  %v1192_v54 = vld [vmem:[%s12588_s5 + $0x2f0] sm:$0xff]  ;;  %1378 = vmatpush1.msra.mxu1 %v1188_v53  ;;  %v1279_v53 = vld [vmem:[%s12588_s5 + $0x5a8] sm:$0xff] }
  0x82   : > { %1014 = vmatpush2.msra.mxu0 %v778_v55  ;;  %v1180_v55 = vld [vmem:[%s12588_s5 + $0x290] sm:$0xff] }
  0x83   : > { %1015 = vmatprep.subr.mxu0 %v777_v56  ;;  %v1184_v56 = vld [vmem:[%s12588_s5 + $0x2b0] sm:$0xff]  ;;  %1379 = vmatprep.subr.mxu1 %v1180_v55  ;;  %v1278_v55 = vld [vmem:[%s12588_s5 + $0x5a0] sm:$0xff] }
  0x84   : > { %1016 = vmatpush2.msra.mxu0 %v776_v57  ;;  %v1179_v57 = vld [vmem:[%s12588_s5 + $0x288] sm:$0xff] }
  0x85   : > { %1017 = vmatprep.subr.mxu0 %v775_v58  ;;  %v1183_v58 = vld [vmem:[%s12588_s5 + $0x2a8] sm:$0xff]  ;;  %1380 = vmatpush1.msra.mxu1 %v1179_v57  ;;  %v1270_v57 = vld [vmem:[%s12588_s5 + $0x560] sm:$0xff] }
  0x86   : > { %1018 = vmatpush2.msra.mxu0 %v774_v59  ;;  %v1171_v59 = vld [vmem:[%s12588_s5 + $0x248] sm:$0xff] }
  0x87   : > { %1019 = vmatprep.subr.mxu0 %v773_v60  ;;  %v1175_v60 = vld [vmem:[%s12588_s5 + $0x268] sm:$0xff]  ;;  %1381 = vmatprep.subr.mxu1 %v1171_v59  ;;  %v1269_v59 = vld [vmem:[%s12588_s5 + $0x558] sm:$0xff] }
  0x88   : > { %1020 = vmatpush2.msra.mxu0 %v772_v61  ;;  %v1170_v61 = vld [vmem:[%s12588_s5 + $0x240] sm:$0xff] }
  0x89   : > { %1021 = vmatprep.subr.mxu0 %v771_v62  ;;  %v1174_v62 = vld [vmem:[%s12588_s5 + $0x260] sm:$0xff]  ;;  %1382 = vmatpush1.msra.mxu1 %v1170_v61  ;;  %v1261_v61 = vld [vmem:[%s12588_s5 + $0x518] sm:$0xff] }
  0x8a   : > { %1022 = vmatpush2.msra.mxu0 %v770_v63  ;;  %v1162_v63 = vld [vmem:[%s12588_s5 + $0x200] sm:$0xff] }
  0x8b   : > { %1023 = vmatprep.subr.mxu0 %v769_v0  ;;  %v1166_v0 = vld [vmem:[%s12588_s5 + $0x220] sm:$0xff]  ;;  %1383 = vmatprep.subr.mxu1 %v1162_v63  ;;  %v1260_v63 = vld [vmem:[%s12588_s5 + $0x510] sm:$0xff] }
  0x8c   : > { %1024 = vmatpush2.msra.mxu0 %v768_v1  ;;  %v1161_v1 = vld [vmem:[%s12588_s5 + $0x1f8] sm:$0xff] }
  0x8d   : > { %1025 = vmatprep.subr.mxu0 %v767_v2  ;;  %v1165_v2 = vld [vmem:[%s12588_s5 + $0x218] sm:$0xff]  ;;  %1384 = vmatpush1.msra.mxu1 %v1161_v1  ;;  %v1252_v1 = vld [vmem:[%s12588_s5 + $0x4d0] sm:$0xff] }
  0x8e   : > { %1026 = vmatpush2.msra.mxu0 %v766_v3  ;;  %v1153_v3 = vld [vmem:[%s12588_s5 + $0x1b8] sm:$0xff] }
  0x8f   : > { %1027 = vmatprep.subr.mxu0 %v765_v4  ;;  %v1157_v4 = vld [vmem:[%s12588_s5 + $0x1d8] sm:$0xff]  ;;  %1385 = vmatprep.subr.mxu1 %v1153_v3  ;;  %v1251_v3 = vld [vmem:[%s12588_s5 + $0x4c8] sm:$0xff] }
  0x90   : > { %1028 = vmatpush2.msra.mxu0 %v764_v5  ;;  %v1152_v5 = vld [vmem:[%s12588_s5 + $0x1b0] sm:$0xff] }
  0x91   : > { %1030 = vmatmul.mubr.f32.vlgmr.msra.gmra.mxu0 %v7667_v6  ;;  %1509 = vmatprep.subr.mxu0 %v1238_v32  ;;  %v1120_v32 = vld [vmem:[%s12588_s5 + $0xb0] sm:$0xff] }
  0x92   : > { %1510 = vmatpush1.msra.mxu0 %v1237_v34  ;;  %1386 = vmatpush1.msra.mxu1 %v1152_v5  ;;  %v1112_v34 = vld [vmem:[%s12588_s5 + $0x70] sm:$0xff]  ;;  %v1243_v5 = vld [vmem:[%s12588_s5 + $0x488] sm:$0xff] }
  0x93   : > { %1511 = vmatprep.subr.mxu0 %v1229_v36  ;;  %1387 = vmatprep.subr.mxu1 %v1144_v10  ;;  %v1111_v36 = vld [vmem:[%s12588_s5 + $0x68] sm:$0xff]  ;;  %v1242_v10 = vld [vmem:[%s12588_s5 + $0x480] sm:$0xff] }
  0x94   : > { %1512 = vmatpush1.msra.mxu0 %v1228_v38  ;;  %1388 = vmatpush1.msra.mxu1 %v1143_v11  ;;  %v1103_v38 = vld [vmem:[%s12588_s5 + $0x28] sm:$0xff]  ;;  %v1236_v11 = vld [vmem:[%s12588_s5 + $0x450] sm:$0xff] }
  0x95   : > { %1513 = vmatprep.subr.mxu0 %v1220_v40  ;;  %v1102_v40 = vld [vmem:[%s12588_s5 + $0x20] sm:$0xff] }
  0x96   : > { %1514 = vmatpush1.msra.mxu0 %v1219_v42  ;;  %v1310_v42 = vld [vmem:[%s12588_s5 + $0x6a0] sm:$0xff] }
  0x97   : > { %1515 = vmatprep.subr.mxu0 %v1211_v44  ;;  %v1309_v44 = vld [vmem:[%s12588_s5 + $0x698] sm:$0xff] }
  0x98   : > { %1516 = vmatpush1.msra.mxu0 %v1210_v46  ;;  %v1301_v46 = vld [vmem:[%s12588_s5 + $0x658] sm:$0xff] }
  0x99   : > { %1517 = vmatprep.subr.mxu0 %v1202_v48  ;;  %v1300_v48 = vld [vmem:[%s12588_s5 + $0x650] sm:$0xff] }
  0x9a   : > { %1518 = vmatpush1.msra.mxu0 %v1201_v50  ;;  %v1292_v50 = vld [vmem:[%s12588_s5 + $0x610] sm:$0xff] }
  0x9b   : > { %1519 = vmatprep.subr.mxu0 %v1193_v52  ;;  %v1291_v52 = vld [vmem:[%s12588_s5 + $0x608] sm:$0xff] }
  0x9c   : > { %1520 = vmatpush1.msra.mxu0 %v1192_v54  ;;  %v1283_v54 = vld [vmem:[%s12588_s5 + $0x5c8] sm:$0xff] }
  0x9d   : > { %1521 = vmatprep.subr.mxu0 %v1184_v56  ;;  %v1282_v56 = vld [vmem:[%s12588_s5 + $0x5c0] sm:$0xff] }
  0x9e   : > { %1522 = vmatpush1.msra.mxu0 %v1183_v58  ;;  %v1274_v58 = vld [vmem:[%s12588_s5 + $0x580] sm:$0xff] }
  0x9f   : > { %1523 = vmatprep.subr.mxu0 %v1175_v60  ;;  %v1273_v60 = vld [vmem:[%s12588_s5 + $0x578] sm:$0xff] }
  0xa0   : > { %1524 = vmatpush1.msra.mxu0 %v1174_v62  ;;  %v1265_v62 = vld [vmem:[%s12588_s5 + $0x538] sm:$0xff] }
  0xa1   : > { %1525 = vmatprep.subr.mxu0 %v1166_v0  ;;  %v1264_v0 = vld [vmem:[%s12588_s5 + $0x530] sm:$0xff] }
  0xa2   : > { %1526 = vmatpush1.msra.mxu0 %v1165_v2  ;;  %v1256_v2 = vld [vmem:[%s12588_s5 + $0x4f0] sm:$0xff] }
  0xa3   : > { %1527 = vmatprep.subr.mxu0 %v1157_v4  ;;  %v1255_v4 = vld [vmem:[%s12588_s5 + $0x4e8] sm:$0xff] }
  0xa4   : > { %1528 = vmatpush1.msra.mxu0 %v1156_v9  ;;  %v1247_v9 = vld [vmem:[%s12588_s5 + $0x4a8] sm:$0xff] }
 0x110   : > { %v889_v6 = vpop.f32.mrf.mxu0 }
 0x111   : > { %v890_v16 = vadd.f32 %v889_v6, %v819_v12  ;;  %v1148_v6 = vld [vmem:[%s12588_s5 + $0x190] sm:$0xff]  ;;  %v1147_v12 = vld [vmem:[%s12588_s5 + $0x188] sm:$0xff] }
 0x112   : > { %v891_v14 = vpop.f32.mrf.mxu0  ;;  %1529 = vmatprep.subr.mxu0 %v1148_v6  ;;  %v1246_v6 = vld [vmem:[%s12588_s5 + $0x4a0] sm:$0xff] }
 0x113   : > { %v960_v15 = vpop.f32.mrf.mxu1  ;;  %v892_v17 = vadd.f32 %v891_v14, %v820_v13  ;;  %v1135_v13 = vld [vmem:[%s12588_s5 + $0x128] sm:$0xff]  ;;  %1530 = vmatpush1.msra.mxu0 %v1147_v12 }
 0x114   : > { %v961_v19 = vadd.f32 %v960_v15, %v890_v16  ;;  %v1139_v14 = vld [vmem:[%s12588_s5 + $0x148] sm:$0xff]  ;;  %v1134_v15 = vld [vmem:[%s12588_s5 + $0x120] sm:$0xff]  ;;  %1389 = vmatprep.subr.mxu1 %v1135_v13 }
 0x115   : > { %v962_v18 = vpop.f32.mrf.mxu1  ;;  %v1138_v16 = vld [vmem:[%s12588_s5 + $0x140] sm:$0xff]  ;;  %1531 = vmatprep.subr.mxu0 %v1139_v14  ;;  %1390 = vmatpush1.msra.mxu1 %v1134_v15  ;;  %v8182_v15 = vshrl.u32 %v802_v8, 7 }
 0x116   : > { %v963_v21 = vadd.f32 %v962_v18, %v892_v17  ;;  %1532 = vmatpush1.msra.mxu0 %v1138_v16 }
 0x117   : > { %v8185_v16 = vsub.s32 0, %v8182_v15 }
 0x151   : > { %v1031_v20 = vpop.f32.mrf.mxu0 }
 0x152   : > { %v1032_v22 = vadd.f32 %v1031_v20, %v961_v19 }
 0x153   : > { %v1033_v23 = vpop.f32.mrf.mxu0 }
 0x154   : > { %v1038_v24 = vrot.slane %v1032_v22, 7  ;;  %v1034_v25 = vadd.f32 %v1033_v23, %v963_v21 }
 0x156   : > { %1042 = vst [vmem:[#allocation2] sm:$0x1e] %v1038_v24  ;;  %v1039_v26 = vrot.slane %v1034_v25, 7  ;;  %v1126_v25 = vld [vmem:[%s12588_s5 + $0xe0] sm:$0xff] }
 0x157   : > { %1391 = vmatprep.subr.mxu1 %v1126_v25 }
 0x158   : > { %1044 = vst.msk [vmem:[#allocation2 + $0x8] sm:$0x1e] %vm1043_vm2, %v1039_v26  ;;  %v1130_v26 = vld [vmem:[%s12588_s5 + $0x100] sm:$0xff] }
 0x159   : > { %1533 = vmatprep.subr.mxu0 %v1130_v26 }
 0x15d   : > { %v7873_v28 = vld [vmem:[#allocation2] sm:$0xff] }
 0x15f   : > { %v7871_v27 = vld [vmem:[#allocation2 + $0x8] sm:$0xff] }
 0x160   : > { %v1053_v29 = vsel %vm800_vm0, %v7871_v27, 0.0 }
 0x161   : > { %v1054_v30 = vadd.f32 %v1053_v29, %v7873_v28  ;;  %v1117_v29 = vld [vmem:[%s12588_s5 + $0x98] sm:$0xff] }
 0x163   : > { %1055 = vadd.xlane.f32.xlu0 %v1054_v30  ;;  %v1121_v30 = vld [vmem:[%s12588_s5 + $0xb8] sm:$0xff] }
 0x1ec   : > { %v1056_v17 = vpop.xlane.xlu0 %1055 }
 0x1ed   : > { %v1058_v18 = vmul.f32 0.0052083335, %v1056_v17  ;;  %v8188_v17 = vsub.s32 1, %v8182_v15 }
 0x1ef   : > { %v8023_v19 = vsub.f32 %v7873_v28, %v1058_v18  ;;  %v8026_v20 = vsub.f32 %v7871_v27, %v1058_v18  ;;  %v1125_v27 = vld [vmem:[%s12588_s5 + $0xd8] sm:$0xff]  ;;  %v1051_v18 = vld [vmem:[%s12616_s0] ss:$2 sm:$0x3] }
 0x1f0   : > { %v1129_v28 = vld [vmem:[%s12588_s5 + $0xf8] sm:$0xff]  ;;  %1392 = vmatpush1.msra.mxu1 %v1125_v27 }
 0x1f1   : > { %v1061_v21 = vmul.f32 %v8023_v19, %v8023_v19  ;;  %v1062_v22 = vmul.f32 %v8026_v20, %v8026_v20  ;;  %1534 = vmatpush1.msra.mxu0 %v1129_v28  ;;  %1393 = vmatprep.subr.mxu1 %v1117_v29 }
 0x1f2   : > { %1535 = vmatprep.subr.mxu0 %v1121_v30  ;;  %1394 = vmatpush1.msra.mxu1 %v1116_v31 }
 0x1f3   : > { %v1063_v23 = vsel %vm800_vm0, %v1062_v22, 0.0  ;;  %1536 = vmatpush1.msra.mxu0 %v1120_v32  ;;  %1395 = vmatprep.subr.mxu1 %v1108_v33  ;;  %v1080_v22 = vrot.slane %v1051_v18, %v8188_v17  ;;  %v1235_v33 = vld [vmem:[%s12588_s5 + $0x448] sm:$0xff] }
 0x1f4   : > { %v1064_v24 = vadd.f32 %v1063_v23, %v1061_v21  ;;  %1537 = vmatprep.subr.mxu0 %v1112_v34  ;;  %1396 = vmatpush1.msra.mxu1 %v1107_v35  ;;  %v1052_v21 = vld [vmem:[%s12587_s4] ss:$2 sm:$0x3]  ;;  %v1076_v23 = vrot.slane %v1051_v18, %v8185_v16  ;;  %v1232_v35 = vld [vmem:[%s12588_s5 + $0x430] sm:$0xff] }
 0x1f5   : > { %1538 = vmatpush1.msra.mxu0 %v1111_v36  ;;  %1397 = vmatprep.subr.mxu1 %v1099_v37  ;;  %v1093_v27 = vrot.slane %v1052_v21, %v8188_v17  ;;  %v1089_v28 = vrot.slane %v1052_v21, %v8185_v16  ;;  %v1226_v34 = vld [vmem:[%s12588_s5 + $0x400] sm:$0xff]  ;;  %v1217_v37 = vld [vmem:[%s12588_s5 + $0x3b8] sm:$0xff]  ;;  %v1308_v21 = vld [vmem:[%s12588_s5 + $0x690] sm:$0xff] }
 0x1f6   : > { %1065 = vadd.xlane.f32.xlu0 %v1064_v24  ;;  %1539 = vmatprep.subr.mxu0 %v1103_v38  ;;  %v1218_v36 = vld [vmem:[%s12588_s5 + $0x3c0] sm:$0xff]  ;;  %v1223_v38 = vld [vmem:[%s12588_s5 + $0x3e8] sm:$0xff] }
 0x1f7   : > { %1398 = vmatpush1.msra.mxu1 %v1098_v39  ;;  %1540 = vmatpush1.msra.mxu0 %v1102_v40  ;;  %v1209_v39 = vld [vmem:[%s12588_s5 + $0x378] sm:$0xff]  ;;  %v1208_v40 = vld [vmem:[%s12588_s5 + $0x370] sm:$0xff]  ;;  %v1106_v18 = vld [vmem:[%s12588_s5 + $0x40] sm:$0xff] }
 0x1f8   : > { %1415 = vmatprep.subr.mxu1 %v1306_v41  ;;  %1557 = vmatprep.subr.mxu0 %v1310_v42  ;;  %v1214_v41 = vld [vmem:[%s12588_s5 + $0x3a0] sm:$0xff]  ;;  %v1200_v42 = vld [vmem:[%s12588_s5 + $0x330] sm:$0xff] }
 0x1f9   : > { %1416 = vmatpush2.msra.mxu1 %v1305_v43  ;;  %1558 = vmatpush2.msra.mxu0 %v1309_v44  ;;  %v1199_v43 = vld [vmem:[%s12588_s5 + $0x328] sm:$0xff]  ;;  %v1205_v44 = vld [vmem:[%s12588_s5 + $0x358] sm:$0xff] }
 0x1fa   : > { %1417 = vmatprep.subr.mxu1 %v1297_v45  ;;  %1559 = vmatprep.subr.mxu0 %v1301_v46  ;;  %v1191_v45 = vld [vmem:[%s12588_s5 + $0x2e8] sm:$0xff]  ;;  %v1190_v46 = vld [vmem:[%s12588_s5 + $0x2e0] sm:$0xff] }
 0x1fb   : > { %1418 = vmatpush2.msra.mxu1 %v1296_v47  ;;  %1560 = vmatpush2.msra.mxu0 %v1300_v48  ;;  %v1196_v47 = vld [vmem:[%s12588_s5 + $0x310] sm:$0xff]  ;;  %v1182_v48 = vld [vmem:[%s12588_s5 + $0x2a0] sm:$0xff] }
 0x1fc   : > { %1419 = vmatprep.subr.mxu1 %v1288_v49  ;;  %1561 = vmatprep.subr.mxu0 %v1292_v50  ;;  %v1181_v49 = vld [vmem:[%s12588_s5 + $0x298] sm:$0xff]  ;;  %v1187_v50 = vld [vmem:[%s12588_s5 + $0x2c8] sm:$0xff] }
 0x1fd   : > { %1420 = vmatpush2.msra.mxu1 %v1287_v51  ;;  %1562 = vmatpush2.msra.mxu0 %v1291_v52  ;;  %v1173_v51 = vld [vmem:[%s12588_s5 + $0x258] sm:$0xff]  ;;  %v1172_v52 = vld [vmem:[%s12588_s5 + $0x250] sm:$0xff] }
 0x1fe   : > { %1421 = vmatprep.subr.mxu1 %v1279_v53  ;;  %1563 = vmatprep.subr.mxu0 %v1283_v54  ;;  %v1178_v53 = vld [vmem:[%s12588_s5 + $0x280] sm:$0xff]  ;;  %v1164_v54 = vld [vmem:[%s12588_s5 + $0x210] sm:$0xff] }
 0x1ff   : > { %1422 = vmatpush2.msra.mxu1 %v1278_v55  ;;  %1564 = vmatpush2.msra.mxu0 %v1282_v56  ;;  %v1163_v55 = vld [vmem:[%s12588_s5 + $0x208] sm:$0xff]  ;;  %v1169_v56 = vld [vmem:[%s12588_s5 + $0x238] sm:$0xff] }
 0x200   : > { %1423 = vmatprep.subr.mxu1 %v1270_v57  ;;  %1565 = vmatprep.subr.mxu0 %v1274_v58  ;;  %v1155_v57 = vld [vmem:[%s12588_s5 + $0x1c8] sm:$0xff]  ;;  %v1154_v58 = vld [vmem:[%s12588_s5 + $0x1c0] sm:$0xff] }
 0x201   : > { %1424 = vmatpush2.msra.mxu1 %v1269_v59  ;;  %1566 = vmatpush2.msra.mxu0 %v1273_v60  ;;  %v1160_v59 = vld [vmem:[%s12588_s5 + $0x1f0] sm:$0xff]  ;;  %v1146_v60 = vld [vmem:[%s12588_s5 + $0x180] sm:$0xff] }
 0x202   : > { %1425 = vmatprep.subr.mxu1 %v1261_v61  ;;  %1567 = vmatprep.subr.mxu0 %v1265_v62  ;;  %v1145_v61 = vld [vmem:[%s12588_s5 + $0x178] sm:$0xff]  ;;  %v1151_v62 = vld [vmem:[%s12588_s5 + $0x1a8] sm:$0xff] }
 0x203   : > { %1426 = vmatpush2.msra.mxu1 %v1260_v63  ;;  %1568 = vmatpush2.msra.mxu0 %v1264_v0  ;;  %v1137_v63 = vld [vmem:[%s12588_s5 + $0x138] sm:$0xff]  ;;  %v1136_v0 = vld [vmem:[%s12588_s5 + $0x130] sm:$0xff] }
 0x204   : > { %1427 = vmatprep.subr.mxu1 %v1252_v1  ;;  %1569 = vmatprep.subr.mxu0 %v1256_v2  ;;  %v1142_v1 = vld [vmem:[%s12588_s5 + $0x160] sm:$0xff]  ;;  %v1128_v2 = vld [vmem:[%s12588_s5 + $0xf0] sm:$0xff] }
 0x205   : > { %1428 = vmatpush2.msra.mxu1 %v1251_v3  ;;  %1570 = vmatpush2.msra.mxu0 %v1255_v4  ;;  %v1127_v3 = vld [vmem:[%s12588_s5 + $0xe8] sm:$0xff]  ;;  %v1133_v4 = vld [vmem:[%s12588_s5 + $0x118] sm:$0xff] }
 0x206   : > { %1429 = vmatprep.subr.mxu1 %v1243_v5  ;;  %1571 = vmatprep.subr.mxu0 %v1247_v9  ;;  %v1119_v5 = vld [vmem:[%s12588_s5 + $0xa8] sm:$0xff]  ;;  %v1118_v9 = vld [vmem:[%s12588_s5 + $0xa0] sm:$0xff] }
 0x207   : > { %1430 = vmatpush2.msra.mxu1 %v1242_v10  ;;  %1572 = vmatpush2.msra.mxu0 %v1246_v6  ;;  %v1124_v10 = vld [vmem:[%s12588_s5 + $0xd0] sm:$0xff]  ;;  %v1110_v6 = vld [vmem:[%s12588_s5 + $0x60] sm:$0xff] }
 0x208   : > { %1438 = vmatprep.subr.mxu1 %v1236_v11  ;;  %1651 = vmatprep.subr.mxu0 %v7144_v7  ;;  %v1109_v11 = vld [vmem:[%s12588_s5 + $0x58] sm:$0xff] }
 0x27f   : > { %v1066_v12 = vpop.xlane.xlu0 %1065 }
 0x280   : > { %v1067_v13 = vmul.f32 0.0052083335, %v1066_v12  ;;  %v1115_v12 = vld [vmem:[%s12588_s5 + $0x88] sm:$0xff] }
 0x282   : > { %v1068_v14 = vadd.f32 1e-06, %v1067_v13  ;;  %v1101_v13 = vld [vmem:[%s12588_s5 + $0x18] sm:$0xff] }
 0x284   : > { %7057 = vrsqrt.f32 %v1068_v14  ;;  %v1100_v14 = vld [vmem:[%s12588_s5 + $0x10] sm:$0xff] }
 0x291   : > { %v7058_v24 = vpop.eup %7057 }
 0x292   : > { %v1070_v25 = vmul.f32 %v7058_v24, %v8023_v19  ;;  %v1071_v26 = vmul.f32 %v7058_v24, %v8026_v20  ;;  %v1241_v19 = vld [vmem:[%s12588_s5 + $0x478] sm:$0xff]  ;;  %v1227_v20 = vld [vmem:[%s12588_s5 + $0x408] sm:$0xff] }
 0x293   : > { %v1299_v24 = vld [vmem:[%s12588_s5 + $0x648] sm:$0xff] }
 0x294   : > { %v1084_v29 = vmul.f32 %v1080_v22, %v1071_v26  ;;  %v1083_v30 = vmul.f32 %v1076_v23, %v1070_v25  ;;  %v1307_v22 = vld [vmem:[%s12588_s5 + $0x688] sm:$0xff]  ;;  %v1313_v23 = vld [vmem:[%s12588_s5 + $0x6b8] sm:$0xff]  ;;  %v1298_v25 = vld [vmem:[%s12588_s5 + $0x640] sm:$0xff] }
 0x295   : > { %v1304_v26 = vld [vmem:[%s12588_s5 + $0x670] sm:$0xff] }
 0x296   : > { %v8202_v31 = vadd.f32 %v1093_v27, %v1084_v29  ;;  %v8204_v32 = vadd.f32 %v1089_v28, %v1083_v30  ;;  %v1290_v27 = vld [vmem:[%s12588_s5 + $0x600] sm:$0xff]  ;;  %v1289_v28 = vld [vmem:[%s12588_s5 + $0x5f8] sm:$0xff]  ;;  %v1295_v29 = vld [vmem:[%s12588_s5 + $0x628] sm:$0xff] }
 0x297   : > { %v1281_v30 = vld [vmem:[%s12588_s5 + $0x5b8] sm:$0xff] }
 0x298   : > { %6274 = vmatprep.mubr.msk.f32.mxu1 %vm800_vm0, %v8202_v31  ;;  %6276 = vmatprep.mubr.msk.f32.mxu0 %vm800_vm0, %v8202_v31 }
 0x299   : > { %1432 = vmatmul.mubr.f32.vlgmr.msra.gmra.mxu1 %v8204_v32  ;;  %1574 = vmatmul.mubr.f32.vlgmr.msra.gmra.mxu0 %v8204_v32 }
 0x29a   : > { %1439 = vmatpush1.msra.mxu1 %v1235_v33  ;;  %1652 = vmatpush1.msra.mxu0 %v1241_v19  ;;  %v1280_v33 = vld [vmem:[%s12588_s5 + $0x5b0] sm:$0xff]  ;;  %v1286_v19 = vld [vmem:[%s12588_s5 + $0x5e0] sm:$0xff] }
 0x29b   : > { %1440 = vmatprep.subr.mxu1 %v1227_v20  ;;  %6275 = vmatprep.mubr.msk.f32.mxu1 %vm800_vm0, %v8202_v31  ;;  %v1272_v20 = vld [vmem:[%s12588_s5 + $0x570] sm:$0xff] }
 0x29c   : > { %1653 = vmatprep.subr.mxu0 %v7144_v7  ;;  %6278 = vmatprep.mubr.msk.f32.mxu0 %vm800_vm0, %v8202_v31 }
 0x29d   : > { %1441 = vmatpush1.msra.mxu1 %v1226_v34  ;;  %1654 = vmatpush1.msra.mxu0 %v1232_v35  ;;  %v1271_v34 = vld [vmem:[%s12588_s5 + $0x568] sm:$0xff]  ;;  %v1277_v35 = vld [vmem:[%s12588_s5 + $0x598] sm:$0xff] }
 0x29e   : > { %1442 = vmatprep.subr.mxu1 %v1218_v36  ;;  %1655 = vmatprep.subr.mxu0 %v7144_v7  ;;  %v1263_v36 = vld [vmem:[%s12588_s5 + $0x528] sm:$0xff] }
 0x29f   : > { %1443 = vmatpush1.msra.mxu1 %v1217_v37  ;;  %1656 = vmatpush1.msra.mxu0 %v1223_v38  ;;  %v1262_v37 = vld [vmem:[%s12588_s5 + $0x520] sm:$0xff]  ;;  %v1268_v38 = vld [vmem:[%s12588_s5 + $0x550] sm:$0xff] }
 0x2a0   : > { %1444 = vmatprep.subr.mxu1 %v1209_v39  ;;  %1657 = vmatprep.subr.mxu0 %v7144_v7  ;;  %v1254_v39 = vld [vmem:[%s12588_s5 + $0x4e0] sm:$0xff] }
 0x2a1   : > { %1445 = vmatpush1.msra.mxu1 %v1208_v40  ;;  %1658 = vmatpush1.msra.mxu0 %v1214_v41  ;;  %v1253_v40 = vld [vmem:[%s12588_s5 + $0x4d8] sm:$0xff]  ;;  %v1259_v41 = vld [vmem:[%s12588_s5 + $0x508] sm:$0xff] }
 0x2a2   : > { %1446 = vmatprep.subr.mxu1 %v1200_v42  ;;  %1659 = vmatprep.subr.mxu0 %v7144_v7  ;;  %v1245_v42 = vld [vmem:[%s12588_s5 + $0x498] sm:$0xff] }
 0x2a3   : > { %1447 = vmatpush1.msra.mxu1 %v1199_v43  ;;  %1660 = vmatpush1.msra.mxu0 %v1205_v44  ;;  %v1244_v43 = vld [vmem:[%s12588_s5 + $0x490] sm:$0xff]  ;;  %v1250_v44 = vld [vmem:[%s12588_s5 + $0x4c0] sm:$0xff] }
 0x2a4   : > { %1448 = vmatprep.subr.mxu1 %v1191_v45  ;;  %1661 = vmatprep.subr.mxu0 %v7144_v7  ;;  %v1240_v45 = vld [vmem:[%s12588_s5 + $0x470] sm:$0xff] }
 0x2a5   : > { %1449 = vmatpush1.msra.mxu1 %v1190_v46  ;;  %1662 = vmatpush1.msra.mxu0 %v1196_v47  ;;  %v1239_v46 = vld [vmem:[%s12588_s5 + $0x468] sm:$0xff] }
 0x2a6   : > { %1450 = vmatprep.subr.mxu1 %v1182_v48  ;;  %1663 = vmatprep.subr.mxu0 %v7144_v7  ;;  %v1231_v47 = vld [vmem:[%s12588_s5 + $0x428] sm:$0xff]  ;;  %v1230_v48 = vld [vmem:[%s12588_s5 + $0x420] sm:$0xff] }
 0x2a7   : > { %1451 = vmatpush1.msra.mxu1 %v1181_v49  ;;  %1664 = vmatpush1.msra.mxu0 %v1187_v50  ;;  %v1222_v49 = vld [vmem:[%s12588_s5 + $0x3e0] sm:$0xff]  ;;  %v1221_v50 = vld [vmem:[%s12588_s5 + $0x3d8] sm:$0xff] }
 0x2a8   : > { %1452 = vmatprep.subr.mxu1 %v1173_v51  ;;  %1665 = vmatprep.subr.mxu0 %v7144_v7  ;;  %v1213_v51 = vld [vmem:[%s12588_s5 + $0x398] sm:$0xff] }
 0x2a9   : > { %1453 = vmatpush1.msra.mxu1 %v1172_v52  ;;  %1666 = vmatpush1.msra.mxu0 %v1178_v53  ;;  %v1212_v52 = vld [vmem:[%s12588_s5 + $0x390] sm:$0xff]  ;;  %v1203_v53 = vld [vmem:[%s12588_s5 + $0x348] sm:$0xff] }
 0x2aa   : > { %1454 = vmatprep.subr.mxu1 %v1164_v54  ;;  %1667 = vmatprep.subr.mxu0 %v7144_v7  ;;  %v1195_v54 = vld [vmem:[%s12588_s5 + $0x308] sm:$0xff] }
 0x2ab   : > { %1455 = vmatpush1.msra.mxu1 %v1163_v55  ;;  %1668 = vmatpush1.msra.mxu0 %v1169_v56  ;;  %v1194_v55 = vld [vmem:[%s12588_s5 + $0x300] sm:$0xff] }
 0x2ac   : > { %1456 = vmatprep.subr.mxu1 %v1155_v57  ;;  %1669 = vmatprep.subr.mxu0 %v7144_v7  ;;  %v1186_v56 = vld [vmem:[%s12588_s5 + $0x2c0] sm:$0xff]  ;;  %v1185_v57 = vld [vmem:[%s12588_s5 + $0x2b8] sm:$0xff] }
 0x2ad   : > { %1457 = vmatpush1.msra.mxu1 %v1154_v58  ;;  %1670 = vmatpush1.msra.mxu0 %v1160_v59  ;;  %v1177_v58 = vld [vmem:[%s12588_s5 + $0x278] sm:$0xff]  ;;  %v1176_v59 = vld [vmem:[%s12588_s5 + $0x270] sm:$0xff] }
 0x2ae   : > { %1458 = vmatprep.subr.mxu1 %v1146_v60  ;;  %1671 = vmatprep.subr.mxu0 %v7144_v7  ;;  %v1168_v60 = vld [vmem:[%s12588_s5 + $0x230] sm:$0xff] }
 0x2af   : > { %1459 = vmatpush1.msra.mxu1 %v1145_v61  ;;  %1672 = vmatpush1.msra.mxu0 %v1151_v62  ;;  %v1167_v61 = vld [vmem:[%s12588_s5 + $0x228] sm:$0xff] }
 0x2b0   : > { %1460 = vmatprep.subr.mxu1 %v1137_v63  ;;  %1673 = vmatprep.subr.mxu0 %v7144_v7  ;;  %v1159_v62 = vld [vmem:[%s12588_s5 + $0x1e8] sm:$0xff]  ;;  %v1158_v63 = vld [vmem:[%s12588_s5 + $0x1e0] sm:$0xff] }
 0x2b1   : > { %1461 = vmatpush1.msra.mxu1 %v1136_v0  ;;  %1674 = vmatpush1.msra.mxu0 %v1142_v1  ;;  %v1150_v0 = vld [vmem:[%s12588_s5 + $0x1a0] sm:$0xff]  ;;  %v1149_v1 = vld [vmem:[%s12588_s5 + $0x198] sm:$0xff] }
 0x2b2   : > { %1462 = vmatprep.subr.mxu1 %v1128_v2  ;;  %1675 = vmatprep.subr.mxu0 %v7144_v7  ;;  %v1141_v2 = vld [vmem:[%s12588_s5 + $0x158] sm:$0xff] }
 0x2b3   : > { %1463 = vmatpush1.msra.mxu1 %v1127_v3  ;;  %1676 = vmatpush1.msra.mxu0 %v1133_v4  ;;  %v1140_v3 = vld [vmem:[%s12588_s5 + $0x150] sm:$0xff] }
 0x2b4   : > { %1464 = vmatprep.subr.mxu1 %v1119_v5  ;;  %1677 = vmatprep.subr.mxu0 %v7144_v7  ;;  %v1132_v4 = vld [vmem:[%s12588_s5 + $0x110] sm:$0xff]  ;;  %v1131_v5 = vld [vmem:[%s12588_s5 + $0x108] sm:$0xff] }
 0x2b5   : > { %1465 = vmatpush1.msra.mxu1 %v1118_v9  ;;  %1678 = vmatpush1.msra.mxu0 %v1124_v10  ;;  %v1123_v9 = vld [vmem:[%s12588_s5 + $0xc8] sm:$0xff]  ;;  %v1122_v10 = vld [vmem:[%s12588_s5 + $0xc0] sm:$0xff] }
 0x2b6   : > { %1466 = vmatprep.subr.mxu1 %v1110_v6  ;;  %1679 = vmatprep.subr.mxu0 %v7144_v7  ;;  %v1114_v6 = vld [vmem:[%s12588_s5 + $0x80] sm:$0xff] }
 0x2b7   : > { %1467 = vmatpush1.msra.mxu1 %v1109_v11  ;;  %1680 = vmatpush1.msra.mxu0 %v1115_v12  ;;  %v1113_v11 = vld [vmem:[%s12588_s5 + $0x78] sm:$0xff] }
 0x2b8   : > { %1468 = vmatprep.subr.mxu1 %v1101_v13  ;;  %1681 = vmatprep.subr.mxu0 %v7144_v7  ;;  %v1105_v12 = vld [vmem:[%s12588_s5 + $0x38] sm:$0xff]  ;;  %v1104_v13 = vld [vmem:[%s12588_s5 + $0x30] sm:$0xff] }
 0x2b9   : > { %1469 = vmatpush1.msra.mxu1 %v1100_v14  ;;  %1682 = vmatpush1.msra.mxu0 %v1106_v18  ;;  %v1312_v14 = vld [vmem:[%s12588_s5 + $0x6b0] sm:$0xff]  ;;  %v1311_v18 = vld [vmem:[%s12588_s5 + $0x6a8] sm:$0xff] }
 0x2ba   : > { %1486 = vmatprep.subr.mxu1 %v1308_v21  ;;  %1699 = vmatprep.subr.mxu0 %v7144_v7  ;;  %v1303_v21 = vld [vmem:[%s12588_s5 + $0x668] sm:$0xff] }
 0x2bb   : > { %1487 = vmatpush2.msra.mxu1 %v1307_v22  ;;  %1700 = vmatpush2.msra.mxu0 %v1313_v23  ;;  %v1302_v22 = vld [vmem:[%s12588_s5 + $0x660] sm:$0xff] }
 0x2bc   : > { %1488 = vmatprep.subr.mxu1 %v1299_v24  ;;  %1701 = vmatprep.subr.mxu0 %v7144_v7  ;;  %v1294_v23 = vld [vmem:[%s12588_s5 + $0x620] sm:$0xff]  ;;  %v1293_v24 = vld [vmem:[%s12588_s5 + $0x618] sm:$0xff] }
 0x2bd   : > { %1489 = vmatpush2.msra.mxu1 %v1298_v25  ;;  %1702 = vmatpush2.msra.mxu0 %v1304_v26  ;;  %v1285_v25 = vld [vmem:[%s12588_s5 + $0x5d8] sm:$0xff]  ;;  %v1284_v26 = vld [vmem:[%s12588_s5 + $0x5d0] sm:$0xff] }
 0x2be   : > { %1490 = vmatprep.subr.mxu1 %v1290_v27  ;;  %1703 = vmatprep.subr.mxu0 %v7144_v7  ;;  %v1276_v27 = vld [vmem:[%s12588_s5 + $0x590] sm:$0xff] }
 0x2bf   : > { %1491 = vmatpush2.msra.mxu1 %v1289_v28  ;;  %1704 = vmatpush2.msra.mxu0 %v1295_v29  ;;  %v1275_v28 = vld [vmem:[%s12588_s5 + $0x588] sm:$0xff] }
 0x2c0   : > { %1492 = vmatprep.subr.mxu1 %v1281_v30  ;;  %1705 = vmatprep.subr.mxu0 %v7144_v7  ;;  %v1267_v29 = vld [vmem:[%s12588_s5 + $0x548] sm:$0xff]  ;;  %v1266_v30 = vld [vmem:[%s12588_s5 + $0x540] sm:$0xff] }
 0x2c1   : > { %1493 = vmatpush2.msra.mxu1 %v1280_v33  ;;  %1706 = vmatpush2.msra.mxu0 %v1286_v19  ;;  %v1258_v33 = vld [vmem:[%s12588_s5 + $0x500] sm:$0xff]  ;;  %v1257_v19 = vld [vmem:[%s12588_s5 + $0x4f8] sm:$0xff] }
 0x2c2   : > { %1494 = vmatprep.subr.mxu1 %v1272_v20  ;;  %1707 = vmatprep.subr.mxu0 %v7144_v7  ;;  %v1249_v20 = vld [vmem:[%s12588_s5 + $0x4b8] sm:$0xff] }
 0x2c3   : > { %1495 = vmatpush2.msra.mxu1 %v1271_v34  ;;  %1708 = vmatpush2.msra.mxu0 %v1277_v35  ;;  %v1248_v34 = vld [vmem:[%s12588_s5 + $0x4b0] sm:$0xff]  ;;  %v8608_v35 = vsub.s32 4, %v8182_v15 }
 0x2c4   : > { %1496 = vmatprep.subr.mxu1 %v1263_v36  ;;  %1709 = vmatprep.subr.mxu0 %v7144_v7  ;;  %v8613_v36 = vld [vmem:[%s12589_s6] ss:$2 sm:$0xff] }
 0x2c5   : > { %1497 = vmatpush2.msra.mxu1 %v1262_v37  ;;  %1710 = vmatpush2.msra.mxu0 %v1268_v38  ;;  %v1338_v37 = vrot.slane %v8613_v36, %v8608_v35  ;;  %v1322_v38 = vrot.slane %v8613_v36, %v8185_v16 }
 0x2c6   : > { %1498 = vmatprep.subr.mxu1 %v1254_v39  ;;  %1711 = vmatprep.subr.mxu0 %v7144_v7 }
 0x2c7   : > { %1499 = vmatpush2.msra.mxu1 %v1253_v40  ;;  %1712 = vmatpush2.msra.mxu0 %v1259_v41 }
 0x2c8   : > { %1500 = vmatprep.subr.mxu1 %v1245_v42  ;;  %1713 = vmatprep.subr.mxu0 %v7144_v7 }
 0x2c9   : > { %1501 = vmatpush2.msra.mxu1 %v1244_v43  ;;  %1714 = vmatpush2.msra.mxu0 %v1250_v44 }
 0x2ca   : > { %1503 = vmatmul.mubr.f32.vlgmr.msra.gmra.mxu1 %v8204_v32  ;;  %1580 = vmatprep.subr.mxu1 %v1240_v45 }
 0x2cb   : > { %1716 = vmatmul.mubr.f32.vlgmr.msra.gmra.mxu0 %v8204_v32  ;;  %1581 = vmatpush1.msra.mxu1 %v1239_v46  ;;  %v8626_v46 = vsub.s32 2, %v8182_v15 }
 0x2cc   : > { %6277 = vmatprep.mubr.msk.f32.mxu1 %vm800_vm0, %v8202_v31  ;;  %1582 = vmatprep.subr.mxu1 %v1231_v47  ;;  %v1204_v31 = vld [vmem:[%s12588_s5 + $0x350] sm:$0xff]  ;;  %v8629_v47 = vsub.s32 3, %v8182_v15 }
 0x2cd   : > { %1583 = vmatpush1.msra.mxu1 %v1230_v48  ;;  %6981 = vmatprep.subr.mxu0 %v7144_v7  ;;  %v1330_v48 = vrot.slane %v8613_v36, %v8626_v46 }
 0x2ce   : > { %1584 = vmatprep.subr.mxu1 %v1222_v49  ;;  %6983 = vmatprep.mubr.msk.f32.mxu0 %vm7145_vm3, %v7144_v7  ;;  %v8634_v49 = vsub.s32 5, %v8182_v15 }
 0x2cf   : > { %1585 = vmatpush1.msra.mxu1 %v1221_v50 }
 0x2d0   : > { %1586 = vmatprep.subr.mxu1 %v1213_v51  ;;  %v1334_v51 = vrot.slane %v8613_v36, %v8629_v47 }
 0x2d1   : > { %1587 = vmatpush1.msra.mxu1 %v1212_v52 }
 0x2d2   : > { %1588 = vmatprep.subr.mxu1 %v1204_v31 }
 0x2d3   : > { %1589 = vmatpush1.msra.mxu1 %v1203_v53 }
 0x2d4   : > { %1590 = vmatprep.subr.mxu1 %v1195_v54  ;;  %v1342_v54 = vrot.slane %v8613_v36, %v8634_v49 }
 0x2d5   : > { %1591 = vmatpush1.msra.mxu1 %v1194_v55 }
 0x2d6   : > { %1592 = vmatprep.subr.mxu1 %v1186_v56 }
 0x2d7   : > { %1593 = vmatpush1.msra.mxu1 %v1185_v57 }
 0x2d8   : > { %1594 = vmatprep.subr.mxu1 %v1177_v58 }
 0x2d9   : > { %1595 = vmatpush1.msra.mxu1 %v1176_v59 }
 0x2da   : > { %1596 = vmatprep.subr.mxu1 %v1168_v60  ;;  %v1046_v60 = vand.u32 127, %v802_v8 }
 0x2db   : > { %1597 = vmatpush1.msra.mxu1 %v1167_v61  ;;  %v7146_v61 = vmov -1e+30  }
 0x2dc   : > { %1598 = vmatprep.subr.mxu1 %v1159_v62  ;;  %vm1047_vm4 = vcmp.lt.s32.totalorder %v1046_v60, 5  ;;  %v1766_v60 = vld [vmem:[%s12590_s7 + $0x168] sm:$0xff] }
 0x2dd   : > { %1599 = vmatpush1.msra.mxu1 %v1158_v63  ;;  %v8646_v62 = vsel %vm1047_vm4, 0.0, %v7146_v61  ;;  %v1765_v61 = vld [vmem:[%s12590_s7 + $0x160] sm:$0xff] }
 0x2de   : > { %1600 = vmatprep.subr.mxu1 %v1150_v0 }
 0x2df   : > { %1601 = vmatpush1.msra.mxu1 %v1149_v1 }
 0x2e0   : > { %1602 = vmatprep.subr.mxu1 %v1141_v2 }
 0x2e1   : > { %1603 = vmatpush1.msra.mxu1 %v1140_v3 }
 0x2e2   : > { %1604 = vmatprep.subr.mxu1 %v1132_v4 }
 0x2e3   : > { %1605 = vmatpush1.msra.mxu1 %v1131_v5 }
 0x2e4   : > { %1606 = vmatprep.subr.mxu1 %v1123_v9 }
 0x2e5   : > { %1607 = vmatpush1.msra.mxu1 %v1122_v10 }
 0x2e6   : > { %1608 = vmatprep.subr.mxu1 %v1114_v6 }
 0x2e7   : > { %1609 = vmatpush1.msra.mxu1 %v1113_v11 }
 0x2e8   : > { %1610 = vmatprep.subr.mxu1 %v1105_v12 }
 0x2e9   : > { %1611 = vmatpush1.msra.mxu1 %v1104_v13 }
 0x2ea   : > { %1628 = vmatprep.subr.mxu1 %v1312_v14 }
 0x2eb   : > { %1629 = vmatpush2.msra.mxu1 %v1311_v18 }
 0x2ec   : > { %1630 = vmatprep.subr.mxu1 %v1303_v21 }
 0x2ed   : > { %1631 = vmatpush2.msra.mxu1 %v1302_v22 }
 0x2ee   : > { %1632 = vmatprep.subr.mxu1 %v1294_v23 }
 0x2ef   : > { %1633 = vmatpush2.msra.mxu1 %v1293_v24 }
 0x2f0   : > { %1634 = vmatprep.subr.mxu1 %v1285_v25 }
 0x2f1   : > { %1635 = vmatpush2.msra.mxu1 %v1284_v26 }
 0x2f2   : > { %1636 = vmatprep.subr.mxu1 %v1276_v27  ;;  %v1345_v27 = vsub.s32 6, %v8182_v15 }
 0x2f3   : > { %1637 = vmatpush2.msra.mxu1 %v1275_v28  ;;  %v1349_v28 = vsub.s32 7, %v8182_v15 }
 0x2f4   : > { %1638 = vmatprep.subr.mxu1 %v1267_v29  ;;  %v1346_v29 = vrot.slane %v8613_v36, %v1345_v27 }
 0x2f5   : > { %1639 = vmatpush2.msra.mxu1 %v1266_v30  ;;  %v1350_v30 = vrot.slane %v8613_v36, %v1349_v28 }
 0x2f6   : > { %1640 = vmatprep.subr.mxu1 %v1258_v33 }
 0x2f7   : > { %1641 = vmatpush2.msra.mxu1 %v1257_v19 }
 0x2f8   : > { %1642 = vmatprep.subr.mxu1 %v1249_v20 }
 0x2f9   : > { %1643 = vmatpush2.msra.mxu1 %v1248_v34 }
 0x2fa   : > { %1645 = vmatmul.mubr.f32.vlgmr.msra.gmra.mxu1 %v8204_v32  ;;  %6991 = vmatprep.subr.mxu1 %v7144_v7  ;;  %v1326_v32 = vrot.slane %v8613_v36, %v8188_v17  ;;  %v1784_v36 = vld [vmem:[%s12590_s7 + $0x1f8] sm:$0xff] }
 0x2fb   : > { %6993 = vmatprep.mubr.msk.f32.mxu1 %vm7145_vm3, %v7144_v7 }
 0x359   : > { %v1433_v39 = vpop.f32.mrf.mxu1  ;;  %v1575_v40 = vpop.f32.mrf.mxu0 }
 0x35a   : > { %v1576_v41 = vadd.f32 %v1575_v40, %v1338_v37  ;;  %v1434_v42 = vadd.f32 %v1433_v39, %v1322_v38  ;;  %v1783_v40 = vld [vmem:[%s12590_s7 + $0x1f0] sm:$0xff] }
 0x35b   : > { %v1435_v43 = vpop.f32.mrf.mxu1  ;;  %v1577_v50 = vpop.f32.mrf.mxu0 }
 0x35c   : > { %v1436_v44 = vadd.f32 %v1435_v43, %v1326_v32  ;;  %6992 = vmatpush3.xpose.msra.mxu1 %v1576_v41  ;;  %v1817_v45 = vmul.f32 0.125, %v1434_v42  ;;  %v1578_v59 = vadd.f32 %v1577_v50, %v1342_v54  ;;  %v1782_v41 = vld [vmem:[%s12590_s7 + $0x1e8] sm:$0xff]  ;;  %v1781_v42 = vld [vmem:[%s12590_s7 + $0x1e0] sm:$0xff]  ;;  %v1780_v43 = vld [vmem:[%s12590_s7 + $0x1d8] sm:$0xff] }
 0x35d   : > { %6996 = vmatprep.subr.mxu1 %v7144_v7  ;;  %v1776_v50 = vld [vmem:[%s12590_s7 + $0x1b8] sm:$0xff] }
 0x35e   : > { %6982 = vmatpush3.xpose.msra.mxu0 %v1436_v44  ;;  %v1779_v44 = vld [vmem:[%s12590_s7 + $0x1d0] sm:$0xff]  ;;  %v1772_v54 = vld [vmem:[%s12590_s7 + $0x198] sm:$0xff] }
 0x35f   : > { %6986 = vmatprep.subr.mxu0 %v7144_v7 }
 0x361   : > { %6984 = vmatmul.mubr.f32.vlgmr.msra.gmra.mxu0 %v1817_v45  ;;  %v1778_v45 = vld [vmem:[%s12590_s7 + $0x1c8] sm:$0xff] }
 0x362   : > { %6988 = vmatprep.mubr.msk.f32.mxu0 %vm7145_vm3, %v7144_v7 }
 0x38a   : > { %v1504_v52 = vpop.f32.mrf.mxu1 }
 0x38b   : > { %v1505_v31 = vadd.f32 %v1504_v52, %v1330_v48  ;;  %v8638_v53 = vpop.f32.mrf.mxu0  ;;  %v1777_v48 = vld [vmem:[%s12590_s7 + $0x1c0] sm:$0xff]  ;;  %v1774_v52 = vld [vmem:[%s12590_s7 + $0x1a8] sm:$0xff] }
 0x38c   : > { %v1506_v55 = vpop.f32.mrf.mxu1 }
 0x38d   : > { %v1507_v56 = vadd.f32 %v1506_v55, %v1334_v51  ;;  %v1719_v57 = vpop.f32.mrf.mxu0  ;;  %6987 = vmatpush3.msra.mxu0 %v1505_v31  ;;  %v1775_v51 = vld [vmem:[%s12590_s7 + $0x1b0] sm:$0xff]  ;;  %v1773_v31 = vld [vmem:[%s12590_s7 + $0x1a0] sm:$0xff] }
 0x38e   : > { %7001 = vmatprep.subr.mxu0 %v7144_v7  ;;  %v1771_v55 = vld [vmem:[%s12590_s7 + $0x190] sm:$0xff]  ;;  %v1769_v57 = vld [vmem:[%s12590_s7 + $0x180] sm:$0xff] }
 0x38f   : > { %v1973_v58 = vmul.f32 0.125, %v1507_v56  ;;  %v1770_v56 = vld [vmem:[%s12590_s7 + $0x188] sm:$0xff] }
 0x391   : > { %6994 = vmatmul.mubr.f32.vlgmr.msra.gmra.mxu1 %v1973_v58  ;;  %v1768_v58 = vld [vmem:[%s12590_s7 + $0x178] sm:$0xff] }
 0x392   : > { %6997 = vmatpush3.msra.mxu1 %v1578_v59  ;;  %6998 = vmatprep.mubr.msk.f32.mxu1 %vm7145_vm3, %v7144_v7  ;;  %v1767_v59 = vld [vmem:[%s12590_s7 + $0x170] sm:$0xff] }
 0x393   : > { %2128 = vmatprep.subr.mxu1 %v1784_v36  ;;  %v1741_v36 = vld [vmem:[%s12590_s7 + $0xa0] sm:$0xff] }
 0x3ba   : > { %v1646_v3 = vpop.f32.mrf.mxu1 }
 0x3bb   : > { %v1647_v19 = vadd.f32 %v1646_v3, %v1346_v29  ;;  %v1760_v3 = vld [vmem:[%s12590_s7 + $0x138] sm:$0xff]  ;;  %v1750_v29 = vld [vmem:[%s12590_s7 + $0xe8] sm:$0xff] }
 0x3bc   : > { %v1648_v4 = vpop.f32.mrf.mxu1 }
 0x3bd   : > { %v1649_v34 = vadd.f32 %v1648_v4, %v1350_v30  ;;  %v2270_v37 = vmul.f32 0.125, %v1647_v19  ;;  %v1759_v4 = vld [vmem:[%s12590_s7 + $0x130] sm:$0xff]  ;;  %v1749_v30 = vld [vmem:[%s12590_s7 + $0xe0] sm:$0xff]  ;;  %v1748_v19 = vld [vmem:[%s12590_s7 + $0xd8] sm:$0xff] }
 0x421   : > { %v1884_v63 = vpop.f32.mrf.mxu0 }
 0x422   : > { %v1885_v0 = vadd.f32 %v1884_v63, %v8646_v62  ;;  %v1764_v63 = vld [vmem:[%s12590_s7 + $0x158] sm:$0xff] }
 0x423   : > { %v6985_v1 = vpop.f32.mrf.mxu0 }
 0x424   : > { %v1889_v2 = vsel %vm1888_vm5, %v1885_v0, -inf  ;;  %v1762_v1 = vld [vmem:[%s12590_s7 + $0x148] sm:$0xff] }
 0x425   : > { %1890 = vmax.xlane.f32.xlu1 %v1889_v2  ;;  %v1761_v2 = vld [vmem:[%s12590_s7 + $0x140] sm:$0xff] }
 0x451   : > { %v2040_v5 = vpop.f32.mrf.mxu1 }
 0x452   : > { %v2041_v9 = vadd.f32 %v2040_v5, %v8646_v62  ;;  %v1758_v5 = vld [vmem:[%s12590_s7 + $0x128] sm:$0xff] }
 0x453   : > { %v6995_v10 = vpop.f32.mrf.mxu1 }
 0x454   : > { %v2044_v6 = vsel %vm1888_vm5, %v2041_v9, -inf  ;;  %v1756_v10 = vld [vmem:[%s12590_s7 + $0x118] sm:$0xff] }
 0x455   : > { %2045 = vmax.xlane.f32.xlu0 %v2044_v6  ;;  %v1755_v6 = vld [vmem:[%s12590_s7 + $0x110] sm:$0xff] }
 0x4ae   : > { %v1891_v11 = vpop.xlane.xlu1 %1890 }
 0x4af   : > { %v1892_v12 = vsub.f32 %v1885_v0, %v1891_v11  ;;  %v1763_v0 = vld [vmem:[%s12590_s7 + $0x150] sm:$0xff]  ;;  %v1754_v11 = vld [vmem:[%s12590_s7 + $0x108] sm:$0xff] }
 0x4b1   : > { %v1893_v13 = vmul.f32 1.442695, %v1892_v12  ;;  %v1753_v12 = vld [vmem:[%s12590_s7 + $0x100] sm:$0xff] }
 0x4b3   : > { %7059 = vpow2.f32 %v1893_v13  ;;  %v1752_v13 = vld [vmem:[%s12590_s7 + $0xf8] sm:$0xff] }
 0x4c0   : > { %v7060_v14 = vpop.eup %7059 }
 0x4c1   : > { %v1895_v18 = vsel %vm1888_vm5, %v7060_v14, 0.0 }
 0x4c2   : > { %1896 = vadd.xlane.f32.xlu1 %v1895_v18 }
 0x4de   : > { %v2046_v21 = vpop.xlane.xlu0 %2045 }
 0x4df   : > { %v2047_v22 = vsub.f32 %v2041_v9, %v2046_v21  ;;  %v1757_v9 = vld [vmem:[%s12590_s7 + $0x120] sm:$0xff] }
 0x4e1   : > { %v2048_v23 = vmul.f32 1.442695, %v2047_v22 }
 0x4e3   : > { %7061 = vpow2.f32 %v2048_v23 }
 0x4f0   : > { %v7062_v24 = vpop.eup %7061 }
 0x4f1   : > { %v2050_v25 = vsel %vm1888_vm5, %v7062_v24, 0.0 }
 0x4f2   : > { %2051 = vadd.xlane.f32.xlu1 %v2050_v25  ;;  %v1751_v25 = vld [vmem:[%s12590_s7 + $0xf0] sm:$0xff] }
 0x54b   : > { %v1897_v26 = vpop.xlane.xlu1 %1896 }
 0x54c   : > { %7063 = vrcp.f32 %v1897_v26 }
 0x559   : > { %v7064_v33 = vpop.eup %7063 }
 0x55a   : > { %v1899_v20 = vmul.f32 %v7064_v33, %v7060_v14 }
 0x55c   : > { %6989 = vmatmul.mubr.msk.f32.vlgmr.msra.gmra.mxu0 %vm1888_vm5, %v1899_v20  ;;  %v1747_v20 = vld [vmem:[%s12590_s7 + $0xd0] sm:$0xff] }
 0x55d   : > { %7002 = vmatpush3.xpose.msra.mxu0 %v1649_v34  ;;  %7003 = vmatprep.mubr.msk.f32.mxu0 %vm7145_vm3, %v7144_v7  ;;  %v1746_v34 = vld [vmem:[%s12590_s7 + $0xc8] sm:$0xff] }
 0x560   : > { %7004 = vmatmul.mubr.f32.vlgmr.msra.gmra.mxu0 %v2270_v37  ;;  %v1745_v37 = vld [vmem:[%s12590_s7 + $0xc0] sm:$0xff] }
 0x561   : > { %2489 = vmatprep.mubr.f32.mxu0 %v7144_v7 }
 0x57b   : > { %v2052_v38 = vpop.xlane.xlu1 %2051 }
 0x57c   : > { %7065 = vrcp.f32 %v2052_v38  ;;  %v1744_v38 = vld [vmem:[%s12590_s7 + $0xb8] sm:$0xff] }
 0x589   : > { %v7066_v32 = vpop.eup %7065 }
 0x58a   : > { %v2054_v39 = vmul.f32 %v7066_v32, %v7062_v24  ;;  %v1743_v32 = vld [vmem:[%s12590_s7 + $0xb0] sm:$0xff] }
 0x58c   : > { %6999 = vmatmul.mubr.msk.f32.vlgmr.msra.gmra.mxu1 %vm1888_vm5, %v2054_v39  ;;  %v1742_v39 = vld [vmem:[%s12590_s7 + $0xa8] sm:$0xff] }
 0x58d   : > { %2192 = vmatprep.mubr.f32.mxu1 %v7144_v7  ;;  %2129 = vmatpush1.msra.mxu1 %v1783_v40  ;;  %v1740_v40 = vld [vmem:[%s12590_s7 + $0x98] sm:$0xff] }
 0x58e   : > { %2130 = vmatprep.subr.mxu1 %v1782_v41  ;;  %v1739_v41 = vld [vmem:[%s12590_s7 + $0x90] sm:$0xff] }
 0x58f   : > { %2131 = vmatpush1.msra.mxu1 %v1781_v42  ;;  %v1738_v42 = vld [vmem:[%s12590_s7 + $0x88] sm:$0xff] }
 0x590   : > { %2132 = vmatprep.subr.mxu1 %v1780_v43  ;;  %v1737_v43 = vld [vmem:[%s12590_s7 + $0x80] sm:$0xff] }
 0x591   : > { %2133 = vmatpush1.msra.mxu1 %v1779_v44  ;;  %v1736_v44 = vld [vmem:[%s12590_s7 + $0x78] sm:$0xff] }
 0x592   : > { %2134 = vmatprep.subr.mxu1 %v1778_v45  ;;  %v1735_v45 = vld [vmem:[%s12590_s7 + $0x70] sm:$0xff] }
 0x593   : > { %2135 = vmatpush1.msra.mxu1 %v1777_v48  ;;  %v1734_v48 = vld [vmem:[%s12590_s7 + $0x68] sm:$0xff] }
 0x594   : > { %2136 = vmatprep.subr.mxu1 %v1776_v50  ;;  %v1733_v50 = vld [vmem:[%s12590_s7 + $0x60] sm:$0xff] }
 0x595   : > { %2137 = vmatpush1.msra.mxu1 %v1775_v51  ;;  %v1732_v51 = vld [vmem:[%s12590_s7 + $0x58] sm:$0xff] }
 0x596   : > { %2138 = vmatprep.subr.mxu1 %v1774_v52  ;;  %v1731_v52 = vld [vmem:[%s12590_s7 + $0x50] sm:$0xff] }
 0x597   : > { %2139 = vmatpush1.msra.mxu1 %v1773_v31  ;;  %v1730_v31 = vld [vmem:[%s12590_s7 + $0x48] sm:$0xff] }
 0x598   : > { %2140 = vmatprep.subr.mxu1 %v1772_v54  ;;  %v1729_v54 = vld [vmem:[%s12590_s7 + $0x40] sm:$0xff] }
 0x599   : > { %2141 = vmatpush1.msra.mxu1 %v1771_v55  ;;  %v1728_v55 = vld [vmem:[%s12590_s7 + $0x38] sm:$0xff] }
 0x59a   : > { %2142 = vmatprep.subr.mxu1 %v1770_v56  ;;  %v1727_v56 = vld [vmem:[%s12590_s7 + $0x30] sm:$0xff] }
 0x59b   : > { %2143 = vmatpush1.msra.mxu1 %v1769_v57  ;;  %v1726_v57 = vld [vmem:[%s12590_s7 + $0x28] sm:$0xff] }
 0x59c   : > { %2144 = vmatprep.subr.mxu1 %v1768_v58  ;;  %v6273_v58 = vld [vmem:[%s12589_s6 + $0x10] ss:$2 sm:$0x1] }
 0x59d   : > { %2145 = vmatpush1.msra.mxu1 %v1767_v59  ;;  %v1725_v59 = vld [vmem:[%s12590_s7 + $0x20] sm:$0xff] }
 0x59e   : > { %2146 = vmatprep.subr.mxu1 %v1766_v60  ;;  %v1724_v60 = vld [vmem:[%s12590_s7 + $0x18] sm:$0xff] }
 0x59f   : > { %2147 = vmatpush1.msra.mxu1 %v1765_v61  ;;  %v1723_v61 = vld [vmem:[%s12590_s7 + $0x10] sm:$0xff] }
 0x5a0   : > { %2148 = vmatprep.subr.mxu1 %v1764_v63  ;;  %v1354_v63 = vrot.slane %v6273_v58, %v8185_v16 }
 0x5a1   : > { %2149 = vmatpush1.msra.mxu1 %v1763_v0  ;;  %v1722_v0 = vld [vmem:[%s12590_s7 + $0x8] sm:$0xff] }
 0x5a2   : > { %2150 = vmatprep.subr.mxu1 %v1762_v1  ;;  %v1721_v1 = vld [vmem:[%s12590_s7] sm:$0xff] }
 0x5a3   : > { %2151 = vmatpush1.msra.mxu1 %v1761_v2  ;;  %v1718_v2 = vadd.f32 %v8638_v53, %v1354_v63  ;;  %v1816_v53 = vld [vmem:[%s12590_s7 + $0x2f8] sm:$0xff] }
 0x5a4   : > { %2152 = vmatprep.subr.mxu1 %v1760_v3  ;;  %2425 = vmatprep.subr.mxu0 %v1816_v53  ;;  %v7132_v53 = vld [vmem:[#allocation2] sm:$0xff] }
 0x5a5   : > { %2153 = vmatpush1.msra.mxu1 %v1759_v4 }
 0x5a6   : > { %2154 = vmatprep.subr.mxu1 %v1758_v5 }
 0x5a7   : > { %2155 = vmatpush1.msra.mxu1 %v1757_v9 }
 0x5a8   : > { %2156 = vmatprep.subr.mxu1 %v1756_v10 }
 0x5a9   : > { %2157 = vmatpush1.msra.mxu1 %v1755_v6  ;;  %v1815_v6 = vld [vmem:[%s12590_s7 + $0x2f0] sm:$0xff] }
 0x5aa   : > { %2158 = vmatprep.subr.mxu1 %v1754_v11  ;;  %v1814_v11 = vld [vmem:[%s12590_s7 + $0x2e8] sm:$0xff]  ;;  %2426 = vmatpush1.msra.mxu0 %v1815_v6 }
 0x5ab   : > { %2159 = vmatpush1.msra.mxu1 %v1753_v12  ;;  %v1813_v12 = vld [vmem:[%s12590_s7 + $0x2e0] sm:$0xff]  ;;  %2427 = vmatprep.subr.mxu0 %v1814_v11 }
 0x5ac   : > { %2199 = vmatprep.subr.mxu1 %v1752_v13  ;;  %v1812_v13 = vld [vmem:[%s12590_s7 + $0x2d8] sm:$0xff]  ;;  %2428 = vmatpush1.msra.mxu0 %v1813_v12 }
 0x5ad   : > { %2429 = vmatprep.subr.mxu0 %v1812_v13 }
 0x61c   : > { %v8767_v14 = vpop.f32.mrf.mxu0 }
 0x61e   : > { %v6990_v18 = vpop.f32.mrf.mxu0 }
 0x61f   : > { %v1810_v18 = vld [vmem:[%s12590_s7 + $0x2c8] sm:$0xff] }
 0x620   : > { %v2337_v21 = vpop.f32.mrf.mxu0 }
 0x621   : > { %v8770_v22 = vadd.f32 %v2337_v21, %v8646_v62  ;;  %v1809_v21 = vld [vmem:[%s12590_s7 + $0x2c0] sm:$0xff] }
 0x622   : > { %v7005_v23 = vpop.f32.mrf.mxu0 }
 0x623   : > { %v2341_v24 = vsel %vm1888_vm5, %v8770_v22, -inf  ;;  %v1807_v23 = vld [vmem:[%s12590_s7 + $0x2b0] sm:$0xff] }
 0x624   : > { %2342 = vmax.xlane.f32.xlu0 %v2341_v24  ;;  %v1806_v24 = vld [vmem:[%s12590_s7 + $0x2a8] sm:$0xff] }
 0x64c   : > { %v2124_v26 = vpop.f32.mrf.mxu1 }
 0x64d   : > { %2193 = vmatmul.mubr.f32.vlgmr.msra.gmra.mxu1 %v2124_v26  ;;  %v1804_v26 = vld [vmem:[%s12590_s7 + $0x298] sm:$0xff] }
 0x64e   : > { %2200 = vmatpush1.msra.mxu1 %v1751_v25  ;;  %v7000_v33 = vpop.f32.mrf.mxu1  ;;  %2263 = vmatprep.mubr.f32.mxu1 %v7144_v7  ;;  %v1805_v25 = vld [vmem:[%s12590_s7 + $0x2a0] sm:$0xff] }
 0x64f   : > { %2201 = vmatprep.subr.mxu1 %v1750_v29  ;;  %v1803_v29 = vld [vmem:[%s12590_s7 + $0x290] sm:$0xff]  ;;  %v1801_v33 = vld [vmem:[%s12590_s7 + $0x280] sm:$0xff] }
 0x650   : > { %2202 = vmatpush1.msra.mxu1 %v1749_v30  ;;  %v1802_v30 = vld [vmem:[%s12590_s7 + $0x288] sm:$0xff] }
 0x651   : > { %2203 = vmatprep.subr.mxu1 %v1748_v19  ;;  %v1800_v19 = vld [vmem:[%s12590_s7 + $0x278] sm:$0xff] }
 0x652   : > { %2204 = vmatpush1.msra.mxu1 %v1747_v20  ;;  %v1799_v20 = vld [vmem:[%s12590_s7 + $0x270] sm:$0xff] }
 0x653   : > { %2205 = vmatprep.subr.mxu1 %v1746_v34  ;;  %v1798_v34 = vld [vmem:[%s12590_s7 + $0x268] sm:$0xff] }
 0x654   : > { %2206 = vmatpush1.msra.mxu1 %v1745_v37  ;;  %v1797_v37 = vld [vmem:[%s12590_s7 + $0x260] sm:$0xff] }
 0x655   : > { %2207 = vmatprep.subr.mxu1 %v1744_v38  ;;  %v1796_v38 = vld [vmem:[%s12590_s7 + $0x258] sm:$0xff] }
 0x656   : > { %2208 = vmatpush1.msra.mxu1 %v1743_v32  ;;  %v1795_v32 = vld [vmem:[%s12590_s7 + $0x250] sm:$0xff] }
 0x657   : > { %2209 = vmatprep.subr.mxu1 %v1742_v39  ;;  %v1794_v39 = vld [vmem:[%s12590_s7 + $0x248] sm:$0xff] }
 0x658   : > { %2210 = vmatpush1.msra.mxu1 %v1741_v36  ;;  %v1793_v36 = vld [vmem:[%s12590_s7 + $0x240] sm:$0xff] }
 0x659   : > { %2211 = vmatprep.subr.mxu1 %v1740_v40  ;;  %v1792_v40 = vld [vmem:[%s12590_s7 + $0x238] sm:$0xff] }
 0x65a   : > { %2212 = vmatpush1.msra.mxu1 %v1739_v41  ;;  %v1791_v41 = vld [vmem:[%s12590_s7 + $0x230] sm:$0xff] }
 0x65b   : > { %2213 = vmatprep.subr.mxu1 %v1738_v42  ;;  %v1790_v42 = vld [vmem:[%s12590_s7 + $0x228] sm:$0xff] }
 0x65c   : > { %2214 = vmatpush1.msra.mxu1 %v1737_v43  ;;  %v1789_v43 = vld [vmem:[%s12590_s7 + $0x220] sm:$0xff] }
 0x65d   : > { %2215 = vmatprep.subr.mxu1 %v1736_v44  ;;  %v1788_v44 = vld [vmem:[%s12590_s7 + $0x218] sm:$0xff] }
 0x65e   : > { %2216 = vmatpush1.msra.mxu1 %v1735_v45  ;;  %v1787_v45 = vld [vmem:[%s12590_s7 + $0x210] sm:$0xff] }
 0x65f   : > { %2217 = vmatprep.subr.mxu1 %v1734_v48  ;;  %v1786_v48 = vld [vmem:[%s12590_s7 + $0x208] sm:$0xff] }
 0x660   : > { %2218 = vmatpush1.msra.mxu1 %v1733_v50 }
 0x661   : > { %2219 = vmatprep.subr.mxu1 %v1732_v51 }
 0x662   : > { %2220 = vmatpush1.msra.mxu1 %v1731_v52 }
 0x663   : > { %2221 = vmatprep.subr.mxu1 %v1730_v31 }
 0x664   : > { %2222 = vmatpush1.msra.mxu1 %v1729_v54 }
 0x665   : > { %2223 = vmatprep.subr.mxu1 %v1728_v55 }
 0x666   : > { %2224 = vmatpush1.msra.mxu1 %v1727_v56 }
 0x667   : > { %2225 = vmatprep.subr.mxu1 %v1726_v57  ;;  %v1785_v57 = vld [vmem:[%s12590_s7 + $0x200] sm:$0xff] }
 0x668   : > { %2226 = vmatpush1.msra.mxu1 %v1725_v59 }
 0x669   : > { %2227 = vmatprep.subr.mxu1 %v1724_v60 }
 0x66a   : > { %2228 = vmatpush1.msra.mxu1 %v1723_v61 }
 0x66b   : > { %2229 = vmatprep.subr.mxu1 %v1722_v0  ;;  %v2500_v0 = vld [vmem:[%s12591_s8] ss:$2 sm:$0x3] }
 0x66c   : > { %2230 = vmatpush1.msra.mxu1 %v1721_v1  ;;  %v2505_v11 = vrot.slane %v2500_v0, %v8185_v16 }
 0x66d   : > { %2264 = vmatmul.mubr.f32.vlgmr.msra.gmra.mxu1 %v8767_v14  ;;  %7006 = vmatprep.subr.mxu1 %v7144_v7  ;;  %v1811_v14 = vld [vmem:[%s12590_s7 + $0x2d0] sm:$0xff] }
 0x66e   : > { %7007 = vmatpush3.msra.mxu1 %v1718_v2  ;;  %7008 = vmatprep.mubr.msk.f32.mxu1 %vm7145_vm3, %v7144_v7 }
 0x66f   : > { %2430 = vmatpush1.msra.mxu0 %v1811_v14 }
 0x670   : > { %2431 = vmatprep.subr.mxu0 %v1810_v18 }
 0x671   : > { %2432 = vmatpush1.msra.mxu0 %v1809_v21  ;;  %v2655_v21 = vld [vmem:[%s12594_s11 + $0x2d8] sm:$0xff] }
 0x672   : > { %2743 = vmatprep.subr.mxu1 %v2655_v21 }
 0x6ad   : > { %v2343_v3 = vpop.xlane.xlu0 %2342 }
 0x6ae   : > { %v2344_v4 = vsub.f32 %v8770_v22, %v2343_v3  ;;  %v1808_v22 = vld [vmem:[%s12590_s7 + $0x2b8] sm:$0xff]  ;;  %v2509_v3 = vrot.slane %v2500_v0, %v8188_v17 }
 0x6af   : > { %2433 = vmatprep.subr.mxu0 %v1808_v22  ;;  %v2654_v22 = vld [vmem:[%s12594_s11 + $0x2d0] sm:$0xff]  ;;  %v2603_v0 = vld [vmem:[%s12594_s11 + $0x138] sm:$0xff] }
 0x6b0   : > { %v2345_v5 = vmul.f32 1.442695, %v2344_v4  ;;  %2434 = vmatpush1.msra.mxu0 %v1807_v23  ;;  %v7131_v4 = vld [vmem:[#allocation2 + $0x8] sm:$0xff] }
 0x6b1   : > { %2435 = vmatprep.subr.mxu0 %v1806_v24  ;;  %v2657_v23 = vld [vmem:[%s12594_s11 + $0x2e8] sm:$0xff] }
 0x6b2   : > { %7067 = vpow2.f32 %v2345_v5  ;;  %2436 = vmatpush1.msra.mxu0 %v1805_v25  ;;  %v2649_v24 = vld [vmem:[%s12594_s11 + $0x2a8] sm:$0xff]  ;;  %v2656_v25 = vld [vmem:[%s12594_s11 + $0x2e0] sm:$0xff] }
 0x6b3   : > { %2437 = vmatprep.subr.mxu0 %v1804_v26  ;;  %v2648_v26 = vld [vmem:[%s12594_s11 + $0x2a0] sm:$0xff] }
 0x6b4   : > { %2438 = vmatpush1.msra.mxu0 %v1803_v29  ;;  %v2651_v29 = vld [vmem:[%s12594_s11 + $0x2b8] sm:$0xff] }
 0x6b5   : > { %2439 = vmatprep.subr.mxu0 %v1802_v30  ;;  %v2643_v30 = vld [vmem:[%s12594_s11 + $0x278] sm:$0xff] }
 0x6b6   : > { %2440 = vmatpush1.msra.mxu0 %v1801_v33  ;;  %v2650_v33 = vld [vmem:[%s12594_s11 + $0x2b0] sm:$0xff] }
 0x6b7   : > { %2441 = vmatprep.subr.mxu0 %v1800_v19  ;;  %v2642_v19 = vld [vmem:[%s12594_s11 + $0x270] sm:$0xff] }
 0x6b8   : > { %2442 = vmatpush1.msra.mxu0 %v1799_v20  ;;  %v2645_v20 = vld [vmem:[%s12594_s11 + $0x288] sm:$0xff] }
 0x6b9   : > { %2443 = vmatprep.subr.mxu0 %v1798_v34  ;;  %v2637_v34 = vld [vmem:[%s12594_s11 + $0x248] sm:$0xff] }
 0x6ba   : > { %2444 = vmatpush1.msra.mxu0 %v1797_v37  ;;  %v2644_v37 = vld [vmem:[%s12594_s11 + $0x280] sm:$0xff] }
 0x6bb   : > { %2445 = vmatprep.subr.mxu0 %v1796_v38  ;;  %v2639_v38 = vld [vmem:[%s12594_s11 + $0x258] sm:$0xff] }
 0x6bc   : > { %2446 = vmatpush1.msra.mxu0 %v1795_v32  ;;  %v2636_v32 = vld [vmem:[%s12594_s11 + $0x240] sm:$0xff] }
 0x6bd   : > { %2447 = vmatprep.subr.mxu0 %v1794_v39  ;;  %v2638_v39 = vld [vmem:[%s12594_s11 + $0x250] sm:$0xff] }
 0x6be   : > { %2448 = vmatpush1.msra.mxu0 %v1793_v36  ;;  %v2631_v36 = vld [vmem:[%s12594_s11 + $0x218] sm:$0xff] }
 0x6bf   : > { %v8878_v9 = vpop.eup %7067  ;;  %2449 = vmatprep.subr.mxu0 %v1792_v40  ;;  %v2633_v40 = vld [vmem:[%s12594_s11 + $0x228] sm:$0xff] }
 0x6c0   : > { %v2347_v10 = vsel %vm1888_vm5, %v8878_v9, 0.0  ;;  %2450 = vmatpush1.msra.mxu0 %v1791_v41  ;;  %v2630_v41 = vld [vmem:[%s12594_s11 + $0x210] sm:$0xff] }
 0x6c1   : > { %2348 = vadd.xlane.f32.xlu1 %v2347_v10  ;;  %2451 = vmatprep.subr.mxu0 %v1790_v42  ;;  %v2632_v42 = vld [vmem:[%s12594_s11 + $0x220] sm:$0xff] }
 0x6c2   : > { %2452 = vmatpush1.msra.mxu0 %v1789_v43  ;;  %v2625_v43 = vld [vmem:[%s12594_s11 + $0x1e8] sm:$0xff] }
 0x6c3   : > { %2453 = vmatprep.subr.mxu0 %v1788_v44  ;;  %v2627_v44 = vld [vmem:[%s12594_s11 + $0x1f8] sm:$0xff] }
 0x6c4   : > { %2454 = vmatpush1.msra.mxu0 %v1787_v45  ;;  %v2624_v45 = vld [vmem:[%s12594_s11 + $0x1e0] sm:$0xff] }
 0x6c5   : > { %2455 = vmatprep.subr.mxu0 %v1786_v48  ;;  %v2626_v48 = vld [vmem:[%s12594_s11 + $0x1f0] sm:$0xff] }
 0x6c6   : > { %2456 = vmatpush1.msra.mxu0 %v1785_v57  ;;  %v2614_v57 = vld [vmem:[%s12594_s11 + $0x190] sm:$0xff] }
 0x6c7   : > { %2814 = vmatprep.subr.mxu0 %v2657_v23 }
 0x70d   : > { %v2194_v50 = vpop.f32.mrf.mxu1 }
 0x70f   : > { %v2196_v51 = vpop.f32.mrf.mxu1 }
 0x72d   : > { %v2265_v52 = vpop.f32.mrf.mxu1 }
 0x72e   : > { %v2266_v31 = vadd.f32 %v2265_v52, %v2194_v50  ;;  %v2619_v50 = vld [vmem:[%s12594_s11 + $0x1b8] sm:$0xff]  ;;  %v2618_v52 = vld [vmem:[%s12594_s11 + $0x1b0] sm:$0xff] }
 0x72f   : > { %v2267_v58 = vpop.f32.mrf.mxu1 }
 0x730   : > { %v2268_v63 = vadd.f32 %v2267_v58, %v2196_v51  ;;  %v2621_v51 = vld [vmem:[%s12594_s11 + $0x1c8] sm:$0xff]  ;;  %v2607_v58 = vld [vmem:[%s12594_s11 + $0x158] sm:$0xff] }
 0x74a   : > { %v2349_v54 = vpop.xlane.xlu1 %2348 }
 0x74b   : > { %7069 = vrcp.f32 %v2349_v54  ;;  %v2613_v54 = vld [vmem:[%s12594_s11 + $0x188] sm:$0xff] }
 0x758   : > { %v7070_v55 = vpop.eup %7069 }
 0x759   : > { %v2351_v56 = vmul.f32 %v7070_v55, %v8878_v9  ;;  %v2615_v55 = vld [vmem:[%s12594_s11 + $0x198] sm:$0xff] }
 0x75b   : > { %7009 = vmatmul.mubr.msk.f32.vlgmr.msra.gmra.mxu1 %vm1888_vm5, %v2351_v56  ;;  %v2612_v56 = vld [vmem:[%s12594_s11 + $0x180] sm:$0xff] }
 0x75c   : > { %2744 = vmatpush1.msra.mxu1 %v2654_v22 }
 0x75d   : > { %2745 = vmatprep.subr.mxu1 %v2649_v24 }
 0x75e   : > { %2746 = vmatpush1.msra.mxu1 %v2648_v26  ;;  %v2583_v26 = vld [vmem:[%s12594_s11 + $0x98] sm:$0xff] }
 0x75f   : > { %2747 = vmatprep.subr.mxu1 %v2643_v30  ;;  %v2585_v30 = vld [vmem:[%s12594_s11 + $0xa8] sm:$0xff] }
 0x760   : > { %2748 = vmatpush1.msra.mxu1 %v2642_v19  ;;  %v2584_v19 = vld [vmem:[%s12594_s11 + $0xa0] sm:$0xff] }
 0x761   : > { %2749 = vmatprep.subr.mxu1 %v2637_v34  ;;  %v2579_v34 = vld [vmem:[%s12594_s11 + $0x78] sm:$0xff] }
 0x762   : > { %2750 = vmatpush1.msra.mxu1 %v2636_v32  ;;  %v2570_v32 = vld [vmem:[%s12594_s11 + $0x30] sm:$0xff] }
 0x763   : > { %2751 = vmatprep.subr.mxu1 %v2631_v36  ;;  %v2565_v36 = vld [vmem:[%s12594_s11 + $0x8] sm:$0xff] }
 0x764   : > { %2752 = vmatpush1.msra.mxu1 %v2630_v41  ;;  %v2564_v41 = vld [vmem:[%s12594_s11] sm:$0xff] }
 0x765   : > { %2753 = vmatprep.subr.mxu1 %v2625_v43  ;;  %v2703_v43 = vld [vmem:[%s12594_s11 + $0x458] sm:$0xff] }
 0x766   : > { %2754 = vmatpush1.msra.mxu1 %v2624_v45  ;;  %v2702_v45 = vld [vmem:[%s12594_s11 + $0x450] sm:$0xff] }
 0x767   : > { %2755 = vmatprep.subr.mxu1 %v2619_v50  ;;  %v2697_v50 = vld [vmem:[%s12594_s11 + $0x428] sm:$0xff] }
 0x768   : > { %2756 = vmatpush1.msra.mxu1 %v2618_v52  ;;  %v2696_v52 = vld [vmem:[%s12594_s11 + $0x420] sm:$0xff] }
 0x769   : > { %2757 = vmatprep.subr.mxu1 %v2613_v54  ;;  %v2691_v54 = vld [vmem:[%s12594_s11 + $0x3f8] sm:$0xff] }
 0x76a   : > { %2758 = vmatpush1.msra.mxu1 %v2612_v56  ;;  %v2690_v56 = vld [vmem:[%s12594_s11 + $0x3f0] sm:$0xff] }
 0x76b   : > { %2759 = vmatprep.subr.mxu1 %v2607_v58  ;;  %v2685_v58 = vld [vmem:[%s12594_s11 + $0x3c8] sm:$0xff] }
 0x81b   : > { %v2421_v59 = vpop.f32.mrf.mxu1 }
 0x81c   : > { %2490 = vmatmul.mubr.f32.vlgmr.msra.gmra.mxu0 %v2421_v59  ;;  %v2609_v59 = vld [vmem:[%s12594_s11 + $0x168] sm:$0xff] }
 0x81d   : > { %v7010_v60 = vpop.f32.mrf.mxu1  ;;  %2815 = vmatpush1.msra.mxu0 %v2656_v25 }
 0x81e   : > { %2816 = vmatprep.subr.mxu0 %v2651_v29  ;;  %v2606_v60 = vld [vmem:[%s12594_s11 + $0x150] sm:$0xff] }
 0x81f   : > { %2817 = vmatpush1.msra.mxu0 %v2650_v33  ;;  %2760 = vmatpush1.msra.mxu1 %v2606_v60  ;;  %v2590_v29 = vld [vmem:[%s12594_s11 + $0xd0] sm:$0xff]  ;;  %v2577_v33 = vld [vmem:[%s12594_s11 + $0x68] sm:$0xff]  ;;  %v2684_v60 = vld [vmem:[%s12594_s11 + $0x3c0] sm:$0xff] }
 0x820   : > { %2818 = vmatprep.subr.mxu0 %v2645_v20  ;;  %v2576_v20 = vld [vmem:[%s12594_s11 + $0x60] sm:$0xff] }
 0x821   : > { %2819 = vmatpush1.msra.mxu0 %v2644_v37  ;;  %v2571_v37 = vld [vmem:[%s12594_s11 + $0x38] sm:$0xff] }
 0x822   : > { %2820 = vmatprep.subr.mxu0 %v2639_v38  ;;  %v2578_v38 = vld [vmem:[%s12594_s11 + $0x70] sm:$0xff] }
 0x823   : > { %2821 = vmatpush1.msra.mxu0 %v2638_v39  ;;  %v2573_v39 = vld [vmem:[%s12594_s11 + $0x48] sm:$0xff] }
 0x824   : > { %2822 = vmatprep.subr.mxu0 %v2633_v40  ;;  %v2572_v40 = vld [vmem:[%s12594_s11 + $0x40] sm:$0xff] }
 0x825   : > { %2823 = vmatpush1.msra.mxu0 %v2632_v42  ;;  %v2567_v42 = vld [vmem:[%s12594_s11 + $0x18] sm:$0xff] }
 0x826   : > { %2824 = vmatprep.subr.mxu0 %v2627_v44  ;;  %v2566_v44 = vld [vmem:[%s12594_s11 + $0x10] sm:$0xff] }
 0x827   : > { %2825 = vmatpush1.msra.mxu0 %v2626_v48  ;;  %v2705_v48 = vld [vmem:[%s12594_s11 + $0x468] sm:$0xff] }
 0x828   : > { %2826 = vmatprep.subr.mxu0 %v2621_v51  ;;  %v2704_v51 = vld [vmem:[%s12594_s11 + $0x460] sm:$0xff] }
 0x8dc   : > { %v2491_v61 = vpop.f32.mrf.mxu0 }
 0x8dd   : > { %v2496_v10 = vadd.f32 %v2491_v61, %v2266_v31  ;;  %v2620_v31 = vld [vmem:[%s12594_s11 + $0x1c0] sm:$0xff] }
 0x8de   : > { %v2493_v1 = vpop.f32.mrf.mxu0  ;;  %2827 = vmatpush1.msra.mxu0 %v2620_v31  ;;  %v2608_v61 = vld [vmem:[%s12594_s11 + $0x160] sm:$0xff]  ;;  %v2699_v31 = vld [vmem:[%s12594_s11 + $0x438] sm:$0xff] }
 0x8df   : > { %v2497_v2 = vadd.f32 %v2493_v1, %v2268_v63  ;;  %v2498_v6 = vadd.f32 %v7132_v53, %v2496_v10  ;;  %2828 = vmatprep.subr.mxu0 %v2615_v55  ;;  %v2601_v63 = vld [vmem:[%s12594_s11 + $0x128] sm:$0xff]  ;;  %v2600_v1 = vld [vmem:[%s12594_s11 + $0x120] sm:$0xff]  ;;  %v2591_v53 = vld [vmem:[%s12594_s11 + $0xd8] sm:$0xff] }
 0x8e0   : > { %2829 = vmatpush1.msra.mxu0 %v2614_v57  ;;  %2761 = vmatprep.subr.mxu1 %v2601_v63  ;;  %v2589_v10 = vld [vmem:[%s12594_s11 + $0xc8] sm:$0xff]  ;;  %v2698_v55 = vld [vmem:[%s12594_s11 + $0x430] sm:$0xff]  ;;  %v2679_v63 = vld [vmem:[%s12594_s11 + $0x398] sm:$0xff] }
 0x8e1   : > { %v2499_v5 = vadd.f32 %v7131_v4, %v2497_v2  ;;  %v8986_v12 = vadd.f32 %v2505_v11, %v2498_v6  ;;  %2830 = vmatprep.subr.mxu0 %v2609_v59  ;;  %v2602_v2 = vld [vmem:[%s12594_s11 + $0x130] sm:$0xff]  ;;  %v2597_v4 = vld [vmem:[%s12594_s11 + $0x108] sm:$0xff]  ;;  %2762 = vmatpush1.msra.mxu1 %v2600_v1  ;;  %v2588_v6 = vld [vmem:[%s12594_s11 + $0xc0] sm:$0xff] }
 0x8e2   : > { %2831 = vmatpush1.msra.mxu0 %v2608_v61  ;;  %v2693_v57 = vld [vmem:[%s12594_s11 + $0x408] sm:$0xff]  ;;  %v2692_v59 = vld [vmem:[%s12594_s11 + $0x400] sm:$0xff]  ;;  %v2687_v61 = vld [vmem:[%s12594_s11 + $0x3d8] sm:$0xff] }
 0x8e3   : > { %v2513_v9 = vadd.f32 %v2509_v3, %v2499_v5  ;;  %v2595_v3 = vld [vmem:[%s12594_s11 + $0xf8] sm:$0xff]  ;;  %2832 = vmatprep.subr.mxu0 %v2603_v0  ;;  %v2594_v5 = vld [vmem:[%s12594_s11 + $0xf0] sm:$0xff] }
 0x8e4   : > { %2833 = vmatpush1.msra.mxu0 %v2602_v2  ;;  %2763 = vmatprep.subr.mxu1 %v2595_v3  ;;  %v2686_v0 = vld [vmem:[%s12594_s11 + $0x3d0] sm:$0xff]  ;;  %v2681_v2 = vld [vmem:[%s12594_s11 + $0x3a8] sm:$0xff] }
 0x8e5   : > { %2515 = vst.msk [vmem:[#allocation2 + $0x8] sm:$0xff] %vm800_vm0, %v2513_v9  ;;  %v2596_v9 = vld [vmem:[%s12594_s11 + $0x100] sm:$0xff]  ;;  %2834 = vmatprep.subr.mxu0 %v2597_v4  ;;  %2764 = vmatpush1.msra.mxu1 %v2594_v5  ;;  %v2678_v1 = vld [vmem:[%s12594_s11 + $0x390] sm:$0xff]  ;;  %v2673_v3 = vld [vmem:[%s12594_s11 + $0x368] sm:$0xff] }
 0x8e6   : > { %2835 = vmatpush1.msra.mxu0 %v2596_v9  ;;  %2765 = vmatprep.subr.mxu1 %v2589_v10  ;;  %v2680_v4 = vld [vmem:[%s12594_s11 + $0x3a0] sm:$0xff]  ;;  %v2675_v9 = vld [vmem:[%s12594_s11 + $0x378] sm:$0xff] }
 0x8e7   : > { %2836 = vmatprep.subr.mxu0 %v2591_v53  ;;  %2766 = vmatpush1.msra.mxu1 %v2588_v6  ;;  %v2672_v5 = vld [vmem:[%s12594_s11 + $0x360] sm:$0xff]  ;;  %v2667_v10 = vld [vmem:[%s12594_s11 + $0x338] sm:$0xff]  ;;  %v2674_v53 = vld [vmem:[%s12594_s11 + $0x370] sm:$0xff] }
 0x8e8   : > { %2767 = vmatprep.subr.mxu1 %v2583_v26  ;;  %2837 = vmatpush1.msra.mxu0 %v2590_v29  ;;  %v2666_v6 = vld [vmem:[%s12594_s11 + $0x330] sm:$0xff]  ;;  %v2659_v26 = vld [vmem:[%s12594_s11 + $0x2f8] sm:$0xff] }
 0x8e9   : > { %2838 = vmatprep.subr.mxu0 %v2585_v30  ;;  %v3041_v29 = vld [vmem:[%s12596_s13 + $0xf8] sm:$0xff] }
 0x8ea   : > { %2839 = vmatpush1.msra.mxu0 %v2584_v19  ;;  %v2518_v19 = vld [vmem:[%s12592_s9] ss:$2 sm:$0x3] }
 0x8eb   : > { %2840 = vmatprep.subr.mxu0 %v2579_v34  ;;  %v2546_v34 = vrot.slane %v2518_v19, %v8188_v17 }
 0x8ec   : > { %v8988_v13 = vld [vmem:[#allocation2 + $0x8] sm:$0xff]  ;;  %2841 = vmatpush1.msra.mxu0 %v2578_v38 }
 0x8ed   : > { %v2520_v14 = vsel %vm800_vm0, %v8988_v13, 0.0  ;;  %2842 = vmatprep.subr.mxu0 %v2573_v39 }
 0x8ee   : > { %v2521_v18 = vadd.f32 %v2520_v14, %v8986_v12  ;;  %2843 = vmatpush1.msra.mxu0 %v2572_v40 }
 0x8ef   : > { %2844 = vmatprep.subr.mxu0 %v2567_v42 }
 0x8f0   : > { %2522 = vadd.xlane.f32.xlu0 %v2521_v18  ;;  %2845 = vmatpush1.msra.mxu0 %v2566_v44 }
 0x8f1   : > { %2862 = vmatprep.subr.mxu0 %v2705_v48  ;;  %v2652_v48 = vld [vmem:[%s12594_s11 + $0x2c0] sm:$0xff] }
 0x8f2   : > { %2863 = vmatpush2.msra.mxu0 %v2704_v51  ;;  %v2647_v51 = vld [vmem:[%s12594_s11 + $0x298] sm:$0xff] }
 0x8f3   : > { %2864 = vmatprep.subr.mxu0 %v2699_v31  ;;  %v2646_v31 = vld [vmem:[%s12594_s11 + $0x290] sm:$0xff] }
 0x8f4   : > { %2865 = vmatpush2.msra.mxu0 %v2698_v55  ;;  %v2641_v55 = vld [vmem:[%s12594_s11 + $0x268] sm:$0xff] }
 0x8f5   : > { %2866 = vmatprep.subr.mxu0 %v2693_v57  ;;  %v2640_v57 = vld [vmem:[%s12594_s11 + $0x260] sm:$0xff] }
 0x8f6   : > { %2867 = vmatpush2.msra.mxu0 %v2692_v59  ;;  %v2635_v59 = vld [vmem:[%s12594_s11 + $0x238] sm:$0xff] }
 0x8f7   : > { %2868 = vmatprep.subr.mxu0 %v2687_v61  ;;  %v2634_v61 = vld [vmem:[%s12594_s11 + $0x230] sm:$0xff] }
 0x8f8   : > { %2869 = vmatpush2.msra.mxu0 %v2686_v0  ;;  %v2629_v0 = vld [vmem:[%s12594_s11 + $0x208] sm:$0xff] }
 0x8f9   : > { %2870 = vmatprep.subr.mxu0 %v2681_v2  ;;  %v2628_v2 = vld [vmem:[%s12594_s11 + $0x200] sm:$0xff] }
 0x8fa   : > { %2871 = vmatpush2.msra.mxu0 %v2680_v4  ;;  %v2623_v4 = vld [vmem:[%s12594_s11 + $0x1d8] sm:$0xff] }
 0x8fb   : > { %2872 = vmatprep.subr.mxu0 %v2675_v9  ;;  %v2622_v9 = vld [vmem:[%s12594_s11 + $0x1d0] sm:$0xff] }
 0x8fc   : > { %2873 = vmatpush2.msra.mxu0 %v2674_v53  ;;  %v2617_v53 = vld [vmem:[%s12594_s11 + $0x1a8] sm:$0xff] }
 0x979   : > { %v2523_v11 = vpop.xlane.xlu0 %2522 }
 0x97a   : > { %v2524_v14 = vmul.f32 0.0052083335, %v2523_v11  ;;  %v2669_v11 = vld [vmem:[%s12594_s11 + $0x348] sm:$0xff] }
 0x97b   : > { %2874 = vmatprep.subr.mxu0 %v2669_v11  ;;  %v2616_v11 = vld [vmem:[%s12594_s11 + $0x1a0] sm:$0xff] }
 0x97c   : > { %v9135_v18 = vsub.f32 %v8986_v12, %v2524_v14  ;;  %v9138_v21 = vsub.f32 %v8988_v13, %v2524_v14  ;;  %v2582_v13 = vld [vmem:[%s12594_s11 + $0x90] sm:$0xff]  ;;  %v2661_v14 = vld [vmem:[%s12594_s11 + $0x308] sm:$0xff] }
 0x97d   : > { %2768 = vmatpush1.msra.mxu1 %v2582_v13 }
 0x97e   : > { %v2527_v22 = vmul.f32 %v9135_v18, %v9135_v18  ;;  %v2528_v23 = vmul.f32 %v9138_v21, %v9138_v21  ;;  %2769 = vmatprep.subr.mxu1 %v2577_v33 }
 0x97f   : > { %2770 = vmatpush1.msra.mxu1 %v2576_v20  ;;  %v2519_v20 = vld [vmem:[%s12593_s10] ss:$2 sm:$0x3] }
 0x980   : > { %v2529_v24 = vsel %vm800_vm0, %v2528_v23, 0.0  ;;  %2771 = vmatprep.subr.mxu1 %v2571_v37  ;;  %v2660_v23 = vld [vmem:[%s12594_s11 + $0x300] sm:$0xff]  ;;  %v2542_v37 = vrot.slane %v2518_v19, %v8185_v16  ;;  %v2559_v39 = vrot.slane %v2519_v20, %v8188_v17  ;;  %v2555_v40 = vrot.slane %v2519_v20, %v8185_v16  ;;  %v2598_v20 = vld [vmem:[%s12594_s11 + $0x110] sm:$0xff] }
 0x981   : > { %v2530_v25 = vadd.f32 %v2529_v24, %v2527_v22  ;;  %2772 = vmatpush1.msra.mxu1 %v2570_v32  ;;  %v2668_v22 = vld [vmem:[%s12594_s11 + $0x340] sm:$0xff]  ;;  %v2663_v24 = vld [vmem:[%s12594_s11 + $0x318] sm:$0xff] }
 0x982   : > { %2773 = vmatprep.subr.mxu1 %v2565_v36  ;;  %2875 = vmatpush2.msra.mxu0 %v2668_v22  ;;  %v2611_v22 = vld [vmem:[%s12594_s11 + $0x178] sm:$0xff]  ;;  %v3022_v19 = vld [vmem:[%s12596_s13 + $0x60] sm:$0xff] }
 0x983   : > { %2531 = vadd.xlane.f32.xlu1 %v2530_v25  ;;  %2774 = vmatpush1.msra.mxu1 %v2564_v41  ;;  %v2662_v25 = vld [vmem:[%s12594_s11 + $0x310] sm:$0xff] }
 0x984   : > { %2791 = vmatprep.subr.mxu1 %v2703_v43  ;;  %2876 = vmatprep.subr.mxu0 %v2663_v24  ;;  %v2610_v24 = vld [vmem:[%s12594_s11 + $0x170] sm:$0xff] }
 0x985   : > { %2792 = vmatpush2.msra.mxu1 %v2702_v45  ;;  %2877 = vmatpush2.msra.mxu0 %v2662_v25  ;;  %v2658_v45 = vld [vmem:[%s12594_s11 + $0x2f0] sm:$0xff]  ;;  %v3025_v25 = vld [vmem:[%s12596_s13 + $0x78] sm:$0xff] }
 0x986   : > { %2793 = vmatprep.subr.mxu1 %v2697_v50  ;;  %3202 = vmatprep.subr.mxu0 %v3041_v29  ;;  %v3039_v50 = vld [vmem:[%s12596_s13 + $0xe8] sm:$0xff]  ;;  %v3024_v29 = vld [vmem:[%s12596_s13 + $0x70] sm:$0xff] }
 0x987   : > { %2794 = vmatpush2.msra.mxu1 %v2696_v52  ;;  %v3038_v52 = vld [vmem:[%s12596_s13 + $0xe0] sm:$0xff] }
 0x988   : > { %2795 = vmatprep.subr.mxu1 %v2691_v54  ;;  %v3037_v54 = vld [vmem:[%s12596_s13 + $0xd8] sm:$0xff] }
 0x989   : > { %2796 = vmatpush2.msra.mxu1 %v2690_v56  ;;  %v3036_v56 = vld [vmem:[%s12596_s13 + $0xd0] sm:$0xff] }
 0x98a   : > { %2797 = vmatprep.subr.mxu1 %v2685_v58  ;;  %v3035_v58 = vld [vmem:[%s12596_s13 + $0xc8] sm:$0xff] }
 0x98b   : > { %2798 = vmatpush2.msra.mxu1 %v2684_v60  ;;  %v3034_v60 = vld [vmem:[%s12596_s13 + $0xc0] sm:$0xff] }
 0x98c   : > { %2799 = vmatprep.subr.mxu1 %v2679_v63  ;;  %v3033_v63 = vld [vmem:[%s12596_s13 + $0xb8] sm:$0xff] }
 0x98d   : > { %2800 = vmatpush2.msra.mxu1 %v2678_v1  ;;  %v3032_v1 = vld [vmem:[%s12596_s13 + $0xb0] sm:$0xff] }
 0x98e   : > { %2801 = vmatprep.subr.mxu1 %v2673_v3  ;;  %v3031_v3 = vld [vmem:[%s12596_s13 + $0xa8] sm:$0xff] }
 0x98f   : > { %2802 = vmatpush2.msra.mxu1 %v2672_v5  ;;  %v3030_v5 = vld [vmem:[%s12596_s13 + $0xa0] sm:$0xff] }
 0x990   : > { %2803 = vmatprep.subr.mxu1 %v2667_v10  ;;  %v3029_v10 = vld [vmem:[%s12596_s13 + $0x98] sm:$0xff] }
 0x991   : > { %2804 = vmatpush2.msra.mxu1 %v2666_v6  ;;  %v3028_v6 = vld [vmem:[%s12596_s13 + $0x90] sm:$0xff] }
 0x992   : > { %2805 = vmatprep.subr.mxu1 %v2661_v14  ;;  %v3027_v14 = vld [vmem:[%s12596_s13 + $0x88] sm:$0xff] }
 0x993   : > { %2806 = vmatpush2.msra.mxu1 %v2660_v23  ;;  %v3026_v23 = vld [vmem:[%s12596_s13 + $0x80] sm:$0xff] }
 0x994   : > { %2885 = vmatprep.subr.mxu1 %v2659_v26  ;;  %v2605_v26 = vld [vmem:[%s12594_s11 + $0x148] sm:$0xff] }
 0xa0c   : > { %v2532_v13 = vpop.xlane.xlu1 %2531 }
 0xa0d   : > { %v2533_v30 = vmul.f32 0.0052083335, %v2532_v13  ;;  %v2604_v13 = vld [vmem:[%s12594_s11 + $0x140] sm:$0xff] }
 0xa0f   : > { %v2534_v33 = vadd.f32 1e-06, %v2533_v30  ;;  %v3023_v30 = vld [vmem:[%s12596_s13 + $0x68] sm:$0xff] }
 0xa11   : > { %7071 = vrsqrt.f32 %v2534_v33  ;;  %v2599_v33 = vld [vmem:[%s12594_s11 + $0x118] sm:$0xff] }
 0xa1e   : > { %v7072_v38 = vpop.eup %7071 }
 0xa1f   : > { %v2537_v32 = vmul.f32 %v7072_v38, %v9138_v21  ;;  %v2536_v36 = vmul.f32 %v7072_v38, %v9135_v18  ;;  %v2653_v21 = vld [vmem:[%s12594_s11 + $0x2c8] sm:$0xff]  ;;  %v3040_v18 = vld [vmem:[%s12596_s13 + $0xf0] sm:$0xff] }
 0xa20   : > { %v3020_v38 = vld [vmem:[%s12596_s13 + $0x50] sm:$0xff] }
 0xa21   : > { %v2550_v41 = vmul.f32 %v2546_v34, %v2537_v32  ;;  %v2549_v42 = vmul.f32 %v2542_v37, %v2536_v36  ;;  %v3021_v34 = vld [vmem:[%s12596_s13 + $0x58] sm:$0xff]  ;;  %v2593_v37 = vld [vmem:[%s12594_s11 + $0xe8] sm:$0xff]  ;;  %v2592_v32 = vld [vmem:[%s12594_s11 + $0xe0] sm:$0xff] }
 0xa22   : > { %v2587_v36 = vld [vmem:[%s12594_s11 + $0xb8] sm:$0xff] }
 0xa23   : > { %v2563_v43 = vadd.f32 %v2559_v39, %v2550_v41  ;;  %v9310_v44 = vadd.f32 %v2555_v40, %v2549_v42  ;;  %v3019_v39 = vld [vmem:[%s12596_s13 + $0x48] sm:$0xff]  ;;  %v3018_v40 = vld [vmem:[%s12596_s13 + $0x40] sm:$0xff]  ;;  %v2586_v41 = vld [vmem:[%s12594_s11 + $0xb0] sm:$0xff] }
 0xa24   : > { %v3017_v42 = vld [vmem:[%s12596_s13 + $0x38] sm:$0xff] }
 0xa25   : > { %6282 = vmatprep.mubr.msk.f32.mxu1 %vm800_vm0, %v2563_v43  ;;  %6283 = vmatprep.mubr.msk.f32.mxu0 %vm800_vm0, %v2563_v43 }
 0xa26   : > { %2808 = vmatmul.mubr.f32.vlgmr.msra.gmra.mxu1 %v9310_v44  ;;  %2879 = vmatmul.mubr.f32.vlgmr.msra.gmra.mxu0 %v9310_v44 }
 0xa27   : > { %2886 = vmatpush1.msra.mxu1 %v2658_v45  ;;  %6284 = vmatprep.mubr.msk.f32.mxu1 %vm800_vm0, %v2563_v43  ;;  %v2581_v43 = vld [vmem:[%s12594_s11 + $0x88] sm:$0xff]  ;;  %v3016_v45 = vld [vmem:[%s12596_s13 + $0x30] sm:$0xff] }
 0xa28   : > { %2887 = vmatprep.subr.mxu1 %v2653_v21  ;;  %3203 = vmatpush1.msra.mxu0 %v3040_v18  ;;  %v2580_v21 = vld [vmem:[%s12594_s11 + $0x80] sm:$0xff]  ;;  %v3015_v18 = vld [vmem:[%s12596_s13 + $0x28] sm:$0xff] }
 0xa29   : > { %2888 = vmatpush1.msra.mxu1 %v2652_v48  ;;  %3204 = vmatprep.subr.mxu0 %v3039_v50  ;;  %v2575_v48 = vld [vmem:[%s12594_s11 + $0x58] sm:$0xff]  ;;  %v3014_v50 = vld [vmem:[%s12596_s13 + $0x20] sm:$0xff] }
 0xa2a   : > { %2889 = vmatprep.subr.mxu1 %v2647_v51  ;;  %3205 = vmatpush1.msra.mxu0 %v3038_v52  ;;  %v2574_v51 = vld [vmem:[%s12594_s11 + $0x50] sm:$0xff]  ;;  %v3013_v52 = vld [vmem:[%s12596_s13 + $0x18] sm:$0xff] }
 0xa2b   : > { %2890 = vmatpush1.msra.mxu1 %v2646_v31  ;;  %3206 = vmatprep.subr.mxu0 %v3037_v54  ;;  %v2569_v31 = vld [vmem:[%s12594_s11 + $0x28] sm:$0xff]  ;;  %v3012_v54 = vld [vmem:[%s12596_s13 + $0x10] sm:$0xff] }
 0xa2c   : > { %2891 = vmatprep.subr.mxu1 %v2641_v55  ;;  %3207 = vmatpush1.msra.mxu0 %v3036_v56  ;;  %v2568_v55 = vld [vmem:[%s12594_s11 + $0x20] sm:$0xff]  ;;  %v3011_v56 = vld [vmem:[%s12596_s13 + $0x8] sm:$0xff] }
 0xa2d   : > { %2892 = vmatpush1.msra.mxu1 %v2640_v57  ;;  %3208 = vmatprep.subr.mxu0 %v3035_v58  ;;  %v2707_v57 = vld [vmem:[%s12594_s11 + $0x478] sm:$0xff]  ;;  %v2706_v58 = vld [vmem:[%s12594_s11 + $0x470] sm:$0xff] }
 0xa2e   : > { %2893 = vmatprep.subr.mxu1 %v2635_v59  ;;  %3209 = vmatpush1.msra.mxu0 %v3034_v60  ;;  %v2701_v59 = vld [vmem:[%s12594_s11 + $0x448] sm:$0xff]  ;;  %v2700_v60 = vld [vmem:[%s12594_s11 + $0x440] sm:$0xff] }
 0xa2f   : > { %2894 = vmatpush1.msra.mxu1 %v2634_v61  ;;  %3210 = vmatprep.subr.mxu0 %v3033_v63  ;;  %v2695_v61 = vld [vmem:[%s12594_s11 + $0x418] sm:$0xff]  ;;  %v2694_v63 = vld [vmem:[%s12594_s11 + $0x410] sm:$0xff] }
 0xa30   : > { %2895 = vmatprep.subr.mxu1 %v2629_v0  ;;  %3211 = vmatpush1.msra.mxu0 %v3032_v1  ;;  %v2689_v0 = vld [vmem:[%s12594_s11 + $0x3e8] sm:$0xff]  ;;  %v2688_v1 = vld [vmem:[%s12594_s11 + $0x3e0] sm:$0xff] }
 0xa31   : > { %2896 = vmatpush1.msra.mxu1 %v2628_v2  ;;  %3212 = vmatprep.subr.mxu0 %v3031_v3  ;;  %v2683_v2 = vld [vmem:[%s12594_s11 + $0x3b8] sm:$0xff]  ;;  %v2682_v3 = vld [vmem:[%s12594_s11 + $0x3b0] sm:$0xff] }
 0xa32   : > { %2897 = vmatprep.subr.mxu1 %v2623_v4  ;;  %3213 = vmatpush1.msra.mxu0 %v3030_v5  ;;  %v2677_v4 = vld [vmem:[%s12594_s11 + $0x388] sm:$0xff]  ;;  %v2676_v5 = vld [vmem:[%s12594_s11 + $0x380] sm:$0xff] }
 0xa33   : > { %2898 = vmatpush1.msra.mxu1 %v2622_v9  ;;  %3214 = vmatprep.subr.mxu0 %v3029_v10  ;;  %v2671_v9 = vld [vmem:[%s12594_s11 + $0x358] sm:$0xff]  ;;  %v2670_v10 = vld [vmem:[%s12594_s11 + $0x350] sm:$0xff] }
 0xa34   : > { %2899 = vmatprep.subr.mxu1 %v2617_v53  ;;  %3215 = vmatpush1.msra.mxu0 %v3028_v6  ;;  %v2665_v53 = vld [vmem:[%s12594_s11 + $0x328] sm:$0xff]  ;;  %v2664_v6 = vld [vmem:[%s12594_s11 + $0x320] sm:$0xff] }
 0xa35   : > { %2900 = vmatpush1.msra.mxu1 %v2616_v11  ;;  %3216 = vmatprep.subr.mxu0 %v3027_v14  ;;  %v3105_v11 = vld [vmem:[%s12596_s13 + $0x2f8] sm:$0xff]  ;;  %v3104_v14 = vld [vmem:[%s12596_s13 + $0x2f0] sm:$0xff] }
 0xa36   : > { %2901 = vmatprep.subr.mxu1 %v2611_v22  ;;  %3217 = vmatpush1.msra.mxu0 %v3026_v23  ;;  %v3103_v22 = vld [vmem:[%s12596_s13 + $0x2e8] sm:$0xff]  ;;  %v3102_v23 = vld [vmem:[%s12596_s13 + $0x2e0] sm:$0xff] }
 0xa37   : > { %2902 = vmatpush1.msra.mxu1 %v2610_v24  ;;  %3218 = vmatprep.subr.mxu0 %v3025_v25  ;;  %v3101_v24 = vld [vmem:[%s12596_s13 + $0x2d8] sm:$0xff]  ;;  %v3100_v25 = vld [vmem:[%s12596_s13 + $0x2d0] sm:$0xff] }
 0xa38   : > { %2903 = vmatprep.subr.mxu1 %v2605_v26  ;;  %3219 = vmatpush1.msra.mxu0 %v3024_v29  ;;  %v3098_v26 = vld [vmem:[%s12596_s13 + $0x2c0] sm:$0xff]  ;;  %v3097_v29 = vld [vmem:[%s12596_s13 + $0x2b8] sm:$0xff] }
 0xa39   : > { %2904 = vmatpush1.msra.mxu1 %v2604_v13  ;;  %3220 = vmatprep.subr.mxu0 %v3023_v30  ;;  %v3096_v13 = vld [vmem:[%s12596_s13 + $0x2b0] sm:$0xff]  ;;  %v3095_v30 = vld [vmem:[%s12596_s13 + $0x2a8] sm:$0xff] }
 0xa3a   : > { %2905 = vmatprep.subr.mxu1 %v2599_v33  ;;  %3221 = vmatpush1.msra.mxu0 %v3022_v19  ;;  %v3094_v33 = vld [vmem:[%s12596_s13 + $0x2a0] sm:$0xff]  ;;  %v3093_v19 = vld [vmem:[%s12596_s13 + $0x298] sm:$0xff] }
 0xa3b   : > { %2906 = vmatpush1.msra.mxu1 %v2598_v20  ;;  %3222 = vmatprep.subr.mxu0 %v3021_v34  ;;  %v3092_v20 = vld [vmem:[%s12596_s13 + $0x290] sm:$0xff]  ;;  %v3091_v34 = vld [vmem:[%s12596_s13 + $0x288] sm:$0xff] }
 0xa3c   : > { %2907 = vmatprep.subr.mxu1 %v2593_v37  ;;  %3223 = vmatpush1.msra.mxu0 %v3020_v38  ;;  %v3090_v37 = vld [vmem:[%s12596_s13 + $0x280] sm:$0xff]  ;;  %v3089_v38 = vld [vmem:[%s12596_s13 + $0x278] sm:$0xff] }
 0xa3d   : > { %2908 = vmatpush1.msra.mxu1 %v2592_v32  ;;  %3224 = vmatprep.subr.mxu0 %v3019_v39  ;;  %v3088_v32 = vld [vmem:[%s12596_s13 + $0x270] sm:$0xff]  ;;  %v3087_v39 = vld [vmem:[%s12596_s13 + $0x268] sm:$0xff] }
 0xa3e   : > { %2909 = vmatprep.subr.mxu1 %v2587_v36  ;;  %3225 = vmatpush1.msra.mxu0 %v3018_v40  ;;  %v3086_v36 = vld [vmem:[%s12596_s13 + $0x260] sm:$0xff]  ;;  %v3085_v40 = vld [vmem:[%s12596_s13 + $0x258] sm:$0xff] }
 0xa3f   : > { %2910 = vmatpush1.msra.mxu1 %v2586_v41  ;;  %3226 = vmatprep.subr.mxu0 %v3017_v42  ;;  %v3084_v41 = vld [vmem:[%s12596_s13 + $0x250] sm:$0xff]  ;;  %v3010_v42 = vld [vmem:[%s12596_s13] sm:$0xff] }
 0xa40   : > { %2911 = vmatprep.subr.mxu1 %v2581_v43  ;;  %3227 = vmatpush1.msra.mxu0 %v3016_v45  ;;  %v3083_v43 = vld [vmem:[%s12596_s13 + $0x248] sm:$0xff]  ;;  %v3073_v45 = vld [vmem:[%s12596_s13 + $0x1f8] sm:$0xff] }
 0xa41   : > { %2912 = vmatpush1.msra.mxu1 %v2580_v21  ;;  %3228 = vmatprep.subr.mxu0 %v3015_v18  ;;  %v3082_v21 = vld [vmem:[%s12596_s13 + $0x240] sm:$0xff]  ;;  %v3072_v18 = vld [vmem:[%s12596_s13 + $0x1f0] sm:$0xff] }
 0xa42   : > { %2913 = vmatprep.subr.mxu1 %v2575_v48  ;;  %3229 = vmatpush1.msra.mxu0 %v3014_v50  ;;  %v3081_v48 = vld [vmem:[%s12596_s13 + $0x238] sm:$0xff]  ;;  %v3071_v50 = vld [vmem:[%s12596_s13 + $0x1e8] sm:$0xff] }
 0xa43   : > { %2914 = vmatpush1.msra.mxu1 %v2574_v51  ;;  %3230 = vmatprep.subr.mxu0 %v3013_v52  ;;  %v3080_v51 = vld [vmem:[%s12596_s13 + $0x230] sm:$0xff]  ;;  %v3070_v52 = vld [vmem:[%s12596_s13 + $0x1e0] sm:$0xff] }
 0xa44   : > { %2915 = vmatprep.subr.mxu1 %v2569_v31  ;;  %3231 = vmatpush1.msra.mxu0 %v3012_v54  ;;  %v3079_v31 = vld [vmem:[%s12596_s13 + $0x228] sm:$0xff]  ;;  %v3069_v54 = vld [vmem:[%s12596_s13 + $0x1d8] sm:$0xff] }
 0xa45   : > { %2916 = vmatpush1.msra.mxu1 %v2568_v55  ;;  %3232 = vmatprep.subr.mxu0 %v3011_v56  ;;  %v3078_v55 = vld [vmem:[%s12596_s13 + $0x220] sm:$0xff]  ;;  %v3068_v56 = vld [vmem:[%s12596_s13 + $0x1d0] sm:$0xff] }
 0xa46   : > { %2933 = vmatprep.subr.mxu1 %v2707_v57  ;;  %3233 = vmatpush1.msra.mxu0 %v3010_v42  ;;  %v3077_v57 = vld [vmem:[%s12596_s13 + $0x218] sm:$0xff]  ;;  %v3123_v42 = vld [vmem:[%s12596_s13 + $0x388] sm:$0xff] }
 0xa47   : > { %2934 = vmatpush2.msra.mxu1 %v2706_v58  ;;  %3234 = vmatprep.subr.mxu0 %v3073_v45  ;;  %v3067_v58 = vld [vmem:[%s12596_s13 + $0x1c8] sm:$0xff]  ;;  %v3122_v45 = vld [vmem:[%s12596_s13 + $0x380] sm:$0xff] }
 0xa48   : > { %2935 = vmatprep.subr.mxu1 %v2701_v59  ;;  %3235 = vmatpush2.msra.mxu0 %v3072_v18  ;;  %v3066_v59 = vld [vmem:[%s12596_s13 + $0x1c0] sm:$0xff]  ;;  %v3121_v18 = vld [vmem:[%s12596_s13 + $0x378] sm:$0xff] }
 0xa49   : > { %2936 = vmatpush2.msra.mxu1 %v2700_v60  ;;  %3236 = vmatprep.subr.mxu0 %v3071_v50  ;;  %v3076_v60 = vld [vmem:[%s12596_s13 + $0x210] sm:$0xff] }
 0xa4a   : > { %2937 = vmatprep.subr.mxu1 %v2695_v61  ;;  %3237 = vmatpush2.msra.mxu0 %v3070_v52  ;;  %v3065_v61 = vld [vmem:[%s12596_s13 + $0x1b8] sm:$0xff]  ;;  %v3120_v50 = vld [vmem:[%s12596_s13 + $0x370] sm:$0xff]  ;;  %v3119_v52 = vld [vmem:[%s12596_s13 + $0x368] sm:$0xff] }
 0xa4b   : > { %2938 = vmatpush2.msra.mxu1 %v2694_v63  ;;  %3238 = vmatprep.subr.mxu0 %v3069_v54  ;;  %v3075_v63 = vld [vmem:[%s12596_s13 + $0x208] sm:$0xff]  ;;  %v3118_v54 = vld [vmem:[%s12596_s13 + $0x360] sm:$0xff] }
 0xa4c   : > { %2939 = vmatprep.subr.mxu1 %v2689_v0  ;;  %3239 = vmatpush2.msra.mxu0 %v3068_v56  ;;  %v3064_v0 = vld [vmem:[%s12596_s13 + $0x1b0] sm:$0xff]  ;;  %v3117_v56 = vld [vmem:[%s12596_s13 + $0x358] sm:$0xff] }
 0xa4d   : > { %2940 = vmatpush2.msra.mxu1 %v2688_v1  ;;  %3240 = vmatprep.subr.mxu0 %v3067_v58  ;;  %v3063_v1 = vld [vmem:[%s12596_s13 + $0x1a8] sm:$0xff]  ;;  %v3169_v58 = vld [vmem:[%s12596_s13 + $0x4f8] sm:$0xff] }
 0xa4e   : > { %2941 = vmatprep.subr.mxu1 %v2683_v2  ;;  %3241 = vmatpush2.msra.mxu0 %v3066_v59  ;;  %v3074_v2 = vld [vmem:[%s12596_s13 + $0x200] sm:$0xff]  ;;  %v3115_v59 = vld [vmem:[%s12596_s13 + $0x348] sm:$0xff] }
 0xa4f   : > { %2942 = vmatpush2.msra.mxu1 %v2682_v3  ;;  %3242 = vmatprep.subr.mxu0 %v3065_v61  ;;  %v3062_v3 = vld [vmem:[%s12596_s13 + $0x1a0] sm:$0xff]  ;;  %v3113_v61 = vld [vmem:[%s12596_s13 + $0x338] sm:$0xff] }
 0xa50   : > { %2943 = vmatprep.subr.mxu1 %v2677_v4  ;;  %v3137_v4 = vld [vmem:[%s12596_s13 + $0x3f8] sm:$0xff]  ;;  %3243 = vmatpush2.msra.mxu0 %v3064_v0  ;;  %v3111_v0 = vld [vmem:[%s12596_s13 + $0x328] sm:$0xff] }
 0xa51   : > { %2944 = vmatpush2.msra.mxu1 %v2676_v5  ;;  %v3061_v5 = vld [vmem:[%s12596_s13 + $0x198] sm:$0xff]  ;;  %3244 = vmatprep.subr.mxu0 %v3063_v1  ;;  %v3110_v1 = vld [vmem:[%s12596_s13 + $0x320] sm:$0xff] }
 0xa52   : > { %2945 = vmatprep.subr.mxu1 %v2671_v9  ;;  %v3136_v9 = vld [vmem:[%s12596_s13 + $0x3f0] sm:$0xff]  ;;  %3245 = vmatpush2.msra.mxu0 %v3062_v3 }
 0xa53   : > { %2946 = vmatpush2.msra.mxu1 %v2670_v10  ;;  %v3060_v10 = vld [vmem:[%s12596_s13 + $0x190] sm:$0xff]  ;;  %3246 = vmatprep.subr.mxu0 %v3061_v5  ;;  %v3106_v5 = vld [vmem:[%s12596_s13 + $0x300] sm:$0xff] }
 0xa54   : > { %2947 = vmatprep.subr.mxu1 %v2665_v53  ;;  %v3135_v53 = vld [vmem:[%s12596_s13 + $0x3e8] sm:$0xff]  ;;  %3247 = vmatpush2.msra.mxu0 %v3060_v10  ;;  %v3108_v3 = vld [vmem:[%s12596_s13 + $0x310] sm:$0xff] }
 0xa55   : > { %2948 = vmatpush2.msra.mxu1 %v2664_v6  ;;  %v3059_v6 = vld [vmem:[%s12596_s13 + $0x188] sm:$0xff] }
 0xa56   : > { %2950 = vmatmul.mubr.f32.vlgmr.msra.gmra.mxu1 %v9310_v44  ;;  %3273 = vmatprep.subr.mxu1 %v3105_v11  ;;  %v3099_v44 = vld [vmem:[%s12596_s13 + $0x2c8] sm:$0xff]  ;;  %v3134_v11 = vld [vmem:[%s12596_s13 + $0x3e0] sm:$0xff] }
 0xa57   : > { %3274 = vmatpush1.msra.mxu1 %v3104_v14  ;;  %v3058_v14 = vld [vmem:[%s12596_s13 + $0x180] sm:$0xff]  ;;  %3248 = vmatprep.subr.mxu0 %v3059_v6 }
 0xa58   : > { %3275 = vmatprep.subr.mxu1 %v3103_v22  ;;  %v3133_v22 = vld [vmem:[%s12596_s13 + $0x3d8] sm:$0xff]  ;;  %3249 = vmatpush2.msra.mxu0 %v3058_v14 }
 0xa59   : > { %3276 = vmatpush1.msra.mxu1 %v3102_v23  ;;  %v3057_v23 = vld [vmem:[%s12596_s13 + $0x178] sm:$0xff] }
 0xa5a   : > { %3277 = vmatprep.subr.mxu1 %v3101_v24  ;;  %v3132_v24 = vld [vmem:[%s12596_s13 + $0x3d0] sm:$0xff]  ;;  %3250 = vmatprep.subr.mxu0 %v3057_v23 }
 0xa5b   : > { %3278 = vmatpush1.msra.mxu1 %v3100_v25  ;;  %v3056_v25 = vld [vmem:[%s12596_s13 + $0x170] sm:$0xff] }
 0xa5c   : > { %3279 = vmatprep.subr.mxu1 %v3099_v44  ;;  %v3131_v44 = vld [vmem:[%s12596_s13 + $0x3c8] sm:$0xff]  ;;  %3251 = vmatpush2.msra.mxu0 %v3056_v25 }
 0xa5d   : > { %3280 = vmatpush1.msra.mxu1 %v3098_v26  ;;  %v3055_v26 = vld [vmem:[%s12596_s13 + $0x168] sm:$0xff] }
 0xa5e   : > { %3281 = vmatprep.subr.mxu1 %v3097_v29  ;;  %v3130_v29 = vld [vmem:[%s12596_s13 + $0x3c0] sm:$0xff]  ;;  %3252 = vmatprep.subr.mxu0 %v3055_v26 }
 0xa5f   : > { %3282 = vmatpush1.msra.mxu1 %v3096_v13  ;;  %v3054_v13 = vld [vmem:[%s12596_s13 + $0x160] sm:$0xff] }
 0xa60   : > { %3283 = vmatprep.subr.mxu1 %v3095_v30  ;;  %v3129_v30 = vld [vmem:[%s12596_s13 + $0x3b8] sm:$0xff]  ;;  %3253 = vmatpush2.msra.mxu0 %v3054_v13 }
 0xa61   : > { %3284 = vmatpush1.msra.mxu1 %v3094_v33  ;;  %v3053_v33 = vld [vmem:[%s12596_s13 + $0x158] sm:$0xff] }
 0xa62   : > { %3285 = vmatprep.subr.mxu1 %v3093_v19  ;;  %v3128_v19 = vld [vmem:[%s12596_s13 + $0x3b0] sm:$0xff]  ;;  %3254 = vmatprep.subr.mxu0 %v3053_v33 }
 0xa63   : > { %3286 = vmatpush1.msra.mxu1 %v3092_v20  ;;  %v3052_v20 = vld [vmem:[%s12596_s13 + $0x150] sm:$0xff] }
 0xa64   : > { %3287 = vmatprep.subr.mxu1 %v3091_v34  ;;  %v3127_v34 = vld [vmem:[%s12596_s13 + $0x3a8] sm:$0xff]  ;;  %3255 = vmatpush2.msra.mxu0 %v3052_v20 }
 0xa65   : > { %3288 = vmatpush1.msra.mxu1 %v3090_v37  ;;  %v3051_v37 = vld [vmem:[%s12596_s13 + $0x148] sm:$0xff] }
 0xa66   : > { %3289 = vmatprep.subr.mxu1 %v3089_v38  ;;  %v3126_v38 = vld [vmem:[%s12596_s13 + $0x3a0] sm:$0xff]  ;;  %3256 = vmatprep.subr.mxu0 %v3051_v37 }
 0xa67   : > { %3290 = vmatpush1.msra.mxu1 %v3088_v32  ;;  %v3050_v32 = vld [vmem:[%s12596_s13 + $0x140] sm:$0xff] }
 0xa68   : > { %3291 = vmatprep.subr.mxu1 %v3087_v39  ;;  %v3125_v39 = vld [vmem:[%s12596_s13 + $0x398] sm:$0xff]  ;;  %3257 = vmatpush2.msra.mxu0 %v3050_v32 }
 0xa69   : > { %3292 = vmatpush1.msra.mxu1 %v3086_v36  ;;  %v3049_v36 = vld [vmem:[%s12596_s13 + $0x138] sm:$0xff] }
 0xa6a   : > { %3293 = vmatprep.subr.mxu1 %v3085_v40  ;;  %v3124_v40 = vld [vmem:[%s12596_s13 + $0x390] sm:$0xff]  ;;  %3258 = vmatprep.subr.mxu0 %v3049_v36 }
 0xa6b   : > { %3294 = vmatpush1.msra.mxu1 %v3084_v41  ;;  %v3048_v41 = vld [vmem:[%s12596_s13 + $0x130] sm:$0xff] }
 0xa6c   : > { %3295 = vmatprep.subr.mxu1 %v3083_v43  ;;  %v3047_v43 = vld [vmem:[%s12596_s13 + $0x128] sm:$0xff]  ;;  %3259 = vmatpush2.msra.mxu0 %v3048_v41 }
 0xa6d   : > { %3296 = vmatpush1.msra.mxu1 %v3082_v21  ;;  %v3046_v21 = vld [vmem:[%s12596_s13 + $0x120] sm:$0xff]  ;;  %3260 = vmatprep.subr.mxu0 %v3047_v43 }
 0xa6e   : > { %3297 = vmatprep.subr.mxu1 %v3081_v48  ;;  %v3045_v48 = vld [vmem:[%s12596_s13 + $0x118] sm:$0xff]  ;;  %3261 = vmatpush2.msra.mxu0 %v3046_v21 }
 0xa6f   : > { %3298 = vmatpush1.msra.mxu1 %v3080_v51  ;;  %v3044_v51 = vld [vmem:[%s12596_s13 + $0x110] sm:$0xff]  ;;  %3262 = vmatprep.subr.mxu0 %v3045_v48 }
 0xa70   : > { %3299 = vmatprep.subr.mxu1 %v3079_v31  ;;  %v3043_v31 = vld [vmem:[%s12596_s13 + $0x108] sm:$0xff]  ;;  %3263 = vmatpush2.msra.mxu0 %v3044_v51 }
 0xa71   : > { %3300 = vmatpush1.msra.mxu1 %v3078_v55  ;;  %v3042_v55 = vld [vmem:[%s12596_s13 + $0x100] sm:$0xff]  ;;  %3264 = vmatprep.subr.mxu0 %v3043_v31 }
 0xa72   : > { %3301 = vmatprep.subr.mxu1 %v3077_v57  ;;  %v3116_v57 = vld [vmem:[%s12596_s13 + $0x350] sm:$0xff]  ;;  %3265 = vmatpush2.msra.mxu0 %v3042_v55 }
 0xa73   : > { %3302 = vmatpush1.msra.mxu1 %v3076_v60  ;;  %v3114_v60 = vld [vmem:[%s12596_s13 + $0x340] sm:$0xff]  ;;  %3344 = vmatprep.subr.mxu0 %v3169_v58 }
 0xa74   : > { %3303 = vmatprep.subr.mxu1 %v3075_v63  ;;  %v3112_v63 = vld [vmem:[%s12596_s13 + $0x330] sm:$0xff] }
 0xa75   : > { %3304 = vmatpush1.msra.mxu1 %v3074_v2  ;;  %v3109_v2 = vld [vmem:[%s12596_s13 + $0x318] sm:$0xff] }
 0xa76   : > { %3305 = vmatprep.subr.mxu1 %v3137_v4  ;;  %v3107_v4 = vld [vmem:[%s12596_s13 + $0x308] sm:$0xff] }
 0xa77   : > { %3306 = vmatpush2.msra.mxu1 %v3136_v9  ;;  %v9846_v9 = vld [vmem:[%s12595_s12] ss:$2 sm:$0x3f] }
 0xa78   : > { %3307 = vmatprep.subr.mxu1 %v3135_v53  ;;  %v2713_v10 = vrot.slane %v9846_v9, %v8185_v16  ;;  %v2721_v53 = vrot.slane %v9846_v9, %v8626_v46  ;;  %v2717_v6 = vrot.slane %v9846_v9, %v8188_v17 }
 0xa79   : > { %3308 = vmatpush2.msra.mxu1 %v3134_v11  ;;  %v2725_v11 = vrot.slane %v9846_v9, %v8629_v47 }
 0xa7a   : > { %3309 = vmatprep.subr.mxu1 %v3133_v22 }
 0xa7b   : > { %3310 = vmatpush2.msra.mxu1 %v3132_v24 }
 0xa7c   : > { %3311 = vmatprep.subr.mxu1 %v3131_v44 }
 0xa7d   : > { %3312 = vmatpush2.msra.mxu1 %v3130_v29 }
 0xa7e   : > { %3313 = vmatprep.subr.mxu1 %v3129_v30 }
 0xa7f   : > { %3314 = vmatpush2.msra.mxu1 %v3128_v19 }
 0xa80   : > { %3315 = vmatprep.subr.mxu1 %v3127_v34 }
 0xa81   : > { %3316 = vmatpush2.msra.mxu1 %v3126_v38 }
 0xa82   : > { %3317 = vmatprep.subr.mxu1 %v3125_v39 }
 0xa83   : > { %3318 = vmatpush2.msra.mxu1 %v3124_v40 }
 0xa84   : > { %3319 = vmatprep.subr.mxu1 %v3123_v42 }
 0xa85   : > { %3320 = vmatpush2.msra.mxu1 %v3122_v45 }
 0xa86   : > { %3321 = vmatprep.subr.mxu1 %v3121_v18 }
 0xa87   : > { %3322 = vmatpush2.msra.mxu1 %v3120_v50 }
 0xa88   : > { %3323 = vmatprep.subr.mxu1 %v3119_v52 }
 0xa89   : > { %3324 = vmatpush2.msra.mxu1 %v3118_v54 }
 0xa8a   : > { %3325 = vmatprep.subr.mxu1 %v3117_v56 }
 0xa8b   : > { %3326 = vmatpush2.msra.mxu1 %v3116_v57 }
 0xa8c   : > { %3327 = vmatprep.subr.mxu1 %v3115_v59 }
 0xa8d   : > { %3328 = vmatpush2.msra.mxu1 %v3114_v60 }
 0xa8e   : > { %3329 = vmatprep.subr.mxu1 %v3113_v61 }
 0xa8f   : > { %3330 = vmatpush2.msra.mxu1 %v3112_v63 }
 0xa90   : > { %3331 = vmatprep.subr.mxu1 %v3111_v0 }
 0xa91   : > { %3332 = vmatpush2.msra.mxu1 %v3110_v1 }
 0xa92   : > { %3333 = vmatprep.subr.mxu1 %v3109_v2 }
 0xa93   : > { %3334 = vmatpush2.msra.mxu1 %v3108_v3  ;;  %v3168_v3 = vld [vmem:[%s12596_s13 + $0x4f0] sm:$0xff] }
 0xa94   : > { %3335 = vmatprep.subr.mxu1 %v3107_v4 }
 0xa95   : > { %3336 = vmatpush2.msra.mxu1 %v3106_v5  ;;  %v3167_v5 = vld [vmem:[%s12596_s13 + $0x4e8] sm:$0xff] }
 0xae6   : > { %v2809_v14 = vpop.f32.mrf.mxu1  ;;  %v2880_v22 = vpop.f32.mrf.mxu0 }
 0xae7   : > { %v2810_v23 = vadd.f32 %v2809_v14, %v2713_v10  ;;  %v2881_v24 = vadd.f32 %v2880_v22, %v2721_v53  ;;  %v3166_v10 = vld [vmem:[%s12596_s13 + $0x4e0] sm:$0xff]  ;;  %v3165_v53 = vld [vmem:[%s12596_s13 + $0x4d8] sm:$0xff] }
 0xae8   : > { %v2811_v25 = vpop.f32.mrf.mxu1  ;;  %v2882_v44 = vpop.f32.mrf.mxu0  ;;  %v3162_v14 = vld [vmem:[%s12596_s13 + $0x4c0] sm:$0xff]  ;;  %v3161_v22 = vld [vmem:[%s12596_s13 + $0x4b8] sm:$0xff] }
 0xae9   : > { %v2962_v26 = vmul.f32 0.044715, %v2810_v23  ;;  %v2964_v29 = vmul.f32 0.044715, %v2881_v24  ;;  %v2812_v13 = vadd.f32 %v2811_v25, %v2717_v6  ;;  %v2883_v30 = vadd.f32 %v2882_v44, %v2725_v11  ;;  %v3164_v6 = vld [vmem:[%s12596_s13 + $0x4d0] sm:$0xff]  ;;  %v3163_v11 = vld [vmem:[%s12596_s13 + $0x4c8] sm:$0xff] }
 0xaea   : > { %v2956_v61 = vmul.f32 0.5, %v2810_v23  ;;  %v2958_v0 = vmul.f32 0.5, %v2881_v24  ;;  %v3158_v25 = vld [vmem:[%s12596_s13 + $0x4a0] sm:$0xff]  ;;  %v3157_v44 = vld [vmem:[%s12596_s13 + $0x498] sm:$0xff] }
 0xaeb   : > { %v2968_v33 = vmul.f32 %v2962_v26, %v2810_v23  ;;  %v2970_v19 = vmul.f32 %v2964_v29, %v2881_v24  ;;  %v2963_v20 = vmul.f32 0.044715, %v2812_v13  ;;  %v2965_v34 = vmul.f32 0.044715, %v2883_v30  ;;  %v3156_v26 = vld [vmem:[%s12596_s13 + $0x490] sm:$0xff]  ;;  %v3155_v29 = vld [vmem:[%s12596_s13 + $0x488] sm:$0xff] }
 0xaec   : > { %v2957_v56 = vmul.f32 0.5, %v2812_v13  ;;  %v2959_v59 = vmul.f32 0.5, %v2883_v30 }
 0xaed   : > { %v2974_v37 = vmul.f32 %v2968_v33, %v2810_v23  ;;  %v2976_v38 = vmul.f32 %v2970_v19, %v2881_v24  ;;  %v2969_v32 = vmul.f32 %v2963_v20, %v2812_v13  ;;  %v2971_v39 = vmul.f32 %v2965_v34, %v2883_v30  ;;  %v3153_v33 = vld [vmem:[%s12596_s13 + $0x478] sm:$0xff]  ;;  %v3152_v34 = vld [vmem:[%s12596_s13 + $0x470] sm:$0xff] }
 0xaee   : > { %v2729_v19 = vrot.slane %v9846_v9, %v8608_v35 }
 0xaef   : > { %v2980_v36 = vadd.f32 %v2974_v37, %v2810_v23  ;;  %v2982_v40 = vadd.f32 %v2976_v38, %v2881_v24  ;;  %v2975_v41 = vmul.f32 %v2969_v32, %v2812_v13  ;;  %v2977_v42 = vmul.f32 %v2971_v39, %v2883_v30  ;;  %v3160_v23 = vld [vmem:[%s12596_s13 + $0x4b0] sm:$0xff]  ;;  %v3159_v24 = vld [vmem:[%s12596_s13 + $0x4a8] sm:$0xff]  ;;  %v3150_v32 = vld [vmem:[%s12596_s13 + $0x460] sm:$0xff] }
 0xaf0   : > { %v3151_v37 = vld [vmem:[%s12596_s13 + $0x468] sm:$0xff] }
 0xaf1   : > { %v2981_v43 = vadd.f32 %v2975_v41, %v2812_v13  ;;  %v2983_v45 = vadd.f32 %v2977_v42, %v2883_v30  ;;  %v2986_v21 = vmul.f32 0.7978846, %v2980_v36  ;;  %v2988_v18 = vmul.f32 0.7978846, %v2982_v40  ;;  %v3154_v13 = vld [vmem:[%s12596_s13 + $0x480] sm:$0xff]  ;;  %v3148_v40 = vld [vmem:[%s12596_s13 + $0x450] sm:$0xff] }
 0xaf2   : > { %v2733_v30 = vrot.slane %v9846_v9, %v8634_v49  ;;  %v3149_v9 = vld [vmem:[%s12596_s13 + $0x458] sm:$0xff]  ;;  %v3147_v42 = vld [vmem:[%s12596_s13 + $0x448] sm:$0xff] }
 0xaf3   : > { %v2987_v48 = vmul.f32 0.7978846, %v2981_v43  ;;  %v2989_v50 = vmul.f32 0.7978846, %v2983_v45  ;;  %7073 = vtanh.f32 %v2986_v21  ;;  %v3146_v43 = vld [vmem:[%s12596_s13 + $0x440] sm:$0xff]  ;;  %v3145_v21 = vld [vmem:[%s12596_s13 + $0x438] sm:$0xff] }
 0xaf4   : > { %7075 = vtanh.f32 %v2988_v18 }
 0xaf5   : > { %7077 = vtanh.f32 %v2987_v48  ;;  %v3144_v48 = vld [vmem:[%s12596_s13 + $0x430] sm:$0xff] }
 0xaf6   : > { %7079 = vtanh.f32 %v2989_v50  ;;  %v3143_v50 = vld [vmem:[%s12596_s13 + $0x428] sm:$0xff] }
 0xb00   : > { %v7074_v51 = vpop.eup %7073 }
 0xb01   : > { %v7076_v52 = vpop.eup %7075  ;;  %v2998_v54 = vadd.f32 1.0, %v7074_v51 }
 0xb02   : > { %v7078_v31 = vpop.eup %7077  ;;  %v3000_v58 = vadd.f32 1.0, %v7076_v52  ;;  %v3142_v52 = vld [vmem:[%s12596_s13 + $0x420] sm:$0xff] }
 0xb03   : > { %v7080_v55 = vpop.eup %7079  ;;  %v2999_v57 = vadd.f32 1.0, %v7078_v31  ;;  %v3004_v2 = vmul.f32 %v2998_v54, %v2956_v61  ;;  %v3141_v31 = vld [vmem:[%s12596_s13 + $0x418] sm:$0xff] }
 0xb04   : > { %v3001_v60 = vadd.f32 1.0, %v7080_v55  ;;  %v3006_v4 = vmul.f32 %v3000_v58, %v2958_v0  ;;  %v3199_v0 = vld [vmem:[%s12596_s13 + $0x5e8] sm:$0xff] }
 0xb05   : > { %v3005_v63 = vmul.f32 %v2999_v57, %v2957_v56  ;;  %v3140_v56 = vld [vmem:[%s12596_s13 + $0x410] sm:$0xff]  ;;  %v3139_v57 = vld [vmem:[%s12596_s13 + $0x408] sm:$0xff] }
 0xb06   : > { %v3007_v1 = vmul.f32 %v3001_v60, %v2959_v59  ;;  %v3138_v59 = vld [vmem:[%s12596_s13 + $0x400] sm:$0xff]  ;;  %v3201_v60 = vld [vmem:[%s12596_s13 + $0x5f8] sm:$0xff] }
 0xb07   : > { %3266 = vmatprep.mubr.f32.mxu0 %v3005_v63  ;;  %v3200_v63 = vld [vmem:[%s12596_s13 + $0x5f0] sm:$0xff] }
 0xb08   : > { %3337 = vmatprep.mubr.f32.mxu1 %v3007_v1  ;;  %3267 = vmatmul.mubr.f32.vlgmr.msra.gmra.mxu0 %v3004_v2  ;;  %v3198_v1 = vld [vmem:[%s12596_s13 + $0x5e0] sm:$0xff]  ;;  %v3197_v2 = vld [vmem:[%s12596_s13 + $0x5d8] sm:$0xff] }
 0xb09   : > { %3338 = vmatmul.mubr.f32.vlgmr.msra.gmra.mxu1 %v3006_v4  ;;  %3345 = vmatpush1.msra.mxu0 %v3168_v3  ;;  %v3196_v4 = vld [vmem:[%s12596_s13 + $0x5d0] sm:$0xff] }
 0xb0a   : > { %3346 = vmatprep.subr.mxu0 %v3167_v5  ;;  %v3195_v5 = vld [vmem:[%s12596_s13 + $0x5c8] sm:$0xff] }
 0xb0b   : > { %3347 = vmatpush1.msra.mxu0 %v3166_v10  ;;  %v3194_v10 = vld [vmem:[%s12596_s13 + $0x5c0] sm:$0xff] }
 0xb0c   : > { %3348 = vmatprep.subr.mxu0 %v3165_v53  ;;  %v3193_v53 = vld [vmem:[%s12596_s13 + $0x5b8] sm:$0xff] }
 0xb0d   : > { %3349 = vmatpush1.msra.mxu0 %v3164_v6  ;;  %v3192_v6 = vld [vmem:[%s12596_s13 + $0x5b0] sm:$0xff] }
 0xb0e   : > { %3350 = vmatprep.subr.mxu0 %v3163_v11 }
 0xb0f   : > { %3351 = vmatpush1.msra.mxu0 %v3162_v14  ;;  %v3191_v14 = vld [vmem:[%s12596_s13 + $0x5a8] sm:$0xff] }
 0xb10   : > { %3352 = vmatprep.subr.mxu0 %v3161_v22  ;;  %v3190_v22 = vld [vmem:[%s12596_s13 + $0x5a0] sm:$0xff] }
 0xb11   : > { %3353 = vmatpush1.msra.mxu0 %v3160_v23  ;;  %v3189_v23 = vld [vmem:[%s12596_s13 + $0x598] sm:$0xff] }
 0xb12   : > { %3354 = vmatprep.subr.mxu0 %v3159_v24 }
 0xb13   : > { %3355 = vmatpush1.msra.mxu0 %v3158_v25  ;;  %v3188_v25 = vld [vmem:[%s12596_s13 + $0x590] sm:$0xff] }
 0xb14   : > { %3356 = vmatprep.subr.mxu0 %v3157_v44  ;;  %v3187_v44 = vld [vmem:[%s12596_s13 + $0x588] sm:$0xff] }
 0xb15   : > { %3357 = vmatpush1.msra.mxu0 %v3156_v26 }
 0xb16   : > { %v2951_v20 = vpop.f32.mrf.mxu1  ;;  %3358 = vmatprep.subr.mxu0 %v3155_v29 }
 0xb17   : > { %3359 = vmatpush1.msra.mxu0 %v3154_v13  ;;  %v9922_v36 = vadd.f32 %v2951_v20, %v2729_v19  ;;  %v3186_v13 = vld [vmem:[%s12596_s13 + $0x580] sm:$0xff]  ;;  %v3184_v19 = vld [vmem:[%s12596_s13 + $0x570] sm:$0xff]  ;;  %v3183_v20 = vld [vmem:[%s12596_s13 + $0x568] sm:$0xff] }
 0xb18   : > { %v2953_v38 = vpop.f32.mrf.mxu1  ;;  %3360 = vmatprep.subr.mxu0 %v3153_v33  ;;  %v3185_v33 = vld [vmem:[%s12596_s13 + $0x578] sm:$0xff] }
 0xb19   : > { %v9917_v39 = vadd.f32 %v2953_v38, %v2733_v30  ;;  %3361 = vmatpush1.msra.mxu0 %v3152_v34  ;;  %v2966_v18 = vmul.f32 0.044715, %v9922_v36  ;;  %v3182_v34 = vld [vmem:[%s12596_s13 + $0x560] sm:$0xff]  ;;  %v3180_v38 = vld [vmem:[%s12596_s13 + $0x550] sm:$0xff] }
 0xb1a   : > { %3362 = vmatprep.subr.mxu0 %v3151_v37  ;;  %v3181_v37 = vld [vmem:[%s12596_s13 + $0x558] sm:$0xff] }
 0xb1b   : > { %v2967_v41 = vmul.f32 0.044715, %v9917_v39  ;;  %3363 = vmatpush1.msra.mxu0 %v3150_v32  ;;  %v2972_v55 = vmul.f32 %v2966_v18, %v9922_v36  ;;  %v2961_v26 = vmul.f32 0.5, %v9917_v39  ;;  %v3179_v32 = vld [vmem:[%s12596_s13 + $0x548] sm:$0xff] }
 0xb1c   : > { %3364 = vmatprep.subr.mxu0 %v3149_v9  ;;  %v3177_v9 = vld [vmem:[%s12596_s13 + $0x538] sm:$0xff] }
 0xb1d   : > { %v2973_v45 = vmul.f32 %v2967_v41, %v9917_v39  ;;  %3365 = vmatpush1.msra.mxu0 %v3148_v40  ;;  %v2978_v61 = vmul.f32 %v2972_v55, %v9922_v36  ;;  %v3176_v40 = vld [vmem:[%s12596_s13 + $0x530] sm:$0xff] }
 0xb1e   : > { %3366 = vmatprep.subr.mxu0 %v3147_v42  ;;  %v3175_v42 = vld [vmem:[%s12596_s13 + $0x528] sm:$0xff] }
 0xb1f   : > { %3367 = vmatpush1.msra.mxu0 %v3146_v43  ;;  %v2979_v51 = vmul.f32 %v2973_v45, %v9917_v39  ;;  %v2984_v3 = vadd.f32 %v2978_v61, %v9922_v36  ;;  %v3174_v43 = vld [vmem:[%s12596_s13 + $0x520] sm:$0xff]  ;;  %v3173_v45 = vld [vmem:[%s12596_s13 + $0x518] sm:$0xff] }
 0xb20   : > { %3368 = vmatprep.subr.mxu0 %v3145_v21  ;;  %v3172_v21 = vld [vmem:[%s12596_s13 + $0x510] sm:$0xff] }
 0xb21   : > { %3369 = vmatpush1.msra.mxu0 %v3144_v48  ;;  %v2985_v54 = vadd.f32 %v2979_v51, %v9917_v39  ;;  %v2990_v11 = vmul.f32 0.7978846, %v2984_v3  ;;  %v3178_v39 = vld [vmem:[%s12596_s13 + $0x540] sm:$0xff]  ;;  %v3171_v48 = vld [vmem:[%s12596_s13 + $0x508] sm:$0xff]  ;;  %v2960_v51 = vmul.f32 0.5, %v9922_v36 }
 0xb22   : > { %3370 = vmatprep.subr.mxu0 %v3143_v50  ;;  %v3170_v50 = vld [vmem:[%s12596_s13 + $0x500] sm:$0xff]  ;;  %v7133_v36 = vld [vmem:[#allocation2 + $0x8] sm:$0xff] }
 0xb23   : > { %3371 = vmatpush1.msra.mxu0 %v3142_v52  ;;  %v2991_v58 = vmul.f32 0.7978846, %v2985_v54 }
 0xb24   : > { %3372 = vmatprep.subr.mxu0 %v3141_v31 }
 0xb25   : > { %3373 = vmatpush1.msra.mxu0 %v3140_v56  ;;  %7081 = vtanh.f32 %v2991_v58 }
 0xb26   : > { %3374 = vmatprep.subr.mxu0 %v3139_v57  ;;  %7083 = vtanh.f32 %v2990_v11 }
 0xb27   : > { %3375 = vmatpush1.msra.mxu0 %v3138_v59  ;;  %v3417_v59 = vld [vmem:[%s12597_s14] ss:$2 sm:$0x3] }
 0xb28   : > { %3376 = vmatprep.subr.mxu0 %v3201_v60 }
 0xb29   : > { %3377 = vmatpush2.msra.mxu0 %v3200_v63  ;;  %v3426_v63 = vrot.slane %v3417_v59, %v8188_v17 }
 0xb2a   : > { %3378 = vmatprep.subr.mxu0 %v3199_v0 }
 0xb2b   : > { %3379 = vmatpush2.msra.mxu0 %v3198_v1 }
 0xb2c   : > { %3380 = vmatprep.subr.mxu0 %v3197_v2 }
 0xb2d   : > { %3381 = vmatpush2.msra.mxu0 %v3196_v4 }
 0xb2e   : > { %3382 = vmatprep.subr.mxu0 %v3195_v5  ;;  %v3422_v5 = vrot.slane %v3417_v59, %v8185_v16  ;;  %v6344_v59 = vld [vmem:[%s12588_s5 + $0x888] sm:$0xff] }
 0xb2f   : > { %3383 = vmatpush2.msra.mxu0 %v3194_v10 }
 0xb30   : > { %3384 = vmatprep.subr.mxu0 %v3193_v53 }
 0xb31   : > { %3385 = vmatpush2.msra.mxu0 %v3192_v6 }
 0xb32   : > { %v7082_v24 = vpop.eup %7081  ;;  %3386 = vmatprep.subr.mxu0 %v3191_v14  ;;  %v6423_v14 = vld [vmem:[%s12588_s5 + $0xb00] sm:$0xff] }
 0xb33   : > { %3387 = vmatpush2.msra.mxu0 %v3190_v22  ;;  %v3003_v29 = vadd.f32 1.0, %v7082_v24  ;;  %v7084_v41 = vpop.eup %7083  ;;  %v6422_v22 = vld [vmem:[%s12588_s5 + $0xaf8] sm:$0xff]  ;;  %3754 = vmatprep.subr.mxu1 %v6423_v14 }
 0xb34   : > { %3388 = vmatprep.subr.mxu0 %v3189_v23  ;;  %v3002_v18 = vadd.f32 1.0, %v7084_v41  ;;  %v6424_v23 = vld [vmem:[%s12588_s5 + $0xb08] sm:$0xff]  ;;  %v6414_v24 = vld [vmem:[%s12588_s5 + $0xab8] sm:$0xff]  ;;  %3755 = vmatpush1.msra.mxu1 %v6422_v22 }
 0xb35   : > { %3389 = vmatpush2.msra.mxu0 %v3188_v25  ;;  %v3009_v30 = vmul.f32 %v3003_v29, %v2961_v26  ;;  %v6416_v25 = vld [vmem:[%s12588_s5 + $0xac8] sm:$0xff]  ;;  %v6415_v26 = vld [vmem:[%s12588_s5 + $0xac0] sm:$0xff]  ;;  %v6405_v29 = vld [vmem:[%s12588_s5 + $0xa70] sm:$0xff]  ;;  %3756 = vmatprep.subr.mxu1 %v6414_v24 }
 0xb36   : > { %3390 = vmatprep.subr.mxu0 %v3187_v44  ;;  %v3008_v52 = vmul.f32 %v3002_v18, %v2960_v51  ;;  %v6413_v44 = vld [vmem:[%s12588_s5 + $0xab0] sm:$0xff]  ;;  %v6380_v41 = vld [vmem:[%s12588_s5 + $0x9a8] sm:$0xff]  ;;  %v6362_v51 = vld [vmem:[%s12588_s5 + $0x918] sm:$0xff] }
 0xb37   : > { %3391 = vmatpush2.msra.mxu0 %v3186_v13  ;;  %3408 = vmatprep.mubr.f32.mxu0 %v3009_v30  ;;  %v6407_v13 = vld [vmem:[%s12588_s5 + $0xa80] sm:$0xff]  ;;  %v6404_v30 = vld [vmem:[%s12588_s5 + $0xa68] sm:$0xff] }
 0xb38   : > { %3392 = vmatprep.subr.mxu0 %v3185_v33  ;;  %v6406_v33 = vld [vmem:[%s12588_s5 + $0xa78] sm:$0xff]  ;;  %3757 = vmatpush1.msra.mxu1 %v6413_v44  ;;  %v6368_v18 = vld [vmem:[%s12588_s5 + $0x948] sm:$0xff]  ;;  %v6315_v44 = vld [vmem:[%s12588_s5 + $0x7a0] sm:$0xff] }
 0xb39   : > { %3393 = vmatpush2.msra.mxu0 %v3184_v19  ;;  %v6396_v19 = vld [vmem:[%s12588_s5 + $0xa28] sm:$0xff]  ;;  %3758 = vmatprep.subr.mxu1 %v6405_v29 }
 0xb3a   : > { %3394 = vmatprep.subr.mxu0 %v3183_v20  ;;  %v6398_v20 = vld [vmem:[%s12588_s5 + $0xa38] sm:$0xff]  ;;  %3759 = vmatpush1.msra.mxu1 %v6404_v30  ;;  %v6316_v29 = vld [vmem:[%s12588_s5 + $0x7a8] sm:$0xff] }
 0xb3b   : > { %3395 = vmatpush2.msra.mxu0 %v3182_v34  ;;  %v6395_v34 = vld [vmem:[%s12588_s5 + $0xa20] sm:$0xff]  ;;  %3760 = vmatprep.subr.mxu1 %v6396_v19  ;;  %v6308_v30 = vld [vmem:[%s12588_s5 + $0x768] sm:$0xff] }
 0xb3c   : > { %3396 = vmatprep.subr.mxu0 %v3181_v37  ;;  %v6397_v37 = vld [vmem:[%s12588_s5 + $0xa30] sm:$0xff]  ;;  %3761 = vmatpush1.msra.mxu1 %v6395_v34  ;;  %v6307_v19 = vld [vmem:[%s12588_s5 + $0x760] sm:$0xff] }
 0xb3d   : > { %3397 = vmatpush2.msra.mxu0 %v3180_v38  ;;  %v6387_v38 = vld [vmem:[%s12588_s5 + $0x9e0] sm:$0xff] }
 0xb3e   : > { %3398 = vmatprep.subr.mxu0 %v3179_v32  ;;  %v6389_v32 = vld [vmem:[%s12588_s5 + $0x9f0] sm:$0xff]  ;;  %3762 = vmatprep.subr.mxu1 %v6387_v38  ;;  %v6299_v34 = vld [vmem:[%s12588_s5 + $0x720] sm:$0xff]  ;;  %v6298_v38 = vld [vmem:[%s12588_s5 + $0x718] sm:$0xff] }
 0xb3f   : > { %3399 = vmatpush2.msra.mxu0 %v3178_v39  ;;  %v6386_v39 = vld [vmem:[%s12588_s5 + $0x9d8] sm:$0xff] }
 0xb40   : > { %3400 = vmatprep.subr.mxu0 %v3177_v9  ;;  %v6388_v9 = vld [vmem:[%s12588_s5 + $0x9e8] sm:$0xff]  ;;  %3763 = vmatpush1.msra.mxu1 %v6386_v39  ;;  %v6290_v39 = vld [vmem:[%s12588_s5 + $0x6d8] sm:$0xff] }
 0xb41   : > { %3401 = vmatpush2.msra.mxu0 %v3176_v40  ;;  %v6378_v40 = vld [vmem:[%s12588_s5 + $0x998] sm:$0xff] }
 0xb42   : > { %3402 = vmatprep.subr.mxu0 %v3175_v42  ;;  %v6377_v42 = vld [vmem:[%s12588_s5 + $0x990] sm:$0xff]  ;;  %3764 = vmatprep.subr.mxu1 %v6378_v40 }
 0xb43   : > { %3403 = vmatpush2.msra.mxu0 %v3174_v43  ;;  %v6379_v43 = vld [vmem:[%s12588_s5 + $0x9a0] sm:$0xff]  ;;  %3765 = vmatpush1.msra.mxu1 %v6377_v42  ;;  %v6289_v40 = vld [vmem:[%s12588_s5 + $0x6d0] sm:$0xff] }
 0xb44   : > { %3404 = vmatprep.subr.mxu0 %v3173_v45  ;;  %v6369_v45 = vld [vmem:[%s12588_s5 + $0x950] sm:$0xff] }
 0xb45   : > { %3405 = vmatpush2.msra.mxu0 %v3172_v21  ;;  %v6371_v21 = vld [vmem:[%s12588_s5 + $0x960] sm:$0xff]  ;;  %3766 = vmatprep.subr.mxu1 %v6369_v45  ;;  %v6497_v42 = vld [vmem:[%s12588_s5 + $0xd50] sm:$0xff]  ;;  %v6496_v45 = vld [vmem:[%s12588_s5 + $0xd48] sm:$0xff] }
 0xb46   : > { %3406 = vmatprep.subr.mxu0 %v3171_v48  ;;  %v6370_v48 = vld [vmem:[%s12588_s5 + $0x958] sm:$0xff]  ;;  %3767 = vmatpush1.msra.mxu1 %v6368_v18  ;;  %v6488_v18 = vld [vmem:[%s12588_s5 + $0xd08] sm:$0xff] }
 0xb47   : > { %3407 = vmatpush2.msra.mxu0 %v3170_v50  ;;  %v6360_v50 = vld [vmem:[%s12588_s5 + $0x908] sm:$0xff] }
 0xb48   : > { %3409 = vmatmul.mubr.f32.vlgmr.msra.gmra.mxu0 %v3008_v52  ;;  %v6359_v52 = vld [vmem:[%s12588_s5 + $0x900] sm:$0xff]  ;;  %3768 = vmatprep.subr.mxu1 %v6360_v50 }
 0xb49   : > { %3769 = vmatpush1.msra.mxu1 %v6359_v52  ;;  %v6487_v50 = vld [vmem:[%s12588_s5 + $0xd00] sm:$0xff] }
 0xb4a   : > { %v6479_v52 = vld [vmem:[%s12588_s5 + $0xcc0] sm:$0xff] }
 0xbc8   : > { %v3268_v31 = vpop.f32.mrf.mxu0 }
 0xbc9   : > { %v3339_v54 = vpop.f32.mrf.mxu1 }
 0xbca   : > { %v3270_v55 = vpop.f32.mrf.mxu0  ;;  %v3340_v1 = vadd.f32 %v3339_v54, %v3268_v31  ;;  %v6361_v31 = vld [vmem:[%s12588_s5 + $0x910] sm:$0xff]  ;;  %v6351_v54 = vld [vmem:[%s12588_s5 + $0x8c0] sm:$0xff] }
 0xbcb   : > { %v3341_v56 = vpop.f32.mrf.mxu1  ;;  %3770 = vmatprep.subr.mxu1 %v6351_v54  ;;  %v6478_v54 = vld [vmem:[%s12588_s5 + $0xcb8] sm:$0xff] }
 0xbcc   : > { %v3342_v58 = vadd.f32 %v3341_v56, %v3270_v55  ;;  %v6353_v55 = vld [vmem:[%s12588_s5 + $0x8d0] sm:$0xff]  ;;  %v6350_v56 = vld [vmem:[%s12588_s5 + $0x8b8] sm:$0xff] }
 0xbcd   : > { %3771 = vmatpush1.msra.mxu1 %v6350_v56  ;;  %v6470_v56 = vld [vmem:[%s12588_s5 + $0xc78] sm:$0xff] }
 0xc08   : > { %v3410_v57 = vpop.f32.mrf.mxu0 }
 0xc09   : > { %v3411_v3 = vadd.f32 %v3410_v57, %v3340_v1  ;;  %v6352_v57 = vld [vmem:[%s12588_s5 + $0x8c8] sm:$0xff]  ;;  %v6334_v1 = vld [vmem:[%s12588_s5 + $0x838] sm:$0xff] }
 0xc0a   : > { %v3412_v60 = vpop.f32.mrf.mxu0 }
 0xc0b   : > { %v3413_v61 = vadd.f32 %v3412_v60, %v3342_v58  ;;  %v3415_v4 = vadd.f32 %v3411_v3, %v8986_v12  ;;  %v6425_v12 = vld [vmem:[%s12588_s5 + $0xb10] sm:$0xff]  ;;  %v6342_v58 = vld [vmem:[%s12588_s5 + $0x878] sm:$0xff] }
 0xc0c   : > { %3825 = vmatprep.subr.mxu0 %v6425_v12  ;;  %v6341_v60 = vld [vmem:[%s12588_s5 + $0x870] sm:$0xff]  ;;  %3772 = vmatprep.subr.mxu1 %v6342_v58  ;;  %v6326_v3 = vld [vmem:[%s12588_s5 + $0x7f8] sm:$0xff] }
 0xc0d   : > { %v3416_v0 = vadd.f32 %v7133_v36, %v3413_v61  ;;  %v10070_v10 = vadd.f32 %v3422_v5, %v3415_v4  ;;  %3826 = vmatpush1.msra.mxu0 %v6424_v23  ;;  %v6343_v61 = vld [vmem:[%s12588_s5 + $0x880] sm:$0xff]  ;;  %3773 = vmatpush1.msra.mxu1 %v6341_v60  ;;  %v6325_v5 = vld [vmem:[%s12588_s5 + $0x7f0] sm:$0xff] }
 0xc0e   : > { %3827 = vmatprep.subr.mxu0 %v6416_v25  ;;  %v6335_v36 = vld [vmem:[%s12588_s5 + $0x840] sm:$0xff]  ;;  %v6469_v58 = vld [vmem:[%s12588_s5 + $0xc70] sm:$0xff] }
 0xc0f   : > { %v3430_v2 = vadd.f32 %v3426_v63, %v3416_v0  ;;  %3828 = vmatpush1.msra.mxu0 %v6415_v26  ;;  %v6333_v63 = vld [vmem:[%s12588_s5 + $0x830] sm:$0xff]  ;;  %v6332_v0 = vld [vmem:[%s12588_s5 + $0x828] sm:$0xff]  ;;  %v6323_v4 = vld [vmem:[%s12588_s5 + $0x7e0] sm:$0xff] }
 0xc10   : > { %3829 = vmatprep.subr.mxu0 %v6407_v13  ;;  %3774 = vmatprep.subr.mxu1 %v6333_v63  ;;  %v6317_v26 = vld [vmem:[%s12588_s5 + $0x7b0] sm:$0xff]  ;;  %v6306_v13 = vld [vmem:[%s12588_s5 + $0x758] sm:$0xff]  ;;  %v6460_v63 = vld [vmem:[%s12588_s5 + $0xc28] sm:$0xff] }
 0xc11   : > { %3432 = vst.msk [vmem:[#allocation2 + $0x8] sm:$0xff] %vm800_vm0, %v3430_v2  ;;  %3830 = vmatpush1.msra.mxu0 %v6406_v33  ;;  %v6324_v2 = vld [vmem:[%s12588_s5 + $0x7e8] sm:$0xff]  ;;  %3775 = vmatpush1.msra.mxu1 %v6332_v0  ;;  %v6305_v33 = vld [vmem:[%s12588_s5 + $0x750] sm:$0xff] }
 0xc12   : > { %3831 = vmatprep.subr.mxu0 %v6398_v20  ;;  %3776 = vmatprep.subr.mxu1 %v6324_v2  ;;  %v6297_v20 = vld [vmem:[%s12588_s5 + $0x710] sm:$0xff]  ;;  %v6452_v0 = vld [vmem:[%s12588_s5 + $0xbe8] sm:$0xff]  ;;  %v6451_v2 = vld [vmem:[%s12588_s5 + $0xbe0] sm:$0xff] }
 0xc13   : > { %3832 = vmatpush1.msra.mxu0 %v6397_v37  ;;  %3777 = vmatpush1.msra.mxu1 %v6323_v4  ;;  %v6296_v37 = vld [vmem:[%s12588_s5 + $0x708] sm:$0xff]  ;;  %v6461_v60 = vld [vmem:[%s12588_s5 + $0xc30] sm:$0xff]  ;;  %v6443_v4 = vld [vmem:[%s12588_s5 + $0xba0] sm:$0xff] }
 0xc14   : > { %3833 = vmatprep.subr.mxu0 %v6389_v32  ;;  %3778 = vmatprep.subr.mxu1 %v6315_v44  ;;  %v6288_v32 = vld [vmem:[%s12588_s5 + $0x6c8] sm:$0xff]  ;;  %v6429_v44 = vld [vmem:[%s12588_s5 + $0xb30] sm:$0xff] }
 0xc15   : > { %3834 = vmatpush1.msra.mxu0 %v6388_v9  ;;  %v6287_v9 = vld [vmem:[%s12588_s5 + $0x6c0] sm:$0xff] }
 0xc16   : > { %3835 = vmatprep.subr.mxu0 %v6380_v41  ;;  %v6495_v41 = vld [vmem:[%s12588_s5 + $0xd40] sm:$0xff] }
 0xc17   : > { %3836 = vmatpush1.msra.mxu0 %v6379_v43  ;;  %v6494_v43 = vld [vmem:[%s12588_s5 + $0xd38] sm:$0xff] }
 0xc18   : > { %v10072_v53 = vld [vmem:[#allocation2 + $0x8] sm:$0xff]  ;;  %3837 = vmatprep.subr.mxu0 %v6371_v21  ;;  %v6486_v21 = vld [vmem:[%s12588_s5 + $0xcf8] sm:$0xff] }
 0xc19   : > { %v3439_v6 = vsel %vm800_vm0, %v10072_v53, 0.0  ;;  %3838 = vmatpush1.msra.mxu0 %v6370_v48  ;;  %v6485_v48 = vld [vmem:[%s12588_s5 + $0xcf0] sm:$0xff] }
 0xc1a   : > { %v3440_v11 = vadd.f32 %v3439_v6, %v10070_v10  ;;  %3839 = vmatprep.subr.mxu0 %v6362_v51  ;;  %v6477_v51 = vld [vmem:[%s12588_s5 + $0xcb0] sm:$0xff] }
 0xc1b   : > { %3840 = vmatpush1.msra.mxu0 %v6361_v31  ;;  %v6476_v31 = vld [vmem:[%s12588_s5 + $0xca8] sm:$0xff] }
 0xc1c   : > { %3441 = vadd.xlane.f32.xlu0 %v3440_v11  ;;  %3841 = vmatprep.subr.mxu0 %v6353_v55  ;;  %v6468_v55 = vld [vmem:[%s12588_s5 + $0xc68] sm:$0xff] }
 0xc1d   : > { %3842 = vmatpush1.msra.mxu0 %v6352_v57  ;;  %v6467_v57 = vld [vmem:[%s12588_s5 + $0xc60] sm:$0xff] }
 0xc1e   : > { %3843 = vmatprep.subr.mxu0 %v6344_v59  ;;  %v6459_v59 = vld [vmem:[%s12588_s5 + $0xc20] sm:$0xff] }
 0xc1f   : > { %3844 = vmatpush1.msra.mxu0 %v6343_v61  ;;  %v6458_v61 = vld [vmem:[%s12588_s5 + $0xc18] sm:$0xff] }
 0xc20   : > { %3845 = vmatprep.subr.mxu0 %v6335_v36  ;;  %v6450_v36 = vld [vmem:[%s12588_s5 + $0xbd8] sm:$0xff] }
 0xc21   : > { %3846 = vmatpush1.msra.mxu0 %v6334_v1  ;;  %v6449_v1 = vld [vmem:[%s12588_s5 + $0xbd0] sm:$0xff] }
 0xc22   : > { %3847 = vmatprep.subr.mxu0 %v6326_v3  ;;  %v6441_v3 = vld [vmem:[%s12588_s5 + $0xb90] sm:$0xff] }
 0xc23   : > { %3848 = vmatpush1.msra.mxu0 %v6325_v5  ;;  %v6440_v5 = vld [vmem:[%s12588_s5 + $0xb88] sm:$0xff] }
 0xc24   : > { %3849 = vmatprep.subr.mxu0 %v6317_v26 }
 0xc25   : > { %3850 = vmatpush1.msra.mxu0 %v6316_v29 }
 0xc26   : > { %3851 = vmatprep.subr.mxu0 %v6308_v30  ;;  %v6286_v30 = vld [vmem:[%s12587_s4 + $0x1] ss:$2 sm:$0x3] }
 0xc27   : > { %3852 = vmatpush1.msra.mxu0 %v6307_v19 }
 0xc28   : > { %3853 = vmatprep.subr.mxu0 %v6299_v34 }
 0xc29   : > { %3854 = vmatpush1.msra.mxu0 %v6298_v38  ;;  %v3478_v38 = vrot.slane %v6286_v30, %v8188_v17 }
 0xc2a   : > { %3855 = vmatprep.subr.mxu0 %v6290_v39 }
 0xc2b   : > { %3856 = vmatpush1.msra.mxu0 %v6289_v40 }
 0xc2c   : > { %3873 = vmatprep.subr.mxu0 %v6497_v42  ;;  %v6426_v42 = vld [vmem:[%s12588_s5 + $0xb18] sm:$0xff] }
 0xc2d   : > { %3874 = vmatpush2.msra.mxu0 %v6496_v45  ;;  %v6417_v45 = vld [vmem:[%s12588_s5 + $0xad0] sm:$0xff] }
 0xc2e   : > { %3875 = vmatprep.subr.mxu0 %v6488_v18  ;;  %v6409_v18 = vld [vmem:[%s12588_s5 + $0xa90] sm:$0xff] }
 0xc2f   : > { %3876 = vmatpush2.msra.mxu0 %v6487_v50  ;;  %v6408_v50 = vld [vmem:[%s12588_s5 + $0xa88] sm:$0xff] }
 0xc30   : > { %3877 = vmatprep.subr.mxu0 %v6479_v52  ;;  %v6400_v52 = vld [vmem:[%s12588_s5 + $0xa48] sm:$0xff] }
 0xc31   : > { %3878 = vmatpush2.msra.mxu0 %v6478_v54  ;;  %v6399_v54 = vld [vmem:[%s12588_s5 + $0xa40] sm:$0xff] }
 0xc32   : > { %3879 = vmatprep.subr.mxu0 %v6470_v56  ;;  %v6391_v56 = vld [vmem:[%s12588_s5 + $0xa00] sm:$0xff] }
 0xc33   : > { %3880 = vmatpush2.msra.mxu0 %v6469_v58  ;;  %v6390_v58 = vld [vmem:[%s12588_s5 + $0x9f8] sm:$0xff] }
 0xc34   : > { %3881 = vmatprep.subr.mxu0 %v6461_v60  ;;  %v6382_v60 = vld [vmem:[%s12588_s5 + $0x9b8] sm:$0xff] }
 0xc35   : > { %3882 = vmatpush2.msra.mxu0 %v6460_v63  ;;  %v6381_v63 = vld [vmem:[%s12588_s5 + $0x9b0] sm:$0xff] }
 0xc36   : > { %3883 = vmatprep.subr.mxu0 %v6452_v0  ;;  %v6373_v0 = vld [vmem:[%s12588_s5 + $0x970] sm:$0xff] }
 0xc37   : > { %3884 = vmatpush2.msra.mxu0 %v6451_v2  ;;  %v6372_v2 = vld [vmem:[%s12588_s5 + $0x968] sm:$0xff] }
 0xc38   : > { %3885 = vmatprep.subr.mxu0 %v6443_v4  ;;  %v6364_v4 = vld [vmem:[%s12588_s5 + $0x928] sm:$0xff] }
 0xca5   : > { %v3442_v6 = vpop.xlane.xlu0 %3441 }
 0xca6   : > { %v3443_v11 = vmul.f32 0.0052083335, %v3442_v6  ;;  %v6442_v6 = vld [vmem:[%s12588_s5 + $0xb98] sm:$0xff] }
 0xca7   : > { %3886 = vmatpush2.msra.mxu0 %v6442_v6  ;;  %v6363_v6 = vld [vmem:[%s12588_s5 + $0x920] sm:$0xff] }
 0xca8   : > { %v10222_v14 = vsub.f32 %v10070_v10, %v3443_v11  ;;  %v10225_v12 = vsub.f32 %v10072_v53, %v3443_v11  ;;  %v6314_v53 = vld [vmem:[%s12588_s5 + $0x798] sm:$0xff]  ;;  %v6432_v11 = vld [vmem:[%s12588_s5 + $0xb48] sm:$0xff] }
 0xca9   : > { %3779 = vmatpush1.msra.mxu1 %v6314_v53 }
 0xcaa   : > { %v3446_v22 = vmul.f32 %v10222_v14, %v10222_v14  ;;  %v3447_v23 = vmul.f32 %v10225_v12, %v10225_v12  ;;  %3780 = vmatprep.subr.mxu1 %v6306_v13  ;;  %v6285_v13 = vld [vmem:[%s12617_s23 + $0x1] ss:$2 sm:$0x3] }
 0xcab   : > { %3781 = vmatpush1.msra.mxu1 %v6305_v33  ;;  %v3465_v33 = vrot.slane %v6285_v13, %v8188_v17  ;;  %v3461_v19 = vrot.slane %v6285_v13, %v8185_v16  ;;  %v6337_v13 = vld [vmem:[%s12588_s5 + $0x850] sm:$0xff] }
 0xcac   : > { %v3448_v24 = vsel %vm800_vm0, %v3447_v23, 0.0  ;;  %3782 = vmatprep.subr.mxu1 %v6297_v20  ;;  %v6431_v23 = vld [vmem:[%s12588_s5 + $0xb40] sm:$0xff] }
 0xcad   : > { %v3449_v25 = vadd.f32 %v3448_v24, %v3446_v22  ;;  %3783 = vmatpush1.msra.mxu1 %v6296_v37  ;;  %v6434_v22 = vld [vmem:[%s12588_s5 + $0xb58] sm:$0xff]  ;;  %v6433_v24 = vld [vmem:[%s12588_s5 + $0xb50] sm:$0xff] }
 0xcae   : > { %3784 = vmatprep.subr.mxu1 %v6288_v32  ;;  %3887 = vmatprep.subr.mxu0 %v6434_v22  ;;  %v3474_v32 = vrot.slane %v6286_v30, %v8185_v16  ;;  %v6355_v22 = vld [vmem:[%s12588_s5 + $0x8e0] sm:$0xff] }
 0xcaf   : > { %3450 = vadd.xlane.f32.xlu1 %v3449_v25  ;;  %3785 = vmatpush1.msra.mxu1 %v6287_v9  ;;  %v6427_v25 = vld [vmem:[%s12588_s5 + $0xb20] sm:$0xff] }
 0xcb0   : > { %3802 = vmatprep.subr.mxu1 %v6495_v41  ;;  %3888 = vmatpush2.msra.mxu0 %v6433_v24  ;;  %v6354_v24 = vld [vmem:[%s12588_s5 + $0x8d8] sm:$0xff]  ;;  %v6339_v30 = vld [vmem:[%s12588_s5 + $0x860] sm:$0xff] }
 0xcb1   : > { %3803 = vmatpush2.msra.mxu1 %v6494_v43  ;;  %3967 = vmatprep.subr.mxu0 %v6429_v44  ;;  %v6420_v43 = vld [vmem:[%s12588_s5 + $0xae8] sm:$0xff]  ;;  %v6346_v44 = vld [vmem:[%s12588_s5 + $0x898] sm:$0xff] }
 0xcb2   : > { %3804 = vmatprep.subr.mxu1 %v6486_v21  ;;  %v6419_v21 = vld [vmem:[%s12588_s5 + $0xae0] sm:$0xff] }
 0xcb3   : > { %3805 = vmatpush2.msra.mxu1 %v6485_v48  ;;  %v6411_v48 = vld [vmem:[%s12588_s5 + $0xaa0] sm:$0xff] }
 0xcb4   : > { %3806 = vmatprep.subr.mxu1 %v6477_v51  ;;  %v6410_v51 = vld [vmem:[%s12588_s5 + $0xa98] sm:$0xff] }
 0xcb5   : > { %3807 = vmatpush2.msra.mxu1 %v6476_v31  ;;  %v6402_v31 = vld [vmem:[%s12588_s5 + $0xa58] sm:$0xff] }
 0xcb6   : > { %3808 = vmatprep.subr.mxu1 %v6468_v55  ;;  %v6401_v55 = vld [vmem:[%s12588_s5 + $0xa50] sm:$0xff] }
 0xcb7   : > { %3809 = vmatpush2.msra.mxu1 %v6467_v57  ;;  %v6393_v57 = vld [vmem:[%s12588_s5 + $0xa10] sm:$0xff] }
 0xcb8   : > { %3810 = vmatprep.subr.mxu1 %v6459_v59  ;;  %v6392_v59 = vld [vmem:[%s12588_s5 + $0xa08] sm:$0xff] }
 0xcb9   : > { %3811 = vmatpush2.msra.mxu1 %v6458_v61  ;;  %v6384_v61 = vld [vmem:[%s12588_s5 + $0x9c8] sm:$0xff] }
 0xcba   : > { %3812 = vmatprep.subr.mxu1 %v6450_v36  ;;  %v6383_v36 = vld [vmem:[%s12588_s5 + $0x9c0] sm:$0xff] }
 0xcbb   : > { %3813 = vmatpush2.msra.mxu1 %v6449_v1  ;;  %v6375_v1 = vld [vmem:[%s12588_s5 + $0x980] sm:$0xff] }
 0xcbc   : > { %3814 = vmatprep.subr.mxu1 %v6441_v3  ;;  %v6374_v3 = vld [vmem:[%s12588_s5 + $0x978] sm:$0xff] }
 0xcbd   : > { %3815 = vmatpush2.msra.mxu1 %v6440_v5  ;;  %v6366_v5 = vld [vmem:[%s12588_s5 + $0x938] sm:$0xff] }
 0xcbe   : > { %3816 = vmatprep.subr.mxu1 %v6432_v11  ;;  %v6365_v11 = vld [vmem:[%s12588_s5 + $0x930] sm:$0xff] }
 0xcbf   : > { %3817 = vmatpush2.msra.mxu1 %v6431_v23  ;;  %v6357_v23 = vld [vmem:[%s12588_s5 + $0x8f0] sm:$0xff] }
 0xcc0   : > { %3896 = vmatprep.subr.mxu1 %v6427_v25  ;;  %v6356_v25 = vld [vmem:[%s12588_s5 + $0x8e8] sm:$0xff] }
 0xd38   : > { %v3451_v26 = vpop.xlane.xlu1 %3450 }
 0xd39   : > { %v3452_v53 = vmul.f32 0.0052083335, %v3451_v26  ;;  %v6348_v26 = vld [vmem:[%s12588_s5 + $0x8a8] sm:$0xff] }
 0xd3b   : > { %v3453_v29 = vadd.f32 1e-06, %v3452_v53  ;;  %v6345_v53 = vld [vmem:[%s12588_s5 + $0x890] sm:$0xff] }
 0xd3d   : > { %7085 = vrsqrt.f32 %v3453_v29  ;;  %v6347_v29 = vld [vmem:[%s12588_s5 + $0x8a0] sm:$0xff] }
 0xd4a   : > { %v7086_v20 = vpop.eup %7085 }
 0xd4b   : > { %v3455_v34 = vmul.f32 %v7086_v20, %v10222_v14  ;;  %v3456_v37 = vmul.f32 %v7086_v20, %v10225_v12  ;;  %v6428_v14 = vld [vmem:[%s12588_s5 + $0xb28] sm:$0xff]  ;;  %v6418_v12 = vld [vmem:[%s12588_s5 + $0xad8] sm:$0xff] }
 0xd4c   : > { %v6328_v20 = vld [vmem:[%s12588_s5 + $0x808] sm:$0xff] }
 0xd4d   : > { %v3469_v39 = vmul.f32 %v3465_v33, %v3456_v37  ;;  %v3468_v9 = vmul.f32 %v3461_v19, %v3455_v34  ;;  %v6336_v33 = vld [vmem:[%s12588_s5 + $0x848] sm:$0xff]  ;;  %v6338_v19 = vld [vmem:[%s12588_s5 + $0x858] sm:$0xff]  ;;  %v6327_v37 = vld [vmem:[%s12588_s5 + $0x800] sm:$0xff] }
 0xd4e   : > { %v6330_v34 = vld [vmem:[%s12588_s5 + $0x818] sm:$0xff] }
 0xd4f   : > { %v10394_v40 = vadd.f32 %v3478_v38, %v3469_v39  ;;  %v10396_v41 = vadd.f32 %v3474_v32, %v3468_v9  ;;  %v6329_v38 = vld [vmem:[%s12588_s5 + $0x810] sm:$0xff]  ;;  %v6319_v32 = vld [vmem:[%s12588_s5 + $0x7c0] sm:$0xff]  ;;  %v6318_v9 = vld [vmem:[%s12588_s5 + $0x7b8] sm:$0xff] }
 0xd50   : > { %v6321_v39 = vld [vmem:[%s12588_s5 + $0x7d0] sm:$0xff] }
 0xd51   : > { %6505 = vmatprep.mubr.msk.f32.mxu1 %vm800_vm0, %v10394_v40  ;;  %6506 = vmatprep.mubr.msk.f32.mxu0 %vm800_vm0, %v10394_v40 }
 0xd52   : > { %3819 = vmatmul.mubr.f32.vlgmr.msra.gmra.mxu1 %v10396_v41  ;;  %3890 = vmatmul.mubr.f32.vlgmr.msra.gmra.mxu0 %v10396_v41 }
 0xd53   : > { %3897 = vmatpush1.msra.mxu1 %v6426_v42  ;;  %3968 = vmatpush1.msra.mxu0 %v6428_v14  ;;  %v6320_v42 = vld [vmem:[%s12588_s5 + $0x7c8] sm:$0xff]  ;;  %v6310_v14 = vld [vmem:[%s12588_s5 + $0x778] sm:$0xff] }
 0xd54   : > { %3898 = vmatprep.subr.mxu1 %v6418_v12  ;;  %6507 = vmatprep.mubr.msk.f32.mxu1 %vm800_vm0, %v10394_v40  ;;  %v6312_v12 = vld [vmem:[%s12588_s5 + $0x788] sm:$0xff] }
 0xd55   : > { %3969 = vmatprep.subr.mxu0 %v6420_v43  ;;  %6508 = vmatprep.mubr.msk.f32.mxu0 %vm800_vm0, %v10394_v40  ;;  %v6309_v43 = vld [vmem:[%s12588_s5 + $0x770] sm:$0xff] }
 0xd56   : > { %3899 = vmatpush1.msra.mxu1 %v6417_v45  ;;  %3970 = vmatpush1.msra.mxu0 %v6419_v21  ;;  %v6311_v45 = vld [vmem:[%s12588_s5 + $0x780] sm:$0xff]  ;;  %v6301_v21 = vld [vmem:[%s12588_s5 + $0x730] sm:$0xff] }
 0xd57   : > { %3900 = vmatprep.subr.mxu1 %v6409_v18  ;;  %3971 = vmatprep.subr.mxu0 %v6411_v48  ;;  %v6303_v18 = vld [vmem:[%s12588_s5 + $0x740] sm:$0xff]  ;;  %v6300_v48 = vld [vmem:[%s12588_s5 + $0x728] sm:$0xff] }
 0xd58   : > { %3901 = vmatpush1.msra.mxu1 %v6408_v50  ;;  %3972 = vmatpush1.msra.mxu0 %v6410_v51  ;;  %v6302_v50 = vld [vmem:[%s12588_s5 + $0x738] sm:$0xff]  ;;  %v6292_v51 = vld [vmem:[%s12588_s5 + $0x6e8] sm:$0xff] }
 0xd59   : > { %3902 = vmatprep.subr.mxu1 %v6400_v52  ;;  %3973 = vmatprep.subr.mxu0 %v6402_v31  ;;  %v6294_v52 = vld [vmem:[%s12588_s5 + $0x6f8] sm:$0xff]  ;;  %v6291_v31 = vld [vmem:[%s12588_s5 + $0x6e0] sm:$0xff] }
 0xd5a   : > { %3903 = vmatpush1.msra.mxu1 %v6399_v54  ;;  %3974 = vmatpush1.msra.mxu0 %v6401_v55  ;;  %v6293_v54 = vld [vmem:[%s12588_s5 + $0x6f0] sm:$0xff]  ;;  %v6499_v55 = vld [vmem:[%s12588_s5 + $0xd60] sm:$0xff] }
 0xd5b   : > { %3904 = vmatprep.subr.mxu1 %v6391_v56  ;;  %3975 = vmatprep.subr.mxu0 %v6393_v57  ;;  %v6501_v56 = vld [vmem:[%s12588_s5 + $0xd70] sm:$0xff]  ;;  %v6498_v57 = vld [vmem:[%s12588_s5 + $0xd58] sm:$0xff] }
 0xd5c   : > { %3905 = vmatpush1.msra.mxu1 %v6390_v58  ;;  %3976 = vmatpush1.msra.mxu0 %v6392_v59  ;;  %v6500_v58 = vld [vmem:[%s12588_s5 + $0xd68] sm:$0xff]  ;;  %v6490_v59 = vld [vmem:[%s12588_s5 + $0xd18] sm:$0xff] }
 0xd5d   : > { %3906 = vmatprep.subr.mxu1 %v6382_v60  ;;  %3977 = vmatprep.subr.mxu0 %v6384_v61  ;;  %v6492_v60 = vld [vmem:[%s12588_s5 + $0xd28] sm:$0xff]  ;;  %v6489_v61 = vld [vmem:[%s12588_s5 + $0xd10] sm:$0xff] }
 0xd5e   : > { %3907 = vmatpush1.msra.mxu1 %v6381_v63  ;;  %3978 = vmatpush1.msra.mxu0 %v6383_v36  ;;  %v6491_v63 = vld [vmem:[%s12588_s5 + $0xd20] sm:$0xff]  ;;  %v6481_v36 = vld [vmem:[%s12588_s5 + $0xcd0] sm:$0xff] }
 0xd5f   : > { %3908 = vmatprep.subr.mxu1 %v6373_v0  ;;  %3979 = vmatprep.subr.mxu0 %v6375_v1  ;;  %v6483_v0 = vld [vmem:[%s12588_s5 + $0xce0] sm:$0xff]  ;;  %v6480_v1 = vld [vmem:[%s12588_s5 + $0xcc8] sm:$0xff] }
 0xd60   : > { %3909 = vmatpush1.msra.mxu1 %v6372_v2  ;;  %3980 = vmatpush1.msra.mxu0 %v6374_v3  ;;  %v6482_v2 = vld [vmem:[%s12588_s5 + $0xcd8] sm:$0xff]  ;;  %v6472_v3 = vld [vmem:[%s12588_s5 + $0xc88] sm:$0xff] }
 0xd61   : > { %3910 = vmatprep.subr.mxu1 %v6364_v4  ;;  %3981 = vmatprep.subr.mxu0 %v6366_v5  ;;  %v6474_v4 = vld [vmem:[%s12588_s5 + $0xc98] sm:$0xff]  ;;  %v6471_v5 = vld [vmem:[%s12588_s5 + $0xc80] sm:$0xff] }
 0xd62   : > { %3911 = vmatpush1.msra.mxu1 %v6363_v6  ;;  %3982 = vmatpush1.msra.mxu0 %v6365_v11  ;;  %v6473_v6 = vld [vmem:[%s12588_s5 + $0xc90] sm:$0xff]  ;;  %v6463_v11 = vld [vmem:[%s12588_s5 + $0xc40] sm:$0xff] }
 0xd63   : > { %3912 = vmatprep.subr.mxu1 %v6355_v22  ;;  %3983 = vmatprep.subr.mxu0 %v6357_v23  ;;  %v6465_v22 = vld [vmem:[%s12588_s5 + $0xc50] sm:$0xff]  ;;  %v6462_v23 = vld [vmem:[%s12588_s5 + $0xc38] sm:$0xff] }
 0xd64   : > { %3913 = vmatpush1.msra.mxu1 %v6354_v24  ;;  %3984 = vmatpush1.msra.mxu0 %v6356_v25  ;;  %v6464_v24 = vld [vmem:[%s12588_s5 + $0xc48] sm:$0xff]  ;;  %v6454_v25 = vld [vmem:[%s12588_s5 + $0xbf8] sm:$0xff] }
 0xd65   : > { %3914 = vmatprep.subr.mxu1 %v6346_v44  ;;  %3985 = vmatprep.subr.mxu0 %v6348_v26  ;;  %v6456_v44 = vld [vmem:[%s12588_s5 + $0xc08] sm:$0xff]  ;;  %v6453_v26 = vld [vmem:[%s12588_s5 + $0xbf0] sm:$0xff] }
 0xd66   : > { %3915 = vmatpush1.msra.mxu1 %v6345_v53  ;;  %3986 = vmatpush1.msra.mxu0 %v6347_v29  ;;  %v6455_v53 = vld [vmem:[%s12588_s5 + $0xc00] sm:$0xff]  ;;  %v6445_v29 = vld [vmem:[%s12588_s5 + $0xbb0] sm:$0xff] }
 0xd67   : > { %3916 = vmatprep.subr.mxu1 %v6337_v13  ;;  %3987 = vmatprep.subr.mxu0 %v6339_v30  ;;  %v6447_v13 = vld [vmem:[%s12588_s5 + $0xbc0] sm:$0xff]  ;;  %v6444_v30 = vld [vmem:[%s12588_s5 + $0xba8] sm:$0xff] }
 0xd68   : > { %3917 = vmatpush1.msra.mxu1 %v6336_v33  ;;  %3988 = vmatpush1.msra.mxu0 %v6338_v19  ;;  %v6446_v33 = vld [vmem:[%s12588_s5 + $0xbb8] sm:$0xff]  ;;  %v6436_v19 = vld [vmem:[%s12588_s5 + $0xb68] sm:$0xff] }
 0xd69   : > { %3918 = vmatprep.subr.mxu1 %v6328_v20  ;;  %3989 = vmatprep.subr.mxu0 %v6330_v34  ;;  %v6438_v20 = vld [vmem:[%s12588_s5 + $0xb78] sm:$0xff]  ;;  %v6435_v34 = vld [vmem:[%s12588_s5 + $0xb60] sm:$0xff] }
 0xd6a   : > { %3919 = vmatpush1.msra.mxu1 %v6327_v37  ;;  %3990 = vmatpush1.msra.mxu0 %v6329_v38  ;;  %v6437_v37 = vld [vmem:[%s12588_s5 + $0xb70] sm:$0xff]  ;;  %v6430_v38 = vld [vmem:[%s12588_s5 + $0xb38] sm:$0xff] }
 0xd6b   : > { %3920 = vmatprep.subr.mxu1 %v6319_v32  ;;  %3991 = vmatprep.subr.mxu0 %v6321_v39  ;;  %v6421_v32 = vld [vmem:[%s12588_s5 + $0xaf0] sm:$0xff]  ;;  %v6412_v39 = vld [vmem:[%s12588_s5 + $0xaa8] sm:$0xff] }
 0xd6c   : > { %3921 = vmatpush1.msra.mxu1 %v6318_v9  ;;  %3992 = vmatpush1.msra.mxu0 %v6320_v42  ;;  %v6394_v9 = vld [vmem:[%s12588_s5 + $0xa18] sm:$0xff]  ;;  %v6385_v42 = vld [vmem:[%s12588_s5 + $0x9d0] sm:$0xff] }
 0xd6d   : > { %3922 = vmatprep.subr.mxu1 %v6310_v14  ;;  %3993 = vmatprep.subr.mxu0 %v6312_v12  ;;  %v6376_v14 = vld [vmem:[%s12588_s5 + $0x988] sm:$0xff]  ;;  %v6367_v12 = vld [vmem:[%s12588_s5 + $0x940] sm:$0xff] }
 0xd6e   : > { %3923 = vmatpush1.msra.mxu1 %v6309_v43  ;;  %3994 = vmatpush1.msra.mxu0 %v6311_v45  ;;  %v6358_v43 = vld [vmem:[%s12588_s5 + $0x8f8] sm:$0xff]  ;;  %v6349_v45 = vld [vmem:[%s12588_s5 + $0x8b0] sm:$0xff] }
 0xd6f   : > { %3924 = vmatprep.subr.mxu1 %v6301_v21  ;;  %3995 = vmatprep.subr.mxu0 %v6303_v18  ;;  %v6340_v21 = vld [vmem:[%s12588_s5 + $0x868] sm:$0xff]  ;;  %v6331_v18 = vld [vmem:[%s12588_s5 + $0x820] sm:$0xff] }
 0xd70   : > { %3925 = vmatpush1.msra.mxu1 %v6300_v48  ;;  %3996 = vmatpush1.msra.mxu0 %v6302_v50  ;;  %v6322_v48 = vld [vmem:[%s12588_s5 + $0x7d8] sm:$0xff]  ;;  %v6313_v50 = vld [vmem:[%s12588_s5 + $0x790] sm:$0xff] }
 0xd71   : > { %3926 = vmatprep.subr.mxu1 %v6292_v51  ;;  %3997 = vmatprep.subr.mxu0 %v6294_v52  ;;  %v6304_v51 = vld [vmem:[%s12588_s5 + $0x748] sm:$0xff]  ;;  %v6295_v52 = vld [vmem:[%s12588_s5 + $0x700] sm:$0xff] }
 0xd72   : > { %3927 = vmatpush1.msra.mxu1 %v6291_v31  ;;  %3998 = vmatpush1.msra.mxu0 %v6293_v54  ;;  %v6502_v31 = vld [vmem:[%s12588_s5 + $0xd78] sm:$0xff]  ;;  %v6493_v54 = vld [vmem:[%s12588_s5 + $0xd30] sm:$0xff] }
 0xd73   : > { %3944 = vmatprep.subr.mxu1 %v6499_v55  ;;  %4015 = vmatprep.subr.mxu0 %v6501_v56  ;;  %v6484_v55 = vld [vmem:[%s12588_s5 + $0xce8] sm:$0xff]  ;;  %v6475_v56 = vld [vmem:[%s12588_s5 + $0xca0] sm:$0xff] }
 0xd74   : > { %3945 = vmatpush2.msra.mxu1 %v6498_v57  ;;  %4016 = vmatpush2.msra.mxu0 %v6500_v58  ;;  %v6466_v57 = vld [vmem:[%s12588_s5 + $0xc58] sm:$0xff]  ;;  %v6457_v58 = vld [vmem:[%s12588_s5 + $0xc10] sm:$0xff] }
 0xd75   : > { %3946 = vmatprep.subr.mxu1 %v6490_v59  ;;  %4017 = vmatprep.subr.mxu0 %v6492_v60  ;;  %v6448_v59 = vld [vmem:[%s12588_s5 + $0xbc8] sm:$0xff]  ;;  %v6439_v60 = vld [vmem:[%s12588_s5 + $0xb80] sm:$0xff] }
 0xd76   : > { %3947 = vmatpush2.msra.mxu1 %v6489_v61  ;;  %4018 = vmatpush2.msra.mxu0 %v6491_v63  ;;  %v10800_v61 = vld [vmem:[%s12589_s6 + $0x1] ss:$2 sm:$0xff] }
 0xd77   : > { %3948 = vmatprep.subr.mxu1 %v6481_v36  ;;  %4019 = vmatprep.subr.mxu0 %v6483_v0  ;;  %v3717_v63 = vrot.slane %v10800_v61, %v8626_v46  ;;  %v3709_v36 = vrot.slane %v10800_v61, %v8185_v16  ;;  %v3713_v0 = vrot.slane %v10800_v61, %v8188_v17 }
 0xd78   : > { %3949 = vmatpush2.msra.mxu1 %v6480_v1  ;;  %4020 = vmatpush2.msra.mxu0 %v6482_v2 }
 0xd79   : > { %3950 = vmatprep.subr.mxu1 %v6472_v3  ;;  %4021 = vmatprep.subr.mxu0 %v6474_v4 }
 0xd7a   : > { %3951 = vmatpush2.msra.mxu1 %v6471_v5  ;;  %4022 = vmatpush2.msra.mxu0 %v6473_v6 }
 0xd7b   : > { %3952 = vmatprep.subr.mxu1 %v6463_v11  ;;  %4023 = vmatprep.subr.mxu0 %v6465_v22  ;;  %v3721_v11 = vrot.slane %v10800_v61, %v8629_v47 }
 0xd7c   : > { %3953 = vmatpush2.msra.mxu1 %v6462_v23  ;;  %4024 = vmatpush2.msra.mxu0 %v6464_v24  ;;  %v3725_v23 = vrot.slane %v10800_v61, %v8608_v35 }
 0xd7d   : > { %3954 = vmatprep.subr.mxu1 %v6454_v25  ;;  %4025 = vmatprep.subr.mxu0 %v6456_v44 }
 0xd7e   : > { %3955 = vmatpush2.msra.mxu1 %v6453_v26  ;;  %4026 = vmatpush2.msra.mxu0 %v6455_v53 }
 0xd7f   : > { %3956 = vmatprep.subr.mxu1 %v6445_v29  ;;  %4027 = vmatprep.subr.mxu0 %v6447_v13 }
 0xd80   : > { %3957 = vmatpush2.msra.mxu1 %v6444_v30  ;;  %4028 = vmatpush2.msra.mxu0 %v6446_v33 }
 0xd81   : > { %3958 = vmatprep.subr.mxu1 %v6436_v19  ;;  %4029 = vmatprep.subr.mxu0 %v6438_v20 }
 0xd82   : > { %3959 = vmatpush2.msra.mxu1 %v6435_v34  ;;  %4030 = vmatpush2.msra.mxu0 %v6437_v37 }
 0xd83   : > { %3961 = vmatmul.mubr.f32.vlgmr.msra.gmra.mxu1 %v10396_v41  ;;  %4032 = vmatmul.mubr.f32.vlgmr.msra.gmra.mxu0 %v10396_v41 }
 0xd84   : > { %4038 = vmatprep.subr.mxu1 %v7144_v7  ;;  %6509 = vmatprep.mubr.msk.f32.mxu1 %vm800_vm0, %v10394_v40  ;;  %v6403_v40 = vld [vmem:[%s12588_s5 + $0xa60] sm:$0xff] }
 0xd85   : > { %4039 = vmatpush1.msra.mxu1 %v6430_v38  ;;  %7011 = vmatprep.subr.mxu0 %v7144_v7 }
 0xd86   : > { %4040 = vmatprep.subr.mxu1 %v7144_v7  ;;  %7013 = vmatprep.mubr.msk.f32.mxu0 %vm7145_vm3, %v7144_v7 }
 0xd87   : > { %4041 = vmatpush1.msra.mxu1 %v6421_v32 }
 0xd88   : > { %4042 = vmatprep.subr.mxu1 %v7144_v7 }
 0xd89   : > { %4043 = vmatpush1.msra.mxu1 %v6412_v39 }
 0xd8a   : > { %4044 = vmatprep.subr.mxu1 %v7144_v7 }
 0xd8b   : > { %4045 = vmatpush1.msra.mxu1 %v6403_v40 }
 0xd8c   : > { %4046 = vmatprep.subr.mxu1 %v7144_v7 }
 0xd8d   : > { %4047 = vmatpush1.msra.mxu1 %v6394_v9 }
 0xd8e   : > { %4048 = vmatprep.subr.mxu1 %v7144_v7 }
 0xd8f   : > { %4049 = vmatpush1.msra.mxu1 %v6385_v42 }
 0xd90   : > { %4050 = vmatprep.subr.mxu1 %v7144_v7 }
 0xd91   : > { %4051 = vmatpush1.msra.mxu1 %v6376_v14 }
 0xd92   : > { %4052 = vmatprep.subr.mxu1 %v7144_v7 }
 0xd93   : > { %4053 = vmatpush1.msra.mxu1 %v6367_v12 }
 0xd94   : > { %4054 = vmatprep.subr.mxu1 %v7144_v7 }
 0xd95   : > { %4055 = vmatpush1.msra.mxu1 %v6358_v43 }
 0xd96   : > { %4056 = vmatprep.subr.mxu1 %v7144_v7 }
 0xd97   : > { %4057 = vmatpush1.msra.mxu1 %v6349_v45 }
 0xd98   : > { %4058 = vmatprep.subr.mxu1 %v7144_v7 }
 0xd99   : > { %4059 = vmatpush1.msra.mxu1 %v6340_v21 }
 0xd9a   : > { %4060 = vmatprep.subr.mxu1 %v7144_v7 }
 0xd9b   : > { %4061 = vmatpush1.msra.mxu1 %v6331_v18 }
 0xd9c   : > { %4062 = vmatprep.subr.mxu1 %v7144_v7 }
 0xd9d   : > { %4063 = vmatpush1.msra.mxu1 %v6322_v48 }
 0xd9e   : > { %4064 = vmatprep.subr.mxu1 %v7144_v7 }
 0xd9f   : > { %4065 = vmatpush1.msra.mxu1 %v6313_v50 }
 0xda0   : > { %4066 = vmatprep.subr.mxu1 %v7144_v7 }
 0xda1   : > { %4067 = vmatpush1.msra.mxu1 %v6304_v51 }
 0xda2   : > { %4068 = vmatprep.subr.mxu1 %v7144_v7 }
 0xda3   : > { %4069 = vmatpush1.msra.mxu1 %v6295_v52  ;;  %v3729_v52 = vrot.slane %v10800_v61, %v8634_v49 }
 0xda4   : > { %4086 = vmatprep.subr.mxu1 %v7144_v7 }
 0xda5   : > { %4087 = vmatpush2.msra.mxu1 %v6502_v31 }
 0xda6   : > { %4088 = vmatprep.subr.mxu1 %v7144_v7 }
 0xda7   : > { %4089 = vmatpush2.msra.mxu1 %v6493_v54 }
 0xda8   : > { %4090 = vmatprep.subr.mxu1 %v7144_v7 }
 0xda9   : > { %4091 = vmatpush2.msra.mxu1 %v6484_v55 }
 0xdaa   : > { %4092 = vmatprep.subr.mxu1 %v7144_v7 }
 0xdab   : > { %4093 = vmatpush2.msra.mxu1 %v6475_v56  ;;  %v6541_v56 = vld [vmem:[%s12590_s7 + $0x3f8] sm:$0xff] }
 0xdac   : > { %4094 = vmatprep.subr.mxu1 %v7144_v7 }
 0xdad   : > { %4095 = vmatpush2.msra.mxu1 %v6466_v57 }
 0xdae   : > { %4096 = vmatprep.subr.mxu1 %v7144_v7 }
 0xdaf   : > { %4097 = vmatpush2.msra.mxu1 %v6457_v58 }
 0xdb0   : > { %4098 = vmatprep.subr.mxu1 %v7144_v7 }
 0xdb1   : > { %4099 = vmatpush2.msra.mxu1 %v6448_v59 }
 0xdb2   : > { %4100 = vmatprep.subr.mxu1 %v7144_v7 }
 0xdb3   : > { %4101 = vmatpush2.msra.mxu1 %v6439_v60  ;;  %v6540_v60 = vld [vmem:[%s12590_s7 + $0x3f0] sm:$0xff] }
 0xdb4   : > { %4103 = vmatmul.mubr.f32.vlgmr.msra.gmra.mxu1 %v10396_v41  ;;  %7016 = vmatprep.subr.mxu1 %v7144_v7 }
 0xdb5   : > { %7018 = vmatprep.mubr.msk.f32.mxu1 %vm7145_vm3, %v7144_v7 }
 0xe12   : > { %v3820_v41 = vpop.f32.mrf.mxu1  ;;  %v3891_v1 = vpop.f32.mrf.mxu0 }
 0xe13   : > { %v3892_v2 = vadd.f32 %v3891_v1, %v3717_v63  ;;  %v3821_v3 = vadd.f32 %v3820_v41, %v3709_v36  ;;  %v6539_v63 = vld [vmem:[%s12590_s7 + $0x3e8] sm:$0xff]  ;;  %v6538_v36 = vld [vmem:[%s12590_s7 + $0x3e0] sm:$0xff]  ;;  %v6536_v41 = vld [vmem:[%s12590_s7 + $0x3d0] sm:$0xff] }
 0xe14   : > { %v3822_v4 = vpop.f32.mrf.mxu1  ;;  %v3893_v22 = vpop.f32.mrf.mxu0  ;;  %v6535_v1 = vld [vmem:[%s12590_s7 + $0x3c8] sm:$0xff] }
 0xe15   : > { %v3823_v5 = vadd.f32 %v3822_v4, %v3713_v0  ;;  %7017 = vmatpush3.msra.mxu1 %v3892_v2  ;;  %v4205_v6 = vmul.f32 0.125, %v3821_v3  ;;  %v3894_v24 = vadd.f32 %v3893_v22, %v3721_v11  ;;  %v6537_v0 = vld [vmem:[%s12590_s7 + $0x3d8] sm:$0xff]  ;;  %v6534_v2 = vld [vmem:[%s12590_s7 + $0x3c0] sm:$0xff]  ;;  %v6532_v4 = vld [vmem:[%s12590_s7 + $0x3b0] sm:$0xff] }
 0xe16   : > { %7026 = vmatprep.subr.mxu1 %v7144_v7  ;;  %v6533_v3 = vld [vmem:[%s12590_s7 + $0x3b8] sm:$0xff]  ;;  %v6528_v22 = vld [vmem:[%s12590_s7 + $0x390] sm:$0xff] }
 0xe17   : > { %7012 = vmatpush3.xpose.msra.mxu0 %v3823_v5  ;;  %v4360_v26 = vmul.f32 0.125, %v3894_v24  ;;  %v6531_v5 = vld [vmem:[%s12590_s7 + $0x3a8] sm:$0xff]  ;;  %v6529_v11 = vld [vmem:[%s12590_s7 + $0x398] sm:$0xff]  ;;  %v6526_v24 = vld [vmem:[%s12590_s7 + $0x380] sm:$0xff] }
 0xe18   : > { %7021 = vmatprep.subr.mxu0 %v7144_v7 }
 0xe1a   : > { %7014 = vmatmul.mubr.f32.vlgmr.msra.gmra.mxu0 %v4205_v6  ;;  %v6530_v6 = vld [vmem:[%s12590_s7 + $0x3a0] sm:$0xff] }
 0xe1b   : > { %7023 = vmatprep.mubr.msk.f32.mxu0 %vm7145_vm3, %v7144_v7 }
 0xe43   : > { %v3962_v25 = vpop.f32.mrf.mxu1  ;;  %v10819_v30 = vpop.f32.mrf.mxu0 }
 0xe44   : > { %v3963_v44 = vadd.f32 %v3962_v25, %v3725_v23  ;;  %v6527_v23 = vld [vmem:[%s12590_s7 + $0x388] sm:$0xff]  ;;  %v6525_v25 = vld [vmem:[%s12590_s7 + $0x378] sm:$0xff] }
 0xe45   : > { %v3964_v53 = vpop.f32.mrf.mxu1  ;;  %v10821_v33 = vpop.f32.mrf.mxu0 }
 0xe46   : > { %7022 = vmatpush3.xpose.msra.mxu0 %v3963_v44  ;;  %v3965_v55 = vadd.f32 %v3964_v53, %v3729_v52  ;;  %v6524_v44 = vld [vmem:[%s12590_s7 + $0x370] sm:$0xff]  ;;  %v6522_v53 = vld [vmem:[%s12590_s7 + $0x360] sm:$0xff]  ;;  %v6511_v52 = vld [vmem:[%s12590_s7 + $0x308] sm:$0xff] }
 0xe49   : > { %7024 = vmatmul.mubr.f32.vlgmr.msra.gmra.mxu0 %v4360_v26  ;;  %v6523_v26 = vld [vmem:[%s12590_s7 + $0x368] sm:$0xff] }
 0xe4a   : > { %4579 = vmatprep.mubr.f32.mxu0 %v7144_v7 }
 0xe74   : > { %v10817_v29 = vpop.f32.mrf.mxu1 }
 0xe76   : > { %v4106_v13 = vpop.f32.mrf.mxu1 }
 0xe77   : > { %v6521_v13 = vld [vmem:[%s12590_s7 + $0x358] sm:$0xff] }
 0xeda   : > { %v4272_v19 = vpop.f32.mrf.mxu0 }
 0xedb   : > { %v4273_v20 = vadd.f32 %v4272_v19, %v8646_v62  ;;  %v6520_v19 = vld [vmem:[%s12590_s7 + $0x350] sm:$0xff] }
 0xedc   : > { %v7015_v34 = vpop.f32.mrf.mxu0 }
 0xedd   : > { %v4276_v37 = vsel %vm1888_vm5, %v4273_v20, -inf  ;;  %v6573_v34 = vld [vmem:[%s12590_s7 + $0x4f8] sm:$0xff] }
 0xede   : > { %4277 = vmax.xlane.f32.xlu0 %v4276_v37  ;;  %v6572_v37 = vld [vmem:[%s12590_s7 + $0x4f0] sm:$0xff]  ;;  %4515 = vmatprep.subr.mxu0 %v6573_v34  ;;  %v3737_v34 = vrot.slane %v10800_v61, %v1349_v28 }
 0xedf   : > { %4516 = vmatpush1.msra.mxu0 %v6572_v37 }
 0xf09   : > { %v4427_v38 = vpop.f32.mrf.mxu0 }
 0xf0a   : > { %v4428_v32 = vadd.f32 %v4427_v38, %v8646_v62  ;;  %v6571_v38 = vld [vmem:[%s12590_s7 + $0x4e8] sm:$0xff] }
 0xf0b   : > { %v7025_v39 = vpop.f32.mrf.mxu0  ;;  %4517 = vmatprep.subr.mxu0 %v6571_v38  ;;  %v4036_v38 = vadd.f32 %v10821_v33, %v3737_v34 }
 0xf0c   : > { %v4431_v40 = vsel %vm1888_vm5, %v4428_v32, -inf  ;;  %v6570_v39 = vld [vmem:[%s12590_s7 + $0x4e0] sm:$0xff] }
 0xf0d   : > { %4432 = vmax.xlane.f32.xlu1 %v4431_v40  ;;  %v6517_v40 = vld [vmem:[%s12590_s7 + $0x338] sm:$0xff]  ;;  %4518 = vmatpush1.msra.mxu0 %v6570_v39 }
 0xf67   : > { %v4278_v9 = vpop.xlane.xlu0 %4277 }
 0xf68   : > { %v4279_v42 = vsub.f32 %v4273_v20, %v4278_v9  ;;  %v6519_v20 = vld [vmem:[%s12590_s7 + $0x348] sm:$0xff]  ;;  %v6569_v9 = vld [vmem:[%s12590_s7 + $0x4d8] sm:$0xff] }
 0xf69   : > { %4519 = vmatprep.subr.mxu0 %v6569_v9 }
 0xf6a   : > { %v4280_v14 = vmul.f32 1.442695, %v4279_v42  ;;  %v6516_v42 = vld [vmem:[%s12590_s7 + $0x330] sm:$0xff] }
 0xf6c   : > { %7087 = vpow2.f32 %v4280_v14  ;;  %v6568_v14 = vld [vmem:[%s12590_s7 + $0x4d0] sm:$0xff] }
 0xf6d   : > { %4520 = vmatpush1.msra.mxu0 %v6568_v14 }
 0xf79   : > { %v7088_v12 = vpop.eup %7087 }
 0xf7a   : > { %v4282_v43 = vsel %vm1888_vm5, %v7088_v12, 0.0 }
 0xf7b   : > { %4283 = vadd.xlane.f32.xlu0 %v4282_v43  ;;  %v6567_v43 = vld [vmem:[%s12590_s7 + $0x4c8] sm:$0xff] }
 0xf7c   : > { %4521 = vmatprep.subr.mxu0 %v6567_v43 }
 0xf96   : > { %v4433_v45 = vpop.xlane.xlu1 %4432 }
 0xf97   : > { %v4434_v21 = vsub.f32 %v4428_v32, %v4433_v45  ;;  %v6518_v32 = vld [vmem:[%s12590_s7 + $0x340] sm:$0xff] }
 0xf98   : > { %v6514_v45 = vld [vmem:[%s12590_s7 + $0x320] sm:$0xff] }
 0xf99   : > { %v4435_v18 = vmul.f32 1.442695, %v4434_v21  ;;  %v6566_v21 = vld [vmem:[%s12590_s7 + $0x4c0] sm:$0xff] }
 0xf9a   : > { %4522 = vmatpush1.msra.mxu0 %v6566_v21  ;;  %v6605_v21 = vld [vmem:[%s12590_s7 + $0x5f8] sm:$0xff] }
 0xf9b   : > { %7089 = vpow2.f32 %v4435_v18  ;;  %v6513_v18 = vld [vmem:[%s12590_s7 + $0x318] sm:$0xff] }
 0xfa8   : > { %v7090_v48 = vpop.eup %7089 }
 0xfa9   : > { %v4437_v50 = vsel %vm1888_vm5, %v7090_v48, 0.0 }
 0xfaa   : > { %4438 = vadd.xlane.f32.xlu1 %v4437_v50  ;;  %v6512_v50 = vld [vmem:[%s12590_s7 + $0x310] sm:$0xff] }
0x1004   : > { %v4284_v51 = vpop.xlane.xlu0 %4283 }
0x1005   : > { %7091 = vrcp.f32 %v4284_v51  ;;  %v6564_v51 = vld [vmem:[%s12590_s7 + $0x4b0] sm:$0xff] }
0x1012   : > { %v7092_v31 = vpop.eup %7091 }
0x1013   : > { %v4286_v54 = vmul.f32 %v7092_v31, %v7088_v12  ;;  %v6515_v12 = vld [vmem:[%s12590_s7 + $0x328] sm:$0xff] }
0x1014   : > { %v6563_v31 = vld [vmem:[%s12590_s7 + $0x4a8] sm:$0xff] }
0x1015   : > { %7019 = vmatmul.mubr.msk.f32.vlgmr.msra.gmra.mxu1 %vm1888_vm5, %v4286_v54  ;;  %v6510_v54 = vld [vmem:[%s12590_s7 + $0x300] sm:$0xff] }
0x1016   : > { %7027 = vmatpush3.msra.mxu1 %v3965_v55  ;;  %7028 = vmatprep.mubr.msk.f32.mxu1 %vm7145_vm3, %v7144_v7  ;;  %v6562_v55 = vld [vmem:[%s12590_s7 + $0x4a0] sm:$0xff] }
0x1017   : > { %4586 = vmatprep.subr.mxu1 %v6541_v56  ;;  %v6561_v56 = vld [vmem:[%s12590_s7 + $0x498] sm:$0xff] }
0x1033   : > { %v4439_v57 = vpop.xlane.xlu1 %4438 }
0x1034   : > { %7093 = vrcp.f32 %v4439_v57  ;;  %v6560_v57 = vld [vmem:[%s12590_s7 + $0x490] sm:$0xff] }
0x1041   : > { %v7094_v58 = vpop.eup %7093 }
0x1042   : > { %v4441_v59 = vmul.f32 %v7094_v58, %v7090_v48  ;;  %v6565_v48 = vld [vmem:[%s12590_s7 + $0x4b8] sm:$0xff]  ;;  %v6559_v58 = vld [vmem:[%s12590_s7 + $0x488] sm:$0xff] }
0x1043   : > { %4523 = vmatprep.subr.mxu0 %v6565_v48  ;;  %v6602_v48 = vld [vmem:[%s12590_s7 + $0x5e0] sm:$0xff] }
0x1044   : > { %7029 = vmatmul.mubr.msk.f32.vlgmr.msra.gmra.mxu1 %vm1888_vm5, %v4441_v59  ;;  %4524 = vmatpush1.msra.mxu0 %v6564_v51  ;;  %v6558_v59 = vld [vmem:[%s12590_s7 + $0x480] sm:$0xff]  ;;  %v6600_v51 = vld [vmem:[%s12590_s7 + $0x5d0] sm:$0xff] }
0x1045   : > { %4587 = vmatpush1.msra.mxu1 %v6540_v60  ;;  %4650 = vmatprep.mubr.f32.mxu1 %v7144_v7  ;;  %v6557_v60 = vld [vmem:[%s12590_s7 + $0x478] sm:$0xff] }
0x1046   : > { %4588 = vmatprep.subr.mxu1 %v6539_v63  ;;  %4525 = vmatprep.subr.mxu0 %v6563_v31  ;;  %v6556_v63 = vld [vmem:[%s12590_s7 + $0x470] sm:$0xff]  ;;  %v6598_v31 = vld [vmem:[%s12590_s7 + $0x5c0] sm:$0xff] }
0x1047   : > { %4589 = vmatpush1.msra.mxu1 %v6538_v36  ;;  %4526 = vmatpush1.msra.mxu0 %v6562_v55  ;;  %v6555_v36 = vld [vmem:[%s12590_s7 + $0x468] sm:$0xff]  ;;  %v6596_v55 = vld [vmem:[%s12590_s7 + $0x5b0] sm:$0xff] }
0x1048   : > { %4590 = vmatprep.subr.mxu1 %v6537_v0  ;;  %4527 = vmatprep.subr.mxu0 %v6561_v56  ;;  %v6554_v0 = vld [vmem:[%s12590_s7 + $0x460] sm:$0xff]  ;;  %v6595_v56 = vld [vmem:[%s12590_s7 + $0x5a8] sm:$0xff] }
0x1049   : > { %4591 = vmatpush1.msra.mxu1 %v6536_v41  ;;  %4528 = vmatpush1.msra.mxu0 %v6560_v57  ;;  %v6553_v41 = vld [vmem:[%s12590_s7 + $0x458] sm:$0xff]  ;;  %v6594_v57 = vld [vmem:[%s12590_s7 + $0x5a0] sm:$0xff] }
0x104a   : > { %4592 = vmatprep.subr.mxu1 %v6535_v1  ;;  %4529 = vmatprep.subr.mxu0 %v6559_v58  ;;  %v6552_v1 = vld [vmem:[%s12590_s7 + $0x450] sm:$0xff]  ;;  %v6593_v58 = vld [vmem:[%s12590_s7 + $0x598] sm:$0xff] }
0x104b   : > { %4593 = vmatpush1.msra.mxu1 %v6534_v2  ;;  %4530 = vmatpush1.msra.mxu0 %v6558_v59  ;;  %v6551_v2 = vld [vmem:[%s12590_s7 + $0x448] sm:$0xff]  ;;  %v6592_v59 = vld [vmem:[%s12590_s7 + $0x590] sm:$0xff] }
0x104c   : > { %4594 = vmatprep.subr.mxu1 %v6533_v3  ;;  %4531 = vmatprep.subr.mxu0 %v6557_v60  ;;  %v6550_v3 = vld [vmem:[%s12590_s7 + $0x440] sm:$0xff]  ;;  %v6591_v60 = vld [vmem:[%s12590_s7 + $0x588] sm:$0xff] }
0x104d   : > { %4595 = vmatpush1.msra.mxu1 %v6532_v4  ;;  %4532 = vmatpush1.msra.mxu0 %v6556_v63  ;;  %v6549_v4 = vld [vmem:[%s12590_s7 + $0x438] sm:$0xff]  ;;  %v6590_v63 = vld [vmem:[%s12590_s7 + $0x580] sm:$0xff] }
0x104e   : > { %4596 = vmatprep.subr.mxu1 %v6531_v5  ;;  %4533 = vmatprep.subr.mxu0 %v6555_v36  ;;  %v6548_v5 = vld [vmem:[%s12590_s7 + $0x430] sm:$0xff]  ;;  %v6589_v36 = vld [vmem:[%s12590_s7 + $0x578] sm:$0xff] }
0x104f   : > { %4597 = vmatpush1.msra.mxu1 %v6530_v6  ;;  %4534 = vmatpush1.msra.mxu0 %v6554_v0  ;;  %v6547_v6 = vld [vmem:[%s12590_s7 + $0x428] sm:$0xff]  ;;  %v6588_v0 = vld [vmem:[%s12590_s7 + $0x570] sm:$0xff] }
0x1050   : > { %4598 = vmatprep.subr.mxu1 %v6529_v11  ;;  %4535 = vmatprep.subr.mxu0 %v6553_v41  ;;  %v6546_v11 = vld [vmem:[%s12590_s7 + $0x420] sm:$0xff]  ;;  %v6587_v41 = vld [vmem:[%s12590_s7 + $0x568] sm:$0xff] }
0x1051   : > { %4599 = vmatpush1.msra.mxu1 %v6528_v22  ;;  %4536 = vmatpush1.msra.mxu0 %v6552_v1  ;;  %v6545_v22 = vld [vmem:[%s12590_s7 + $0x418] sm:$0xff]  ;;  %v6586_v1 = vld [vmem:[%s12590_s7 + $0x560] sm:$0xff] }
0x1052   : > { %4600 = vmatprep.subr.mxu1 %v6527_v23  ;;  %4537 = vmatprep.subr.mxu0 %v6551_v2  ;;  %v6544_v23 = vld [vmem:[%s12590_s7 + $0x410] sm:$0xff]  ;;  %v6585_v2 = vld [vmem:[%s12590_s7 + $0x558] sm:$0xff] }
0x1053   : > { %4601 = vmatpush1.msra.mxu1 %v6526_v24  ;;  %4538 = vmatpush1.msra.mxu0 %v6550_v3  ;;  %v6543_v24 = vld [vmem:[%s12590_s7 + $0x408] sm:$0xff]  ;;  %v6584_v3 = vld [vmem:[%s12590_s7 + $0x550] sm:$0xff] }
0x1054   : > { %4602 = vmatprep.subr.mxu1 %v6525_v25  ;;  %4539 = vmatprep.subr.mxu0 %v6549_v4  ;;  %v6542_v25 = vld [vmem:[%s12590_s7 + $0x400] sm:$0xff]  ;;  %v6583_v4 = vld [vmem:[%s12590_s7 + $0x548] sm:$0xff] }
0x1055   : > { %4603 = vmatpush1.msra.mxu1 %v6524_v44  ;;  %4540 = vmatpush1.msra.mxu0 %v6548_v5  ;;  %v6504_v44 = vld [vmem:[%s12589_s6 + $0x11] ss:$2 sm:$0x1]  ;;  %v6582_v5 = vld [vmem:[%s12590_s7 + $0x540] sm:$0xff] }
0x1056   : > { %4604 = vmatprep.subr.mxu1 %v6523_v26  ;;  %4541 = vmatprep.subr.mxu0 %v6547_v6  ;;  %v3741_v26 = vrot.slane %v6504_v44, %v8185_v16  ;;  %v6581_v6 = vld [vmem:[%s12590_s7 + $0x538] sm:$0xff]  ;;  %v6575_v44 = vld [vmem:[%s12590_s7 + $0x508] sm:$0xff] }
0x1057   : > { %4605 = vmatpush1.msra.mxu1 %v6522_v53  ;;  %4542 = vmatpush1.msra.mxu0 %v6546_v11  ;;  %v6580_v11 = vld [vmem:[%s12590_s7 + $0x530] sm:$0xff] }
0x1058   : > { %4606 = vmatprep.subr.mxu1 %v6521_v13  ;;  %4543 = vmatprep.subr.mxu0 %v6545_v22  ;;  %v4105_v53 = vadd.f32 %v10817_v29, %v3741_v26  ;;  %v6579_v22 = vld [vmem:[%s12590_s7 + $0x528] sm:$0xff] }
0x1059   : > { %4607 = vmatpush1.msra.mxu1 %v6520_v19  ;;  %4544 = vmatpush1.msra.mxu0 %v6544_v23  ;;  %v6578_v23 = vld [vmem:[%s12590_s7 + $0x520] sm:$0xff] }
0x105a   : > { %4608 = vmatprep.subr.mxu1 %v6519_v20  ;;  %4545 = vmatprep.subr.mxu0 %v6543_v24  ;;  %v3733_v20 = vrot.slane %v10800_v61, %v1345_v27  ;;  %v6577_v24 = vld [vmem:[%s12590_s7 + $0x518] sm:$0xff] }
0x105b   : > { %4609 = vmatpush1.msra.mxu1 %v6518_v32  ;;  %4546 = vmatpush1.msra.mxu0 %v6542_v25  ;;  %v6576_v25 = vld [vmem:[%s12590_s7 + $0x510] sm:$0xff] }
0x105c   : > { %4610 = vmatprep.subr.mxu1 %v6517_v40  ;;  %7031 = vmatprep.subr.mxu0 %v7144_v7  ;;  %v4034_v37 = vadd.f32 %v10819_v30, %v3733_v20 }
0x105d   : > { %4611 = vmatpush1.msra.mxu1 %v6516_v42 }
0x105e   : > { %4612 = vmatprep.subr.mxu1 %v6515_v12  ;;  %v4657_v39 = vmul.f32 0.125, %v4034_v37 }
0x105f   : > { %4613 = vmatpush1.msra.mxu1 %v6514_v45 }
0x1060   : > { %4614 = vmatprep.subr.mxu1 %v6513_v18  ;;  %v6603_v18 = vld [vmem:[%s12590_s7 + $0x5e8] sm:$0xff] }
0x1061   : > { %4615 = vmatpush1.msra.mxu1 %v6512_v50  ;;  %v6601_v50 = vld [vmem:[%s12590_s7 + $0x5d8] sm:$0xff] }
0x1062   : > { %4616 = vmatprep.subr.mxu1 %v6511_v52  ;;  %v6599_v52 = vld [vmem:[%s12590_s7 + $0x5c8] sm:$0xff] }
0x1063   : > { %4617 = vmatpush1.msra.mxu1 %v6510_v54  ;;  %v6597_v54 = vld [vmem:[%s12590_s7 + $0x5b8] sm:$0xff] }
0x1064   : > { %7036 = vmatprep.subr.mxu1 %v7144_v7 }
0x10d5   : > { %v4356_v13 = vpop.f32.mrf.mxu1 }
0x10d6   : > { %4651 = vmatmul.mubr.f32.vlgmr.msra.gmra.mxu1 %v4356_v13 }
0x10d7   : > { %7037 = vmatpush3.msra.mxu1 %v4105_v53  ;;  %v7020_v19 = vpop.f32.mrf.mxu1  ;;  %7038 = vmatprep.mubr.msk.f32.mxu1 %vm7145_vm3, %v7144_v7 }
0x10d8   : > { %v6574_v19 = vld [vmem:[%s12590_s7 + $0x500] sm:$0xff] }
0x1104   : > { %v4511_v29 = vpop.f32.mrf.mxu1 }
0x1105   : > { %4580 = vmatmul.mubr.f32.vlgmr.msra.gmra.mxu0 %v4511_v29 }
0x1106   : > { %7032 = vmatpush3.xpose.msra.mxu0 %v4036_v38  ;;  %v7030_v32 = vpop.f32.mrf.mxu1  ;;  %7033 = vmatprep.mubr.msk.f32.mxu0 %vm7145_vm3, %v7144_v7 }
0x1107   : > { %4812 = vmatprep.subr.mxu0 %v6605_v21  ;;  %v6609_v32 = vld [vmem:[%s12591_s8 + $0x1] ss:$2 sm:$0x3]  ;;  %v6705_v21 = vld [vmem:[%s12594_s11 + $0x768] sm:$0xff] }
0x1109   : > { %7034 = vmatmul.mubr.f32.vlgmr.msra.gmra.mxu0 %v4657_v39 }
0x110a   : > { %4876 = vmatprep.mubr.f32.mxu0 %v7144_v7 }
0x1196   : > { %v4652_v27 = vpop.f32.mrf.mxu1 }
0x1198   : > { %v4654_v20 = vpop.f32.mrf.mxu1 }
0x11c5   : > { %v4581_v40 = vpop.f32.mrf.mxu0 }
0x11c6   : > { %v11048_v9 = vadd.f32 %v4652_v27, %v4581_v40  ;;  %v4897_v40 = vrot.slane %v6609_v32, %v8188_v17 }
0x11c7   : > { %v11050_v28 = vpop.f32.mrf.mxu0 }
0x11c8   : > { %v4655_v29 = vadd.f32 %v4654_v20, %v11050_v28  ;;  %v6651_v20 = vld [vmem:[%s12594_s11 + $0x5b8] sm:$0xff] }
0x11c9   : > { %v4724_v61 = vpop.f32.mrf.mxu0 }
0x11ca   : > { %v4725_v30 = vadd.f32 %v4724_v61, %v8646_v62  ;;  %v6604_v62 = vld [vmem:[%s12590_s7 + $0x5f0] sm:$0xff]  ;;  %v7134_v61 = vld [vmem:[#allocation2 + $0x8] sm:$0xff] }
0x11cb   : > { %v7035_v33 = vpop.f32.mrf.mxu0  ;;  %4813 = vmatpush1.msra.mxu0 %v6604_v62  ;;  %v6697_v62 = vld [vmem:[%s12594_s11 + $0x728] sm:$0xff] }
0x11cc   : > { %v4728_v42 = vsel %vm1888_vm5, %v4725_v30, -inf  ;;  %4814 = vmatprep.subr.mxu0 %v6603_v18  ;;  %v6704_v18 = vld [vmem:[%s12594_s11 + $0x760] sm:$0xff] }
0x11cd   : > { %4729 = vmax.xlane.f32.xlu0 %v4728_v42  ;;  %4815 = vmatpush1.msra.mxu0 %v6602_v48  ;;  %v6696_v48 = vld [vmem:[%s12594_s11 + $0x720] sm:$0xff] }
0x11ce   : > { %4816 = vmatprep.subr.mxu0 %v6601_v50  ;;  %v6699_v50 = vld [vmem:[%s12594_s11 + $0x738] sm:$0xff] }
0x11cf   : > { %4817 = vmatpush1.msra.mxu0 %v6600_v51  ;;  %v6691_v51 = vld [vmem:[%s12594_s11 + $0x6f8] sm:$0xff] }
0x11d0   : > { %4818 = vmatprep.subr.mxu0 %v6599_v52  ;;  %v6698_v52 = vld [vmem:[%s12594_s11 + $0x730] sm:$0xff] }
0x11d1   : > { %4819 = vmatpush1.msra.mxu0 %v6598_v31  ;;  %v6690_v31 = vld [vmem:[%s12594_s11 + $0x6f0] sm:$0xff] }
0x11d2   : > { %4820 = vmatprep.subr.mxu0 %v6597_v54  ;;  %v6693_v54 = vld [vmem:[%s12594_s11 + $0x708] sm:$0xff] }
0x11d3   : > { %4821 = vmatpush1.msra.mxu0 %v6596_v55  ;;  %v6685_v55 = vld [vmem:[%s12594_s11 + $0x6c8] sm:$0xff] }
0x11d4   : > { %4822 = vmatprep.subr.mxu0 %v6595_v56  ;;  %v6692_v56 = vld [vmem:[%s12594_s11 + $0x700] sm:$0xff] }
0x11d5   : > { %4823 = vmatpush1.msra.mxu0 %v6594_v57  ;;  %v6687_v57 = vld [vmem:[%s12594_s11 + $0x6d8] sm:$0xff] }
0x11d6   : > { %4824 = vmatprep.subr.mxu0 %v6593_v58  ;;  %v6684_v58 = vld [vmem:[%s12594_s11 + $0x6c0] sm:$0xff] }
0x11d7   : > { %4825 = vmatpush1.msra.mxu0 %v6592_v59  ;;  %v6686_v59 = vld [vmem:[%s12594_s11 + $0x6d0] sm:$0xff] }
0x11d8   : > { %4826 = vmatprep.subr.mxu0 %v6591_v60  ;;  %v6679_v60 = vld [vmem:[%s12594_s11 + $0x698] sm:$0xff] }
0x11d9   : > { %4827 = vmatpush1.msra.mxu0 %v6590_v63  ;;  %v6681_v63 = vld [vmem:[%s12594_s11 + $0x6a8] sm:$0xff] }
0x11da   : > { %4828 = vmatprep.subr.mxu0 %v6589_v36  ;;  %v6678_v36 = vld [vmem:[%s12594_s11 + $0x690] sm:$0xff] }
0x11db   : > { %4829 = vmatpush1.msra.mxu0 %v6588_v0  ;;  %v6680_v0 = vld [vmem:[%s12594_s11 + $0x6a0] sm:$0xff] }
0x11dc   : > { %4830 = vmatprep.subr.mxu0 %v6587_v41  ;;  %v6673_v41 = vld [vmem:[%s12594_s11 + $0x668] sm:$0xff] }
0x11dd   : > { %4831 = vmatpush1.msra.mxu0 %v6586_v1  ;;  %v6675_v1 = vld [vmem:[%s12594_s11 + $0x678] sm:$0xff] }
0x11de   : > { %4832 = vmatprep.subr.mxu0 %v6585_v2  ;;  %v6672_v2 = vld [vmem:[%s12594_s11 + $0x660] sm:$0xff] }
0x11df   : > { %4833 = vmatpush1.msra.mxu0 %v6584_v3  ;;  %v6674_v3 = vld [vmem:[%s12594_s11 + $0x670] sm:$0xff] }
0x11e0   : > { %4834 = vmatprep.subr.mxu0 %v6583_v4  ;;  %v6667_v4 = vld [vmem:[%s12594_s11 + $0x638] sm:$0xff] }
0x11e1   : > { %4835 = vmatpush1.msra.mxu0 %v6582_v5  ;;  %v6669_v5 = vld [vmem:[%s12594_s11 + $0x648] sm:$0xff] }
0x11e2   : > { %4836 = vmatprep.subr.mxu0 %v6581_v6  ;;  %v6666_v6 = vld [vmem:[%s12594_s11 + $0x630] sm:$0xff] }
0x11e3   : > { %4837 = vmatpush1.msra.mxu0 %v6580_v11  ;;  %v6668_v11 = vld [vmem:[%s12594_s11 + $0x640] sm:$0xff] }
0x11e4   : > { %4838 = vmatprep.subr.mxu0 %v6579_v22  ;;  %v6661_v22 = vld [vmem:[%s12594_s11 + $0x608] sm:$0xff] }
0x11e5   : > { %4839 = vmatpush1.msra.mxu0 %v6578_v23  ;;  %v6663_v23 = vld [vmem:[%s12594_s11 + $0x618] sm:$0xff] }
0x11e6   : > { %4840 = vmatprep.subr.mxu0 %v6577_v24  ;;  %v6660_v24 = vld [vmem:[%s12594_s11 + $0x600] sm:$0xff] }
0x11e7   : > { %4841 = vmatpush1.msra.mxu0 %v6576_v25  ;;  %v6662_v25 = vld [vmem:[%s12594_s11 + $0x610] sm:$0xff] }
0x11e8   : > { %4842 = vmatprep.subr.mxu0 %v6575_v44  ;;  %v6655_v44 = vld [vmem:[%s12594_s11 + $0x5d8] sm:$0xff] }
0x11e9   : > { %4843 = vmatpush1.msra.mxu0 %v6574_v19  ;;  %v6649_v19 = vld [vmem:[%s12594_s11 + $0x5a8] sm:$0xff] }
0x11ea   : > { %5206 = vmatprep.subr.mxu0 %v6705_v21  ;;  %v6638_v21 = vld [vmem:[%s12594_s11 + $0x550] sm:$0xff] }
0x1256   : > { %v4730_v14 = vpop.xlane.xlu0 %4729 }
0x1257   : > { %v4731_v12 = vsub.f32 %v4725_v30, %v4730_v14 }
0x1259   : > { %v4732_v43 = vmul.f32 1.442695, %v4731_v12  ;;  %v4893_v12 = vrot.slane %v6609_v32, %v8185_v16  ;;  %v6642_v32 = vld [vmem:[%s12594_s11 + $0x570] sm:$0xff] }
0x125b   : > { %7095 = vpow2.f32 %v4732_v43 }
0x1268   : > { %v11054_v45 = vpop.eup %7095 }
0x1269   : > { %v4734_v7 = vsel %vm1888_vm5, %v11054_v45, 0.0 }
0x126a   : > { %4735 = vadd.xlane.f32.xlu1 %v4734_v7 }
0x12f3   : > { %v4736_v26 = vpop.xlane.xlu1 %4735 }
0x12f4   : > { %7097 = vrcp.f32 %v4736_v26  ;;  %v6657_v26 = vld [vmem:[%s12594_s11 + $0x5e8] sm:$0xff] }
0x1301   : > { %v7098_v53 = vpop.eup %7097 }
0x1302   : > { %v4738_v13 = vmul.f32 %v7098_v53, %v11054_v45  ;;  %v6654_v53 = vld [vmem:[%s12594_s11 + $0x5d0] sm:$0xff] }
0x1304   : > { %7039 = vmatmul.mubr.msk.f32.vlgmr.msra.gmra.mxu1 %vm1888_vm5, %v4738_v13  ;;  %v6656_v13 = vld [vmem:[%s12594_s11 + $0x5e0] sm:$0xff] }
0x13c4   : > { %v4808_v34 = vpop.f32.mrf.mxu1 }
0x13c5   : > { %4877 = vmatmul.mubr.f32.vlgmr.msra.gmra.mxu0 %v4808_v34  ;;  %v6648_v34 = vld [vmem:[%s12594_s11 + $0x5a0] sm:$0xff] }
0x13c6   : > { %v7040_v37 = vpop.f32.mrf.mxu1  ;;  %5207 = vmatpush1.msra.mxu0 %v6704_v18  ;;  %v6625_v18 = vld [vmem:[%s12594_s11 + $0x4e8] sm:$0xff] }
0x13c7   : > { %5208 = vmatprep.subr.mxu0 %v6699_v50  ;;  %v6650_v37 = vld [vmem:[%s12594_s11 + $0x5b0] sm:$0xff]  ;;  %v6624_v50 = vld [vmem:[%s12594_s11 + $0x4e0] sm:$0xff] }
0x13c8   : > { %5209 = vmatpush1.msra.mxu0 %v6698_v52  ;;  %v6619_v52 = vld [vmem:[%s12594_s11 + $0x4b8] sm:$0xff] }
0x13c9   : > { %5210 = vmatprep.subr.mxu0 %v6693_v54  ;;  %v6618_v54 = vld [vmem:[%s12594_s11 + $0x4b0] sm:$0xff] }
0x13ca   : > { %5211 = vmatpush1.msra.mxu0 %v6692_v56  ;;  %v6613_v56 = vld [vmem:[%s12594_s11 + $0x488] sm:$0xff] }
0x13cb   : > { %5212 = vmatprep.subr.mxu0 %v6687_v57  ;;  %v6620_v57 = vld [vmem:[%s12594_s11 + $0x4c0] sm:$0xff] }
0x13cc   : > { %5213 = vmatpush1.msra.mxu0 %v6686_v59  ;;  %v6615_v59 = vld [vmem:[%s12594_s11 + $0x498] sm:$0xff] }
0x13cd   : > { %5214 = vmatprep.subr.mxu0 %v6681_v63  ;;  %v6614_v63 = vld [vmem:[%s12594_s11 + $0x490] sm:$0xff] }
0x13ce   : > { %5215 = vmatpush1.msra.mxu0 %v6680_v0  ;;  %v6753_v0 = vld [vmem:[%s12594_s11 + $0x8e8] sm:$0xff] }
0x13cf   : > { %5216 = vmatprep.subr.mxu0 %v6675_v1  ;;  %v6752_v1 = vld [vmem:[%s12594_s11 + $0x8e0] sm:$0xff] }
0x13d0   : > { %5217 = vmatpush1.msra.mxu0 %v6674_v3  ;;  %v6747_v3 = vld [vmem:[%s12594_s11 + $0x8b8] sm:$0xff] }
0x13d1   : > { %5218 = vmatprep.subr.mxu0 %v6669_v5  ;;  %v6746_v5 = vld [vmem:[%s12594_s11 + $0x8b0] sm:$0xff] }
0x13d2   : > { %5219 = vmatpush1.msra.mxu0 %v6668_v11  ;;  %v6741_v11 = vld [vmem:[%s12594_s11 + $0x888] sm:$0xff] }
0x13d3   : > { %5220 = vmatprep.subr.mxu0 %v6663_v23  ;;  %v6740_v23 = vld [vmem:[%s12594_s11 + $0x880] sm:$0xff] }
0x13d4   : > { %5221 = vmatpush1.msra.mxu0 %v6662_v25  ;;  %v6735_v25 = vld [vmem:[%s12594_s11 + $0x858] sm:$0xff] }
0x13d5   : > { %5222 = vmatprep.subr.mxu0 %v6657_v26  ;;  %v6734_v26 = vld [vmem:[%s12594_s11 + $0x850] sm:$0xff] }
0x13d6   : > { %5223 = vmatpush1.msra.mxu0 %v6656_v13  ;;  %v6729_v13 = vld [vmem:[%s12594_s11 + $0x828] sm:$0xff] }
0x13d7   : > { %5224 = vmatprep.subr.mxu0 %v6651_v20  ;;  %v6728_v20 = vld [vmem:[%s12594_s11 + $0x820] sm:$0xff] }
0x13d8   : > { %5225 = vmatpush1.msra.mxu0 %v6650_v37  ;;  %v6723_v37 = vld [vmem:[%s12594_s11 + $0x7f8] sm:$0xff] }
0x1485   : > { %v4878_v38 = vpop.f32.mrf.mxu0 }
0x1486   : > { %v4883_v42 = vadd.f32 %v4878_v38, %v11048_v9  ;;  %v6703_v9 = vld [vmem:[%s12594_s11 + $0x758] sm:$0xff] }
0x1487   : > { %v4880_v39 = vpop.f32.mrf.mxu0  ;;  %5135 = vmatprep.subr.mxu1 %v6703_v9  ;;  %v6643_v38 = vld [vmem:[%s12594_s11 + $0x578] sm:$0xff] }
0x1488   : > { %v4884_v27 = vadd.f32 %v4880_v39, %v4655_v29  ;;  %v4885_v14 = vadd.f32 %v4883_v42, %v10070_v10  ;;  %v6702_v10 = vld [vmem:[%s12594_s11 + $0x750] sm:$0xff]  ;;  %v6645_v29 = vld [vmem:[%s12594_s11 + $0x588] sm:$0xff]  ;;  %v6644_v39 = vld [vmem:[%s12594_s11 + $0x580] sm:$0xff] }
0x1489   : > { %5136 = vmatpush1.msra.mxu1 %v6702_v10  ;;  %5226 = vmatprep.subr.mxu0 %v6645_v29  ;;  %v6631_v10 = vld [vmem:[%s12594_s11 + $0x518] sm:$0xff]  ;;  %v6722_v29 = vld [vmem:[%s12594_s11 + $0x7f0] sm:$0xff] }
0x148a   : > { %v4886_v30 = vadd.f32 %v7134_v61, %v4884_v27  ;;  %v11165_v28 = vadd.f32 %v4893_v12, %v4885_v14  ;;  %5137 = vmatprep.subr.mxu1 %v6697_v62  ;;  %v6637_v27 = vld [vmem:[%s12594_s11 + $0x548] sm:$0xff]  ;;  %v6636_v61 = vld [vmem:[%s12594_s11 + $0x540] sm:$0xff]  ;;  %5227 = vmatpush1.msra.mxu0 %v6644_v39 }
0x148b   : > { %5138 = vmatpush1.msra.mxu1 %v6696_v48  ;;  %v6633_v62 = vld [vmem:[%s12594_s11 + $0x528] sm:$0xff]  ;;  %v6632_v48 = vld [vmem:[%s12594_s11 + $0x520] sm:$0xff] }
0x148c   : > { %v4901_v33 = vadd.f32 %v4897_v40, %v4886_v30  ;;  %5139 = vmatprep.subr.mxu1 %v6691_v51  ;;  %v6639_v40 = vld [vmem:[%s12594_s11 + $0x558] sm:$0xff]  ;;  %v6717_v39 = vld [vmem:[%s12594_s11 + $0x7c8] sm:$0xff] }
0x148d   : > { %5140 = vmatpush1.msra.mxu1 %v6690_v31  ;;  %5228 = vmatprep.subr.mxu0 %v6639_v40  ;;  %v6627_v51 = vld [vmem:[%s12594_s11 + $0x4f8] sm:$0xff]  ;;  %v6626_v31 = vld [vmem:[%s12594_s11 + $0x4f0] sm:$0xff]  ;;  %v6716_v40 = vld [vmem:[%s12594_s11 + $0x7c0] sm:$0xff] }
0x148e   : > { %4903 = vst.msk [vmem:[#allocation2 + $0x8] sm:$0xff] %vm800_vm0, %v4901_v33  ;;  %5141 = vmatprep.subr.mxu1 %v6685_v55  ;;  %5229 = vmatpush1.msra.mxu0 %v6638_v21  ;;  %v6621_v55 = vld [vmem:[%s12594_s11 + $0x4c8] sm:$0xff]  ;;  %v6610_v21 = vld [vmem:[%s12592_s9 + $0x1] ss:$2 sm:$0x3] }
0x148f   : > { %5142 = vmatpush1.msra.mxu1 %v6684_v58  ;;  %5230 = vmatprep.subr.mxu0 %v6633_v62  ;;  %v6612_v58 = vld [vmem:[%s12594_s11 + $0x480] sm:$0xff]  ;;  %v4936_v62 = vrot.slane %v6610_v21, %v8188_v17 }
0x1490   : > { %5143 = vmatprep.subr.mxu1 %v6679_v60  ;;  %5231 = vmatpush1.msra.mxu0 %v6632_v48  ;;  %v6751_v60 = vld [vmem:[%s12594_s11 + $0x8d8] sm:$0xff] }
0x1491   : > { %5144 = vmatpush1.msra.mxu1 %v6678_v36  ;;  %5232 = vmatprep.subr.mxu0 %v6627_v51  ;;  %v6750_v36 = vld [vmem:[%s12594_s11 + $0x8d0] sm:$0xff] }
0x1492   : > { %5145 = vmatprep.subr.mxu1 %v6673_v41  ;;  %5233 = vmatpush1.msra.mxu0 %v6626_v31  ;;  %v6745_v41 = vld [vmem:[%s12594_s11 + $0x8a8] sm:$0xff] }
0x1493   : > { %5146 = vmatpush1.msra.mxu1 %v6672_v2  ;;  %5234 = vmatprep.subr.mxu0 %v6621_v55  ;;  %v6744_v2 = vld [vmem:[%s12594_s11 + $0x8a0] sm:$0xff] }
0x1494   : > { %5147 = vmatprep.subr.mxu1 %v6667_v4  ;;  %5235 = vmatpush1.msra.mxu0 %v6620_v57  ;;  %v6739_v4 = vld [vmem:[%s12594_s11 + $0x878] sm:$0xff] }
0x1495   : > { %v11167_v43 = vld [vmem:[#allocation2 + $0x8] sm:$0xff]  ;;  %5148 = vmatpush1.msra.mxu1 %v6666_v6  ;;  %5236 = vmatprep.subr.mxu0 %v6615_v59  ;;  %v6738_v6 = vld [vmem:[%s12594_s11 + $0x870] sm:$0xff]  ;;  %v6700_v59 = vld [vmem:[%s12594_s11 + $0x740] sm:$0xff] }
0x1496   : > { %v4910_v45 = vsel %vm800_vm0, %v11167_v43, 0.0  ;;  %5149 = vmatprep.subr.mxu1 %v6661_v22  ;;  %5237 = vmatpush1.msra.mxu0 %v6614_v63  ;;  %v6733_v22 = vld [vmem:[%s12594_s11 + $0x848] sm:$0xff]  ;;  %v6695_v63 = vld [vmem:[%s12594_s11 + $0x718] sm:$0xff] }
0x1497   : > { %v4911_v7 = vadd.f32 %v4910_v45, %v11165_v28  ;;  %5150 = vmatpush1.msra.mxu1 %v6660_v24  ;;  %5254 = vmatprep.subr.mxu0 %v6753_v0  ;;  %v6732_v24 = vld [vmem:[%s12594_s11 + $0x840] sm:$0xff]  ;;  %v6694_v0 = vld [vmem:[%s12594_s11 + $0x710] sm:$0xff] }
0x1498   : > { %5151 = vmatprep.subr.mxu1 %v6655_v44  ;;  %5255 = vmatpush2.msra.mxu0 %v6752_v1  ;;  %v6727_v44 = vld [vmem:[%s12594_s11 + $0x818] sm:$0xff]  ;;  %v6689_v1 = vld [vmem:[%s12594_s11 + $0x6e8] sm:$0xff] }
0x1499   : > { %4912 = vadd.xlane.f32.xlu0 %v4911_v7  ;;  %5152 = vmatpush1.msra.mxu1 %v6654_v53  ;;  %v6726_v53 = vld [vmem:[%s12594_s11 + $0x810] sm:$0xff] }
0x149a   : > { %5153 = vmatprep.subr.mxu1 %v6649_v19  ;;  %5256 = vmatprep.subr.mxu0 %v6747_v3  ;;  %v6721_v19 = vld [vmem:[%s12594_s11 + $0x7e8] sm:$0xff]  ;;  %v6688_v3 = vld [vmem:[%s12594_s11 + $0x6e0] sm:$0xff] }
0x149b   : > { %5154 = vmatpush1.msra.mxu1 %v6648_v34  ;;  %5257 = vmatpush2.msra.mxu0 %v6746_v5  ;;  %v6720_v34 = vld [vmem:[%s12594_s11 + $0x7e0] sm:$0xff]  ;;  %v6683_v5 = vld [vmem:[%s12594_s11 + $0x6b8] sm:$0xff] }
0x149c   : > { %5155 = vmatprep.subr.mxu1 %v6643_v38  ;;  %5258 = vmatprep.subr.mxu0 %v6741_v11  ;;  %v6715_v38 = vld [vmem:[%s12594_s11 + $0x7b8] sm:$0xff]  ;;  %v6682_v11 = vld [vmem:[%s12594_s11 + $0x6b0] sm:$0xff] }
0x149d   : > { %5156 = vmatpush1.msra.mxu1 %v6642_v32  ;;  %5259 = vmatpush2.msra.mxu0 %v6740_v23  ;;  %v6714_v32 = vld [vmem:[%s12594_s11 + $0x7b0] sm:$0xff]  ;;  %v6677_v23 = vld [vmem:[%s12594_s11 + $0x688] sm:$0xff] }
0x149e   : > { %5157 = vmatprep.subr.mxu1 %v6637_v27  ;;  %5260 = vmatprep.subr.mxu0 %v6735_v25  ;;  %v6709_v27 = vld [vmem:[%s12594_s11 + $0x788] sm:$0xff]  ;;  %v6676_v25 = vld [vmem:[%s12594_s11 + $0x680] sm:$0xff] }
0x149f   : > { %5158 = vmatpush1.msra.mxu1 %v6636_v61  ;;  %5261 = vmatpush2.msra.mxu0 %v6734_v26  ;;  %v6708_v61 = vld [vmem:[%s12594_s11 + $0x780] sm:$0xff]  ;;  %v6671_v26 = vld [vmem:[%s12594_s11 + $0x658] sm:$0xff] }
0x14a0   : > { %5159 = vmatprep.subr.mxu1 %v6631_v10  ;;  %5262 = vmatprep.subr.mxu0 %v6729_v13  ;;  %v6670_v13 = vld [vmem:[%s12594_s11 + $0x650] sm:$0xff] }
0x14a1   : > { %5263 = vmatpush2.msra.mxu0 %v6728_v20  ;;  %v6665_v20 = vld [vmem:[%s12594_s11 + $0x628] sm:$0xff] }
0x14a2   : > { %5264 = vmatprep.subr.mxu0 %v6723_v37  ;;  %v6664_v37 = vld [vmem:[%s12594_s11 + $0x620] sm:$0xff] }
0x14a3   : > { %5265 = vmatpush2.msra.mxu0 %v6722_v29  ;;  %v6659_v29 = vld [vmem:[%s12594_s11 + $0x5f8] sm:$0xff] }
0x14a4   : > { %5266 = vmatprep.subr.mxu0 %v6717_v39  ;;  %v6658_v39 = vld [vmem:[%s12594_s11 + $0x5f0] sm:$0xff] }
0x14a5   : > { %5267 = vmatpush2.msra.mxu0 %v6716_v40  ;;  %v6653_v40 = vld [vmem:[%s12594_s11 + $0x5c8] sm:$0xff] }
0x1522   : > { %v4913_v30 = vpop.xlane.xlu0 %4912 }
0x1523   : > { %v4914_v33 = vmul.f32 0.0052083335, %v4913_v30  ;;  %v6711_v30 = vld [vmem:[%s12594_s11 + $0x798] sm:$0xff] }
0x1524   : > { %5268 = vmatprep.subr.mxu0 %v6711_v30  ;;  %v6652_v30 = vld [vmem:[%s12594_s11 + $0x5c0] sm:$0xff] }
0x1525   : > { %v11314_v42 = vsub.f32 %v11165_v28, %v4914_v33  ;;  %v11317_v14 = vsub.f32 %v11167_v43, %v4914_v33  ;;  %v6630_v43 = vld [vmem:[%s12594_s11 + $0x510] sm:$0xff] }
0x1526   : > { %5160 = vmatpush1.msra.mxu1 %v6630_v43  ;;  %v6710_v33 = vld [vmem:[%s12594_s11 + $0x790] sm:$0xff]  ;;  %v6611_v43 = vld [vmem:[%s12593_s10 + $0x1] ss:$2 sm:$0x3] }
0x1527   : > { %v4917_v12 = vmul.f32 %v11314_v42, %v11314_v42  ;;  %v4918_v45 = vmul.f32 %v11317_v14, %v11317_v14  ;;  %5161 = vmatprep.subr.mxu1 %v6625_v18  ;;  %5269 = vmatpush2.msra.mxu0 %v6710_v33  ;;  %v4932_v18 = vrot.slane %v6610_v21, %v8185_v16  ;;  %v6773_v33 = vld [vmem:[%s12596_s13 + $0x668] sm:$0xff]  ;;  %v6770_v21 = vld [vmem:[%s12596_s13 + $0x650] sm:$0xff] }
0x1528   : > { %5162 = vmatpush1.msra.mxu1 %v6624_v50  ;;  %v4949_v51 = vrot.slane %v6611_v43, %v8188_v17  ;;  %v4945_v31 = vrot.slane %v6611_v43, %v8185_v16  ;;  %v6640_v43 = vld [vmem:[%s12594_s11 + $0x560] sm:$0xff] }
0x1529   : > { %v4919_v7 = vsel %vm800_vm0, %v4918_v45, 0.0  ;;  %5163 = vmatprep.subr.mxu1 %v6619_v52  ;;  %v6791_v45 = vld [vmem:[%s12596_s13 + $0x6f8] sm:$0xff] }
0x152a   : > { %v4920_v9 = vadd.f32 %v4919_v7, %v4917_v12  ;;  %5164 = vmatpush1.msra.mxu1 %v6618_v54  ;;  %v6707_v12 = vld [vmem:[%s12594_s11 + $0x778] sm:$0xff]  ;;  %5595 = vmatprep.subr.mxu0 %v6791_v45  ;;  %v6772_v45 = vld [vmem:[%s12596_s13 + $0x660] sm:$0xff] }
0x152b   : > { %5165 = vmatprep.subr.mxu1 %v6613_v56 }
0x152c   : > { %4921 = vadd.xlane.f32.xlu1 %v4920_v9  ;;  %5166 = vmatpush1.msra.mxu1 %v6612_v58  ;;  %v6706_v58 = vld [vmem:[%s12594_s11 + $0x770] sm:$0xff] }
0x152d   : > { %5183 = vmatprep.subr.mxu1 %v6751_v60  ;;  %v6789_v60 = vld [vmem:[%s12596_s13 + $0x6e8] sm:$0xff] }
0x152e   : > { %5184 = vmatpush2.msra.mxu1 %v6750_v36  ;;  %v6788_v36 = vld [vmem:[%s12596_s13 + $0x6e0] sm:$0xff] }
0x152f   : > { %5185 = vmatprep.subr.mxu1 %v6745_v41  ;;  %v6787_v41 = vld [vmem:[%s12596_s13 + $0x6d8] sm:$0xff] }
0x1530   : > { %5186 = vmatpush2.msra.mxu1 %v6744_v2  ;;  %v6786_v2 = vld [vmem:[%s12596_s13 + $0x6d0] sm:$0xff] }
0x1531   : > { %5187 = vmatprep.subr.mxu1 %v6739_v4  ;;  %v6785_v4 = vld [vmem:[%s12596_s13 + $0x6c8] sm:$0xff] }
0x1532   : > { %5188 = vmatpush2.msra.mxu1 %v6738_v6  ;;  %v6784_v6 = vld [vmem:[%s12596_s13 + $0x6c0] sm:$0xff] }
0x1533   : > { %5189 = vmatprep.subr.mxu1 %v6733_v22  ;;  %v6783_v22 = vld [vmem:[%s12596_s13 + $0x6b8] sm:$0xff] }
0x1534   : > { %5190 = vmatpush2.msra.mxu1 %v6732_v24  ;;  %v6782_v24 = vld [vmem:[%s12596_s13 + $0x6b0] sm:$0xff] }
0x1535   : > { %5191 = vmatprep.subr.mxu1 %v6727_v44  ;;  %v6781_v44 = vld [vmem:[%s12596_s13 + $0x6a8] sm:$0xff] }
0x1536   : > { %5192 = vmatpush2.msra.mxu1 %v6726_v53  ;;  %v6780_v53 = vld [vmem:[%s12596_s13 + $0x6a0] sm:$0xff] }
0x1537   : > { %5193 = vmatprep.subr.mxu1 %v6721_v19  ;;  %v6779_v19 = vld [vmem:[%s12596_s13 + $0x698] sm:$0xff] }
0x1538   : > { %5194 = vmatpush2.msra.mxu1 %v6720_v34  ;;  %v6778_v34 = vld [vmem:[%s12596_s13 + $0x690] sm:$0xff] }
0x1539   : > { %5195 = vmatprep.subr.mxu1 %v6715_v38  ;;  %v6777_v38 = vld [vmem:[%s12596_s13 + $0x688] sm:$0xff] }
0x153a   : > { %5196 = vmatpush2.msra.mxu1 %v6714_v32  ;;  %v6776_v32 = vld [vmem:[%s12596_s13 + $0x680] sm:$0xff] }
0x153b   : > { %5197 = vmatprep.subr.mxu1 %v6709_v27  ;;  %v6775_v27 = vld [vmem:[%s12596_s13 + $0x678] sm:$0xff] }
0x153c   : > { %5198 = vmatpush2.msra.mxu1 %v6708_v61  ;;  %v6774_v61 = vld [vmem:[%s12596_s13 + $0x670] sm:$0xff] }
0x153d   : > { %5277 = vmatprep.subr.mxu1 %v6707_v12  ;;  %v6647_v12 = vld [vmem:[%s12594_s11 + $0x598] sm:$0xff] }
0x15b5   : > { %v4922_v7 = vpop.xlane.xlu1 %4921 }
0x15b6   : > { %v4923_v9 = vmul.f32 0.0052083335, %v4922_v7  ;;  %v6646_v7 = vld [vmem:[%s12594_s11 + $0x590] sm:$0xff] }
0x15b8   : > { %v4924_v10 = vadd.f32 1e-06, %v4923_v9  ;;  %v6771_v9 = vld [vmem:[%s12596_s13 + $0x658] sm:$0xff] }
0x15ba   : > { %7099 = vrsqrt.f32 %v4924_v10  ;;  %v6641_v10 = vld [vmem:[%s12594_s11 + $0x568] sm:$0xff] }
0x15c7   : > { %v7100_v48 = vpop.eup %7099 }
0x15c8   : > { %v4927_v50 = vmul.f32 %v7100_v48, %v11317_v14  ;;  %v4926_v52 = vmul.f32 %v7100_v48, %v11314_v42  ;;  %v6701_v14 = vld [vmem:[%s12594_s11 + $0x748] sm:$0xff]  ;;  %v6790_v42 = vld [vmem:[%s12596_s13 + $0x6f0] sm:$0xff]  ;;  %v6768_v48 = vld [vmem:[%s12596_s13 + $0x640] sm:$0xff] }
0x15ca   : > { %v4940_v54 = vmul.f32 %v4936_v62, %v4927_v50  ;;  %v4939_v55 = vmul.f32 %v4932_v18, %v4926_v52  ;;  %v6769_v62 = vld [vmem:[%s12596_s13 + $0x648] sm:$0xff]  ;;  %v6635_v18 = vld [vmem:[%s12594_s11 + $0x538] sm:$0xff]  ;;  %v6634_v50 = vld [vmem:[%s12594_s11 + $0x530] sm:$0xff] }
0x15cb   : > { %v6629_v52 = vld [vmem:[%s12594_s11 + $0x508] sm:$0xff] }
0x15cc   : > { %v4953_v56 = vadd.f32 %v4949_v51, %v4940_v54  ;;  %v11489_v57 = vadd.f32 %v4945_v31, %v4939_v55  ;;  %v6767_v51 = vld [vmem:[%s12596_s13 + $0x638] sm:$0xff]  ;;  %v6766_v31 = vld [vmem:[%s12596_s13 + $0x630] sm:$0xff]  ;;  %v6628_v54 = vld [vmem:[%s12594_s11 + $0x500] sm:$0xff] }
0x15cd   : > { %v6765_v55 = vld [vmem:[%s12596_s13 + $0x628] sm:$0xff] }
0x15ce   : > { %6757 = vmatprep.mubr.msk.f32.mxu1 %vm800_vm0, %v4953_v56  ;;  %6758 = vmatprep.mubr.msk.f32.mxu0 %vm800_vm0, %v4953_v56 }
0x15cf   : > { %5200 = vmatmul.mubr.f32.vlgmr.msra.gmra.mxu1 %v11489_v57  ;;  %5271 = vmatmul.mubr.f32.vlgmr.msra.gmra.mxu0 %v11489_v57 }
0x15d0   : > { %5278 = vmatpush1.msra.mxu1 %v6706_v58  ;;  %6759 = vmatprep.mubr.msk.f32.mxu1 %vm800_vm0, %v4953_v56  ;;  %v6623_v56 = vld [vmem:[%s12594_s11 + $0x4d8] sm:$0xff]  ;;  %v6764_v58 = vld [vmem:[%s12596_s13 + $0x620] sm:$0xff] }
0x15d1   : > { %5279 = vmatprep.subr.mxu1 %v6701_v14  ;;  %5596 = vmatpush1.msra.mxu0 %v6790_v42  ;;  %v6622_v14 = vld [vmem:[%s12594_s11 + $0x4d0] sm:$0xff]  ;;  %v6763_v42 = vld [vmem:[%s12596_s13 + $0x618] sm:$0xff] }
0x15d2   : > { %5280 = vmatpush1.msra.mxu1 %v6700_v59  ;;  %5597 = vmatprep.subr.mxu0 %v6789_v60  ;;  %v6617_v59 = vld [vmem:[%s12594_s11 + $0x4a8] sm:$0xff]  ;;  %v6762_v60 = vld [vmem:[%s12596_s13 + $0x610] sm:$0xff] }
0x15d3   : > { %5281 = vmatprep.subr.mxu1 %v6695_v63  ;;  %5598 = vmatpush1.msra.mxu0 %v6788_v36  ;;  %v6616_v63 = vld [vmem:[%s12594_s11 + $0x4a0] sm:$0xff]  ;;  %v6761_v36 = vld [vmem:[%s12596_s13 + $0x608] sm:$0xff] }
0x15d4   : > { %5282 = vmatpush1.msra.mxu1 %v6694_v0  ;;  %5599 = vmatprep.subr.mxu0 %v6787_v41  ;;  %v6755_v0 = vld [vmem:[%s12594_s11 + $0x8f8] sm:$0xff]  ;;  %v6754_v41 = vld [vmem:[%s12594_s11 + $0x8f0] sm:$0xff] }
0x15d5   : > { %5283 = vmatprep.subr.mxu1 %v6689_v1  ;;  %5600 = vmatpush1.msra.mxu0 %v6786_v2  ;;  %v6749_v1 = vld [vmem:[%s12594_s11 + $0x8c8] sm:$0xff]  ;;  %v6748_v2 = vld [vmem:[%s12594_s11 + $0x8c0] sm:$0xff] }
0x15d6   : > { %5284 = vmatpush1.msra.mxu1 %v6688_v3  ;;  %5601 = vmatprep.subr.mxu0 %v6785_v4  ;;  %v6743_v3 = vld [vmem:[%s12594_s11 + $0x898] sm:$0xff]  ;;  %v6742_v4 = vld [vmem:[%s12594_s11 + $0x890] sm:$0xff] }
0x15d7   : > { %5285 = vmatprep.subr.mxu1 %v6683_v5  ;;  %5602 = vmatpush1.msra.mxu0 %v6784_v6  ;;  %v6737_v5 = vld [vmem:[%s12594_s11 + $0x868] sm:$0xff]  ;;  %v6736_v6 = vld [vmem:[%s12594_s11 + $0x860] sm:$0xff] }
0x15d8   : > { %5286 = vmatpush1.msra.mxu1 %v6682_v11  ;;  %5603 = vmatprep.subr.mxu0 %v6783_v22  ;;  %v6731_v11 = vld [vmem:[%s12594_s11 + $0x838] sm:$0xff]  ;;  %v6730_v22 = vld [vmem:[%s12594_s11 + $0x830] sm:$0xff] }
0x15d9   : > { %5287 = vmatprep.subr.mxu1 %v6677_v23  ;;  %5604 = vmatpush1.msra.mxu0 %v6782_v24  ;;  %v6725_v23 = vld [vmem:[%s12594_s11 + $0x808] sm:$0xff]  ;;  %v6724_v24 = vld [vmem:[%s12594_s11 + $0x800] sm:$0xff] }
0x15da   : > { %5288 = vmatpush1.msra.mxu1 %v6676_v25  ;;  %5605 = vmatprep.subr.mxu0 %v6781_v44  ;;  %v6719_v25 = vld [vmem:[%s12594_s11 + $0x7d8] sm:$0xff]  ;;  %v6718_v44 = vld [vmem:[%s12594_s11 + $0x7d0] sm:$0xff] }
0x15db   : > { %5289 = vmatprep.subr.mxu1 %v6671_v26  ;;  %5606 = vmatpush1.msra.mxu0 %v6780_v53  ;;  %v6713_v26 = vld [vmem:[%s12594_s11 + $0x7a8] sm:$0xff]  ;;  %v6712_v53 = vld [vmem:[%s12594_s11 + $0x7a0] sm:$0xff] }
0x15dc   : > { %5290 = vmatpush1.msra.mxu1 %v6670_v13  ;;  %5607 = vmatprep.subr.mxu0 %v6779_v19  ;;  %v6855_v13 = vld [vmem:[%s12596_s13 + $0x8f8] sm:$0xff]  ;;  %v6854_v19 = vld [vmem:[%s12596_s13 + $0x8f0] sm:$0xff] }
0x15dd   : > { %5291 = vmatprep.subr.mxu1 %v6665_v20  ;;  %5608 = vmatpush1.msra.mxu0 %v6778_v34  ;;  %v6853_v20 = vld [vmem:[%s12596_s13 + $0x8e8] sm:$0xff]  ;;  %v6852_v34 = vld [vmem:[%s12596_s13 + $0x8e0] sm:$0xff] }
0x15de   : > { %5292 = vmatpush1.msra.mxu1 %v6664_v37  ;;  %5609 = vmatprep.subr.mxu0 %v6777_v38  ;;  %v6851_v37 = vld [vmem:[%s12596_s13 + $0x8d8] sm:$0xff]  ;;  %v6850_v38 = vld [vmem:[%s12596_s13 + $0x8d0] sm:$0xff] }
0x15df   : > { %5293 = vmatprep.subr.mxu1 %v6659_v29  ;;  %5610 = vmatpush1.msra.mxu0 %v6776_v32  ;;  %v6848_v29 = vld [vmem:[%s12596_s13 + $0x8c0] sm:$0xff]  ;;  %v6847_v32 = vld [vmem:[%s12596_s13 + $0x8b8] sm:$0xff] }
0x15e0   : > { %5294 = vmatpush1.msra.mxu1 %v6658_v39  ;;  %5611 = vmatprep.subr.mxu0 %v6775_v27  ;;  %v6846_v39 = vld [vmem:[%s12596_s13 + $0x8b0] sm:$0xff]  ;;  %v6845_v27 = vld [vmem:[%s12596_s13 + $0x8a8] sm:$0xff] }
0x15e1   : > { %5295 = vmatprep.subr.mxu1 %v6653_v40  ;;  %5612 = vmatpush1.msra.mxu0 %v6774_v61  ;;  %v6844_v40 = vld [vmem:[%s12596_s13 + $0x8a0] sm:$0xff]  ;;  %v6843_v61 = vld [vmem:[%s12596_s13 + $0x898] sm:$0xff] }
0x15e2   : > { %5296 = vmatpush1.msra.mxu1 %v6652_v30  ;;  %5613 = vmatprep.subr.mxu0 %v6773_v33  ;;  %v6842_v30 = vld [vmem:[%s12596_s13 + $0x890] sm:$0xff]  ;;  %v6841_v33 = vld [vmem:[%s12596_s13 + $0x888] sm:$0xff] }
0x15e3   : > { %5297 = vmatprep.subr.mxu1 %v6647_v12  ;;  %5614 = vmatpush1.msra.mxu0 %v6772_v45  ;;  %v6840_v12 = vld [vmem:[%s12596_s13 + $0x880] sm:$0xff]  ;;  %v6839_v45 = vld [vmem:[%s12596_s13 + $0x878] sm:$0xff] }
0x15e4   : > { %5298 = vmatpush1.msra.mxu1 %v6646_v7  ;;  %5615 = vmatprep.subr.mxu0 %v6771_v9  ;;  %v6838_v7 = vld [vmem:[%s12596_s13 + $0x870] sm:$0xff]  ;;  %v6837_v9 = vld [vmem:[%s12596_s13 + $0x868] sm:$0xff] }
0x15e5   : > { %5299 = vmatprep.subr.mxu1 %v6641_v10  ;;  %5616 = vmatpush1.msra.mxu0 %v6770_v21  ;;  %v6836_v10 = vld [vmem:[%s12596_s13 + $0x860] sm:$0xff] }
0x15e6   : > { %5300 = vmatpush1.msra.mxu1 %v6640_v43  ;;  %5617 = vmatprep.subr.mxu0 %v6769_v62  ;;  %v6760_v21 = vld [vmem:[%s12596_s13 + $0x600] sm:$0xff]  ;;  %v6835_v43 = vld [vmem:[%s12596_s13 + $0x858] sm:$0xff] }
0x15e7   : > { %5301 = vmatprep.subr.mxu1 %v6635_v18  ;;  %5618 = vmatpush1.msra.mxu0 %v6768_v48  ;;  %v6823_v62 = vld [vmem:[%s12596_s13 + $0x7f8] sm:$0xff]  ;;  %v6834_v18 = vld [vmem:[%s12596_s13 + $0x850] sm:$0xff] }
0x15e8   : > { %5302 = vmatpush1.msra.mxu1 %v6634_v50  ;;  %5619 = vmatprep.subr.mxu0 %v6767_v51  ;;  %v6822_v48 = vld [vmem:[%s12596_s13 + $0x7f0] sm:$0xff]  ;;  %v6833_v50 = vld [vmem:[%s12596_s13 + $0x848] sm:$0xff] }
0x15e9   : > { %5303 = vmatprep.subr.mxu1 %v6629_v52  ;;  %5620 = vmatpush1.msra.mxu0 %v6766_v31  ;;  %v6821_v51 = vld [vmem:[%s12596_s13 + $0x7e8] sm:$0xff]  ;;  %v6832_v52 = vld [vmem:[%s12596_s13 + $0x840] sm:$0xff] }
0x15ea   : > { %5304 = vmatpush1.msra.mxu1 %v6628_v54  ;;  %5621 = vmatprep.subr.mxu0 %v6765_v55  ;;  %v6820_v31 = vld [vmem:[%s12596_s13 + $0x7e0] sm:$0xff]  ;;  %v6831_v54 = vld [vmem:[%s12596_s13 + $0x838] sm:$0xff] }
0x15eb   : > { %5305 = vmatprep.subr.mxu1 %v6623_v56  ;;  %5622 = vmatpush1.msra.mxu0 %v6764_v58  ;;  %v6819_v55 = vld [vmem:[%s12596_s13 + $0x7d8] sm:$0xff]  ;;  %v6830_v56 = vld [vmem:[%s12596_s13 + $0x830] sm:$0xff] }
0x15ec   : > { %5306 = vmatpush1.msra.mxu1 %v6622_v14  ;;  %5623 = vmatprep.subr.mxu0 %v6763_v42  ;;  %v6818_v58 = vld [vmem:[%s12596_s13 + $0x7d0] sm:$0xff]  ;;  %v6829_v14 = vld [vmem:[%s12596_s13 + $0x828] sm:$0xff] }
0x15ed   : > { %5307 = vmatprep.subr.mxu1 %v6617_v59  ;;  %5624 = vmatpush1.msra.mxu0 %v6762_v60  ;;  %v6817_v42 = vld [vmem:[%s12596_s13 + $0x7c8] sm:$0xff]  ;;  %v6828_v59 = vld [vmem:[%s12596_s13 + $0x820] sm:$0xff] }
0x15ee   : > { %5308 = vmatpush1.msra.mxu1 %v6616_v63  ;;  %5625 = vmatprep.subr.mxu0 %v6761_v36  ;;  %v6816_v60 = vld [vmem:[%s12596_s13 + $0x7c0] sm:$0xff]  ;;  %v6827_v63 = vld [vmem:[%s12596_s13 + $0x818] sm:$0xff] }
0x15ef   : > { %5325 = vmatprep.subr.mxu1 %v6755_v0  ;;  %5626 = vmatpush1.msra.mxu0 %v6760_v21  ;;  %v6815_v36 = vld [vmem:[%s12596_s13 + $0x7b8] sm:$0xff]  ;;  %v6814_v0 = vld [vmem:[%s12596_s13 + $0x7b0] sm:$0xff]  ;;  %v6873_v21 = vld [vmem:[%s12596_s13 + $0x988] sm:$0xff] }
0x15f0   : > { %5326 = vmatpush2.msra.mxu1 %v6754_v41  ;;  %5627 = vmatprep.subr.mxu0 %v6823_v62  ;;  %v6826_v41 = vld [vmem:[%s12596_s13 + $0x810] sm:$0xff]  ;;  %v6872_v62 = vld [vmem:[%s12596_s13 + $0x980] sm:$0xff] }
0x15f1   : > { %5327 = vmatprep.subr.mxu1 %v6749_v1  ;;  %5628 = vmatpush2.msra.mxu0 %v6822_v48  ;;  %v6813_v1 = vld [vmem:[%s12596_s13 + $0x7a8] sm:$0xff]  ;;  %v6871_v48 = vld [vmem:[%s12596_s13 + $0x978] sm:$0xff] }
0x15f2   : > { %5328 = vmatpush2.msra.mxu1 %v6748_v2  ;;  %5629 = vmatprep.subr.mxu0 %v6821_v51  ;;  %v6825_v2 = vld [vmem:[%s12596_s13 + $0x808] sm:$0xff]  ;;  %v6870_v51 = vld [vmem:[%s12596_s13 + $0x970] sm:$0xff] }
0x15f3   : > { %5329 = vmatprep.subr.mxu1 %v6743_v3  ;;  %5630 = vmatpush2.msra.mxu0 %v6820_v31  ;;  %v6812_v3 = vld [vmem:[%s12596_s13 + $0x7a0] sm:$0xff]  ;;  %v6869_v31 = vld [vmem:[%s12596_s13 + $0x968] sm:$0xff] }
0x15f4   : > { %5330 = vmatpush2.msra.mxu1 %v6742_v4  ;;  %5631 = vmatprep.subr.mxu0 %v6819_v55  ;;  %v6811_v4 = vld [vmem:[%s12596_s13 + $0x798] sm:$0xff] }
0x15f5   : > { %5331 = vmatprep.subr.mxu1 %v6737_v5  ;;  %5632 = vmatpush2.msra.mxu0 %v6818_v58  ;;  %v6824_v5 = vld [vmem:[%s12596_s13 + $0x800] sm:$0xff]  ;;  %v6867_v55 = vld [vmem:[%s12596_s13 + $0x958] sm:$0xff]  ;;  %v6866_v58 = vld [vmem:[%s12596_s13 + $0x950] sm:$0xff] }
0x15f6   : > { %5332 = vmatpush2.msra.mxu1 %v6736_v6  ;;  %5633 = vmatprep.subr.mxu0 %v6817_v42  ;;  %v6810_v6 = vld [vmem:[%s12596_s13 + $0x790] sm:$0xff]  ;;  %v6864_v42 = vld [vmem:[%s12596_s13 + $0x940] sm:$0xff] }
0x15f7   : > { %5333 = vmatprep.subr.mxu1 %v6731_v11  ;;  %5634 = vmatpush2.msra.mxu0 %v6816_v60  ;;  %v6887_v11 = vld [vmem:[%s12596_s13 + $0x9f8] sm:$0xff]  ;;  %v6862_v60 = vld [vmem:[%s12596_s13 + $0x930] sm:$0xff] }
0x15f8   : > { %5334 = vmatpush2.msra.mxu1 %v6730_v22  ;;  %5635 = vmatprep.subr.mxu0 %v6815_v36  ;;  %v6809_v22 = vld [vmem:[%s12596_s13 + $0x788] sm:$0xff]  ;;  %v6860_v36 = vld [vmem:[%s12596_s13 + $0x920] sm:$0xff] }
0x15f9   : > { %5335 = vmatprep.subr.mxu1 %v6725_v23  ;;  %5636 = vmatpush2.msra.mxu0 %v6814_v0  ;;  %v6886_v23 = vld [vmem:[%s12596_s13 + $0x9f0] sm:$0xff]  ;;  %v6859_v0 = vld [vmem:[%s12596_s13 + $0x918] sm:$0xff] }
0x15fa   : > { %5336 = vmatpush2.msra.mxu1 %v6724_v24  ;;  %5637 = vmatprep.subr.mxu0 %v6813_v1  ;;  %v6808_v24 = vld [vmem:[%s12596_s13 + $0x780] sm:$0xff]  ;;  %v6857_v1 = vld [vmem:[%s12596_s13 + $0x908] sm:$0xff] }
0x15fb   : > { %5337 = vmatprep.subr.mxu1 %v6719_v25  ;;  %5638 = vmatpush2.msra.mxu0 %v6812_v3  ;;  %v6885_v25 = vld [vmem:[%s12596_s13 + $0x9e8] sm:$0xff] }
0x15fc   : > { %5338 = vmatpush2.msra.mxu1 %v6718_v44  ;;  %5639 = vmatprep.subr.mxu0 %v6811_v4  ;;  %v6807_v44 = vld [vmem:[%s12596_s13 + $0x778] sm:$0xff]  ;;  %v12025_v3 = vld [vmem:[%s12595_s12 + $0x1] ss:$2 sm:$0x3f] }
0x15fd   : > { %5339 = vmatprep.subr.mxu1 %v6713_v26  ;;  %5640 = vmatpush2.msra.mxu0 %v6810_v6  ;;  %v6884_v26 = vld [vmem:[%s12596_s13 + $0x9e0] sm:$0xff]  ;;  %v5105_v4 = vrot.slane %v12025_v3, %v8185_v16  ;;  %v5109_v6 = vrot.slane %v12025_v3, %v8188_v17 }
0x15fe   : > { %5340 = vmatpush2.msra.mxu1 %v6712_v53  ;;  %5641 = vmatprep.subr.mxu0 %v6809_v22  ;;  %v6806_v53 = vld [vmem:[%s12596_s13 + $0x770] sm:$0xff] }
0x15ff   : > { %5342 = vmatmul.mubr.f32.vlgmr.msra.gmra.mxu1 %v11489_v57  ;;  %5666 = vmatprep.subr.mxu1 %v6855_v13  ;;  %v6849_v57 = vld [vmem:[%s12596_s13 + $0x8c8] sm:$0xff]  ;;  %v6883_v13 = vld [vmem:[%s12596_s13 + $0x9d8] sm:$0xff] }
0x1600   : > { %5667 = vmatpush1.msra.mxu1 %v6854_v19  ;;  %5642 = vmatpush2.msra.mxu0 %v6808_v24  ;;  %v6805_v19 = vld [vmem:[%s12596_s13 + $0x768] sm:$0xff] }
0x1601   : > { %5668 = vmatprep.subr.mxu1 %v6853_v20  ;;  %v6882_v20 = vld [vmem:[%s12596_s13 + $0x9d0] sm:$0xff]  ;;  %5643 = vmatprep.subr.mxu0 %v6807_v44 }
0x1602   : > { %5669 = vmatpush1.msra.mxu1 %v6852_v34  ;;  %v6804_v34 = vld [vmem:[%s12596_s13 + $0x760] sm:$0xff]  ;;  %5644 = vmatpush2.msra.mxu0 %v6806_v53 }
0x1603   : > { %5670 = vmatprep.subr.mxu1 %v6851_v37  ;;  %v6881_v37 = vld [vmem:[%s12596_s13 + $0x9c8] sm:$0xff]  ;;  %5645 = vmatprep.subr.mxu0 %v6805_v19 }
0x1604   : > { %5671 = vmatpush1.msra.mxu1 %v6850_v38  ;;  %v6803_v38 = vld [vmem:[%s12596_s13 + $0x758] sm:$0xff]  ;;  %5646 = vmatpush2.msra.mxu0 %v6804_v34 }
0x1605   : > { %5672 = vmatprep.subr.mxu1 %v6849_v57  ;;  %v6880_v57 = vld [vmem:[%s12596_s13 + $0x9c0] sm:$0xff]  ;;  %5647 = vmatprep.subr.mxu0 %v6803_v38 }
0x1606   : > { %5673 = vmatpush1.msra.mxu1 %v6848_v29  ;;  %v6802_v29 = vld [vmem:[%s12596_s13 + $0x750] sm:$0xff] }
0x1607   : > { %5674 = vmatprep.subr.mxu1 %v6847_v32  ;;  %v6879_v32 = vld [vmem:[%s12596_s13 + $0x9b8] sm:$0xff]  ;;  %5648 = vmatpush2.msra.mxu0 %v6802_v29 }
0x1608   : > { %5675 = vmatpush1.msra.mxu1 %v6846_v39  ;;  %v6801_v39 = vld [vmem:[%s12596_s13 + $0x748] sm:$0xff] }
0x1609   : > { %5676 = vmatprep.subr.mxu1 %v6845_v27  ;;  %v6878_v27 = vld [vmem:[%s12596_s13 + $0x9b0] sm:$0xff]  ;;  %5649 = vmatprep.subr.mxu0 %v6801_v39 }
0x160a   : > { %5677 = vmatpush1.msra.mxu1 %v6844_v40  ;;  %v6800_v40 = vld [vmem:[%s12596_s13 + $0x740] sm:$0xff] }
0x160b   : > { %5678 = vmatprep.subr.mxu1 %v6843_v61  ;;  %v6877_v61 = vld [vmem:[%s12596_s13 + $0x9a8] sm:$0xff]  ;;  %5650 = vmatpush2.msra.mxu0 %v6800_v40 }
0x160c   : > { %5679 = vmatpush1.msra.mxu1 %v6842_v30  ;;  %v6799_v30 = vld [vmem:[%s12596_s13 + $0x738] sm:$0xff] }
0x160d   : > { %5680 = vmatprep.subr.mxu1 %v6841_v33  ;;  %v6876_v33 = vld [vmem:[%s12596_s13 + $0x9a0] sm:$0xff]  ;;  %5651 = vmatprep.subr.mxu0 %v6799_v30 }
0x160e   : > { %5681 = vmatpush1.msra.mxu1 %v6840_v12  ;;  %v6798_v12 = vld [vmem:[%s12596_s13 + $0x730] sm:$0xff] }
0x160f   : > { %5682 = vmatprep.subr.mxu1 %v6839_v45  ;;  %v6875_v45 = vld [vmem:[%s12596_s13 + $0x998] sm:$0xff]  ;;  %5652 = vmatpush2.msra.mxu0 %v6798_v12 }
0x1610   : > { %5683 = vmatpush1.msra.mxu1 %v6838_v7  ;;  %v6797_v7 = vld [vmem:[%s12596_s13 + $0x728] sm:$0xff] }
0x1611   : > { %5684 = vmatprep.subr.mxu1 %v6837_v9  ;;  %v6874_v9 = vld [vmem:[%s12596_s13 + $0x990] sm:$0xff]  ;;  %5653 = vmatprep.subr.mxu0 %v6797_v7 }
0x1612   : > { %5685 = vmatpush1.msra.mxu1 %v6836_v10  ;;  %v6796_v10 = vld [vmem:[%s12596_s13 + $0x720] sm:$0xff] }
0x1613   : > { %5686 = vmatprep.subr.mxu1 %v6835_v43  ;;  %v6795_v43 = vld [vmem:[%s12596_s13 + $0x718] sm:$0xff]  ;;  %5654 = vmatpush2.msra.mxu0 %v6796_v10 }
0x1614   : > { %5687 = vmatpush1.msra.mxu1 %v6834_v18  ;;  %v6794_v18 = vld [vmem:[%s12596_s13 + $0x710] sm:$0xff]  ;;  %5655 = vmatprep.subr.mxu0 %v6795_v43 }
0x1615   : > { %5688 = vmatprep.subr.mxu1 %v6833_v50  ;;  %v6793_v50 = vld [vmem:[%s12596_s13 + $0x708] sm:$0xff]  ;;  %5656 = vmatpush2.msra.mxu0 %v6794_v18 }
0x1616   : > { %5689 = vmatpush1.msra.mxu1 %v6832_v52  ;;  %v6792_v52 = vld [vmem:[%s12596_s13 + $0x700] sm:$0xff]  ;;  %5657 = vmatprep.subr.mxu0 %v6793_v50 }
0x1617   : > { %5690 = vmatprep.subr.mxu1 %v6831_v54  ;;  %v6868_v54 = vld [vmem:[%s12596_s13 + $0x960] sm:$0xff]  ;;  %5658 = vmatpush2.msra.mxu0 %v6792_v52 }
0x1618   : > { %5691 = vmatpush1.msra.mxu1 %v6830_v56  ;;  %v6919_v56 = vld [vmem:[%s12596_s13 + $0xaf8] sm:$0xff] }
0x1619   : > { %5692 = vmatprep.subr.mxu1 %v6829_v14  ;;  %5737 = vmatprep.subr.mxu0 %v6919_v56  ;;  %v6865_v14 = vld [vmem:[%s12596_s13 + $0x948] sm:$0xff] }
0x161a   : > { %5693 = vmatpush1.msra.mxu1 %v6828_v59  ;;  %v6863_v59 = vld [vmem:[%s12596_s13 + $0x938] sm:$0xff] }
0x161b   : > { %5694 = vmatprep.subr.mxu1 %v6827_v63  ;;  %v6861_v63 = vld [vmem:[%s12596_s13 + $0x928] sm:$0xff] }
0x161c   : > { %5695 = vmatpush1.msra.mxu1 %v6826_v41  ;;  %v6858_v41 = vld [vmem:[%s12596_s13 + $0x910] sm:$0xff] }
0x161d   : > { %5696 = vmatprep.subr.mxu1 %v6825_v2  ;;  %v6856_v2 = vld [vmem:[%s12596_s13 + $0x900] sm:$0xff] }
0x161e   : > { %5697 = vmatpush1.msra.mxu1 %v6824_v5  ;;  %v5113_v5 = vrot.slane %v12025_v3, %v8626_v46 }
0x161f   : > { %5698 = vmatprep.subr.mxu1 %v6887_v11  ;;  %v5117_v11 = vrot.slane %v12025_v3, %v8629_v47 }
0x1620   : > { %5699 = vmatpush2.msra.mxu1 %v6886_v23 }
0x1621   : > { %5700 = vmatprep.subr.mxu1 %v6885_v25 }
0x1622   : > { %5701 = vmatpush2.msra.mxu1 %v6884_v26 }
0x1623   : > { %5702 = vmatprep.subr.mxu1 %v6883_v13 }
0x1624   : > { %5703 = vmatpush2.msra.mxu1 %v6882_v20 }
0x1625   : > { %5704 = vmatprep.subr.mxu1 %v6881_v37 }
0x1626   : > { %5705 = vmatpush2.msra.mxu1 %v6880_v57 }
0x1627   : > { %5706 = vmatprep.subr.mxu1 %v6879_v32 }
0x1628   : > { %5707 = vmatpush2.msra.mxu1 %v6878_v27 }
0x1629   : > { %5708 = vmatprep.subr.mxu1 %v6877_v61 }
0x162a   : > { %5709 = vmatpush2.msra.mxu1 %v6876_v33 }
0x162b   : > { %5710 = vmatprep.subr.mxu1 %v6875_v45 }
0x162c   : > { %5711 = vmatpush2.msra.mxu1 %v6874_v9 }
0x162d   : > { %5712 = vmatprep.subr.mxu1 %v6873_v21 }
0x162e   : > { %5713 = vmatpush2.msra.mxu1 %v6872_v62 }
0x162f   : > { %5714 = vmatprep.subr.mxu1 %v6871_v48 }
0x1630   : > { %5715 = vmatpush2.msra.mxu1 %v6870_v51 }
0x1631   : > { %5716 = vmatprep.subr.mxu1 %v6869_v31 }
0x1632   : > { %5717 = vmatpush2.msra.mxu1 %v6868_v54 }
0x1633   : > { %5718 = vmatprep.subr.mxu1 %v6867_v55 }
0x1634   : > { %5719 = vmatpush2.msra.mxu1 %v6866_v58 }
0x1635   : > { %5720 = vmatprep.subr.mxu1 %v6865_v14 }
0x1636   : > { %5721 = vmatpush2.msra.mxu1 %v6864_v42 }
0x1637   : > { %5722 = vmatprep.subr.mxu1 %v6863_v59 }
0x1638   : > { %5723 = vmatpush2.msra.mxu1 %v6862_v60  ;;  %v6918_v60 = vld [vmem:[%s12596_s13 + $0xaf0] sm:$0xff] }
0x1639   : > { %5724 = vmatprep.subr.mxu1 %v6861_v63 }
0x163a   : > { %5725 = vmatpush2.msra.mxu1 %v6860_v36  ;;  %v6917_v36 = vld [vmem:[%s12596_s13 + $0xae8] sm:$0xff] }
0x163b   : > { %5726 = vmatprep.subr.mxu1 %v6859_v0  ;;  %v6916_v0 = vld [vmem:[%s12596_s13 + $0xae0] sm:$0xff] }
0x163c   : > { %5727 = vmatpush2.msra.mxu1 %v6858_v41  ;;  %v6915_v41 = vld [vmem:[%s12596_s13 + $0xad8] sm:$0xff] }
0x163d   : > { %5728 = vmatprep.subr.mxu1 %v6857_v1  ;;  %v6914_v1 = vld [vmem:[%s12596_s13 + $0xad0] sm:$0xff] }
0x163e   : > { %5729 = vmatpush2.msra.mxu1 %v6856_v2  ;;  %v6913_v2 = vld [vmem:[%s12596_s13 + $0xac8] sm:$0xff] }
0x168f   : > { %v5201_v22 = vpop.f32.mrf.mxu1  ;;  %v5272_v23 = vpop.f32.mrf.mxu0 }
0x1690   : > { %v5202_v24 = vadd.f32 %v5201_v22, %v5105_v4  ;;  %v5273_v25 = vadd.f32 %v5272_v23, %v5113_v5  ;;  %v6912_v4 = vld [vmem:[%s12596_s13 + $0xac0] sm:$0xff]  ;;  %v6911_v5 = vld [vmem:[%s12596_s13 + $0xab8] sm:$0xff] }
0x1691   : > { %v5203_v44 = vpop.f32.mrf.mxu1  ;;  %v5274_v26 = vpop.f32.mrf.mxu0  ;;  %v6908_v22 = vld [vmem:[%s12596_s13 + $0xaa0] sm:$0xff]  ;;  %v6907_v23 = vld [vmem:[%s12596_s13 + $0xa98] sm:$0xff] }
0x1692   : > { %v5354_v53 = vmul.f32 0.044715, %v5202_v24  ;;  %v5356_v13 = vmul.f32 0.044715, %v5273_v25  ;;  %v5204_v19 = vadd.f32 %v5203_v44, %v5109_v6  ;;  %v5275_v20 = vadd.f32 %v5274_v26, %v5117_v11  ;;  %v6910_v6 = vld [vmem:[%s12596_s13 + $0xab0] sm:$0xff]  ;;  %v6909_v11 = vld [vmem:[%s12596_s13 + $0xaa8] sm:$0xff] }
0x1693   : > { %v5348_v56 = vmul.f32 0.5, %v5202_v24  ;;  %v5350_v14 = vmul.f32 0.5, %v5273_v25  ;;  %v6904_v44 = vld [vmem:[%s12596_s13 + $0xa80] sm:$0xff]  ;;  %v5125_v26 = vrot.slane %v12025_v3, %v8634_v49 }
0x1694   : > { %v5360_v34 = vmul.f32 %v5354_v53, %v5202_v24  ;;  %v5362_v37 = vmul.f32 %v5356_v13, %v5273_v25  ;;  %v5355_v38 = vmul.f32 0.044715, %v5204_v19  ;;  %v5357_v57 = vmul.f32 0.044715, %v5275_v20  ;;  %v6903_v53 = vld [vmem:[%s12596_s13 + $0xa78] sm:$0xff]  ;;  %v6900_v49 = vld [vmem:[%s12596_s13 + $0xa60] sm:$0xff] }
0x1695   : > { %v5349_v51 = vmul.f32 0.5, %v5204_v19  ;;  %v5351_v54 = vmul.f32 0.5, %v5275_v20  ;;  %v5121_v13 = vrot.slane %v12025_v3, %v8608_v35  ;;  %v6899_v35 = vld [vmem:[%s12596_s13 + $0xa58] sm:$0xff] }
0x1696   : > { %v5366_v29 = vmul.f32 %v5360_v34, %v5202_v24  ;;  %v5368_v32 = vmul.f32 %v5362_v37, %v5273_v25  ;;  %v5361_v39 = vmul.f32 %v5355_v38, %v5204_v19  ;;  %v5363_v27 = vmul.f32 %v5357_v57, %v5275_v20  ;;  %v6901_v34 = vld [vmem:[%s12596_s13 + $0xa68] sm:$0xff]  ;;  %v6898_v57 = vld [vmem:[%s12596_s13 + $0xa50] sm:$0xff] }
0x1698   : > { %v5372_v40 = vadd.f32 %v5366_v29, %v5202_v24  ;;  %v5374_v61 = vadd.f32 %v5368_v32, %v5273_v25  ;;  %v5367_v30 = vmul.f32 %v5361_v39, %v5204_v19  ;;  %v5369_v33 = vmul.f32 %v5363_v27, %v5275_v20  ;;  %v6906_v24 = vld [vmem:[%s12596_s13 + $0xa90] sm:$0xff]  ;;  %v6905_v25 = vld [vmem:[%s12596_s13 + $0xa88] sm:$0xff]  ;;  %v6896_v39 = vld [vmem:[%s12596_s13 + $0xa40] sm:$0xff] }
0x1699   : > { %v6897_v32 = vld [vmem:[%s12596_s13 + $0xa48] sm:$0xff] }
0x169a   : > { %v5373_v12 = vadd.f32 %v5367_v30, %v5204_v19  ;;  %v5375_v45 = vadd.f32 %v5369_v33, %v5275_v20  ;;  %v5378_v7 = vmul.f32 0.7978846, %v5372_v40  ;;  %v5380_v9 = vmul.f32 0.7978846, %v5374_v61  ;;  %v6902_v20 = vld [vmem:[%s12596_s13 + $0xa70] sm:$0xff]  ;;  %v6895_v40 = vld [vmem:[%s12596_s13 + $0xa38] sm:$0xff] }
0x169b   : > { %v6894_v30 = vld [vmem:[%s12596_s13 + $0xa30] sm:$0xff]  ;;  %v6893_v33 = vld [vmem:[%s12596_s13 + $0xa28] sm:$0xff] }
0x169c   : > { %v5379_v10 = vmul.f32 0.7978846, %v5373_v12  ;;  %v5381_v21 = vmul.f32 0.7978846, %v5375_v45  ;;  %7101 = vtanh.f32 %v5378_v7  ;;  %v6892_v45 = vld [vmem:[%s12596_s13 + $0xa20] sm:$0xff]  ;;  %v6891_v7 = vld [vmem:[%s12596_s13 + $0xa18] sm:$0xff] }
0x169d   : > { %7103 = vtanh.f32 %v5380_v9 }
0x169e   : > { %7105 = vtanh.f32 %v5379_v10 }
0x169f   : > { %7107 = vtanh.f32 %v5381_v21  ;;  %v6890_v21 = vld [vmem:[%s12596_s13 + $0xa10] sm:$0xff] }
0x16a9   : > { %v7102_v43 = vpop.eup %7101 }
0x16aa   : > { %v7104_v62 = vpop.eup %7103  ;;  %v5390_v48 = vadd.f32 1.0, %v7102_v43  ;;  %v6889_v43 = vld [vmem:[%s12596_s13 + $0xa08] sm:$0xff] }
0x16ab   : > { %v7106_v18 = vpop.eup %7105  ;;  %v5392_v31 = vadd.f32 1.0, %v7104_v62 }
0x16ac   : > { %v7108_v50 = vpop.eup %7107  ;;  %v5391_v52 = vadd.f32 1.0, %v7106_v18  ;;  %v5396_v59 = vmul.f32 %v5390_v48, %v5348_v56  ;;  %v6888_v18 = vld [vmem:[%s12596_s13 + $0xa00] sm:$0xff]  ;;  %v6951_v48 = vld [vmem:[%s12596_s13 + $0xbf8] sm:$0xff]  ;;  %v6946_v56 = vld [vmem:[%s12596_s13 + $0xbd0] sm:$0xff] }
0x16ad   : > { %v5393_v55 = vadd.f32 1.0, %v7108_v50  ;;  %v5398_v63 = vmul.f32 %v5392_v31, %v5350_v14  ;;  %v6948_v31 = vld [vmem:[%s12596_s13 + $0xbe0] sm:$0xff] }
0x16ae   : > { %v5397_v58 = vmul.f32 %v5391_v52, %v5349_v51  ;;  %v6950_v51 = vld [vmem:[%s12596_s13 + $0xbf0] sm:$0xff]  ;;  %v6949_v52 = vld [vmem:[%s12596_s13 + $0xbe8] sm:$0xff]  ;;  %v6944_v14 = vld [vmem:[%s12596_s13 + $0xbc0] sm:$0xff] }
0x16af   : > { %v5399_v42 = vmul.f32 %v5393_v55, %v5351_v54  ;;  %v6947_v54 = vld [vmem:[%s12596_s13 + $0xbd8] sm:$0xff] }
0x16b0   : > { %5659 = vmatprep.mubr.f32.mxu0 %v5397_v58  ;;  %v6945_v58 = vld [vmem:[%s12596_s13 + $0xbc8] sm:$0xff] }
0x16b1   : > { %5730 = vmatprep.mubr.f32.mxu1 %v5399_v42  ;;  %5660 = vmatmul.mubr.f32.vlgmr.msra.gmra.mxu0 %v5396_v59  ;;  %v6943_v42 = vld [vmem:[%s12596_s13 + $0xbb8] sm:$0xff]  ;;  %v6942_v59 = vld [vmem:[%s12596_s13 + $0xbb0] sm:$0xff] }
0x16b2   : > { %5731 = vmatmul.mubr.f32.vlgmr.msra.gmra.mxu1 %v5398_v63  ;;  %5738 = vmatpush1.msra.mxu0 %v6918_v60  ;;  %v6941_v63 = vld [vmem:[%s12596_s13 + $0xba8] sm:$0xff] }
0x16b3   : > { %5739 = vmatprep.subr.mxu0 %v6917_v36  ;;  %v6940_v36 = vld [vmem:[%s12596_s13 + $0xba0] sm:$0xff] }
0x16b4   : > { %5740 = vmatpush1.msra.mxu0 %v6916_v0  ;;  %v6939_v0 = vld [vmem:[%s12596_s13 + $0xb98] sm:$0xff] }
0x16b5   : > { %5741 = vmatprep.subr.mxu0 %v6915_v41 }
0x16b6   : > { %5742 = vmatpush1.msra.mxu0 %v6914_v1  ;;  %v6938_v1 = vld [vmem:[%s12596_s13 + $0xb90] sm:$0xff] }
0x16b7   : > { %5743 = vmatprep.subr.mxu0 %v6913_v2  ;;  %v6937_v2 = vld [vmem:[%s12596_s13 + $0xb88] sm:$0xff] }
0x16b8   : > { %5744 = vmatpush1.msra.mxu0 %v6912_v4 }
0x16b9   : > { %5745 = vmatprep.subr.mxu0 %v6911_v5 }
0x16ba   : > { %5746 = vmatpush1.msra.mxu0 %v6910_v6  ;;  %v6936_v6 = vld [vmem:[%s12596_s13 + $0xb80] sm:$0xff] }
0x16bb   : > { %5747 = vmatprep.subr.mxu0 %v6909_v11 }
0x16bc   : > { %5748 = vmatpush1.msra.mxu0 %v6908_v22  ;;  %v6935_v22 = vld [vmem:[%s12596_s13 + $0xb78] sm:$0xff] }
0x16bd   : > { %5749 = vmatprep.subr.mxu0 %v6907_v23  ;;  %v6934_v23 = vld [vmem:[%s12596_s13 + $0xb70] sm:$0xff] }
0x16be   : > { %5750 = vmatpush1.msra.mxu0 %v6906_v24  ;;  %v6933_v24 = vld [vmem:[%s12596_s13 + $0xb68] sm:$0xff] }
0x16bf   : > { %v5343_v19 = vpop.f32.mrf.mxu1  ;;  %5751 = vmatprep.subr.mxu0 %v6905_v25  ;;  %v6932_v25 = vld [vmem:[%s12596_s13 + $0xb60] sm:$0xff] }
0x16c0   : > { %5752 = vmatpush1.msra.mxu0 %v6904_v44  ;;  %v12101_v3 = vadd.f32 %v5343_v19, %v5121_v13  ;;  %v6931_v44 = vld [vmem:[%s12596_s13 + $0xb58] sm:$0xff]  ;;  %v6928_v13 = vld [vmem:[%s12596_s13 + $0xb40] sm:$0xff] }
0x16c1   : > { %v5345_v37 = vpop.f32.mrf.mxu1  ;;  %5753 = vmatprep.subr.mxu0 %v6903_v53  ;;  %v6929_v53 = vld [vmem:[%s12596_s13 + $0xb48] sm:$0xff]  ;;  %v6927_v19 = vld [vmem:[%s12596_s13 + $0xb38] sm:$0xff] }
0x16c2   : > { %v12096_v38 = vadd.f32 %v5345_v37, %v5125_v26  ;;  %5754 = vmatpush1.msra.mxu0 %v6902_v20  ;;  %v5358_v61 = vmul.f32 0.044715, %v12101_v3  ;;  %v6930_v26 = vld [vmem:[%s12596_s13 + $0xb50] sm:$0xff]  ;;  %v6925_v37 = vld [vmem:[%s12596_s13 + $0xb28] sm:$0xff] }
0x16c3   : > { %5755 = vmatprep.subr.mxu0 %v6901_v34  ;;  %v6926_v20 = vld [vmem:[%s12596_s13 + $0xb30] sm:$0xff] }
0x16c4   : > { %v5359_v29 = vmul.f32 0.044715, %v12096_v38  ;;  %5756 = vmatpush1.msra.mxu0 %v6900_v49  ;;  %v5364_v10 = vmul.f32 %v5358_v61, %v12101_v3  ;;  %v5353_v4 = vmul.f32 0.5, %v12096_v38  ;;  %v6924_v49 = vld [vmem:[%s12596_s13 + $0xb20] sm:$0xff] }
0x16c5   : > { %5757 = vmatprep.subr.mxu0 %v6899_v35  ;;  %v6922_v35 = vld [vmem:[%s12596_s13 + $0xb10] sm:$0xff] }
0x16c6   : > { %v5365_v27 = vmul.f32 %v5359_v29, %v12096_v38  ;;  %5758 = vmatpush1.msra.mxu0 %v6898_v57  ;;  %v5370_v50 = vmul.f32 %v5364_v10, %v12101_v3  ;;  %v6921_v29 = vld [vmem:[%s12596_s13 + $0xb08] sm:$0xff] }
0x16c7   : > { %5759 = vmatprep.subr.mxu0 %v6897_v32  ;;  %v6920_v32 = vld [vmem:[%s12596_s13 + $0xb00] sm:$0xff] }
0x16c8   : > { %5760 = vmatpush1.msra.mxu0 %v6896_v39  ;;  %v5371_v12 = vmul.f32 %v5365_v27, %v12096_v38  ;;  %v5376_v55 = vadd.f32 %v5370_v50, %v12101_v3  ;;  %v5352_v39 = vmul.f32 0.5, %v12101_v3  ;;  %v7135_v50 = vld [vmem:[#allocation2 + $0x8] sm:$0xff] }
0x16c9   : > { %5761 = vmatprep.subr.mxu0 %v6895_v40 }
0x16ca   : > { %5762 = vmatpush1.msra.mxu0 %v6894_v30  ;;  %v5377_v9 = vadd.f32 %v5371_v12, %v12096_v38  ;;  %v5382_v60 = vmul.f32 0.7978846, %v5376_v55  ;;  %v6923_v38 = vld [vmem:[%s12596_s13 + $0xb18] sm:$0xff]  ;;  %v6952_v12 = vld [vmem:[%s12597_s14 + $0x1] ss:$2 sm:$0x3] }
0x16cb   : > { %5763 = vmatprep.subr.mxu0 %v6893_v33 }
0x16cc   : > { %5764 = vmatpush1.msra.mxu0 %v6892_v45  ;;  %v5383_v62 = vmul.f32 0.7978846, %v5377_v9 }
0x16cd   : > { %5765 = vmatprep.subr.mxu0 %v6891_v7 }
0x16ce   : > { %5766 = vmatpush1.msra.mxu0 %v6890_v21  ;;  %7109 = vtanh.f32 %v5383_v62  ;;  %v5816_v21 = vrot.slane %v6952_v12, %v8185_v16 }
0x16cf   : > { %5767 = vmatprep.subr.mxu0 %v6889_v43  ;;  %7111 = vtanh.f32 %v5382_v60  ;;  %v5947_v60 = vld [vmem:[%s12600_s17 + $0x1f0] sm:$0xff] }
0x16d0   : > { %5768 = vmatpush1.msra.mxu0 %v6888_v18  ;;  %v5820_v18 = vrot.slane %v6952_v12, %v8188_v17 }
0x16d1   : > { %5769 = vmatprep.subr.mxu0 %v6951_v48 }
0x16d2   : > { %5770 = vmatpush2.msra.mxu0 %v6950_v51 }
0x16d3   : > { %5771 = vmatprep.subr.mxu0 %v6949_v52 }
0x16d4   : > { %5772 = vmatpush2.msra.mxu0 %v6948_v31 }
0x16d5   : > { %5773 = vmatprep.subr.mxu0 %v6947_v54 }
0x16d6   : > { %5774 = vmatpush2.msra.mxu0 %v6946_v56 }
0x16d7   : > { %5775 = vmatprep.subr.mxu0 %v6945_v58 }
0x16d8   : > { %5776 = vmatpush2.msra.mxu0 %v6944_v14  ;;  %v5946_v14 = vld [vmem:[%s12600_s17 + $0x1e8] sm:$0xff] }
0x16d9   : > { %5777 = vmatprep.subr.mxu0 %v6943_v42  ;;  %v5948_v42 = vld [vmem:[%s12600_s17 + $0x1f8] sm:$0xff]  ;;  %6015 = vmatprep.subr.mxu1 %v5946_v14  ;;  %v5898_v14 = vld [vmem:[%s12600_s17 + $0x68] sm:$0xff] }
0x16da   : > { %5778 = vmatpush2.msra.mxu0 %v6942_v59  ;;  %v5945_v59 = vld [vmem:[%s12600_s17 + $0x1e0] sm:$0xff] }
0x16db   : > { %v7110_v41 = vpop.eup %7109  ;;  %5779 = vmatprep.subr.mxu0 %v6941_v63  ;;  %v5942_v63 = vld [vmem:[%s12600_s17 + $0x1c8] sm:$0xff]  ;;  %6016 = vmatpush1.msra.mxu1 %v5945_v59  ;;  %v5897_v59 = vld [vmem:[%s12600_s17 + $0x60] sm:$0xff] }
0x16dc   : > { %5780 = vmatpush2.msra.mxu0 %v6940_v36  ;;  %v5395_v5 = vadd.f32 1.0, %v7110_v41  ;;  %v7112_v34 = vpop.eup %7111  ;;  %v5944_v36 = vld [vmem:[%s12600_s17 + $0x1d8] sm:$0xff]  ;;  %v5943_v41 = vld [vmem:[%s12600_s17 + $0x1d0] sm:$0xff]  ;;  %6017 = vmatprep.subr.mxu1 %v5942_v63  ;;  %v5894_v63 = vld [vmem:[%s12600_s17 + $0x48] sm:$0xff] }
0x16dd   : > { %5781 = vmatprep.subr.mxu0 %v6939_v0  ;;  %v5394_v57 = vadd.f32 1.0, %v7112_v34  ;;  %v5941_v0 = vld [vmem:[%s12600_s17 + $0x1c0] sm:$0xff]  ;;  %v5922_v34 = vld [vmem:[%s12600_s17 + $0x128] sm:$0xff] }
0x16de   : > { %5782 = vmatpush2.msra.mxu0 %v6938_v1  ;;  %v5401_v11 = vmul.f32 %v5395_v5, %v5353_v4  ;;  %v5938_v1 = vld [vmem:[%s12600_s17 + $0x1a8] sm:$0xff]  ;;  %v5937_v4 = vld [vmem:[%s12600_s17 + $0x1a0] sm:$0xff]  ;;  %v5939_v5 = vld [vmem:[%s12600_s17 + $0x1b0] sm:$0xff]  ;;  %6018 = vmatpush1.msra.mxu1 %v5941_v0 }
0x16df   : > { %5783 = vmatprep.subr.mxu0 %v6937_v2  ;;  %v5400_v27 = vmul.f32 %v5394_v57, %v5352_v39  ;;  %v5940_v2 = vld [vmem:[%s12600_s17 + $0x1b8] sm:$0xff]  ;;  %6019 = vmatprep.subr.mxu1 %v5938_v1  ;;  %v5914_v39 = vld [vmem:[%s12600_s17 + $0xe8] sm:$0xff]  ;;  %v5893_v0 = vld [vmem:[%s12600_s17 + $0x40] sm:$0xff] }
0x16e0   : > { %5784 = vmatpush2.msra.mxu0 %v6936_v6  ;;  %5801 = vmatprep.mubr.f32.mxu0 %v5401_v11  ;;  %v5934_v6 = vld [vmem:[%s12600_s17 + $0x188] sm:$0xff]  ;;  %v5936_v11 = vld [vmem:[%s12600_s17 + $0x198] sm:$0xff] }
0x16e1   : > { %5785 = vmatprep.subr.mxu0 %v6935_v22  ;;  %v5933_v22 = vld [vmem:[%s12600_s17 + $0x180] sm:$0xff]  ;;  %6020 = vmatpush1.msra.mxu1 %v5937_v4  ;;  %v5920_v57 = vld [vmem:[%s12600_s17 + $0x118] sm:$0xff]  ;;  %v5890_v1 = vld [vmem:[%s12600_s17 + $0x28] sm:$0xff] }
0x16e2   : > { %5786 = vmatpush2.msra.mxu0 %v6934_v23  ;;  %v5935_v23 = vld [vmem:[%s12600_s17 + $0x190] sm:$0xff]  ;;  %6021 = vmatprep.subr.mxu1 %v5934_v6  ;;  %v5889_v4 = vld [vmem:[%s12600_s17 + $0x20] sm:$0xff]  ;;  %v5886_v6 = vld [vmem:[%s12600_s17 + $0x8] sm:$0xff] }
0x16e3   : > { %5787 = vmatprep.subr.mxu0 %v6933_v24  ;;  %v5930_v24 = vld [vmem:[%s12600_s17 + $0x168] sm:$0xff]  ;;  %6022 = vmatpush1.msra.mxu1 %v5933_v22  ;;  %v5885_v22 = vld [vmem:[%s12600_s17] sm:$0xff] }
0x16e4   : > { %5788 = vmatpush2.msra.mxu0 %v6932_v25  ;;  %v5932_v25 = vld [vmem:[%s12600_s17 + $0x178] sm:$0xff]  ;;  %6023 = vmatprep.subr.mxu1 %v5930_v24  ;;  %v5978_v24 = vld [vmem:[%s12600_s17 + $0x2e8] sm:$0xff] }
0x16e5   : > { %5789 = vmatprep.subr.mxu0 %v6931_v44  ;;  %v5929_v44 = vld [vmem:[%s12600_s17 + $0x160] sm:$0xff] }
0x16e6   : > { %5790 = vmatpush2.msra.mxu0 %v6930_v26  ;;  %v5931_v26 = vld [vmem:[%s12600_s17 + $0x170] sm:$0xff]  ;;  %6024 = vmatpush1.msra.mxu1 %v5929_v44  ;;  %v5977_v44 = vld [vmem:[%s12600_s17 + $0x2e0] sm:$0xff] }
0x16e7   : > { %5791 = vmatprep.subr.mxu0 %v6929_v53  ;;  %v5926_v53 = vld [vmem:[%s12600_s17 + $0x148] sm:$0xff] }
0x16e8   : > { %5792 = vmatpush2.msra.mxu0 %v6928_v13  ;;  %v5928_v13 = vld [vmem:[%s12600_s17 + $0x158] sm:$0xff]  ;;  %6025 = vmatprep.subr.mxu1 %v5926_v53  ;;  %v5974_v53 = vld [vmem:[%s12600_s17 + $0x2c8] sm:$0xff] }
0x16e9   : > { %5793 = vmatprep.subr.mxu0 %v6927_v19  ;;  %v5925_v19 = vld [vmem:[%s12600_s17 + $0x140] sm:$0xff] }
0x16ea   : > { %5794 = vmatpush2.msra.mxu0 %v6926_v20  ;;  %v5927_v20 = vld [vmem:[%s12600_s17 + $0x150] sm:$0xff]  ;;  %6026 = vmatpush1.msra.mxu1 %v5925_v19  ;;  %v5973_v19 = vld [vmem:[%s12600_s17 + $0x2c0] sm:$0xff] }
0x16eb   : > { %5795 = vmatprep.subr.mxu0 %v6925_v37  ;;  %v5924_v37 = vld [vmem:[%s12600_s17 + $0x138] sm:$0xff]  ;;  %6027 = vmatprep.subr.mxu1 %v5922_v34  ;;  %v5970_v34 = vld [vmem:[%s12600_s17 + $0x2a8] sm:$0xff] }
0x16ec   : > { %5796 = vmatpush2.msra.mxu0 %v6924_v49  ;;  %v5921_v49 = vld [vmem:[%s12600_s17 + $0x120] sm:$0xff] }
0x16ed   : > { %5797 = vmatprep.subr.mxu0 %v6923_v38  ;;  %v5923_v38 = vld [vmem:[%s12600_s17 + $0x130] sm:$0xff]  ;;  %6028 = vmatpush1.msra.mxu1 %v5921_v49  ;;  %v5969_v49 = vld [vmem:[%s12600_s17 + $0x2a0] sm:$0xff] }
0x16ee   : > { %5798 = vmatpush2.msra.mxu0 %v6922_v35  ;;  %v5918_v35 = vld [vmem:[%s12600_s17 + $0x108] sm:$0xff] }
0x16ef   : > { %5799 = vmatprep.subr.mxu0 %v6921_v29  ;;  %v5917_v29 = vld [vmem:[%s12600_s17 + $0x100] sm:$0xff]  ;;  %6029 = vmatprep.subr.mxu1 %v5918_v35  ;;  %v5966_v35 = vld [vmem:[%s12600_s17 + $0x288] sm:$0xff] }
0x16f0   : > { %5800 = vmatpush2.msra.mxu0 %v6920_v32  ;;  %v5919_v32 = vld [vmem:[%s12600_s17 + $0x110] sm:$0xff]  ;;  %6030 = vmatpush1.msra.mxu1 %v5917_v29  ;;  %v5965_v29 = vld [vmem:[%s12600_s17 + $0x280] sm:$0xff] }
0x16f1   : > { %5802 = vmatmul.mubr.f32.vlgmr.msra.gmra.mxu0 %v5400_v27  ;;  %6086 = vmatprep.subr.mxu0 %v5948_v42  ;;  %v5916_v27 = vld [vmem:[%s12600_s17 + $0xf8] sm:$0xff] }
0x16f2   : > { %6087 = vmatpush1.msra.mxu0 %v5947_v60  ;;  %6031 = vmatprep.subr.mxu1 %v5914_v39  ;;  %v5900_v42 = vld [vmem:[%s12600_s17 + $0x78] sm:$0xff]  ;;  %v5899_v60 = vld [vmem:[%s12600_s17 + $0x70] sm:$0xff]  ;;  %v5962_v39 = vld [vmem:[%s12600_s17 + $0x268] sm:$0xff] }
0x16f3   : > { %6088 = vmatprep.subr.mxu0 %v5944_v36  ;;  %v5896_v36 = vld [vmem:[%s12600_s17 + $0x58] sm:$0xff] }
0x16f4   : > { %6089 = vmatpush1.msra.mxu0 %v5943_v41  ;;  %v5895_v41 = vld [vmem:[%s12600_s17 + $0x50] sm:$0xff] }
0x16f5   : > { %6090 = vmatprep.subr.mxu0 %v5940_v2  ;;  %v5892_v2 = vld [vmem:[%s12600_s17 + $0x38] sm:$0xff] }
0x16f6   : > { %6091 = vmatpush1.msra.mxu0 %v5939_v5  ;;  %v5891_v5 = vld [vmem:[%s12600_s17 + $0x30] sm:$0xff] }
0x16f7   : > { %6092 = vmatprep.subr.mxu0 %v5936_v11  ;;  %v5888_v11 = vld [vmem:[%s12600_s17 + $0x18] sm:$0xff] }
0x16f8   : > { %6093 = vmatpush1.msra.mxu0 %v5935_v23  ;;  %v5887_v23 = vld [vmem:[%s12600_s17 + $0x10] sm:$0xff] }
0x16f9   : > { %6094 = vmatprep.subr.mxu0 %v5932_v25  ;;  %v5980_v25 = vld [vmem:[%s12600_s17 + $0x2f8] sm:$0xff] }
0x16fa   : > { %6095 = vmatpush1.msra.mxu0 %v5931_v26  ;;  %v5979_v26 = vld [vmem:[%s12600_s17 + $0x2f0] sm:$0xff] }
0x16fb   : > { %6096 = vmatprep.subr.mxu0 %v5928_v13  ;;  %v5976_v13 = vld [vmem:[%s12600_s17 + $0x2d8] sm:$0xff] }
0x16fc   : > { %6097 = vmatpush1.msra.mxu0 %v5927_v20  ;;  %v5975_v20 = vld [vmem:[%s12600_s17 + $0x2d0] sm:$0xff] }
0x16fd   : > { %6098 = vmatprep.subr.mxu0 %v5924_v37  ;;  %v5972_v37 = vld [vmem:[%s12600_s17 + $0x2b8] sm:$0xff] }
0x16fe   : > { %6099 = vmatpush1.msra.mxu0 %v5923_v38  ;;  %v5971_v38 = vld [vmem:[%s12600_s17 + $0x2b0] sm:$0xff] }
0x16ff   : > { %6100 = vmatprep.subr.mxu0 %v5920_v57  ;;  %v5968_v57 = vld [vmem:[%s12600_s17 + $0x298] sm:$0xff] }
0x1700   : > { %6101 = vmatpush1.msra.mxu0 %v5919_v32  ;;  %v5967_v32 = vld [vmem:[%s12600_s17 + $0x290] sm:$0xff] }
0x1701   : > { %6102 = vmatprep.subr.mxu0 %v5916_v27  ;;  %v5964_v27 = vld [vmem:[%s12600_s17 + $0x278] sm:$0xff] }
0x1771   : > { %v5661_v40 = vpop.f32.mrf.mxu0 }
0x1772   : > { %v5732_v61 = vpop.f32.mrf.mxu1 }
0x1773   : > { %v5663_v30 = vpop.f32.mrf.mxu0  ;;  %v5733_v45 = vadd.f32 %v5732_v61, %v5661_v40  ;;  %v5913_v40 = vld [vmem:[%s12600_s17 + $0xe0] sm:$0xff]  ;;  %v5915_v61 = vld [vmem:[%s12600_s17 + $0xf0] sm:$0xff] }
0x1774   : > { %v5734_v33 = vpop.f32.mrf.mxu1  ;;  %6032 = vmatpush1.msra.mxu1 %v5913_v40  ;;  %6103 = vmatpush1.msra.mxu0 %v5915_v61  ;;  %v5961_v40 = vld [vmem:[%s12600_s17 + $0x260] sm:$0xff]  ;;  %v5963_v61 = vld [vmem:[%s12600_s17 + $0x270] sm:$0xff] }
0x1775   : > { %v5735_v9 = vadd.f32 %v5734_v33, %v5663_v30  ;;  %v5910_v30 = vld [vmem:[%s12600_s17 + $0xc8] sm:$0xff]  ;;  %v5912_v33 = vld [vmem:[%s12600_s17 + $0xd8] sm:$0xff] }
0x1776   : > { %6033 = vmatprep.subr.mxu1 %v5910_v30  ;;  %6104 = vmatprep.subr.mxu0 %v5912_v33  ;;  %v5958_v30 = vld [vmem:[%s12600_s17 + $0x248] sm:$0xff]  ;;  %v5960_v33 = vld [vmem:[%s12600_s17 + $0x258] sm:$0xff] }
0x17b1   : > { %v5803_v7 = vpop.f32.mrf.mxu0 }
0x17b2   : > { %v5804_v10 = vadd.f32 %v5803_v7, %v5733_v45 }
0x17b3   : > { %v5805_v3 = vpop.f32.mrf.mxu0 }
0x17b4   : > { %v5808_v43 = vadd.f32 %v5804_v10, %v11165_v28  ;;  %v5806_v62 = vadd.f32 %v5805_v3, %v5735_v9 }
0x17b6   : > { %v5823_v48 = vadd.f32 %v5816_v21, %v5808_v43  ;;  %v5809_v51 = vadd.f32 %v7135_v50, %v5806_v62  ;;  %v5911_v50 = vld [vmem:[%s12600_s17 + $0xd0] sm:$0xff] }
0x17b7   : > { %6105 = vmatpush1.msra.mxu0 %v5911_v50 }
0x17b8   : > { %5825 = vst [vmem:[#allocation2] sm:$0xff] %v5823_v48  ;;  %v5824_v52 = vadd.f32 %v5820_v18, %v5809_v51  ;;  %v5909_v48 = vld [vmem:[%s12600_s17 + $0xc0] sm:$0xff]  ;;  %v5906_v51 = vld [vmem:[%s12600_s17 + $0xa8] sm:$0xff] }
0x17b9   : > { %6034 = vmatpush1.msra.mxu1 %v5909_v48  ;;  %v5951_v48 = vld [vmem:[%s12600_s17 + $0x210] sm:$0xff] }
0x17ba   : > { %5826 = vst.msk [vmem:[#allocation2 + $0x8] sm:$0xff] %vm800_vm0, %v5824_v52  ;;  %v5908_v52 = vld [vmem:[%s12600_s17 + $0xb8] sm:$0xff]  ;;  %6035 = vmatprep.subr.mxu1 %v5906_v51 }
0x17bb   : > { %6106 = vmatprep.subr.mxu0 %v5908_v52 }
0x17c1   : > { %v12249_v31 = vld [vmem:[#allocation2] ss:$8 sm:$0x3] }
0x17c2   : > { %v5834_v54 = vrot.slane %v12249_v31, %v8185_v16  ;;  %v5838_v28 = vrot.slane %v12249_v31, %v8188_v17 }
0x17c4   : > { %v5842_v55 = vsel %vm5841_vm6, %v5834_v54, 0.0  ;;  %v5844_v56 = vsel %vm5843_vm7, %v5838_v28, 0.0  ;;  %v5907_v54 = vld [vmem:[%s12600_s17 + $0xb0] sm:$0xff]  ;;  %v5902_v28 = vld [vmem:[%s12600_s17 + $0x88] sm:$0xff] }
0x17c5   : > { %v5845_v58 = vadd.f32 %v5844_v56, %v5842_v55  ;;  %6107 = vmatpush1.msra.mxu0 %v5907_v54  ;;  %v5904_v55 = vld [vmem:[%s12600_s17 + $0x98] sm:$0xff]  ;;  %v5901_v56 = vld [vmem:[%s12600_s17 + $0x80] sm:$0xff] }
0x17c6   : > { %6108 = vmatprep.subr.mxu0 %v5904_v55 }
0x17c7   : > { %5846 = vadd.xlane.f32.xlu0 %v5845_v58  ;;  %v5903_v58 = vld [vmem:[%s12600_s17 + $0x90] sm:$0xff] }
0x17c8   : > { %6109 = vmatpush1.msra.mxu0 %v5903_v58 }
0x17c9   : > { %6110 = vmatprep.subr.mxu0 %v5900_v42 }
0x17ca   : > { %6111 = vmatpush1.msra.mxu0 %v5899_v60 }
0x17cb   : > { %6112 = vmatprep.subr.mxu0 %v5896_v36 }
0x17cc   : > { %6113 = vmatpush1.msra.mxu0 %v5895_v41 }
0x17cd   : > { %6114 = vmatprep.subr.mxu0 %v5892_v2 }
0x17ce   : > { %6115 = vmatpush1.msra.mxu0 %v5891_v5 }
0x17cf   : > { %6116 = vmatprep.subr.mxu0 %v5888_v11 }
0x17d0   : > { %6117 = vmatpush1.msra.mxu0 %v5887_v23 }
0x17d1   : > { %6134 = vmatprep.subr.mxu0 %v5980_v25 }
0x17d2   : > { %6135 = vmatpush2.msra.mxu0 %v5979_v26 }
0x17d3   : > { %6136 = vmatprep.subr.mxu0 %v5976_v13 }
0x17d4   : > { %6137 = vmatpush2.msra.mxu0 %v5975_v20 }
0x17d5   : > { %6138 = vmatprep.subr.mxu0 %v5972_v37 }
0x17d6   : > { %6139 = vmatpush2.msra.mxu0 %v5971_v38  ;;  %v7147_v38 = vmov 1966171168  }
0x17d7   : > { %6140 = vmatprep.subr.mxu0 %v5968_v57 }
0x17d8   : > { %6141 = vmatpush2.msra.mxu0 %v5967_v32 }
0x17d9   : > { %6142 = vmatprep.subr.mxu0 %v5964_v27 }
0x17da   : > { %6143 = vmatpush2.msra.mxu0 %v5963_v61 }
0x17db   : > { %6144 = vmatprep.subr.mxu0 %v5960_v33 }
0x1850   : > { %v5847_v12 = vpop.xlane.xlu0 %5846 }
0x1851   : > { %v5848_v45 = vmul.f32 0.0052083335, %v5847_v12  ;;  %v5957_v12 = vld [vmem:[%s12600_s17 + $0x240] sm:$0xff] }
0x1853   : > { %v5853_v7 = vrot.slane %v5848_v45, %v8185_v16  ;;  %v5959_v45 = vld [vmem:[%s12600_s17 + $0x250] sm:$0xff] }
0x1854   : > { %6145 = vmatpush2.msra.mxu0 %v5959_v45 }
0x1855   : > { %v12373_v9 = vsub.f32 %v12249_v31, %v5853_v7  ;;  %v5905_v31 = vld [vmem:[%s12600_s17 + $0xa0] sm:$0xff]  ;;  %v5954_v7 = vld [vmem:[%s12600_s17 + $0x228] sm:$0xff] }
0x1856   : > { %6036 = vmatpush1.msra.mxu1 %v5905_v31 }
0x1857   : > { %v5856_v10 = vmul.f32 %v12373_v9, %v12373_v9  ;;  %6037 = vmatprep.subr.mxu1 %v5902_v28  ;;  %v5828_v28 = vld [vmem:[%s12598_s15] sm:$0x3] }
0x1858   : > { %6038 = vmatpush1.msra.mxu1 %v5901_v56  ;;  %v5829_v56 = vld [vmem:[%s12599_s16] sm:$0x3] }
0x1859   : > { %v5861_v21 = vrot.slane %v5856_v10, %v8185_v16  ;;  %v5865_v3 = vrot.slane %v5856_v10, %v8188_v17  ;;  %6039 = vmatprep.subr.mxu1 %v5898_v14  ;;  %v5956_v10 = vld [vmem:[%s12600_s17 + $0x238] sm:$0xff] }
0x185a   : > { %6040 = vmatpush1.msra.mxu1 %v5897_v59  ;;  %6146 = vmatprep.subr.mxu0 %v5956_v10 }
0x185b   : > { %v5868_v43 = vsel %vm5841_vm6, %v5861_v21, 0.0  ;;  %v5869_v62 = vsel %vm5843_vm7, %v5865_v3, 0.0  ;;  %6041 = vmatprep.subr.mxu1 %v5894_v63  ;;  %v5953_v21 = vld [vmem:[%s12600_s17 + $0x220] sm:$0xff]  ;;  %v5955_v3 = vld [vmem:[%s12600_s17 + $0x230] sm:$0xff] }
0x185c   : > { %v5870_v18 = vadd.f32 %v5869_v62, %v5868_v43  ;;  %6042 = vmatpush1.msra.mxu1 %v5893_v0  ;;  %v5950_v43 = vld [vmem:[%s12600_s17 + $0x208] sm:$0xff]  ;;  %v5952_v62 = vld [vmem:[%s12600_s17 + $0x218] sm:$0xff]  ;;  %6147 = vmatpush2.msra.mxu0 %v5955_v3 }
0x185d   : > { %6043 = vmatprep.subr.mxu1 %v5890_v1  ;;  %6148 = vmatprep.subr.mxu0 %v5952_v62 }
0x185e   : > { %5871 = vadd.xlane.f32.xlu1 %v5870_v18  ;;  %6044 = vmatpush1.msra.mxu1 %v5889_v4  ;;  %v5949_v18 = vld [vmem:[%s12600_s17 + $0x200] sm:$0xff] }
0x185f   : > { %6045 = vmatprep.subr.mxu1 %v5886_v6  ;;  %6149 = vmatpush2.msra.mxu0 %v5951_v48 }
0x1860   : > { %6046 = vmatpush1.msra.mxu1 %v5885_v22 }
0x1861   : > { %6063 = vmatprep.subr.mxu1 %v5978_v24 }
0x1862   : > { %6064 = vmatpush2.msra.mxu1 %v5977_v44 }
0x1863   : > { %6065 = vmatprep.subr.mxu1 %v5974_v53 }
0x1864   : > { %6066 = vmatpush2.msra.mxu1 %v5973_v19 }
0x1865   : > { %6067 = vmatprep.subr.mxu1 %v5970_v34 }
0x1866   : > { %6068 = vmatpush2.msra.mxu1 %v5969_v49 }
0x1867   : > { %6069 = vmatprep.subr.mxu1 %v5966_v35  ;;  %v6188_v35 = vunpack.c.l.s4 %v7147_v38 }
0x1868   : > { %6070 = vmatpush2.msra.mxu1 %v5965_v29 }
0x1869   : > { %6071 = vmatprep.subr.mxu1 %v5962_v39  ;;  %v6189_v57 = vunpack.c.0.s8 %v6188_v35 }
0x186a   : > { %6072 = vmatpush2.msra.mxu1 %v5961_v40 }
0x186b   : > { %6073 = vmatprep.subr.mxu1 %v5958_v30  ;;  %v6192_v39 = vsub.s32 %v6189_v57, %v8182_v15 }
0x186c   : > { %6074 = vmatpush2.msra.mxu1 %v5957_v12 }
0x186d   : > { %6075 = vmatprep.subr.mxu1 %v5954_v7 }
0x186e   : > { %6076 = vmatpush2.msra.mxu1 %v5953_v21 }
0x186f   : > { %6077 = vmatprep.subr.mxu1 %v5950_v43 }
0x1870   : > { %6078 = vmatpush2.msra.mxu1 %v5949_v18 }
0x18e7   : > { %v5872_v50 = vpop.xlane.xlu1 %5871 }
0x18e8   : > { %v5873_v51 = vmul.f32 0.0052083335, %v5872_v50 }
0x18ea   : > { %v5874_v52 = vadd.f32 1e-06, %v5873_v51 }
0x18ec   : > { %7113 = vrsqrt.f32 %v5874_v52 }
0x18f9   : > { %v7114_v31 = vpop.eup %7113 }
0x18fa   : > { %v5880_v54 = vrot.slane %v7114_v31, %v8185_v16 }
0x18fc   : > { %v5882_v55 = vmul.f32 %v5880_v54, %v12373_v9  ;;  %v5981_v9 = vld [vmem:[%s12601_s18] sm:$0xf] }
0x18fd   : > { %v5996_v60 = vrot.slane %v5981_v9, %v8185_v16  ;;  %v6004_v63 = vrot.slane %v5981_v9, %v8626_v46  ;;  %v6000_v36 = vrot.slane %v5981_v9, %v8188_v17  ;;  %v6008_v0 = vrot.slane %v5981_v9, %v8629_v47 }
0x18fe   : > { %v5883_v58 = vmul.f32 %v5882_v55, %v5828_v28 }
0x1900   : > { %v5884_v14 = vadd.f32 %v5883_v58, %v5829_v56 }
0x1902   : > { %v5990_v42 = vrot.slane %v5884_v14, %v8188_v17  ;;  %v5986_v59 = vrot.slane %v5884_v14, %v8185_v16 }
0x1904   : > { %6953 = vmatprep.mubr.msk.f32.mxu1 %vm800_vm0, %v5990_v42  ;;  %6954 = vmatprep.mubr.msk.f32.mxu0 %vm800_vm0, %v5990_v42 }
0x1905   : > { %6080 = vmatmul.mubr.f32.vlgmr.msra.gmra.mxu1 %v5986_v59  ;;  %6151 = vmatmul.mubr.f32.vlgmr.msra.gmra.mxu0 %v5986_v59 }
0x19c5   : > { %v6081_v41 = vpop.f32.mrf.mxu1  ;;  %v6152_v1 = vpop.f32.mrf.mxu0 }
0x19c6   : > { %v6082_v2 = vadd.f32 %v6081_v41, %v5996_v60  ;;  %v6153_v4 = vadd.f32 %v6152_v1, %v6004_v63 }
0x19c7   : > { %v6083_v5 = vpop.f32.mrf.mxu1  ;;  %v6154_v6 = vpop.f32.mrf.mxu0 }
0x19c8   : > { %v6157_v11 = vsub.f32 0.0, %v6082_v2  ;;  %v6159_v22 = vsub.f32 0.0, %v6153_v4  ;;  %v6084_v23 = vadd.f32 %v6083_v5, %v6000_v36  ;;  %v6155_v24 = vadd.f32 %v6154_v6, %v6008_v0 }
0x19ca   : > { %v6161_v25 = vmul.f32 1.442695, %v6157_v11  ;;  %v6165_v44 = vmul.f32 1.442695, %v6159_v22  ;;  %v6158_v26 = vsub.f32 0.0, %v6084_v23  ;;  %v6160_v16 = vsub.f32 0.0, %v6155_v24 }
0x19cc   : > { %7115 = vpow2.f32 %v6161_v25  ;;  %v6163_v46 = vmul.f32 1.442695, %v6158_v26  ;;  %v6167_v53 = vmul.f32 1.442695, %v6160_v16 }
0x19cd   : > { %7117 = vpow2.f32 %v6165_v44 }
0x19ce   : > { %7119 = vpow2.f32 %v6163_v46 }
0x19cf   : > { %7121 = vpow2.f32 %v6167_v53 }
0x19d9   : > { %v7116_v17 = vpop.eup %7115 }
0x19da   : > { %v7118_v47 = vpop.eup %7117  ;;  %v6169_v13 = vadd.f32 1.0, %v7116_v17 }
0x19db   : > { %v7120_v19 = vpop.eup %7119  ;;  %v6171_v20 = vadd.f32 1.0, %v7118_v47 }
0x19dc   : > { %v7122_v34 = vpop.eup %7121  ;;  %7123 = vrcp.f32 %v6169_v13  ;;  %v6170_v37 = vadd.f32 1.0, %v7120_v19 }
0x19dd   : > { %7125 = vrcp.f32 %v6171_v20  ;;  %v6172_v49 = vadd.f32 1.0, %v7122_v34 }
0x19de   : > { %7127 = vrcp.f32 %v6170_v37 }
0x19df   : > { %7129 = vrcp.f32 %v6172_v49 }
0x19e9   : > { %v7124_v29 = vpop.eup %7123 }
0x19ea   : > { %v7126_v32 = vpop.eup %7125 }
0x19eb   : > { %v7128_v27 = vpop.eup %7127 }
0x19ec   : > { %v7130_v40 = vpop.eup %7129  ;;  %v6185_v61 = vcombine.low %v7124_v29, %v7128_v27 }
0x19ed   : > { %v6186_v30 = vcombine.low %v7126_v32, %v7130_v40 }
0x19ee   : > { %v6193_v33 = vrot.slane %v6185_v61, %v6192_v39 }
0x19ef   : > { %v6200_v12 = vrot.slane %v6186_v30, %v6192_v39 }
0x19f1   : > { %v6201_v45 = vcombine.low %v6193_v33, %v6200_v12 }
0x19f3   : > { %v6208_v7 = vrot.slane %v6201_v45, %v6192_v39 }
0x19f5   : > { %6212 = vst.msk [vmem:[%s600_s22] sm:$0xf] %vm6210_vm8, %v6208_v7 }
0x19f6 PF: > { %s12618_s2 = sld [smem:[#allocation3_spill]] }
0x19fc   : > { %s29_s0 = sadd.s32 1, %s12618_s2  }
0x19fd   : > { %p26_p4 = scmp.ge.s32.totalorder %s29_s0, 4  }
0x19ff   :  { %28 = sbr.rel (!%p26_p4) target bundleno = 5 (0x5), region = 140 }

</bundles_post_ra>
